<compile_context>
chip_gen: v7x
topology: tpu7x:2x2x1
jax: 0.10.0
libtpu: 0.0.40
codegen_flags: <defaults>
</compile_context>

<pallas_src>
import functools

import jax
import jax.numpy as jnp
from jax import lax
from jax.experimental import pallas as pl
from jax.experimental.pallas import tpu as pltpu


# ----------------------------- fused Pallas kernel --------------------------

def _bottleneck_kernel(x_ref, w1_ref, w2_ref, w3_ref,
                       s1_ref, b1_ref, s2_ref, b2_ref, s3_ref, b3_ref,
                       alpha_ref,
                       out_ref, idx_ref,
                       *, H, W, cin, cb, cout):
    f32 = jnp.float32
    cdt = w1_ref.dtype                      # MXU compute dtype (bf16 here)
    hp, wp = H - 1, W - 1                   # 2x2-valid projection conv output
    ho, wo = H // 2, W // 2                 # middle-conv / maxpool output

    a1, a2, a3, af = alpha_ref[0], alpha_ref[1], alpha_ref[2], alpha_ref[3]

    def prelu(y, a):
        return jnp.where(y > 0, y, a * y)

    x = x_ref[...]                          # (H*W, cin) f32 -- single VMEM read
    x3 = x.reshape(H, W, cin)

    # --- right path, stage 1: 2x2 valid conv (in-register im2col) + BN + PReLU
    p1 = jnp.concatenate(
        [x3[kh:kh + hp, kw:kw + wp, :] for kh in range(2) for kw in range(2)],
        axis=-1).reshape(hp * wp, 4 * cin)
    y1 = jnp.dot(p1.astype(cdt), w1_ref[...], preferred_element_type=f32)
    r1 = prelu(y1 * s1_ref[...] + b1_ref[...], a1).reshape(hp, wp, cb)

    # --- right path, stage 2: 3x3 / stride 2 / pad 1 conv + BN + PReLU -------
    # Zero-pad to (H+2, W+2) (1 top/left, 2 bottom/right) and split the padded
    # grid into even/odd phases so every stride-2 tap is a *static* slice.
    z = jnp.zeros
    r1p = jnp.concatenate([z((hp, 1, cb), f32), r1, z((hp, 2, cb), f32)], axis=1)
    r1p = jnp.concatenate([z((1, W + 2, cb), f32), r1p,
                           z((2, W + 2, cb), f32)], axis=0)
    r1p = r1p.reshape(ho + 1, 2, wo + 1, 2, cb)

    def phase(k):                           # padded index 2*o + k, o in [0, ho)
        if k == 0:
            return slice(0, ho), 0
        if k == 1:
            return slice(0, ho), 1
        return slice(1, ho + 1), 0

    taps = []
    for kh in range(3):
        rs, rj = phase(kh)
        for kw in range(3):
            cs, cj = phase(kw)
            taps.append(r1p[rs, rj, cs, cj, :])          # (ho, wo, cb)
    p2 = jnp.concatenate(taps, axis=-1).reshape(ho * wo, 9 * cb)
    y2 = jnp.dot(p2.astype(cdt), w2_ref[...], preferred_element_type=f32)
    r2 = prelu(y2 * s2_ref[...] + b2_ref[...], a2)        # (ho*wo, cb)

    # --- right path, stage 3: 1x1 conv + BN + PReLU; Dropout2d == identity ---
    # TODO(synk): training-mode Dropout2d (per-channel RNG mask); identity in eval.
    y3 = jnp.dot(r2.astype(cdt), w3_ref[...], preferred_element_type=f32)
    y3 = prelu(y3 * s3_ref[...] + b3_ref[...], a3)        # (ho*wo, cout)

    # --- left path: MaxPool2d(2,2) with flat PyTorch indices (fused) ---------
    x5 = x.reshape(ho, 2, wo, 2, cin)
    oh_i = lax.broadcasted_iota(jnp.int32, (ho, wo, cin), 0)
    ow_i = lax.broadcasted_iota(jnp.int32, (ho, wo, cin), 1)
    base = 2 * oh_i * W + 2 * ow_i                        # index of x[2oh, 2ow]
    v = x5[:, 0, :, 0, :]
    best = base
    for cand, off in ((x5[:, 0, :, 1, :], 1),
                      (x5[:, 1, :, 0, :], W),
                      (x5[:, 1, :, 1, :], W + 1)):
        better = cand > v                                 # first-max tie-break
        best = jnp.where(better, base + off, best)
        v = jnp.where(better, cand, v)
    left = v.reshape(ho * wo, cin)
    idx = best.reshape(ho * wo, cin)

    # --- channel zero-pad (VMEM only), residual add, final PReLU -------------
    if cout > cin:
        left = jnp.concatenate(
            [left, jnp.zeros((ho * wo, cout - cin), f32)], axis=1)
    res = prelu(y3 + left, af)

    # Lane-dense stores: (C, ho*wo) per image == the NCHW layout the caller wants.
    out_ref[...] = jnp.transpose(res).astype(out_ref.dtype)
    idx_ref[...] = jnp.transpose(idx)


# ----------------------------- wrapper ---------------------------------------

def _fold_bn(p, eps=1e-5):
    gamma, beta, mean, var = p
    scale = gamma / jnp.sqrt(var + eps)
    return scale, beta - mean * scale


def _bcast_spec(shape):
    return pl.BlockSpec(shape, lambda i: (0,) * len(shape))


def bottleneck_downsample_forward(x_nchw, params, *, compute_dtype=jnp.bfloat16):
    n, cin, h, w = x_nchw.shape
    cb = params["w_proj"].shape[0]
    cout = params["w_exp"].shape[0]
    assert h % 2 == 0 and w % 2 == 0, "downsample bottleneck expects even H, W"
    # TODO(synk): general spatial pad when pooled / conv branch sizes differ (odd H, W).
    ho, wo = h // 2, w // 2

    # NHWC-flat input: rows = h*W + w, channels on lanes.
    x_flat = jnp.transpose(x_nchw, (0, 2, 3, 1)).reshape(n, h * w, cin)
    x_flat = x_flat.astype(jnp.float32)

    # Conv weights as matmul matrices (patch column order = (kh, kw, cin)).
    w1 = jnp.transpose(params["w_proj"], (2, 3, 1, 0)).reshape(4 * cin, cb)
    w2 = jnp.transpose(params["w_mid"], (2, 3, 1, 0)).reshape(9 * cb, cb)
    w3 = jnp.transpose(params["w_exp"].reshape(cout, cb))
    w1, w2, w3 = (m.astype(compute_dtype) for m in (w1, w2, w3))

    s1, b1 = _fold_bn(params["bn1"])
    s2, b2 = _fold_bn(params["bn2"])
    s3, b3 = _fold_bn(params["bn3"])
    s1, b1, s2, b2, s3, b3 = (v.reshape(1, -1).astype(jnp.float32)
                              for v in (s1, b1, s2, b2, s3, b3))
    alphas = jnp.stack([params["a1"], params["a2"],
                        params["a3"], params["af"]]).astype(jnp.float32)

    kernel = functools.partial(_bottleneck_kernel,
                               H=h, W=w, cin=cin, cb=cb, cout=cout)

    out_flat, idx_flat = pl.pallas_call(
        kernel,
        grid=(n,),
        in_specs=[
            pl.BlockSpec((None, h * w, cin), lambda i: (i, 0, 0)),
            _bcast_spec((4 * cin, cb)),
            _bcast_spec((9 * cb, cb)),
            _bcast_spec((cb, cout)),
            _bcast_spec((1, cb)), _bcast_spec((1, cb)),
            _bcast_spec((1, cb)), _bcast_spec((1, cb)),
            _bcast_spec((1, cout)), _bcast_spec((1, cout)),
            pl.BlockSpec(memory_space=pltpu.MemorySpace.SMEM),
        ],
        out_specs=(
            pl.BlockSpec((None, cout, ho * wo), lambda i: (i, 0, 0)),
            pl.BlockSpec((None, cin, ho * wo), lambda i: (i, 0, 0)),
        ),
        out_shape=(
            jax.ShapeDtypeStruct((n, cout, ho * wo), jnp.float32),
            jax.ShapeDtypeStruct((n, cin, ho * wo), jnp.int32),
        ),
        compiler_params=pltpu.CompilerParams(
            dimension_semantics=("parallel",),      # batch across TCs
        ),
    )(x_flat, w1, w2, w3, s1, b1, s2, b2, s3, b3, alphas)

    out = out_flat.reshape(n, cout, ho, wo)          # already NCHW-ordered
    idx = idx_flat.reshape(n, cin, ho, wo)
    return out, idx


# ----------------------------- reference (pure JAX) --------------------------

def _reference_forward(x, params, eps=1e-5):
    def bn(y, p):
        g, b, m, v = p
        return (g[None, :, None, None] * (y - m[None, :, None, None])
                / jnp.sqrt(v[None, :, None, None] + eps) + b[None, :, None, None])

    def prelu(y, a):
        return jnp.where(y > 0, y, a * y)

    def conv(y, w, stride, padding):
        dn = lax.conv_dimension_numbers(y.shape, w.shape, ("NCHW", "OIHW", "NCHW"))
        return lax.conv_general_dilated(y, w, stride, padding, dimension_numbers=dn,
                                        precision=lax.Precision.HIGHEST)

    r = prelu(bn(conv(x, params["w_proj"], (1, 1), "VALID"), params["bn1"]), params["a1"])
    r = prelu(bn(conv(r, params["w_mid"], (2, 2), ((1, 1), (1, 1))), params["bn2"]), params["a2"])
    r = prelu(bn(conv(r, params["w_exp"], (1, 1), "VALID"), params["bn3"]), params["a3"])
    n, c, h, w = x.shape
    left = x.reshape(n, c, h // 2, 2, w // 2, 2).max(axis=(3, 5))
    left = jnp.pad(left, ((0, 0), (0, params["w_exp"].shape[0] - c), (0, 0), (0, 0)))
    return prelu(r + left, params["af"])


# ----------------------------- params ----------------------------------------

def init_params(key, cin, cout):
    cb = cin // 4
    ks = jax.random.split(key, 6)

    def conv_w(k, shape):
        fan_in = shape[1] * shape[2] * shape[3]
        bound = 1.0 / (fan_in ** 0.5)
        return jax.random.uniform(k, shape, jnp.float32, -bound, bound)

    def bn_p(k, c):
        k1, k2, k3, k4 = jax.random.split(k, 4)
        return (1.0 + 0.1 * jax.random.normal(k1, (c,), jnp.float32),
                0.1 * jax.random.normal(k2, (c,), jnp.float32),
                0.1 * jax.random.normal(k3, (c,), jnp.float32),
                1.0 + 0.1 * jax.random.uniform(k4, (c,), jnp.float32))

    return dict(
        w_proj=conv_w(ks[0], (cb, cin, 2, 2)), bn1=bn_p(ks[1], cb),
        a1=jnp.asarray(0.25, jnp.float32),
        w_mid=conv_w(ks[2], (cb, cb, 3, 3)), bn2=bn_p(ks[3], cb),
        a2=jnp.asarray(0.2, jnp.float32),
        w_exp=conv_w(ks[4], (cout, cb, 1, 1)), bn3=bn_p(ks[5], cout),
        a3=jnp.asarray(0.3, jnp.float32),
        af=jnp.asarray(0.25, jnp.float32),
    )


# ----------------------------- main -------------------------------------------

if __name__ == "__main__":
    key = jax.random.PRNGKey(0)
    kx, kp = jax.random.split(key)
    N, Cin, Cout, H, W = 2, 16, 32, 16, 16
    x = jax.random.normal(kx, (N, Cin, H, W), jnp.float32)
    params = init_params(kp, Cin, Cout)

    fwd = jax.jit(functools.partial(bottleneck_downsample_forward,
                                    compute_dtype=jnp.bfloat16))
    out, idx = fwd(x, params)
    out = jax.block_until_ready(out)
    idx = jax.block_until_ready(idx)

    assert out.shape == (N, Cout, H // 2, W // 2)
    assert idx.shape == (N, Cin, H // 2, W // 2)

    ref = _reference_forward(x, params)
    # bf16 MXU tolerance (reference uses f32 HIGHEST precision)
    assert bool(jnp.allclose(out, ref, atol=3e-2, rtol=3e-2)), \
        float(jnp.max(jnp.abs(out - ref)))

    # check max-pool indices (first-max, PyTorch h*W+w convention)
    win = x.reshape(N, Cin, H // 2, 2, W // 2, 2).transpose(0, 1, 2, 4, 3, 5)
    win = win.reshape(N, Cin, H // 2, W // 2, 4)
    arg = jnp.argmax(win, axis=-1)
    dh, dw = arg // 2, arg % 2
    oh = jnp.arange(H // 2)[None, None, :, None]
    ow = jnp.arange(W // 2)[None, None, None, :]
    ref_idx = ((2 * oh + dh) * W + (2 * ow + dw)).astype(jnp.int32)
    assert bool(jnp.array_equal(idx, ref_idx))

    print("KERNEL_OK")
</pallas_src>

<mosaic_0001>
module attributes {stable_mosaic.version = 11 : i64} {
  func.func @_bottleneck_kernel(%arg0: i32, %arg1: memref<1x256x16xf32, #tpu.memory_space<vmem>>, %arg2: memref<64x4xbf16, #tpu.memory_space<vmem>>, %arg3: memref<36x4xbf16, #tpu.memory_space<vmem>>, %arg4: memref<4x32xbf16, #tpu.memory_space<vmem>>, %arg5: memref<1x4xf32, #tpu.memory_space<vmem>>, %arg6: memref<1x4xf32, #tpu.memory_space<vmem>>, %arg7: memref<1x4xf32, #tpu.memory_space<vmem>>, %arg8: memref<1x4xf32, #tpu.memory_space<vmem>>, %arg9: memref<1x32xf32, #tpu.memory_space<vmem>>, %arg10: memref<1x32xf32, #tpu.memory_space<vmem>>, %arg11: memref<4xf32, #tpu.memory_space<smem>>, %arg12: memref<1x32x64xf32, #tpu.memory_space<vmem>>, %arg13: memref<1x16x64xi32, #tpu.memory_space<vmem>>) attributes {dimension_semantics = [#tpu.dimension_semantics<parallel>], iteration_bounds = array<i64: 2>, scalar_prefetch = 0 : i64, scratch_operands = 0 : i64, tpu.core_type = #tpu.core_type<tc>, window_params = [{transform_indices = @transform_0, window_bounds = array<i64: 1, 256, 16>}, {pipeline_mode = #tpu.pipeline_mode<synchronous>, transform_indices = @transform_1, window_bounds = array<i64: 64, 4>}, {pipeline_mode = #tpu.pipeline_mode<synchronous>, transform_indices = @transform_2, window_bounds = array<i64: 36, 4>}, {pipeline_mode = #tpu.pipeline_mode<synchronous>, transform_indices = @transform_3, window_bounds = array<i64: 4, 32>}, {pipeline_mode = #tpu.pipeline_mode<synchronous>, transform_indices = @transform_4, window_bounds = array<i64: 1, 4>}, {pipeline_mode = #tpu.pipeline_mode<synchronous>, transform_indices = @transform_5, window_bounds = array<i64: 1, 4>}, {pipeline_mode = #tpu.pipeline_mode<synchronous>, transform_indices = @transform_6, window_bounds = array<i64: 1, 4>}, {pipeline_mode = #tpu.pipeline_mode<synchronous>, transform_indices = @transform_7, window_bounds = array<i64: 1, 4>}, {pipeline_mode = #tpu.pipeline_mode<synchronous>, transform_indices = @transform_8, window_bounds = array<i64: 1, 32>}, {pipeline_mode = #tpu.pipeline_mode<synchronous>, transform_indices = @transform_9, window_bounds = array<i64: 1, 32>}, {transform_indices = @transform_10, window_bounds = array<i64: 4>}, {transform_indices = @transform_11, window_bounds = array<i64: 1, 32, 64>}, {transform_indices = @transform_12, window_bounds = array<i64: 1, 16, 64>}]} {
    %c0 = arith.constant 0 : index
    %0 = memref.load %arg11[%c0] : memref<4xf32, #tpu.memory_space<smem>>
    %c1 = arith.constant 1 : index
    %1 = memref.load %arg11[%c1] : memref<4xf32, #tpu.memory_space<smem>>
    %c2 = arith.constant 2 : index
    %2 = memref.load %arg11[%c2] : memref<4xf32, #tpu.memory_space<smem>>
    %c3 = arith.constant 3 : index
    %3 = memref.load %arg11[%c3] : memref<4xf32, #tpu.memory_space<smem>>
    %c0_0 = arith.constant 0 : index
    %c0_1 = arith.constant 0 : index
    %c0_2 = arith.constant 0 : index
    %4 = vector.load %arg1[%c0_0, %c0_1, %c0_2] : memref<1x256x16xf32, #tpu.memory_space<vmem>>, vector<1x256x16xf32>
    %5 = vector.shape_cast %4 : vector<1x256x16xf32> to vector<256x16xf32>
    %6 = vector.shape_cast %5 : vector<256x16xf32> to vector<16x16x16xf32>
    %7 = vector.extract_strided_slice %6 {offsets = [0, 0, 0], sizes = [15, 15, 16], strides = [1, 1, 1]} : vector<16x16x16xf32> to vector<15x15x16xf32>
    %8 = vector.extract_strided_slice %6 {offsets = [0, 1, 0], sizes = [15, 15, 16], strides = [1, 1, 1]} : vector<16x16x16xf32> to vector<15x15x16xf32>
    %9 = vector.extract_strided_slice %6 {offsets = [1, 0, 0], sizes = [15, 15, 16], strides = [1, 1, 1]} : vector<16x16x16xf32> to vector<15x15x16xf32>
    %10 = vector.extract_strided_slice %6 {offsets = [1, 1, 0], sizes = [15, 15, 16], strides = [1, 1, 1]} : vector<16x16x16xf32> to vector<15x15x16xf32>
    %11 = tpu.concatenate %7, %8, %9, %10 in 2 : vector<15x15x16xf32>, vector<15x15x16xf32>, vector<15x15x16xf32>, vector<15x15x16xf32> -> vector<15x15x64xf32>
    %12 = vector.shape_cast %11 : vector<15x15x64xf32> to vector<225x64xf32>
    %13 = arith.truncf %12 : vector<225x64xf32> to vector<225x64xbf16>
    %c0_3 = arith.constant 0 : index
    %c0_4 = arith.constant 0 : index
    %14 = vector.load %arg2[%c0_3, %c0_4] : memref<64x4xbf16, #tpu.memory_space<vmem>>, vector<64x4xbf16>
    %cst = arith.constant dense<0.000000e+00> : vector<225x4xf32>
    %15 = tpu.matmul %13, %14, %cst {dimension_numbers = #tpu.dot_dimension_numbers<[1], [0], [0], [1], [0, 0, 1, 1], [], []>} : vector<225x64xbf16>, vector<64x4xbf16>, vector<225x4xf32> -> vector<225x4xf32>
    %c0_5 = arith.constant 0 : index
    %c0_6 = arith.constant 0 : index
    %16 = vector.load %arg5[%c0_5, %c0_6] : memref<1x4xf32, #tpu.memory_space<vmem>>, vector<1x4xf32>
    %17 = vector.broadcast %16 : vector<1x4xf32> to vector<225x4xf32>
    %18 = arith.mulf %15, %17 : vector<225x4xf32>
    %c0_7 = arith.constant 0 : index
    %c0_8 = arith.constant 0 : index
    %19 = vector.load %arg6[%c0_7, %c0_8] : memref<1x4xf32, #tpu.memory_space<vmem>>, vector<1x4xf32>
    %20 = vector.broadcast %19 : vector<1x4xf32> to vector<225x4xf32>
    %21 = arith.addf %18, %20 : vector<225x4xf32>
    %cst_9 = arith.constant 0.000000e+00 : f32
    %22 = vector.broadcast %cst_9 : f32 to vector<225x4xf32>
    %23 = arith.cmpf ogt, %21, %22 : vector<225x4xf32>
    %24 = vector.broadcast %0 : f32 to vector<225x4xf32>
    %25 = arith.mulf %24, %21 : vector<225x4xf32>
    %26 = arith.select %23, %21, %25 : vector<225x4xi1>, vector<225x4xf32>
    %27 = vector.shape_cast %26 : vector<225x4xf32> to vector<15x15x4xf32>
    %cst_10 = arith.constant 0.000000e+00 : f32
    %28 = vector.broadcast %cst_10 : f32 to vector<15x1x4xf32>
    %cst_11 = arith.constant 0.000000e+00 : f32
    %29 = vector.broadcast %cst_11 : f32 to vector<15x2x4xf32>
    %30 = tpu.concatenate %28, %27, %29 in 1 : vector<15x1x4xf32>, vector<15x15x4xf32>, vector<15x2x4xf32> -> vector<15x18x4xf32>
    %cst_12 = arith.constant 0.000000e+00 : f32
    %31 = vector.broadcast %cst_12 : f32 to vector<1x18x4xf32>
    %cst_13 = arith.constant 0.000000e+00 : f32
    %32 = vector.broadcast %cst_13 : f32 to vector<2x18x4xf32>
    %33 = tpu.concatenate %31, %30, %32 in 0 : vector<1x18x4xf32>, vector<15x18x4xf32>, vector<2x18x4xf32> -> vector<18x18x4xf32>
    %34 = vector.shape_cast %33 : vector<18x18x4xf32> to vector<9x2x9x2x4xf32>
    %35 = vector.extract_strided_slice %34 {offsets = [0, 0, 0, 0, 0], sizes = [8, 1, 8, 1, 4], strides = [1, 1, 1, 1, 1]} : vector<9x2x9x2x4xf32> to vector<8x1x8x1x4xf32>
    %36 = vector.shape_cast %35 : vector<8x1x8x1x4xf32> to vector<8x8x4xf32>
    %37 = vector.extract_strided_slice %34 {offsets = [0, 0, 0, 1, 0], sizes = [8, 1, 8, 1, 4], strides = [1, 1, 1, 1, 1]} : vector<9x2x9x2x4xf32> to vector<8x1x8x1x4xf32>
    %38 = vector.shape_cast %37 : vector<8x1x8x1x4xf32> to vector<8x8x4xf32>
    %39 = vector.extract_strided_slice %34 {offsets = [0, 0, 1, 0, 0], sizes = [8, 1, 8, 1, 4], strides = [1, 1, 1, 1, 1]} : vector<9x2x9x2x4xf32> to vector<8x1x8x1x4xf32>
    %40 = vector.shape_cast %39 : vector<8x1x8x1x4xf32> to vector<8x8x4xf32>
    %41 = vector.extract_strided_slice %34 {offsets = [0, 1, 0, 0, 0], sizes = [8, 1, 8, 1, 4], strides = [1, 1, 1, 1, 1]} : vector<9x2x9x2x4xf32> to vector<8x1x8x1x4xf32>
    %42 = vector.shape_cast %41 : vector<8x1x8x1x4xf32> to vector<8x8x4xf32>
    %43 = vector.extract_strided_slice %34 {offsets = [0, 1, 0, 1, 0], sizes = [8, 1, 8, 1, 4], strides = [1, 1, 1, 1, 1]} : vector<9x2x9x2x4xf32> to vector<8x1x8x1x4xf32>
    %44 = vector.shape_cast %43 : vector<8x1x8x1x4xf32> to vector<8x8x4xf32>
    %45 = vector.extract_strided_slice %34 {offsets = [0, 1, 1, 0, 0], sizes = [8, 1, 8, 1, 4], strides = [1, 1, 1, 1, 1]} : vector<9x2x9x2x4xf32> to vector<8x1x8x1x4xf32>
    %46 = vector.shape_cast %45 : vector<8x1x8x1x4xf32> to vector<8x8x4xf32>
    %47 = vector.extract_strided_slice %34 {offsets = [1, 0, 0, 0, 0], sizes = [8, 1, 8, 1, 4], strides = [1, 1, 1, 1, 1]} : vector<9x2x9x2x4xf32> to vector<8x1x8x1x4xf32>
    %48 = vector.shape_cast %47 : vector<8x1x8x1x4xf32> to vector<8x8x4xf32>
    %49 = vector.extract_strided_slice %34 {offsets = [1, 0, 0, 1, 0], sizes = [8, 1, 8, 1, 4], strides = [1, 1, 1, 1, 1]} : vector<9x2x9x2x4xf32> to vector<8x1x8x1x4xf32>
    %50 = vector.shape_cast %49 : vector<8x1x8x1x4xf32> to vector<8x8x4xf32>
    %51 = vector.extract_strided_slice %34 {offsets = [1, 0, 1, 0, 0], sizes = [8, 1, 8, 1, 4], strides = [1, 1, 1, 1, 1]} : vector<9x2x9x2x4xf32> to vector<8x1x8x1x4xf32>
    %52 = vector.shape_cast %51 : vector<8x1x8x1x4xf32> to vector<8x8x4xf32>
    %53 = tpu.concatenate %36, %38, %40, %42, %44, %46, %48, %50, %52 in 2 : vector<8x8x4xf32>, vector<8x8x4xf32>, vector<8x8x4xf32>, vector<8x8x4xf32>, vector<8x8x4xf32>, vector<8x8x4xf32>, vector<8x8x4xf32>, vector<8x8x4xf32>, vector<8x8x4xf32> -> vector<8x8x36xf32>
    %54 = vector.shape_cast %53 : vector<8x8x36xf32> to vector<64x36xf32>
    %55 = arith.truncf %54 : vector<64x36xf32> to vector<64x36xbf16>
    %c0_14 = arith.constant 0 : index
    %c0_15 = arith.constant 0 : index
    %56 = vector.load %arg3[%c0_14, %c0_15] : memref<36x4xbf16, #tpu.memory_space<vmem>>, vector<36x4xbf16>
    %cst_16 = arith.constant dense<0.000000e+00> : vector<64x4xf32>
    %57 = tpu.matmul %55, %56, %cst_16 {dimension_numbers = #tpu.dot_dimension_numbers<[1], [0], [0], [1], [0, 0, 1, 1], [], []>} : vector<64x36xbf16>, vector<36x4xbf16>, vector<64x4xf32> -> vector<64x4xf32>
    %c0_17 = arith.constant 0 : index
    %c0_18 = arith.constant 0 : index
    %58 = vector.load %arg7[%c0_17, %c0_18] : memref<1x4xf32, #tpu.memory_space<vmem>>, vector<1x4xf32>
    %59 = vector.broadcast %58 : vector<1x4xf32> to vector<64x4xf32>
    %60 = arith.mulf %57, %59 : vector<64x4xf32>
    %c0_19 = arith.constant 0 : index
    %c0_20 = arith.constant 0 : index
    %61 = vector.load %arg8[%c0_19, %c0_20] : memref<1x4xf32, #tpu.memory_space<vmem>>, vector<1x4xf32>
    %62 = vector.broadcast %61 : vector<1x4xf32> to vector<64x4xf32>
    %63 = arith.addf %60, %62 : vector<64x4xf32>
    %cst_21 = arith.constant 0.000000e+00 : f32
    %64 = vector.broadcast %cst_21 : f32 to vector<64x4xf32>
    %65 = arith.cmpf ogt, %63, %64 : vector<64x4xf32>
    %66 = vector.broadcast %1 : f32 to vector<64x4xf32>
    %67 = arith.mulf %66, %63 : vector<64x4xf32>
    %68 = arith.select %65, %63, %67 : vector<64x4xi1>, vector<64x4xf32>
    %69 = arith.truncf %68 : vector<64x4xf32> to vector<64x4xbf16>
    %c0_22 = arith.constant 0 : index
    %c0_23 = arith.constant 0 : index
    %70 = vector.load %arg4[%c0_22, %c0_23] : memref<4x32xbf16, #tpu.memory_space<vmem>>, vector<4x32xbf16>
    %cst_24 = arith.constant dense<0.000000e+00> : vector<64x32xf32>
    %71 = tpu.matmul %69, %70, %cst_24 {dimension_numbers = #tpu.dot_dimension_numbers<[1], [0], [0], [1], [0, 0, 1, 1], [], []>} : vector<64x4xbf16>, vector<4x32xbf16>, vector<64x32xf32> -> vector<64x32xf32>
    %c0_25 = arith.constant 0 : index
    %c0_26 = arith.constant 0 : index
    %72 = vector.load %arg9[%c0_25, %c0_26] : memref<1x32xf32, #tpu.memory_space<vmem>>, vector<1x32xf32>
    %73 = vector.broadcast %72 : vector<1x32xf32> to vector<64x32xf32>
    %74 = arith.mulf %71, %73 : vector<64x32xf32>
    %c0_27 = arith.constant 0 : index
    %c0_28 = arith.constant 0 : index
    %75 = vector.load %arg10[%c0_27, %c0_28] : memref<1x32xf32, #tpu.memory_space<vmem>>, vector<1x32xf32>
    %76 = vector.broadcast %75 : vector<1x32xf32> to vector<64x32xf32>
    %77 = arith.addf %74, %76 : vector<64x32xf32>
    %cst_29 = arith.constant 0.000000e+00 : f32
    %78 = vector.broadcast %cst_29 : f32 to vector<64x32xf32>
    %79 = arith.cmpf ogt, %77, %78 : vector<64x32xf32>
    %80 = vector.broadcast %2 : f32 to vector<64x32xf32>
    %81 = arith.mulf %80, %77 : vector<64x32xf32>
    %82 = arith.select %79, %77, %81 : vector<64x32xi1>, vector<64x32xf32>
    %83 = vector.shape_cast %5 : vector<256x16xf32> to vector<8x2x8x2x16xf32>
    %84 = tpu.iota {dimensions = array<i32: 0>} : vector<8x8x16xi32>
    %85 = tpu.iota {dimensions = array<i32: 1>} : vector<8x8x16xi32>
    %c2_i32 = arith.constant 2 : i32
    %86 = vector.broadcast %c2_i32 : i32 to vector<8x8x16xi32>
    %87 = arith.muli %86, %84 : vector<8x8x16xi32>
    %c16_i32 = arith.constant 16 : i32
    %88 = vector.broadcast %c16_i32 : i32 to vector<8x8x16xi32>
    %89 = arith.muli %87, %88 : vector<8x8x16xi32>
    %c2_i32_30 = arith.constant 2 : i32
    %90 = vector.broadcast %c2_i32_30 : i32 to vector<8x8x16xi32>
    %91 = arith.muli %90, %85 : vector<8x8x16xi32>
    %92 = arith.addi %89, %91 : vector<8x8x16xi32>
    %93 = vector.extract_strided_slice %83 {offsets = [0, 0, 0, 0, 0], sizes = [8, 1, 8, 1, 16], strides = [1, 1, 1, 1, 1]} : vector<8x2x8x2x16xf32> to vector<8x1x8x1x16xf32>
    %94 = vector.shape_cast %93 : vector<8x1x8x1x16xf32> to vector<8x8x16xf32>
    %95 = vector.extract_strided_slice %83 {offsets = [0, 0, 0, 1, 0], sizes = [8, 1, 8, 1, 16], strides = [1, 1, 1, 1, 1]} : vector<8x2x8x2x16xf32> to vector<8x1x8x1x16xf32>
    %96 = vector.shape_cast %95 : vector<8x1x8x1x16xf32> to vector<8x8x16xf32>
    %97 = vector.extract_strided_slice %83 {offsets = [0, 1, 0, 0, 0], sizes = [8, 1, 8, 1, 16], strides = [1, 1, 1, 1, 1]} : vector<8x2x8x2x16xf32> to vector<8x1x8x1x16xf32>
    %98 = vector.shape_cast %97 : vector<8x1x8x1x16xf32> to vector<8x8x16xf32>
    %99 = vector.extract_strided_slice %83 {offsets = [0, 1, 0, 1, 0], sizes = [8, 1, 8, 1, 16], strides = [1, 1, 1, 1, 1]} : vector<8x2x8x2x16xf32> to vector<8x1x8x1x16xf32>
    %100 = vector.shape_cast %99 : vector<8x1x8x1x16xf32> to vector<8x8x16xf32>
    %101 = arith.cmpf ogt, %96, %94 : vector<8x8x16xf32>
    %c1_i32 = arith.constant 1 : i32
    %102 = vector.broadcast %c1_i32 : i32 to vector<8x8x16xi32>
    %103 = arith.addi %92, %102 : vector<8x8x16xi32>
    %104 = arith.select %101, %103, %92 : vector<8x8x16xi1>, vector<8x8x16xi32>
    %105 = arith.select %101, %96, %94 : vector<8x8x16xi1>, vector<8x8x16xf32>
    %106 = arith.cmpf ogt, %98, %105 : vector<8x8x16xf32>
    %c16_i32_31 = arith.constant 16 : i32
    %107 = vector.broadcast %c16_i32_31 : i32 to vector<8x8x16xi32>
    %108 = arith.addi %92, %107 : vector<8x8x16xi32>
    %109 = arith.select %106, %108, %104 : vector<8x8x16xi1>, vector<8x8x16xi32>
    %110 = arith.select %106, %98, %105 : vector<8x8x16xi1>, vector<8x8x16xf32>
    %111 = arith.cmpf ogt, %100, %110 : vector<8x8x16xf32>
    %c17_i32 = arith.constant 17 : i32
    %112 = vector.broadcast %c17_i32 : i32 to vector<8x8x16xi32>
    %113 = arith.addi %92, %112 : vector<8x8x16xi32>
    %114 = arith.select %111, %113, %109 : vector<8x8x16xi1>, vector<8x8x16xi32>
    %115 = arith.select %111, %100, %110 : vector<8x8x16xi1>, vector<8x8x16xf32>
    %116 = vector.shape_cast %115 : vector<8x8x16xf32> to vector<64x16xf32>
    %117 = vector.shape_cast %114 : vector<8x8x16xi32> to vector<64x16xi32>
    %cst_32 = arith.constant 0.000000e+00 : f32
    %118 = vector.broadcast %cst_32 : f32 to vector<64x16xf32>
    %119 = tpu.concatenate %116, %118 in 1 : vector<64x16xf32>, vector<64x16xf32> -> vector<64x32xf32>
    %120 = arith.addf %82, %119 : vector<64x32xf32>
    %cst_33 = arith.constant 0.000000e+00 : f32
    %121 = vector.broadcast %cst_33 : f32 to vector<64x32xf32>
    %122 = arith.cmpf ogt, %120, %121 : vector<64x32xf32>
    %123 = vector.broadcast %3 : f32 to vector<64x32xf32>
    %124 = arith.mulf %123, %120 : vector<64x32xf32>
    %125 = arith.select %122, %120, %124 : vector<64x32xi1>, vector<64x32xf32>
    %126 = tpu.transpose %125, [1, 0] : vector<64x32xf32> -> vector<32x64xf32>
    %c0_34 = arith.constant 0 : index
    %c0_35 = arith.constant 0 : index
    %c0_36 = arith.constant 0 : index
    %127 = vector.load %arg12[%c0_34, %c0_35, %c0_36] : memref<1x32x64xf32, #tpu.memory_space<vmem>>, vector<1x32x64xf32>
    %128 = vector.shape_cast %127 : vector<1x32x64xf32> to vector<32x64xf32>
    %129 = vector.shape_cast %126 : vector<32x64xf32> to vector<1x32x64xf32>
    tpu.vector_store %arg12[%c0_34, %c0_35, %c0_36], %129 {strides = array<i32>} : memref<1x32x64xf32, #tpu.memory_space<vmem>>, vector<1x32x64xf32>,
    %130 = tpu.transpose %117, [1, 0] : vector<64x16xi32> -> vector<16x64xi32>
    %c0_37 = arith.constant 0 : index
    %c0_38 = arith.constant 0 : index
    %c0_39 = arith.constant 0 : index
    %131 = vector.load %arg13[%c0_37, %c0_38, %c0_39] : memref<1x16x64xi32, #tpu.memory_space<vmem>>, vector<1x16x64xi32>
    %132 = vector.shape_cast %131 : vector<1x16x64xi32> to vector<16x64xi32>
    %133 = vector.shape_cast %130 : vector<16x64xi32> to vector<1x16x64xi32>
    tpu.vector_store %arg13[%c0_37, %c0_38, %c0_39], %133 {strides = array<i32>} : memref<1x16x64xi32, #tpu.memory_space<vmem>>, vector<1x16x64xi32>,
    return
  }
  func.func @transform_0(%arg0: i32) -> (i32, i32, i32) {
    %c0_i32 = arith.constant 0 : i32
    %c0_i32_0 = arith.constant 0 : i32
    %c0_i32_1 = arith.constant 0 : i32
    return %arg0, %c0_i32, %c0_i32_0 : i32, i32, i32
  }
  func.func @transform_1(%arg0: i32) -> (i32, i32) {
    %c0_i32 = arith.constant 0 : i32
    %c0_i32_0 = arith.constant 0 : i32
    %c0_i32_1 = arith.constant 0 : i32
    return %c0_i32, %c0_i32_0 : i32, i32
  }
  func.func @transform_2(%arg0: i32) -> (i32, i32) {
    %c0_i32 = arith.constant 0 : i32
    %c0_i32_0 = arith.constant 0 : i32
    %c0_i32_1 = arith.constant 0 : i32
    return %c0_i32, %c0_i32_0 : i32, i32
  }
  func.func @transform_3(%arg0: i32) -> (i32, i32) {
    %c0_i32 = arith.constant 0 : i32
    %c0_i32_0 = arith.constant 0 : i32
    %c0_i32_1 = arith.constant 0 : i32
    return %c0_i32, %c0_i32_0 : i32, i32
  }
  func.func @transform_4(%arg0: i32) -> (i32, i32) {
    %c0_i32 = arith.constant 0 : i32
    %c0_i32_0 = arith.constant 0 : i32
    %c0_i32_1 = arith.constant 0 : i32
    return %c0_i32, %c0_i32_0 : i32, i32
  }
  func.func @transform_5(%arg0: i32) -> (i32, i32) {
    %c0_i32 = arith.constant 0 : i32
    %c0_i32_0 = arith.constant 0 : i32
    %c0_i32_1 = arith.constant 0 : i32
    return %c0_i32, %c0_i32_0 : i32, i32
  }
  func.func @transform_6(%arg0: i32) -> (i32, i32) {
    %c0_i32 = arith.constant 0 : i32
    %c0_i32_0 = arith.constant 0 : i32
    %c0_i32_1 = arith.constant 0 : i32
    return %c0_i32, %c0_i32_0 : i32, i32
  }
  func.func @transform_7(%arg0: i32) -> (i32, i32) {
    %c0_i32 = arith.constant 0 : i32
    %c0_i32_0 = arith.constant 0 : i32
    %c0_i32_1 = arith.constant 0 : i32
    return %c0_i32, %c0_i32_0 : i32, i32
  }
  func.func @transform_8(%arg0: i32) -> (i32, i32) {
    %c0_i32 = arith.constant 0 : i32
    %c0_i32_0 = arith.constant 0 : i32
    %c0_i32_1 = arith.constant 0 : i32
    return %c0_i32, %c0_i32_0 : i32, i32
  }
  func.func @transform_9(%arg0: i32) -> (i32, i32) {
    %c0_i32 = arith.constant 0 : i32
    %c0_i32_0 = arith.constant 0 : i32
    %c0_i32_1 = arith.constant 0 : i32
    return %c0_i32, %c0_i32_0 : i32, i32
  }
  func.func @transform_10(%arg0: i32) -> i32 {
    %c0_i32 = arith.constant 0 : i32
    %c0_i32_0 = arith.constant 0 : i32
    return %c0_i32 : i32
  }
  func.func @transform_11(%arg0: i32) -> (i32, i32, i32) {
    %c0_i32 = arith.constant 0 : i32
    %c0_i32_0 = arith.constant 0 : i32
    %c0_i32_1 = arith.constant 0 : i32
    return %arg0, %c0_i32, %c0_i32_0 : i32, i32, i32
  }
  func.func @transform_12(%arg0: i32) -> (i32, i32, i32) {
    %c0_i32 = arith.constant 0 : i32
    %c0_i32_0 = arith.constant 0 : i32
    %c0_i32_1 = arith.constant 0 : i32
    return %arg0, %c0_i32, %c0_i32_0 : i32, i32, i32
  }
}

</mosaic_0001>

<bundles_post_ra>
// kernel: bottleneck_downsample_forward.1
= control target key start
LH: loop header
LB: loop body
LE: loop exit
PB: predicated region body
PF: predicated region fallthrough
CT: control target
= control target key end

     0   :  { %18 = vsyncpa [#allocation3], 0  ;;  %s14333_s21 = smov 0   ;;  %s21887_s0 = inlined_call_operand.vmem [shape: f32[2,256,16], index: 0, kind: input, shape index: {}]   ;;  %s21888_s1 = inlined_call_operand.vmem [shape: bf16[64,4], index: 1, kind: input, shape index: {}]   ;;  %s21889_s2 = inlined_call_operand.vmem [shape: bf16[36,4], index: 2, kind: input, shape index: {}]   ;;  %s21890_s3 = inlined_call_operand.vmem [shape: bf16[4,32], index: 3, kind: input, shape index: {}]   ;;  %s21891_s4 = inlined_call_operand.vmem [shape: f32[1,4], index: 4, kind: input, shape index: {}]   ;;  %s21892_s5 = inlined_call_operand.vmem [shape: f32[1,4], index: 5, kind: input, shape index: {}]   ;;  %s21893_s6 = inlined_call_operand.vmem [shape: f32[1,4], index: 6, kind: input, shape index: {}]   ;;  %s21894_s7 = inlined_call_operand.vmem [shape: f32[1,4], index: 7, kind: input, shape index: {}]   ;;  %s21895_s8 = inlined_call_operand.vmem [shape: f32[1,32], index: 8, kind: input, shape index: {}]   ;;  %s21896_s9 = inlined_call_operand.vmem [shape: f32[1,32], index: 9, kind: input, shape index: {}]   ;;  %s21897_s10 = inlined_call_operand.vmem [shape: f32[4], index: 10, kind: input, shape index: {}]   ;;  %s21898_s11 = inlined_call_operand.vmem [shape: f32[2,32,64], index: 11, kind: output, shape index: {0}]   ;;  %s21899_s12 = inlined_call_operand.vmem [shape: s32[2,16,64], index: 12, kind: output, shape index: {1}]  }
   0x1 LB: > { %s13608_s22 = sadd.s32 4294967295, %s14248_s21   ;;  %p13610_p0 = scmp.ge.s32.totalorder %s14248_s21, 1  ;;  %s14248_s21 = sphi %s14333_s21, %s24_s21  }
   0x2   : > { %p317_p1 = scmp.lt.s32.totalorder %s14248_s21, 3  ;;  %s357_s25 = sshll.u32 %s21897_s10, 4  ;;  %s358_s25 = int_to_ptr.vmem [resolvable:$true] %s357_s25 }
   0x3   : > { %p13941_p3 = scmp.eq.s32.totalorder %s13608_s22, 0  ;;  %s14223_s27 = scalar_lea.vmem %s358_s25, 16 }
   0x4   : > { %p14344_p2 = pnand %p13610_p0, %p317_p1  ;;  %p14224_p6 = scmp.ne.s32.totalorder %s358_s25, %s14223_s27 }
   0x5   : > { %p14231_p10 = scmp.lt.s32.totalorder %s358_s25, %s358_s25  ;;  %p14232_p11 = scmp.lt.s32.totalorder %s14223_s27, %s14223_s27 }
   0x6   : > { %p13937_p4 = pneg %p14344_p2 }
   0x7   : > { %p14233_p12 = por %p14232_p11, %p14231_p10 }
   0x8   : > { %p13938_p5 = pnand %p13941_p3, %p13937_p4 }
   0xa   : > { %p14225_p7 = pneg %p13938_p5 }
   0xc   : > { %p14226_p8 = pnand %p14225_p7, %p14224_p6 }
   0xe   : > { %p14227_p9 = pneg %p14226_p8 }
  0x10   : > { %p14234_p13 = pnand %p14233_p12, %p14227_p9 }
  0x12   : > { %14237 = shalt.err (!%p14234_p13)
}
  0x13   : > { %s14250_s28 = smov [#allocation2]   ;;  %378 = sbr.rel (%p14344_p2) target bundleno = 1796 (0x704), region = 64 }
  0x14   : > { %13940 = dma.vmem_to_smem (!%p13938_p5), %s358_s25, 16, %s14250_s28, [#allocation3]  }
  0x1a   : > { %14243 = dma.done.wait (%p13941_p3), [#allocation3], 16  }
  0x1b   : > { %14245 = vsyncadd (%p13941_p3), [#allocation3], 4294967280 }
  0x1c   : > { %384 = sfence }
  0x1d   : > { %p426_p0 = scmp.lt.s32.totalorder %s13608_s22, 1  ;;  %s14251_s15 = smov 32   ;;  %vm22017_vm0 = vcmask 1046528   ;;  %vm22036_vm2 = vcmask 130048   ;;  %vm860_vm3 = vcmask 261120   ;;  %vm891_vm4 = vcmask 392192  }
  0x1e   : > { %s14252_s16 = smov 16   ;;  %s14253_s17 = smov 48   ;;  %vm14258_vm6 = vmmov 0   ;;  %vm21973_vm7 = vcmask 523264   ;;  %vm22114_vm10 = vcmask 1041409   ;;  %vm22035_vm12 = vcmask 1042434  }
  0x1f   : > { %s23987_s22 = smov (!%p426_p0, %s13608_s22), 1  ;;  %s442_s28 = sld [smem:[#allocation2]]  ;;  %vm22088_vm14 = vcmask 1043459   ;;  %vm7127_vm15 = vcmask 1040384  }
  0x20   : > { %s13797_s29 = sshll.u32 %s23987_s22, 8  ;;  %s14259_s18 = smov 4  }
  0x21   : > { %s14361_s14 = scalar_lea.vmem %s21887_s0, %s13797_s29  ;;  %s14260_s19 = smov 8  }
  0x22   : > { %v14364_v0 = vld [vmem:[%s14361_s14 + $0x10] sm:$0xff]  ;;  %v14367_v1 = vld [vmem:[%s14361_s14 + $0x8] sm:$0xff]  ;;  %v14373_v3 = vld [vmem:[%s14361_s14 + $0x18] sm:$0xff]  ;;  %s14261_s20 = smov 12   ;;  %s14262_s27 = smov 20  }
  0x23   : > { %646 = vrot.lane.b32.xlu1 %v14364_v0, %s14251_s15  ;;  %v510_v2 = vrot.slane %v14367_v1, 1  ;;  %v14379_v4 = vld [vmem:[%s14361_s14] sm:$0xff]  ;;  %v513_v7 = vrot.slane %v14373_v3, 1  ;;  %v512_v9 = vrot.slane %v14364_v0, 1  ;;  %v14393_v10 = vld [vmem:[%s14361_s14 + $0x28] sm:$0xff]  ;;  %v14404_v15 = vld [vmem:[%s14361_s14 + $0x30] sm:$0xff] }
  0x24   : > { %v509_v5 = vrot.slane %v14379_v4, 1  ;;  %v14387_v8 = vld [vmem:[%s14361_s14 + $0x20] sm:$0xff]  ;;  %v516_v13 = vrot.slane %v14393_v10, 1  ;;  %v14410_v16 = vld [vmem:[%s14361_s14 + $0x38] sm:$0xff]  ;;  %v518_v17 = vrot.slane %v14404_v15, 1  ;;  %v14430_v21 = vld [vmem:[%s14361_s14 + $0x48] sm:$0xff] }
  0x25   : > { %556 = vrot.lane.b32.xlu0 %v510_v2, %s14252_s16  ;;  %v514_v11 = vsel %vm22017_vm0, %v512_v9, %v513_v7  ;;  %v515_v12 = vrot.slane %v14387_v8, 1  ;;  %v519_v18 = vrot.slane %v14410_v16, 1  ;;  %v14421_v20 = vld [vmem:[%s14361_s14 + $0x40] sm:$0xff]  ;;  %v522_v23 = vrot.slane %v14430_v21, 1  ;;  %v14439_v25 = vld [vmem:[%s14361_s14 + $0x50] sm:$0xff]  ;;  %v14442_v26 = vld [vmem:[%s14361_s14 + $0x58] sm:$0xff] }
  0x26   : > { %v511_v6 = vsel %vm22017_vm0, %v509_v5, %v510_v2  ;;  %v521_v22 = vrot.slane %v14421_v20, 1  ;;  %22506 = vst [vmem:[#allocation5_spill] sm:$0xff] %v14439_v25  ;;  %22507 = vst [vmem:[#allocation6_spill] sm:$0xff] %v14442_v26  ;;  %v524_v27 = vrot.slane %v14439_v25, 1  ;;  %v525_v28 = vrot.slane %v14442_v26, 1  ;;  %v458_v30 = vld [vmem:[%s14361_s14 + $0x60] sm:$0xff] }
  0x27   : > { %648 = vrot.lane.b32.xlu1 %v14373_v3, %s14251_s15  ;;  %v517_v14 = vsel %vm22017_vm0, %v515_v12, %v516_v13  ;;  %v520_v19 = vsel %vm22017_vm0, %v518_v17, %v519_v18  ;;  %v459_v31 = vld [vmem:[%s14361_s14 + $0x68] sm:$0xff]  ;;  %v527_v32 = vrot.slane %v458_v30, 1  ;;  %v14464_v35 = vld [vmem:[%s14361_s14 + $0xb0] sm:$0xff]  ;;  %v469_v36 = vld [vmem:[%s14361_s14 + $0xb8] sm:$0xff]  ;;  %s14264_s29 = smov 28   ;;  %s13798_s30 = sshll.u32 %s23987_s22, 5 }
  0x28   : > { %v523_v24 = vsel %vm22017_vm0, %v521_v22, %v522_v23  ;;  %v526_v29 = vsel %vm22017_vm0, %v524_v27, %v525_v28  ;;  %v528_v33 = vrot.slane %v459_v31, 1  ;;  %v542_v37 = vrot.slane %v14464_v35, 1  ;;  %v460_v39 = vld [vmem:[%s14361_s14 + $0x70] sm:$0xff]  ;;  %v461_v41 = vld [vmem:[%s14361_s14 + $0x78] sm:$0xff]  ;;  %v14481_v44 = vld [vmem:[%s14361_s14 + $0xa8] sm:$0xff] }
  0x29   : > { %554 = vrot.lane.b32.xlu0 %v511_v6, %s14252_s16  ;;  %v543_v38 = vrot.slane %v469_v36, 1  ;;  %v530_v42 = vrot.slane %v460_v39, 1  ;;  %v531_v43 = vrot.slane %v461_v41, 1  ;;  %v14487_v46 = vrot.slane %v14481_v44, 1  ;;  %v470_v47 = vld [vmem:[%s14361_s14 + $0xc0] sm:$0xff]  ;;  %v471_v49 = vld [vmem:[%s14361_s14 + $0xc8] sm:$0xff] }
  0x2a   : > { %v529_v34 = vsel %vm22017_vm0, %v527_v32, %v528_v33  ;;  %v462_v48 = vld [vmem:[%s14361_s14 + $0x80] sm:$0xff]  ;;  %v545_v50 = vrot.slane %v470_v47, 1  ;;  %v546_v51 = vrot.slane %v471_v49, 1  ;;  %v463_v54 = vld [vmem:[%s14361_s14 + $0x88] sm:$0xff]  ;;  %v464_v63 = vld [vmem:[%s14361_s14 + $0x90] sm:$0xff] }
  0x2b   : > { %741 = vrot.lane.b32.xlu1 %v513_v7, %s14253_s17  ;;  %v14474_v40 = vsel %vm22017_vm0, %v542_v37, %v543_v38  ;;  %v532_v45 = vsel %vm22017_vm0, %v530_v42, %v531_v43  ;;  %v533_v55 = vrot.slane %v462_v48, 1  ;;  %v14505_v56 = vrot.slane %v463_v54, 1  ;;  %v14534_v6 = vld [vmem:[%s14361_s14 + $0x98] sm:$0xff]  ;;  %v472_v9 = vld [vmem:[%s14361_s14 + $0xd0] sm:$0xff] }
  0x2c   : > { %v547_v52 = vsel %vm22017_vm0, %v545_v50, %v546_v51  ;;  %v14541_v12 = vrot.slane %v14534_v6, 1  ;;  %v14256_v37 = vmov 269488144  }
  0x2d   : > { %739 = vrot.lane.b32.xlu0 %v514_v11, %s14253_s17  ;;  %v535_v57 = vsel %vm22017_vm0, %v533_v55, %v14505_v56 }
  0x2f   : > { %650 = vrot.lane.b32.xlu1 %v14387_v8, %s14251_s15 }
  0x31   : > { %558 = vrot.lane.b32.xlu0 %v514_v11, %s14252_s16  ;;  %v536_v11 = vrot.slane %v464_v63, 1 }
  0x33   : > { %560 = vrot.lane.b32.xlu1 %v513_v7, %s14252_s16 }
  0x35   : > { %743 = vrot.lane.b32.xlu0 %v517_v14, %s14253_s17 }
  0x37   : > { %562 = vrot.lane.b32.xlu1 %v517_v14, %s14252_s16  ;;  %v473_v14 = vld [vmem:[%s14361_s14 + $0xd8] sm:$0xff] }
  0x38   : > { %v549_v22 = vrot.slane %v473_v14, 1 }
  0x39   : > { %652 = vrot.lane.b32.xlu0 %v14393_v10, %s14251_s15 }
  0x3b   : > { %654 = vrot.lane.b32.xlu1 %v14404_v15, %s14251_s15 }
  0x3d   : > { %745 = vrot.lane.b32.xlu0 %v516_v13, %s14253_s17 }
  0x3f   : > { %564 = vrot.lane.b32.xlu1 %v516_v13, %s14252_s16 }
  0x41   : > { %747 = vrot.lane.b32.xlu0 %v520_v19, %s14253_s17 }
  0x43   : > { %566 = vrot.lane.b32.xlu1 %v520_v19, %s14252_s16  ;;  %v548_v19 = vrot.slane %v472_v9, 1 }
  0x45   : > { %656 = vrot.lane.b32.xlu0 %v14410_v16, %s14251_s15 }
  0x47   : > { %658 = vrot.lane.b32.xlu1 %v14421_v20, %s14251_s15 }
  0x49   : > { %749 = vrot.lane.b32.xlu0 %v519_v18, %s14253_s17 }
  0x4b   : > { %568 = vrot.lane.b32.xlu1 %v519_v18, %s14252_s16  ;;  %v538_v18 = vsel %vm22017_vm0, %v536_v11, %v14541_v12 }
  0x4d   : > { %751 = vrot.lane.b32.xlu0 %v523_v24, %s14253_s17 }
  0x4f   : > { %570 = vrot.lane.b32.xlu1 %v523_v24, %s14252_s16  ;;  %v14157_v24 = vld [vmem:[%s21888_s1] sm:$0xff]  }
  0x51   : > { %660 = vrot.lane.b32.xlu0 %v14430_v21, %s14251_s15 }
  0x53   : > { %662 = vrot.lane.b32.xlu1 %v14439_v25, %s14251_s15 }
  0x55   : > { %753 = vrot.lane.b32.xlu0 %v522_v23, %s14253_s17 }
  0x57   : > { %572 = vrot.lane.b32.xlu1 %v522_v23, %s14252_s16 }
  0x59   : > { %755 = vrot.lane.b32.xlu0 %v526_v29, %s14253_s17 }
  0x5b   : > { %664 = vrot.lane.b32.xlu1 %v14442_v26, %s14251_s15 }
  0x5d   : > { %574 = vrot.lane.b32.xlu0 %v526_v29, %s14252_s16 }
  0x5f   : > { %757 = vrot.lane.b32.xlu1 %v525_v28, %s14253_s17 }
  0x61   : > { %666 = vrot.lane.b32.xlu0 %v458_v30, %s14251_s15  ;;  %v21904_v30 = vmov 0.0  }
  0x62   : > { %13831 = vmatprep.subr.bf16.mxu0 %v21904_v30  ;;  %13923 = vmatprep.subr.bf16.mxu1 %v21904_v30 }
  0x63   : > { %576 = vrot.lane.b32.xlu1 %v525_v28, %s14252_s16  ;;  %v550_v28 = vsel %vm22017_vm0, %v548_v19, %v549_v22  ;;  %13832 = vmatpush3.bf16.msra.mxu0 %v14157_v24 }
  0x64   : > { %13833 = vmatprep.subr.bf16.mxu0 %v21904_v30  ;;  %13927 = vmatpush3.bf16.msra.mxu1 %v14157_v24 }
  0x65   : > { %759 = vrot.lane.b32.xlu0 %v529_v34, %s14253_s17  ;;  %13924 = vmatprep.subr.bf16.mxu1 %v21904_v30 }
  0x67   : > { %668 = vrot.lane.b32.xlu1 %v459_v31, %s14251_s15  ;;  %v14255_v31 = vmov 1983009808  }
  0x68   : > { %v7161_v32 = vunpack.c.l.s4 %v14255_v31 }
  0x69   : > { %578 = vrot.lane.b32.xlu0 %v529_v34, %s14252_s16 }
  0x6a   : > { %v7162_v42 = vunpack.c.0.s8 %v7161_v32  ;;  %v14257_v32 = vmov 1966171168  }
  0x6b   : > { %761 = vrot.lane.b32.xlu1 %v528_v33, %s14253_s17 }
  0x6d   : > { %670 = vrot.lane.b32.xlu0 %v460_v39, %s14251_s15 }
  0x6f   : > { %598 = vrot.lane.b32.xlu1 %v14474_v40, %s14252_s16 }
  0x71   : > { %763 = vrot.lane.b32.xlu0 %v532_v45, %s14253_s17 }
  0x73   : > { %582 = vrot.lane.b32.xlu1 %v532_v45, %s14252_s16 }
  0x75   : > { %580 = vrot.lane.b32.xlu0 %v528_v33, %s14252_s16  ;;  %v14159_v33 = vld [vmem:[%s21888_s1 + $0x8] sm:$0xff]  }
  0x76   : > { %13834 = vmatpush3.bf16.msra.mxu0 %v14159_v33  ;;  %13928 = vmatpush3.bf16.msra.mxu1 %v14159_v33 }
  0x77   : > { %596 = vrot.lane.b32.xlu1 %v14487_v46, %s14252_s16  ;;  %13835 = vmatprep.subr.bf16.mxu0 %v21904_v30 }
  0x78   : > { %13925 = vmatprep.subr.bf16.mxu1 %v21904_v30 }
  0x79   : > { %690 = vrot.lane.b32.xlu0 %v470_v47, %s14251_s15 }
  0x7b   : > { %674 = vrot.lane.b32.xlu1 %v462_v48, %s14251_s15 }
  0x7d   : > { %672 = vrot.lane.b32.xlu0 %v461_v41, %s14251_s15  ;;  %v14578_v41 = vld [vmem:[%s14361_s14 + $0xa0] sm:$0xff] }
  0x7f   : > { %688 = vrot.lane.b32.xlu1 %v469_v36, %s14251_s15  ;;  %v956_v36 = vlaneseq }
  0x81   : > { %783 = vrot.lane.b32.xlu0 %v547_v52, %s14253_s17  ;;  %v14586_v47 = vshrl.u32 %v956_v36, 7  ;;  %v954_v36 = vunpack.c.l.s4 %v14257_v32 }
  0x83   : > { %767 = vrot.lane.b32.xlu1 %v535_v57, %s14253_s17  ;;  %22508 = vst [vmem:[#allocation7_spill] sm:$0xff] %v14586_v47 }
  0x85   : > { %765 = vrot.lane.b32.xlu0 %v531_v43, %s14253_s17 }
  0x87   : > { %781 = vrot.lane.b32.xlu1 %v543_v38, %s14253_s17 }
  0x89   : > { %600 = vrot.lane.b32.xlu0 %v543_v38, %s14252_s16  ;;  %v10475_v38 = vunpack.c.l.s4 %v14256_v37 }
  0x8b   : > { %785 = vrot.lane.b32.xlu1 %v546_v51, %s14253_s17  ;;  %v10476_v48 = vunpack.c.0.s8 %v10475_v38 }
  0x8d   : > { %692 = vrot.lane.b32.xlu0 %v471_v49, %s14251_s15  ;;  %v14592_v49 = vld [vmem:[%s14361_s14 + $0xe0] sm:$0xff] }
  0x8f   : > { %586 = vrot.lane.b32.xlu1 %v535_v57, %s14252_s16  ;;  %v14609_v57 = vsub.s32 %v10476_v48, %v14586_v47 }
  0x91   : > { %584 = vrot.lane.b32.xlu0 %v531_v43, %s14252_s16  ;;  %v14161_v43 = vld [vmem:[%s21888_s1 + $0x10] sm:$0xff]   ;;  %22511 = vst [vmem:[#allocation10_spill] sm:$0xff] %v14609_v57 }
  0x92   : > { %13836 = vmatpush3.bf16.msra.mxu0 %v14161_v43  ;;  %13929 = vmatpush3.bf16.msra.mxu1 %v14161_v43 }
  0x93   : > { %676 = vrot.lane.b32.xlu1 %v463_v54, %s14251_s15  ;;  %v14162_v54 = vld [vmem:[%s21888_s1 + $0x18] sm:$0xff]   ;;  %13837 = vmatprep.subr.bf16.mxu0 %v21904_v30 }
  0x95   : > { %v14502_v53 = vpop.permute.xlu1 %646  ;;  %602 = vrot.lane.b32.xlu0 %v547_v52, %s14252_s16  ;;  %v14600_v52 = vmul.u32 2, %v14586_v47 }
  0x96   : > { %13838 = vmatpush3.bf16.msra.mxu0 %v14162_v54 }
  0x97   : > { %v14513_v59 = vpop.permute.xlu0 %556  ;;  %694 = vrot.lane.b32.xlu1 %v472_v9, %s14251_s15  ;;  %22510 = vst [vmem:[#allocation9_spill] sm:$0xff] %v14600_v52  ;;  %v14616_v9 = vadd.s32 160, %v14600_v52 }
  0x98   : > { %v831_v33 = vsel %vm22036_vm2, %v14367_v1, %v14513_v59 }
  0x99   : > { %v14510_v58 = vpop.permute.xlu1 %648  ;;  %678 = vrot.lane.b32.xlu0 %v464_v63, %s14251_s15  ;;  %22513 = vst [vmem:[#allocation12_spill] sm:$0xff] %v14616_v9  ;;  %v14653_v32 = vadd.s32 16, %v14616_v9 }
  0x9a   : > { %v862_v59 = vsel %vm860_vm3, %v831_v33, %v14510_v58 }
  0x9b   : > { %v14520_v61 = vpop.permute.xlu0 %554  ;;  %771 = vrot.lane.b32.xlu1 %v538_v18, %s14253_s17  ;;  %22518 = vst [vmem:[#allocation17_spill] sm:$0xff] %v14653_v32 }
  0x9d   : > { %v14518_v60 = vpop.permute.xlu1 %741  ;;  %769 = vrot.lane.b32.xlu0 %v14505_v56, %s14253_s17 }
  0x9f   : > { %v14528_v2 = vpop.permute.xlu0 %739  ;;  %787 = vrot.lane.b32.xlu1 %v550_v28, %s14253_s17 }
  0xa1   : > { %v14524_v62 = vpop.permute.xlu1 %650  ;;  %604 = vrot.lane.b32.xlu0 %v546_v51, %s14252_s16  ;;  %v14597_v51 = vsub.s32 %v7162_v42, %v14586_v47 }
  0xa3   : > { %v14537_v7 = vpop.permute.xlu0 %558  ;;  %789 = vrot.lane.b32.xlu1 %v549_v22, %s14253_s17  ;;  %22509 = vst [vmem:[#allocation8_spill] sm:$0xff] %v14597_v51  ;;  %v14613_v63 = vrot.slane %v14578_v41, %v14597_v51  ;;  %v14649_v38 = vrot.slane %v14464_v35, %v14597_v51 }
  0xa5   : > { %v14531_v5 = vpop.permute.xlu1 %560  ;;  %696 = vrot.lane.b32.xlu0 %v473_v14, %s14251_s15  ;;  %22512 = vst [vmem:[#allocation11_spill] sm:$0xff] %v14613_v63  ;;  %v10314_v11 = vrot.slane %v14613_v63, 7  ;;  %v14624_v14 = vadd.s32 1, %v14616_v9  ;;  %22517 = vst [vmem:[#allocation16_spill] sm:$0xff] %v14649_v38 }
  0xa7   : > { %v14549_v17 = vpop.permute.xlu0 %743  ;;  %606 = vrot.lane.b32.xlu1 %v550_v28, %s14252_s16  ;;  %22514 = vst [vmem:[#allocation13_spill] sm:$0xff] %v14624_v14  ;;  %vm10442_vm1 = vcmp.gt.f32.partialorder %v14613_v63, %v10314_v11  ;;  %v14640_v31 = vrot.slane %v14624_v14, %v14609_v57  ;;  %v955_v14 = vunpack.c.0.s8 %v954_v36  ;;  %v14669_v36 = vrot.slane %v14653_v32, %v14609_v57 }
  0xa8   : > { %v11090_v37 = vsel %vm10442_vm1, %v14613_v63, %v10314_v11 }
  0xa9   : > { %v14545_v13 = vpop.permute.xlu1 %562  ;;  %590 = vrot.lane.b32.xlu0 %v538_v18, %s14252_s16  ;;  %v14628_v18 = vrot.slane %v14616_v9, %v14609_v57  ;;  %22516 = vst [vmem:[#allocation15_spill] sm:$0xff] %v14640_v31  ;;  %v11258_v48 = vrot.slane %v11090_v37, 7  ;;  %22520 = vst [vmem:[#allocation19_spill] sm:$0xff] %v14669_v36  ;;  %v14691_v43 = vsub.s32 %v955_v14, %v14586_v47 }
  0xab   : > { %v14560_v27 = vpop.permute.xlu0 %652  ;;  %22515 = vst [vmem:[#allocation14_spill] sm:$0xff] %v14628_v18  ;;  %588 = vrot.lane.b32.xlu1 %v14505_v56, %s14252_s16  ;;  %v10974_v24 = vrot.slane %v14628_v18, 7  ;;  %v10718_v56 = vrot.slane %v14640_v31, 7  ;;  %v14662_v11 = vrot.slane %v11258_v48, 2 }
  0xad   : > { %v14554_v23 = vpop.permute.xlu1 %654  ;;  %682 = vrot.lane.b32.xlu0 %v14578_v41, %s14251_s15  ;;  %v11026_v42 = vsel %vm10442_vm1, %v10718_v56, %v10974_v24  ;;  %22519 = vst [vmem:[#allocation18_spill] sm:$0xff] %v14662_v11  ;;  %v22521_v24 = vmov 0.0   ;;  %vm22034_vm5 = vcmp.gt.f32.partialorder %v14649_v38, %v14662_v11  ;;  %v893_v56 = vsel %vm891_vm4, %v862_v59, %v14518_v60 }
  0xae   : > { %v13771_v30 = vrot.slane %v11026_v42, 9  ;;  %13926 = vmatprep.subr.bf16.mxu1 %v22521_v24  ;;  %v832_v42 = vsel %vm22036_vm2, %v14364_v0, %v14537_v7  ;;  %v1001_v48 = vcombine.high %v893_v56, %v893_v56  ;;  %v1008_v60 = vrot.slane %v893_v56, %v14691_v43  ;;  %13839 = vmatprep.mubr.msk.bf16.mxu0 %vm14258_vm6, %v22521_v24 }
  0xaf   : > { %v14571_v34 = vpop.permute.xlu0 %745  ;;  %13930 = vmatpush3.bf16.msra.mxu1 %v14162_v54  ;;  %v834_v11 = vsel %vm22036_vm2, %v14387_v8, %v14545_v13  ;;  %13879 = vmatprep.mubr.msk.bf16.mxu1 %vm14258_vm6, %v22521_v24  ;;  %vm22087_vm1 = vcmask 1044484  }
  0xb0   : > { %v1015_v0 = vrot.slane %v1001_v48, %v14691_v43 }
  0xb1   : > { %v14564_v29 = vpop.permute.xlu1 %564  ;;  %698 = vrot.lane.b32.xlu0 %v14592_v49, %s14251_s15 }
  0xb2   : > { %v1031_v32 = vrot.slane %v1015_v0, %v14691_v43 }
  0xb3   : > { %v14584_v45 = vpop.permute.xlu0 %747 }
  0xb5   : > { %v14574_v39 = vpop.permute.xlu1 %566  ;;  %608 = vrot.lane.b32.xlu0 %v549_v22, %s14252_s16  ;;  %v539_v22 = vrot.slane %v14578_v41, 1  ;;  %v830_v41 = vsel %vm22036_vm2, %v14379_v4, %v14520_v61  ;;  %v14684_v4 = vsel %vm22034_vm5, %v14669_v36, %v13771_v30  ;;  %v1024_v36 = vrot.slane %v1008_v60, %v14691_v43 }
  0xb6   : > { %22522 = vst [vmem:[#allocation20_spill] sm:$0xff] %v14684_v4  ;;  %v861_v58 = vsel %vm860_vm3, %v830_v41, %v14502_v53  ;;  %v14710_v53 = vld [vmem:[%s14361_s14 + $0xe8] sm:$0xff]  ;;  %vm9315_vm5 = vcmask 293888  }
  0xb7   : > { %v14606_v55 = vpop.permute.xlu0 %656  ;;  %v14676_v1 = vsel %vm22017_vm0, %v539_v22, %v14487_v46  ;;  %v892_v30 = vsel %vm891_vm4, %v861_v58, %v14528_v2  ;;  %v863_v2 = vsel %vm860_vm3, %v832_v42, %v14524_v62  ;;  %v1017_v62 = vcombine.high %v1015_v0, %v1015_v0 }
  0xb8   : > { %775 = vrot.lane.b32.xlu1 %v14676_v1, %s14253_s17  ;;  %v952_v22 = vcombine.high %v892_v30, %v892_v30  ;;  %v894_v54 = vsel %vm891_vm4, %v863_v2, %v14549_v17  ;;  %v959_v7 = vrot.slane %v892_v30, %v14691_v43  ;;  %v833_v30 = vsel %vm22036_vm2, %v14373_v3, %v14531_v5 }
  0xb9   : > { %v14594_v50 = vpop.permute.xlu1 %658  ;;  %v1056_v56 = vrot.slane %v894_v54, %v14691_v43  ;;  %v1049_v4 = vcombine.high %v894_v54, %v894_v54  ;;  %v1045_v9 = vrot.slane %v1017_v62, %v14691_v43 }
  0xba   : > { %v966_v41 = vrot.slane %v952_v22, %v14691_v43  ;;  %v967_v42 = vcombine.high %v959_v7, %v959_v7  ;;  %v864_v22 = vsel %vm860_vm3, %v833_v30, %v14560_v27  ;;  %v975_v8 = vrot.slane %v959_v7, %v14691_v43 }
  0xbb   : > { %v14632_v19 = vpop.permute.xlu0 %749  ;;  %v1064_v2 = vcombine.high %v1056_v56, %v1056_v56  ;;  %v895_v54 = vsel %vm891_vm4, %v864_v22, %v14571_v34  ;;  %v1063_v5 = vrot.slane %v1049_v4, %v14691_v43  ;;  %v1072_v0 = vrot.slane %v1056_v56, %v14691_v43 }
  0xbc   : > { %680 = vrot.lane.b32.xlu1 %v14534_v6, %s14251_s15  ;;  %v1016_v6 = vcombine.high %v1008_v60, %v1008_v60  ;;  %v968_v48 = vcombine.high %v966_v41, %v966_v41  ;;  %v989_v3 = vrot.slane %v967_v42, %v14691_v43  ;;  %v865_v34 = vsel %vm860_vm3, %v834_v11, %v14554_v23 }
  0xbd   : > { %v14634_v28 = vpop.permute.xlu1 %568  ;;  %v1086_v13 = vrot.slane %v1064_v2, %v14691_v43  ;;  %v1105_v62 = vrot.slane %v895_v54, %v14691_v43  ;;  %v982_v42 = vrot.slane %v966_v41, %v14691_v43  ;;  %v1047_v4 = vcombine.high %v1031_v32, %v1031_v32 }
  0xbe   : > { %v1038_v17 = vrot.slane %v1016_v6, %v14691_v43  ;;  %v996_v60 = vrot.slane %v968_v48, %v14691_v43  ;;  %v1098_v22 = vcombine.high %v895_v54, %v895_v54  ;;  %v2407_v56 = vcombine.low %v975_v8, %v989_v3 }
  0xbf   : > { %v14655_v18 = vpop.permute.xlu0 %751  ;;  %v1065_v48 = vcombine.high %v1063_v5, %v1063_v5  ;;  %v1079_v7 = vrot.slane %v1063_v5, %v14691_v43  ;;  %v2459_v47 = vcombine.low %v1047_v4, %v1072_v0  ;;  %v1096_v23 = vcombine.high %v1086_v13, %v1086_v13 }
  0xc0   : > { %700 = vrot.lane.b32.xlu1 %v14710_v53, %s14251_s15  ;;  %v2456_v27 = vcombine.low %v1024_v36, %v1038_v17  ;;  %v13626_v30 = vcombine.high %v1024_v36, %v1038_v17  ;;  %v14758_v36 = vsel %vm891_vm4, %v865_v34, %v14584_v45  ;;  %v13624_v17 = vcombine.high %v975_v8, %v989_v3 }
  0xc1   : > { %v14657_v31 = vpop.permute.xlu1 %570  ;;  %v2409_v38 = vcombine.low %v982_v42, %v996_v60  ;;  %v13625_v2 = vcombine.high %v982_v42, %v996_v60  ;;  %v1113_v11 = vcombine.high %v1105_v62, %v1105_v62  ;;  %v1153_v41 = vrot.slane %v14758_v36, %v14691_v43 }
  0xc2   : > { %v2458_v45 = vcombine.low %v1031_v32, %v1045_v9  ;;  %v2466_v54 = vrot.slane %v2456_v27, %v14691_v43  ;;  %v2473_v3 = vrot.slane %v13626_v30, %v14691_v43  ;;  %v1112_v5 = vrot.slane %v1098_v22, %v14691_v43 }
  0xc3   : > { %v14688_v61 = vpop.permute.xlu0 %660  ;;  %v2417_v8 = vrot.slane %v2407_v56, %v14691_v43  ;;  %v1093_v34 = vrot.slane %v1065_v48, %v14691_v43  ;;  %v1094_v42 = vcombine.high %v1072_v0, %v1072_v0  ;;  %v1095_v4 = vcombine.high %v1079_v7, %v1079_v7 }
  0xc4   : > { %v2431_v9 = vrot.slane %v2409_v38, %v14691_v43  ;;  %v2438_v32 = vrot.slane %v13625_v2, %v14691_v43  ;;  %v2487_v27 = vrot.slane %v2459_v47, %v14691_v43  ;;  %v14780_v30 = vcombine.low %v1096_v23, %v1079_v7 }
  0xc5   : > { %v14697_v37 = vpop.permute.xlu1 %662  ;;  %v1135_v22 = vrot.slane %v1113_v11, %v14691_v43  ;;  %v2480_v25 = vrot.slane %v2458_v45, %v14691_v43  ;;  %v1114_v56 = vcombine.high %v1112_v5, %v1112_v5  ;;  %v1121_v48 = vrot.slane %v1105_v62, %v14691_v43 }
  0xc6   : > { %v1128_v38 = vrot.slane %v1112_v5, %v14691_v43  ;;  %v1097_v7 = vcombine.high %v1093_v34, %v1093_v34  ;;  %v2522_v11 = vrot.slane %v14780_v30, %v14691_v43  ;;  %v14794_v62 = vrot.slane %v14592_v49, %v14597_v51 }
  0xc7   : > { %v14706_v14 = vpop.permute.xlu0 %753  ;;  %v2489_v47 = vcombine.low %v2480_v25, %v2487_v27  ;;  %v1145_v45 = vcombine.high %v1135_v22, %v1135_v22  ;;  %v551_v25 = vrot.slane %v14592_v49, 1  ;;  %v1143_v5 = vcombine.high %v1121_v48, %v1121_v48 }
  0xc8   : > { %22528 = vst [vmem:[#allocation26_spill] sm:$0xff] %v14794_v62  ;;  %v835_v49 = vsel %vm22036_vm2, %v14393_v10, %v14564_v29 }
  0xc9   : > { %v14712_v33 = vpop.permute.xlu1 %572  ;;  %v2555_v30 = vcombine.low %v1145_v45, %v1128_v38  ;;  %v2554_v29 = vcombine.low %v1135_v22, %v1143_v5  ;;  %v866_v45 = vsel %vm860_vm3, %v835_v49, %v14606_v55 }
  0xcb   : > { %v14723_v59 = vpop.permute.xlu0 %755 }
  0xcd   : > { %v14726_v58 = vpop.permute.xlu1 %664 }
  0xce   : > { %22523 = vst [vmem:[#allocation21_spill] sm:$0xff] %v14726_v58  ;;  %v2440_v58 = vcombine.low %v2431_v9, %v2438_v32  ;;  %v2503_v32 = vrot.slane %v2489_v47, %v14691_v43 }
  0xcf   : > { %v14741_v6 = vpop.permute.xlu0 %574 }
  0xd0   : > { %22524 = vst [vmem:[#allocation22_spill] sm:$0xff] %v14741_v6  ;;  %v2488_v6 = vcombine.low %v2466_v54, %v2473_v3  ;;  %v2508_v3 = vcombine.low %v1097_v7, %v1121_v48  ;;  %v1146_v7 = vcombine.high %v14758_v36, %v14758_v36 }
  0xd1   : > { %v14748_v63 = vpop.permute.xlu1 %757 }
  0xd2   : > { %22525 = vst [vmem:[#allocation23_spill] sm:$0xff] %v14748_v63  ;;  %v2507_v63 = vcombine.low %v1093_v34, %v1095_v4  ;;  %v14805_v34 = vrot.slane %v1153_v41, %v14691_v43  ;;  %v2496_v9 = vrot.slane %v2488_v6, %v14691_v43  ;;  %v10330_v6 = vrot.slane %v14794_v62, 7 }
  0xd3   : > { %v14761_v26 = vpop.permute.xlu0 %666 }
  0xd4   : > { %22526 = vst [vmem:[#allocation24_spill] sm:$0xff] %v14761_v26  ;;  %v2424_v26 = vrot.slane %v13624_v17, %v14691_v43  ;;  %v2505_v17 = vcombine.low %v1086_v13, %v1094_v42  ;;  %v1142_v13 = vrot.slane %v1114_v56, %v14691_v43  ;;  %v14808_v42 = vrot.slane %v14710_v53, 1 }
  0xd5   : > { %v14770_v60 = vpop.permute.xlu1 %576  ;;  %v2504_v48 = vcombine.low %v2496_v9, %v2503_v32  ;;  %v2529_v47 = vrot.slane %v2507_v63, %v14691_v43  ;;  %vm14849_vm8 = vcmp.gt.f32.partialorder %v14794_v62, %v10330_v6  ;;  %v1160_v9 = vrot.slane %v1146_v7, %v14691_v43 }
  0xd6   : > { %22527 = vst [vmem:[#allocation25_spill] sm:$0xff] %v14770_v60  ;;  %v1161_v60 = vcombine.high %v1153_v41, %v1153_v41  ;;  %v2439_v2 = vcombine.low %v2417_v8, %v2424_v26  ;;  %v14801_v26 = vadd.s32 224, %v14600_v52  ;;  %v1144_v8 = vcombine.high %v1128_v38, %v1128_v38  ;;  %793 = vrot.lane.b32.xlu1 %v14808_v42, %s14253_s17 }
  0xd7   : > { %v14785_v0 = vpop.permute.xlu0 %759  ;;  %v14823_v53 = vsel %vm22017_vm0, %v551_v25, %v14808_v42  ;;  %v2515_v25 = vrot.slane %v2505_v17, %v14691_v43 }
  0xd8   : > { %v14797_v54 = vrot.slane %v1161_v60, %v14691_v43  ;;  %22529 = vst [vmem:[#allocation27_spill] sm:$0xff] %v14801_v26  ;;  %v2447_v4 = vrot.slane %v2439_v2, %v14691_v43  ;;  %v2454_v60 = vrot.slane %v2440_v58, %v14691_v43  ;;  %v2536_v58 = vrot.slane %v2508_v3, %v14691_v43 }
  0xd9   : > { %v14788_v23 = vpop.permute.xlu1 %668  ;;  %791 = vrot.lane.b32.xlu0 %v14823_v53, %s14253_s17  ;;  %v2556_v38 = vcombine.low %v1142_v13, %v1144_v8  ;;  %v14834_v2 = vadd.s32 1, %v14801_v26  ;;  %v897_v13 = vsel %vm891_vm4, %v866_v45, %v14632_v19  ;;  %v14855_v55 = vrot.slane %v14801_v26, %v14609_v57 }
  0xda   : > { %v2557_v41 = vcombine.low %v14805_v34, %v14797_v54  ;;  %v2455_v56 = vcombine.low %v2447_v4, %v2454_v60  ;;  %v2571_v4 = vrot.slane %v2555_v30, %v14691_v43  ;;  %684 = vrot.lane.b32.xlu1 %v14481_v44, %s14251_s15  ;;  %v2538_v63 = vcombine.low %v2529_v47, %v2536_v58 }
  0xdb   : > { %v14814_v27 = vpop.permute.xlu0 %578  ;;  %22530 = vst [vmem:[#allocation28_spill] sm:$0xff] %v14834_v2  ;;  %22533 = vst [vmem:[#allocation29_spill] sm:$0xff] %v14855_v55  ;;  %v2564_v19 = vrot.slane %v2554_v29, %v14691_v43  ;;  %v14865_v44 = vrot.slane %v14834_v2, %v14609_v57  ;;  %v2578_v5 = vrot.slane %v2556_v38, %v14691_v43 }
  0xdc   : > { %v3822_v3 = vpack.c.bf16 %v2504_v48, %v2455_v56  ;;  %v2585_v22 = vrot.slane %v2557_v41, %v14691_v43  ;;  %v836_v8 = vsel %vm22036_vm2, %v14404_v15, %v14574_v39  ;;  %v2537_v60 = vcombine.low %v2515_v25, %v2522_v11 }
  0xdd   : > { %v14831_v10 = vpop.permute.xlu1 %761  ;;  %773 = vrot.lane.b32.xlu0 %v14541_v12, %s14253_s17  ;;  %22534 = vst [vmem:[#allocation30_spill] sm:$0xff] %v14865_v44  ;;  %v1195_v32 = vcombine.high %v897_v13, %v897_v13  ;;  %v2586_v49 = vcombine.low %v2564_v19, %v2571_v4  ;;  %v11106_v41 = vsel %vm14849_vm8, %v14794_v62, %v10330_v6  ;;  %v10982_v15 = vrot.slane %v14855_v55, 7  ;;  %v22543_v55 = vld [vmem:[#allocation5_spill] sm:$0xff] }
  0xde   : > { %13840 = vmatmul.mubr.msk.bf16.vlgmr.msra.gmra.mrb[0].mxu0 %vm21973_vm7, %v3822_v3  ;;  %v2587_v58 = vcombine.low %v2578_v5, %v2585_v22  ;;  %v1202_v56 = vrot.slane %v897_v13, %v14691_v43  ;;  %594 = vrot.lane.b32.xlu1 %v14676_v1, %s14252_s16  ;;  %v867_v39 = vsel %vm860_vm3, %v836_v8, %v14594_v50  ;;  %v10726_v11 = vrot.slane %v14865_v44, 7  ;;  %v14910_v3 = vld [vmem:[%s14361_s14 + $0xf0] sm:$0xff] }
  0xdf   : > { %v14860_v17 = vpop.permute.xlu0 %670  ;;  %13843 = vmatprep.mubr.msk.bf16.mxu0 %vm14258_vm6, %v22521_v24  ;;  %v837_v6 = vsel %vm22036_vm2, %v14410_v16, %v14634_v28  ;;  %v898_v48 = vsel %vm891_vm4, %v867_v39, %v14655_v18  ;;  %v2552_v1 = vrot.slane %v2538_v63, %v14691_v43  ;;  %v11290_v29 = vrot.slane %v11106_v41, 7 }
  0xe0   : > { %v1162_v38 = vcombine.high %v1160_v9, %v1160_v9  ;;  %v1209_v47 = vrot.slane %v1195_v32, %v14691_v43  ;;  %v868_v50 = vsel %vm860_vm3, %v837_v6, %v14688_v61  ;;  %v1210_v7 = vcombine.high %v1202_v56, %v1202_v56 }
  0xe1   : > { %v14874_v30 = vpop.permute.xlu1 %598  ;;  %592 = vrot.lane.b32.xlu0 %v14541_v12, %s14252_s16  ;;  %v2545_v16 = vrot.slane %v2537_v60, %v14691_v43  ;;  %v2594_v28 = vrot.slane %v2586_v49, %v14691_v43  ;;  %v2601_v18 = vrot.slane %v2587_v58, %v14691_v43  ;;  %v1250_v45 = vrot.slane %v898_v48, %v14691_v43 }
  0xe2   : > { %612 = vrot.lane.b32.xlu1 %v14808_v42, %s14252_s16  ;;  %v899_v61 = vsel %vm891_vm4, %v868_v50, %v14706_v14  ;;  %v1243_v4 = vcombine.high %v898_v48, %v898_v48  ;;  %v11042_v13 = vsel %vm14849_vm8, %v10726_v11, %v10982_v15  ;;  %v14916_v63 = vrot.slane %v11290_v29, 2 }
  0xe3   : > { %v14897_v12 = vpop.permute.xlu0 %763  ;;  %v2553_v42 = vcombine.low %v2545_v16, %v2552_v1  ;;  %v2602_v22 = vcombine.low %v2594_v28, %v2601_v18  ;;  %v1190_v19 = vrot.slane %v1162_v38, %v14691_v43  ;;  %v1211_v5 = vcombine.high %v1209_v47, %v1209_v47  ;;  %v14970_v18 = vld [vmem:[%s14361_s14 + $0xf8] sm:$0xff] }
  0xe4   : > { %22535 = vst [vmem:[#allocation31_spill] sm:$0xff] %v14916_v63  ;;  %v1299_v14 = vrot.slane %v899_v61, %v14691_v43  ;;  %v14922_v60 = vadd.s32 16, %v14801_v26  ;;  %v1176_v32 = vrot.slane %v1160_v9, %v14691_v43  ;;  %v1258_v36 = vcombine.high %v1250_v45, %v1250_v45 }
  0xe5   : > { %777 = vrot.lane.b32.xlu0 %v14487_v46, %s14253_s17  ;;  %v14912_v25 = vpop.permute.xlu1 %582  ;;  %v1232_v46 = vrot.slane %v1210_v7, %v14691_v43  ;;  %v3823_v8 = vpack.c.bf16 %v2602_v22, %v2553_v42  ;;  %v1292_v49 = vcombine.high %v899_v61, %v899_v61  ;;  %v14931_v41 = vrot.slane %v14910_v3, %v14597_v51 }
  0xe6   : > { %22536 = vst [vmem:[#allocation32_spill] sm:$0xff] %v14922_v60  ;;  %702 = vrot.lane.b32.xlu1 %v14910_v3, %s14251_s15  ;;  %v13787_v15 = vrot.slane %v11042_v13, 9  ;;  %v13627_v39 = vcombine.high %v14805_v34, %v14797_v54  ;;  %v1218_v11 = vrot.slane %v1202_v56, %v14691_v43  ;;  %v1257_v6 = vrot.slane %v1243_v4, %v14691_v43 }
  0xe7   : > { %22537 = vst [vmem:[#allocation33_spill] sm:$0xff] %v14931_v41  ;;  %v14933_v58 = vpop.permute.xlu0 %580  ;;  %13844 = vmatmul.mubr.msk.bf16.gmra.mrb[4].mxu0 %vm21973_vm7, %v3823_v8  ;;  %v2604_v9 = vcombine.low %v1176_v32, %v1190_v19  ;;  %v1225_v48 = vrot.slane %v1209_v47, %v14691_v43  ;;  %v1239_v29 = vrot.slane %v1211_v5, %v14691_v43 }
  0xe8   : > { %13847 = vmatprep.mubr.msk.bf16.mxu0 %vm14258_vm6, %v22521_v24  ;;  %v2606_v54 = vcombine.low %v1218_v11, %v1232_v46  ;;  %v1307_v34 = vcombine.high %v1299_v14, %v1299_v14  ;;  %v14949_v56 = vrot.slane %v14922_v60, %v14609_v57  ;;  %v13628_v38 = vcombine.high %v1176_v32, %v1190_v19 }
  0xe9   : > { %610 = vrot.lane.b32.xlu0 %v14823_v53, %s14252_s16  ;;  %v1266_v53 = vrot.slane %v1250_v45, %v14691_v43  ;;  %v14944_v1 = vpop.permute.xlu1 %596  ;;  %v1280_v47 = vrot.slane %v1258_v36, %v14691_v43  ;;  %v1306_v50 = vrot.slane %v1292_v49, %v14691_v43  ;;  %vm22029_vm9 = vcmp.gt.f32.partialorder %v14931_v41, %v14916_v63 }
  0xea   : > { %22538 = vst [vmem:[#allocation34_spill] sm:$0xff] %v14949_v56  ;;  %779 = vrot.lane.b32.xlu1 %v14474_v40, %s14253_s17  ;;  %v14960_v7 = vrot.slane %v13627_v39, %v14691_v43  ;;  %v1259_v16 = vcombine.high %v1257_v6, %v1257_v6  ;;  %v1273_v28 = vrot.slane %v1257_v6, %v14691_v43 }
  0xeb   : > { %v14967_v40 = vsel %vm22029_vm9, %v14949_v56, %v13787_v15  ;;  %v13629_v45 = vcombine.high %v1218_v11, %v1232_v46  ;;  %v1241_v61 = vcombine.high %v1225_v48, %v1225_v48  ;;  %v1315_v4 = vrot.slane %v1299_v14, %v14691_v43  ;;  %v14976_v42 = vpop.permute.xlu0 %690 }
  0xec   : > { %22539 = vst [vmem:[#allocation35_spill] sm:$0xff] %v14967_v40  ;;  %v14979_v22 = vrot.slane %v2606_v54, %v14691_v43  ;;  %v2653_v13 = vcombine.low %v1225_v48, %v1239_v29  ;;  %v1288_v19 = vcombine.high %v1266_v53, %v1266_v53  ;;  %v1329_v5 = vrot.slane %v1307_v34, %v14691_v43 }
  0xed   : > { %686 = vrot.lane.b32.xlu0 %v14464_v35, %s14251_s15  ;;  %v838_v35 = vsel %vm22036_vm2, %v14421_v20, %v14657_v31  ;;  %v14983_v8 = vrot.slane %v2604_v9, %v14691_v43  ;;  %v1290_v46 = vcombine.high %v1280_v47, %v1280_v47  ;;  %v1308_v32 = vcombine.high %v1306_v50, %v1306_v50  ;;  %v14988_v20 = vpop.permute.xlu1 %674 }
  0xee   : > { %v1322_v36 = vrot.slane %v1306_v50, %v14691_v43  ;;  %v14991_v31 = vrot.slane %v13628_v38, %v14691_v43  ;;  %v1287_v14 = vrot.slane %v1259_v16, %v14691_v43  ;;  %v1289_v49 = vcombine.high %v1273_v28, %v1273_v28 }
  0xef   : > { %v869_v15 = vsel %vm860_vm3, %v838_v35, %v14697_v37  ;;  %v14997_v39 = vrot.slane %v13629_v45, %v14691_v43  ;;  %v2654_v11 = vcombine.low %v1241_v61, %v1266_v53  ;;  %v1337_v6 = vcombine.high %v1315_v4, %v1315_v4  ;;  %v15010_v16 = vpop.permute.xlu0 %672 }
  0xf0   : > { %v839_v9 = vsel %vm22036_vm2, %v14430_v21, %v14712_v33  ;;  %v15005_v29 = vrot.slane %v2653_v13, %v14691_v43  ;;  %v2655_v54 = vcombine.low %v1280_v47, %v1288_v19  ;;  %v1339_v34 = vcombine.high %v1329_v5, %v1329_v5  ;;  %v22540_v33 = vld [vmem:[#allocation21_spill] sm:$0xff]  ;;  %v22541_v47 = vld [vmem:[#allocation23_spill] sm:$0xff] }
  0xf1   : > { %704 = vrot.lane.b32.xlu0 %v14970_v18, %s14251_s15  ;;  %v2701_v38 = vcombine.low %v1290_v46, %v1273_v28  ;;  %v1336_v37 = vrot.slane %v1308_v32, %v14691_v43  ;;  %v1338_v50 = vcombine.high %v1322_v36, %v1322_v36  ;;  %v900_v53 = vsel %vm891_vm4, %v869_v15, %v14723_v59  ;;  %v15018_v46 = vpop.permute.xlu1 %688 }
  0xf2   : > { %v2702_v45 = vcombine.low %v1287_v14, %v1289_v49  ;;  %v1340_v61 = vcombine.high %v900_v53, %v900_v53  ;;  %v1347_v21 = vrot.slane %v900_v53, %v14691_v43  ;;  %v870_v35 = vsel %vm860_vm3, %v839_v9, %v22540_v33 }
  0xf3   : > { %v1291_v13 = vcombine.high %v1287_v14, %v1287_v14  ;;  %v2704_v48 = vcombine.low %v1329_v5, %v1337_v6  ;;  %v901_v28 = vsel %vm891_vm4, %v870_v35, %v22541_v47  ;;  %v21922_v19 = vrot.slane %v14970_v18, 1 }
  0xf4   : > { %v2750_v32 = vcombine.low %v1339_v34, %v1322_v36  ;;  %v1354_v59 = vrot.slane %v1340_v61, %v14691_v43  ;;  %v1355_v15 = vcombine.high %v1347_v21, %v1347_v21  ;;  %v1389_v49 = vcombine.high %v901_v28, %v901_v28 }
  0xf5   : > { %v2676_v40 = vrot.slane %v2654_v11, %v14691_v43  ;;  %v2683_v53 = vrot.slane %v2655_v54, %v14691_v43  ;;  %v2751_v60 = vcombine.low %v1336_v37, %v1338_v50  ;;  %v1396_v14 = vrot.slane %v901_v28, %v14691_v43  ;;  %797 = vrot.lane.b32.xlu1 %v21922_v19, %s14253_s17  ;;  %v15032_v37 = vpop.permute.xlu0 %783  ;;  %v15041_v28 = vpop.permute.xlu1 %767 }
  0xf6   : > { %v2703_v5 = vcombine.low %v1291_v13, %v1315_v4  ;;  %v1356_v6 = vcombine.high %v1354_v59, %v1354_v59  ;;  %v1377_v9 = vrot.slane %v1355_v15, %v14691_v43  ;;  %v1403_v36 = vrot.slane %v1389_v49, %v14691_v43 }
  0xf7   : > { %v2711_v34 = vrot.slane %v2701_v38, %v14691_v43  ;;  %v2718_v61 = vrot.slane %v2702_v45, %v14691_v43  ;;  %v2732_v11 = vrot.slane %v2704_v48, %v14691_v43  ;;  %v1404_v54 = vcombine.high %v1396_v14, %v1396_v14 }
  0xf8   : > { %v2760_v50 = vrot.slane %v2750_v32, %v14691_v43  ;;  %v1363_v33 = vrot.slane %v1347_v21, %v14691_v43  ;;  %v1370_v4 = vrot.slane %v1354_v59, %v14691_v43  ;;  %v1384_v35 = vrot.slane %v1356_v6, %v14691_v43 }
  0xf9   : > { %v2767_v13 = vrot.slane %v2751_v60, %v14691_v43  ;;  %v1405_v47 = vcombine.high %v1403_v36, %v1403_v36  ;;  %v1412_v38 = vrot.slane %v1396_v14, %v14691_v43  ;;  %v1426_v45 = vrot.slane %v1404_v54, %v14691_v43 }
  0xfa   : > { %v2725_v48 = vrot.slane %v2703_v5, %v14691_v43  ;;  %v2752_v15 = vcombine.low %v1363_v33, %v1377_v9  ;;  %v13630_v49 = vcombine.high %v1363_v33, %v1377_v9  ;;  %v2799_v32 = vcombine.low %v1370_v4, %v1384_v35  ;;  %v22542_v5 = vld [vmem:[#allocation22_spill] sm:$0xff] }
  0xfb   : > { %v2635_v21 = vcombine.low %v14960_v7, %v14983_v8  ;;  %v13631_v59 = vcombine.high %v1370_v4, %v1384_v35  ;;  %v2801_v19 = vcombine.low %v1412_v38, %v1426_v45  ;;  %v13632_v6 = vcombine.high %v1412_v38, %v1426_v45  ;;  %v15059_v8 = vpop.permute.xlu0 %765 }
  0xfc   : > { %v2684_v60 = vcombine.low %v14997_v39, %v15005_v29  ;;  %v2685_v56 = vcombine.low %v2676_v40, %v2683_v53  ;;  %v15048_v14 = vcombine.low %v2711_v34, %v2718_v61  ;;  %v15050_v54 = vcombine.low %v2725_v48, %v2732_v11  ;;  %v15084_v11 = vpop.permute.xlu1 %781 }
  0xfd   : > { %v15052_v44 = vcombine.low %v2760_v50, %v2767_v13  ;;  %v840_v9 = vsel %vm22036_vm2, %v22543_v55, %v22542_v5  ;;  %v1419_v33 = vrot.slane %v1403_v36, %v14691_v43  ;;  %v1433_v7 = vrot.slane %v1405_v47, %v14691_v43  ;;  %v22545_v13 = vld [vmem:[#allocation24_spill] sm:$0xff]  ;;  %v22547_v47 = vld [vmem:[#allocation6_spill] sm:$0xff] }
  0xfe   : > { %v15062_v4 = vrot.slane %v2752_v15, %v14691_v43  ;;  %v15065_v40 = vrot.slane %v13630_v49, %v14691_v43  ;;  %v15068_v39 = vrot.slane %v2799_v32, %v14691_v43  ;;  %v22544_v29 = vcombine.low %v14991_v31, %v14979_v22  ;;  %v22546_v31 = vld [vmem:[#allocation25_spill] sm:$0xff] }
  0xff   : > { %v15075_v53 = vrot.slane %v13631_v59, %v14691_v43  ;;  %v15078_v36 = vrot.slane %v2801_v19, %v14691_v43  ;;  %v15081_v34 = vrot.slane %v13632_v6, %v14691_v43  ;;  %v2643_v61 = vrot.slane %v2635_v21, %v14691_v43  ;;  %v15108_v5 = vpop.permute.xlu0 %600 }
 0x100   : > { %v2650_v55 = vrot.slane %v22544_v29, %v14691_v43  ;;  %v2692_v50 = vrot.slane %v2684_v60, %v14691_v43  ;;  %v2699_v35 = vrot.slane %v2685_v56, %v14691_v43  ;;  %v871_v22 = vsel %vm860_vm3, %v840_v9, %v22545_v13 }
 0x101   : > { %v841_v38 = vsel %vm22036_vm2, %v22547_v47, %v22546_v31  ;;  %v2848_v19 = vcombine.low %v1419_v33, %v1433_v7  ;;  %v736_v48 = vrot.slane %v14910_v3, 1  ;;  %v902_v15 = vsel %vm891_vm4, %v871_v22, %v14785_v0 }
 0x102   : > { %v2651_v45 = vcombine.low %v2643_v61, %v2650_v55  ;;  %v2700_v49 = vcombine.low %v2692_v50, %v2699_v35  ;;  %v1437_v32 = vcombine.high %v902_v15, %v902_v15  ;;  %v1444_v21 = vrot.slane %v902_v15, %v14691_v43 }
 0x103   : > { %v872_v56 = vsel %vm860_vm3, %v841_v38, %v14788_v23  ;;  %v2783_v59 = vcombine.low %v15062_v4, %v15065_v40  ;;  %v2831_v6 = vcombine.low %v15068_v39, %v15075_v53  ;;  %v22548_v60 = vrot.slane %v14970_v18, 1 }
 0x104   : > { %v903_v0 = vsel %vm891_vm4, %v872_v56, %v14831_v10  ;;  %v3824_v9 = vpack.c.bf16 %v2700_v49, %v2651_v45  ;;  %v1451_v23 = vrot.slane %v1437_v32, %v14691_v43  ;;  %v1452_v7 = vcombine.high %v1444_v21, %v1444_v21  ;;  %v15117_v10 = vpop.permute.xlu1 %785 }
 0x105   : > { %v738_v3 = vsel %vm22017_vm0, %v736_v48, %v22548_v60  ;;  %v1460_v4 = vrot.slane %v1444_v21, %v14691_v43  ;;  %v2832_v40 = vcombine.low %v15078_v36, %v15081_v34  ;;  %v2858_v18 = vrot.slane %v2848_v19, %v14691_v43  ;;  %v15132_v60 = vpop.permute.xlu0 %692 }
 0x106   : > { %795 = vrot.lane.b32.xlu0 %v738_v3, %s14253_s17  ;;  %v1486_v29 = vcombine.high %v903_v0, %v903_v0  ;;  %v1493_v55 = vrot.slane %v903_v0, %v14691_v43  ;;  %13848 = vmatmul.mubr.msk.bf16.gmra.mrb[8].mxu0 %vm21973_vm7, %v3824_v9  ;;  %v1435_v61 = vcombine.high %v1419_v33, %v1419_v33  ;;  %v14169_v33 = vld [vmem:[%s14361_s14 + $0x60] sm:$0xff]  ;;  %vm9239_vm0 = vcmask 97280   ;;  %s20137_s17 = sld [smem:[#allocation2 + $0x3]] }
 0x107   : > { %v1453_v50 = vcombine.high %v1451_v23, %v1451_v23  ;;  %v1467_v35 = vrot.slane %v1451_v23, %v14691_v43  ;;  %v1474_v13 = vrot.slane %v1452_v7, %v14691_v43  ;;  %v1482_v22 = vcombine.high %v1460_v4, %v1460_v4  ;;  %13851 = vmatprep.mubr.msk.bf16.mxu0 %vm14258_vm6, %v22521_v24 }
 0x108   : > { %v1500_v31 = vrot.slane %v1486_v29, %v14691_v43  ;;  %v1501_v47 = vcombine.high %v1493_v55, %v1493_v55  ;;  %v1509_v38 = vrot.slane %v1493_v55, %v14691_v43  ;;  %v2849_v15 = vcombine.low %v1435_v61, %v1460_v4  ;;  %v15139_v55 = vpop.permute.xlu1 %586 }
 0x109   : > { %v1481_v19 = vrot.slane %v1453_v50, %v14691_v43  ;;  %v1483_v45 = vcombine.high %v1467_v35, %v1467_v35  ;;  %v1484_v48 = vcombine.high %v1474_v13, %v1474_v13  ;;  %v842_v49 = vsel %vm22036_vm2, %v14169_v33, %v14814_v27 }
 0x10a   : > { %v1502_v32 = vcombine.high %v1500_v31, %v1500_v31  ;;  %v1516_v21 = vrot.slane %v1500_v31, %v14691_v43  ;;  %v1523_v56 = vrot.slane %v1501_v47, %v14691_v43  ;;  %v2741_v9 = vrot.slane %v15048_v14, %v14691_v43 }
 0x10b   : > { %v2851_v3 = vcombine.low %v1484_v48, %v1467_v35  ;;  %v1485_v0 = vcombine.high %v1481_v19, %v1481_v19  ;;  %v2748_v23 = vrot.slane %v15050_v54, %v14691_v43  ;;  %v2850_v7 = vcombine.low %v1474_v13, %v1482_v22 }
 0x10c   : > { %v1530_v4 = vrot.slane %v1502_v32, %v14691_v43  ;;  %v1531_v29 = vcombine.high %v1509_v38, %v1509_v38  ;;  %v1532_v27 = vcombine.high %v1516_v21, %v1516_v21  ;;  %v2865_v61 = vrot.slane %v2849_v15, %v14691_v43 }
 0x10d   : > { %v2897_v50 = vcombine.low %v1481_v19, %v1483_v45  ;;  %v1533_v31 = vcombine.high %v1523_v56, %v1523_v56  ;;  %v2898_v47 = vcombine.low %v1485_v0, %v1509_v38  ;;  %v2879_v35 = vrot.slane %v2851_v3, %v14691_v43 }
 0x10e   : > { %v2899_v48 = vcombine.low %v1523_v56, %v1531_v29  ;;  %v2790_v14 = vrot.slane %v15052_v44, %v14691_v43  ;;  %v2797_v54 = vrot.slane %v2783_v59, %v14691_v43  ;;  %v15146_v22 = vcombine.low %v1530_v4, %v1532_v27  ;;  %v15154_v56 = vpop.permute.xlu0 %584 }
 0x10f   : > { %v2900_v13 = vcombine.low %v1533_v31, %v1516_v21  ;;  %v2749_v33 = vcombine.low %v2741_v9, %v2748_v23  ;;  %v873_v32 = vsel %vm860_vm3, %v842_v49, %v14860_v17  ;;  %v2872_v19 = vrot.slane %v2850_v7, %v14691_v43  ;;  %v14170_v9 = vld [vmem:[%s14361_s14 + $0xb0] sm:$0xff]  ;;  %v15162_v7 = vpop.permute.xlu1 %676 }
 0x110   : > { %v2914_v38 = vrot.slane %v2898_v47, %v14691_v43  ;;  %v2798_v45 = vcombine.low %v2790_v14, %v2797_v54  ;;  %v904_v15 = vsel %vm891_vm4, %v873_v32, %v14897_v12  ;;  %v2880_v44 = vcombine.low %v2858_v18, %v2865_v61 }
 0x111   : > { %v2907_v59 = vrot.slane %v2897_v50, %v14691_v43  ;;  %v1534_v21 = vcombine.high %v904_v15, %v904_v15  ;;  %v1541_v3 = vrot.slane %v904_v15, %v14691_v43  ;;  %v2881_v0 = vcombine.low %v2872_v19, %v2879_v35  ;;  %v14171_v50 = vld [vmem:[%s14361_s14 + $0x70] sm:$0xff]  ;;  %v14172_v15 = vld [vmem:[%s14361_s14 + $0x68] sm:$0xff] }
 0x112   : > { %v2921_v17 = vrot.slane %v2899_v48, %v14691_v43  ;;  %v3825_v49 = vpack.c.bf16 %v2798_v45, %v2749_v33  ;;  %v852_v23 = vsel %vm22036_vm2, %v14170_v9, %v14874_v30  ;;  %v2928_v12 = vrot.slane %v2900_v13, %v14691_v43 }
 0x113   : > { %v2956_v18 = vrot.slane %v15146_v22, %v14691_v43  ;;  %v1548_v4 = vrot.slane %v1534_v21, %v14691_v43  ;;  %v1549_v29 = vcombine.high %v1541_v3, %v1541_v3  ;;  %v15168_v27 = vcombine.low %v2907_v59, %v2914_v38  ;;  %v15201_v19 = vpop.permute.xlu1 %694  ;;  %v14173_v59 = vld [vmem:[%s14361_s14 + $0xa8] sm:$0xff] }
 0x114   : > { %13852 = vmatmul.mubr.msk.bf16.gmra.mrb[12].mxu0 %vm21973_vm7, %v3825_v49  ;;  %v1557_v61 = vrot.slane %v1541_v3, %v14691_v43  ;;  %v844_v30 = vsel %vm22036_vm2, %v14171_v50, %v14912_v25  ;;  %v2846_v31 = vrot.slane %v2832_v40, %v14691_v43  ;;  %v883_v48 = vsel %vm860_vm3, %v852_v23, %v14976_v42  ;;  %v15193_v42 = vpop.permute.xlu0 %602 }
 0x115   : > { %v1550_v47 = vcombine.high %v1548_v4, %v1548_v4  ;;  %v1571_v35 = vrot.slane %v1549_v29, %v14691_v43  ;;  %13855 = vmatprep.mubr.msk.bf16.mxu0 %vm14258_vm6, %v22521_v24  ;;  %v2839_v14 = vrot.slane %v2831_v6, %v14691_v43  ;;  %v1564_v25 = vrot.slane %v1548_v4, %v14691_v43 }
 0x116   : > { %v875_v36 = vsel %vm860_vm3, %v844_v30, %v14988_v20  ;;  %v2888_v34 = vrot.slane %v2880_v44, %v14691_v43  ;;  %v2895_v40 = vrot.slane %v2881_v0, %v14691_v43  ;;  %v914_v39 = vsel %vm891_vm4, %v883_v48, %v15032_v37 }
 0x117   : > { %v1578_v54 = vrot.slane %v1550_v47, %v14691_v43  ;;  %v2947_v13 = vcombine.low %v1557_v61, %v1571_v35  ;;  %v2847_v33 = vcombine.low %v2839_v14, %v2846_v31  ;;  %v2019_v6 = vcombine.high %v914_v39, %v914_v39  ;;  %v15237_v14 = vpop.permute.xlu1 %771 }
 0x118   : > { %v2896_v53 = vcombine.low %v2888_v34, %v2895_v40  ;;  %v2026_v32 = vrot.slane %v914_v39, %v14691_v43  ;;  %v906_v20 = vsel %vm891_vm4, %v875_v36, %v15041_v28  ;;  %v15203_v38 = vcombine.low %v2921_v17, %v2928_v12  ;;  %v15221_v29 = vpop.permute.xlu0 %678 }
 0x119   : > { %v2949_v45 = vcombine.low %v1564_v25, %v1578_v54  ;;  %v843_v44 = vsel %vm22036_vm2, %v14172_v15, %v14933_v58  ;;  %v851_v37 = vsel %vm22036_vm2, %v14173_v59, %v14944_v1  ;;  %v2033_v3 = vrot.slane %v2019_v6, %v14691_v43 }
 0x11a   : > { %v3826_v21 = vpack.c.bf16 %v2896_v53, %v2847_v33  ;;  %v2034_v0 = vcombine.high %v2026_v32, %v2026_v32  ;;  %v15213_v49 = vrot.slane %v2026_v32, %v14691_v43  ;;  %v13633_v28 = vcombine.high %v1557_v61, %v1571_v35 }
 0x11b   : > { %v2963_v17 = vrot.slane %v2947_v13, %v14691_v43  ;;  %v874_v9 = vsel %vm860_vm3, %v843_v44, %v15010_v16  ;;  %v1631_v23 = vcombine.high %v906_v20, %v906_v20  ;;  %v13634_v12 = vcombine.high %v1564_v25, %v1578_v54 }
 0x11c   : > { %13856 = vmatmul.mubr.msk.bf16.gmra.mrb[16].mxu0 %vm21973_vm7, %v3826_v21  ;;  %v2035_v58 = vcombine.high %v2033_v3, %v2033_v3  ;;  %v2049_v1 = vrot.slane %v2033_v3, %v14691_v43  ;;  %v2056_v4 = vrot.slane %v2034_v0, %v14691_v43  ;;  %v15224_v50 = vrot.slane %v2949_v45, %v14691_v43  ;;  %v15262_v44 = vpop.permute.xlu0 %769 }
 0x11d   : > { %v2064_v61 = vcombine.high %v15213_v49, %v15213_v49  ;;  %v1638_v30 = vrot.slane %v906_v20, %v14691_v43  ;;  %v1645_v16 = vrot.slane %v1631_v23, %v14691_v43  ;;  %13859 = vmatprep.mubr.msk.bf16.mxu0 %vm14258_vm6, %v22521_v24  ;;  %v905_v48 = vsel %vm891_vm4, %v874_v9, %v15059_v8 }
 0x11e   : > { %v15233_v31 = vrot.slane %v2035_v58, %v14691_v43  ;;  %v2065_v47 = vcombine.high %v2049_v1, %v2049_v1  ;;  %v2066_v35 = vcombine.high %v2056_v4, %v2056_v4  ;;  %v15242_v54 = vrot.slane %v13633_v28, %v14691_v43 }
 0x11f   : > { %v1646_v25 = vcombine.high %v1638_v30, %v1638_v30  ;;  %v1647_v36 = vcombine.high %v1645_v16, %v1645_v16  ;;  %v1654_v34 = vrot.slane %v1638_v30, %v14691_v43  ;;  %v1661_v40 = vrot.slane %v1645_v16, %v14691_v43 }
 0x120   : > { %v882_v13 = vsel %vm860_vm3, %v851_v37, %v15018_v46  ;;  %v3436_v33 = vcombine.low %v2066_v35, %v2049_v1  ;;  %v3437_v39 = vcombine.low %v15233_v31, %v2065_v47  ;;  %v15250_v8 = vcombine.low %v2956_v18, %v2963_v17  ;;  %v15271_v17 = vpop.permute.xlu1 %787 }
 0x121   : > { %v1668_v53 = vrot.slane %v1646_v25, %v14691_v43  ;;  %v15254_v6 = vrot.slane %v1647_v36, %v14691_v43  ;;  %v1677_v32 = vcombine.high %v1661_v40, %v1661_v40  ;;  %v2979_v20 = vcombine.low %v15242_v54, %v15224_v50 }
 0x122   : > { %v15259_v45 = vrot.slane %v13634_v12, %v14691_v43  ;;  %v1583_v46 = vcombine.high %v905_v48, %v905_v48  ;;  %v1590_v15 = vrot.slane %v905_v48, %v14691_v43  ;;  %v15264_v22 = vcombine.low %v2056_v4, %v2064_v61 }
 0x123   : > { %v1676_v18 = vcombine.high %v1654_v34, %v1654_v34  ;;  %v1678_v59 = vcombine.high %v1668_v53, %v1668_v53  ;;  %v913_v37 = vsel %vm891_vm4, %v882_v13, %v15084_v11  ;;  %v3446_v21 = vrot.slane %v3436_v33, %v14691_v43 }
 0x124   : > { %v3453_v3 = vrot.slane %v3437_v39, %v14691_v43  ;;  %v1597_v0 = vrot.slane %v1583_v46, %v14691_v43  ;;  %v1598_v28 = vcombine.high %v1590_v15, %v1590_v15  ;;  %v3047_v23 = vcombine.low %v15254_v6, %v1677_v32 }
 0x125   : > { %v3046_v9 = vcombine.low %v1678_v59, %v1661_v40  ;;  %v1606_v12 = vrot.slane %v1590_v15, %v14691_v43  ;;  %v1971_v58 = vcombine.high %v913_v37, %v913_v37  ;;  %v1978_v50 = vrot.slane %v913_v37, %v14691_v43  ;;  %v15286_v40 = vpop.permute.xlu0 %604 }
 0x126   : > { %v1599_v1 = vcombine.high %v1597_v0, %v1597_v0  ;;  %v1613_v4 = vrot.slane %v1597_v0, %v14691_v43  ;;  %v1620_v11 = vrot.slane %v1598_v28, %v14691_v43  ;;  %v2067_v61 = vcombine.high %v15233_v31, %v15233_v31 }
 0x127   : > { %v3418_v30 = vrot.slane %v15264_v22, %v14691_v43  ;;  %v3045_v16 = vcombine.low %v1668_v53, %v1676_v18  ;;  %v1985_v47 = vrot.slane %v1971_v58, %v14691_v43  ;;  %v15283_v35 = vcombine.low %v3446_v21, %v3453_v3  ;;  %v15295_v18 = vpop.permute.xlu1 %789 }
 0x128   : > { %v1627_v48 = vrot.slane %v1599_v1, %v14691_v43  ;;  %v1629_v25 = vcombine.high %v1613_v4, %v1613_v4  ;;  %v2996_v36 = vcombine.low %v1606_v12, %v1620_v11  ;;  %v3068_v54 = vrot.slane %v3046_v9, %v14691_v43 }
 0x129   : > { %v3075_v13 = vrot.slane %v3047_v23, %v14691_v43  ;;  %v1986_v33 = vcombine.high %v1978_v50, %v1978_v50  ;;  %v1987_v39 = vcombine.high %v1985_v47, %v1985_v47  ;;  %v13635_v32 = vcombine.high %v1606_v12, %v1620_v11 }
 0x12a   : > { %v2998_v46 = vcombine.low %v1613_v4, %v1627_v48  ;;  %v15291_v53 = vrot.slane %v1978_v50, %v14691_v43  ;;  %v2944_v15 = vrot.slane %v15203_v38, %v14691_v43  ;;  %v3044_v59 = vcombine.low %v1629_v25, %v1654_v34  ;;  %v14174_v25 = vld [vmem:[%s14361_s14 + $0xb8] sm:$0xff] }
 0x12b   : > { %v2001_v37 = vrot.slane %v1985_v47, %v14691_v43  ;;  %v15299_v21 = vrot.slane %v1986_v33, %v14691_v43  ;;  %v2015_v3 = vrot.slane %v1987_v39, %v14691_v43  ;;  %v3061_v0 = vrot.slane %v3045_v16, %v14691_v43  ;;  %v15317_v16 = vpop.permute.xlu0 %696  ;;  %v15329_v33 = vpop.permute.xlu1 %606 }
 0x12c   : > { %v3012_v28 = vrot.slane %v2996_v36, %v14691_v43  ;;  %v3026_v9 = vrot.slane %v2998_v46, %v14691_v43  ;;  %v2937_v38 = vrot.slane %v15168_v27, %v14691_v43  ;;  %v15311_v1 = vcombine.low %v3068_v54, %v3075_v13 }
 0x12d   : > { %v2017_v23 = vcombine.high %v2001_v37, %v2001_v37  ;;  %v3341_v34 = vcombine.low %v15291_v53, %v15299_v21  ;;  %v13641_v12 = vcombine.high %v15291_v53, %v15299_v21  ;;  %v3388_v58 = vcombine.low %v2001_v37, %v2015_v3  ;;  %v14182_v53 = vld [vmem:[%s14361_s14 + $0xd8] sm:$0xff] }
 0x12e   : > { %v3019_v4 = vrot.slane %v13635_v32, %v14691_v43  ;;  %v2986_v11 = vrot.slane %v15250_v8, %v14691_v43  ;;  %v2993_v50 = vrot.slane %v2979_v20, %v14691_v43  ;;  %v3054_v27 = vrot.slane %v3044_v59, %v14691_v43 }
 0x12f   : > { %v15321_v47 = vcombine.low %v2017_v23, %v15213_v49  ;;  %v2945_v48 = vcombine.low %v2937_v38, %v2944_v15  ;;  %v853_v36 = vsel %vm22036_vm2, %v14174_v25, %v15108_v5  ;;  %v3027_v54 = vcombine.low %v15259_v45, %v3012_v28  ;;  %v14175_v5 = vld [vmem:[%s14361_s14 + $0x80] sm:$0xff]  ;;  %v15367_v25 = vpop.permute.xlu1 %588 }
 0x130   : > { %v3028_v8 = vcombine.low %v3019_v4, %v3026_v9  ;;  %v2994_v13 = vcombine.low %v2986_v11, %v2993_v50  ;;  %v884_v20 = vsel %vm860_vm3, %v853_v36, %v15132_v60  ;;  %v15332_v39 = vrot.slane %v13641_v12, %v14691_v43  ;;  %v14176_v60 = vld [vmem:[%s14361_s14 + $0x78] sm:$0xff]  ;;  %v14177_v28 = vld [vmem:[%s14361_s14 + $0xc0] sm:$0xff] }
 0x131   : > { %v15335_v49 = vrot.slane %v3388_v58, %v14691_v43  ;;  %v915_v32 = vsel %vm891_vm4, %v884_v20, %v15117_v10  ;;  %v846_v45 = vsel %vm22036_vm2, %v14175_v5, %v15139_v55  ;;  %v845_v37 = vsel %vm22036_vm2, %v14176_v60, %v15154_v56  ;;  %v15358_v58 = vpop.permute.xlu0 %590 }
 0x132   : > { %v3827_v46 = vpack.c.bf16 %v2994_v13, %v2945_v48  ;;  %v2068_v15 = vcombine.high %v915_v32, %v915_v32  ;;  %v2075_v59 = vrot.slane %v915_v32, %v14691_v43  ;;  %v3411_v3 = vrot.slane %v15321_v47, %v14691_v43 }
 0x133   : > { %v854_v9 = vsel %vm22036_vm2, %v14177_v28, %v15193_v42  ;;  %v877_v10 = vsel %vm860_vm3, %v846_v45, %v15221_v29  ;;  %v3076_v38 = vcombine.low %v3054_v27, %v3061_v0  ;;  %v3035_v29 = vrot.slane %v3027_v54, %v14691_v43 }
 0x134   : > { %13860 = vmatmul.mubr.msk.bf16.gmra.mrb[20].mxu0 %vm21973_vm7, %v3827_v46  ;;  %v2082_v55 = vrot.slane %v2068_v15, %v14691_v43  ;;  %v2083_v23 = vcombine.high %v2075_v59, %v2075_v59  ;;  %v2091_v12 = vrot.slane %v2075_v59, %v14691_v43  ;;  %v908_v56 = vsel %vm891_vm4, %v877_v10, %v15237_v14 }
 0x135   : > { %13863 = vmatprep.mubr.msk.bf16.mxu0 %vm14258_vm6, %v22521_v24  ;;  %v1728_v42 = vcombine.high %v908_v56, %v908_v56  ;;  %v1735_v4 = vrot.slane %v908_v56, %v14691_v43  ;;  %v3042_v0 = vrot.slane %v3028_v8, %v14691_v43  ;;  %v3084_v20 = vrot.slane %v3076_v38, %v14691_v43  ;;  %v15383_v10 = vpop.permute.xlu0 %682 }
 0x136   : > { %v2084_v11 = vcombine.high %v2082_v55, %v2082_v55  ;;  %v2098_v50 = vrot.slane %v2082_v55, %v14691_v43  ;;  %v2105_v27 = vrot.slane %v2083_v23, %v14691_v43  ;;  %v2113_v48 = vcombine.high %v2091_v12, %v2091_v12 }
 0x137   : > { %v3438_v14 = vcombine.low %v2067_v61, %v2091_v12  ;;  %v1742_v36 = vrot.slane %v1728_v42, %v14691_v43  ;;  %v1743_v13 = vcombine.high %v1735_v4, %v1735_v4  ;;  %v3419_v45 = vcombine.low %v15332_v39, %v15335_v49 }
 0x138   : > { %v2112_v54 = vrot.slane %v2084_v11, %v14691_v43  ;;  %v2114_v8 = vcombine.high %v2098_v50, %v2098_v50  ;;  %v2115_v32 = vcombine.high %v2105_v27, %v2105_v27  ;;  %v3439_v5 = vcombine.low %v2105_v27, %v2113_v48 }
 0x139   : > { %v1744_v46 = vcombine.high %v1742_v36, %v1742_v36  ;;  %v1751_v15 = vrot.slane %v1735_v4, %v14691_v43  ;;  %v1765_v59 = vrot.slane %v1743_v13, %v14691_v43  ;;  %v1758_v61 = vrot.slane %v1742_v36, %v14691_v43  ;;  %v15393_v4 = vpop.permute.xlu1 %775  ;;  %v15416_v13 = vpop.permute.xlu0 %698 }
 0x13a   : > { %v3467_v31 = vrot.slane %v3439_v5, %v14691_v43  ;;  %v3043_v60 = vcombine.low %v3035_v29, %v3042_v0  ;;  %v3091_v28 = vrot.slane %v15311_v1, %v14691_v43  ;;  %v15385_v38 = vcombine.low %v2115_v32, %v2098_v50  ;;  %v14178_v32 = vld [vmem:[%s14361_s14 + $0xc8] sm:$0xff] }
 0x13b   : > { %v15387_v55 = vcombine.low %v2112_v54, %v2114_v8  ;;  %v1772_v39 = vrot.slane %v1744_v46, %v14691_v43  ;;  %v3142_v49 = vcombine.low %v1751_v15, %v1765_v59  ;;  %v3460_v23 = vrot.slane %v3438_v14, %v14691_v43 }
 0x13c   : > { %v876_v12 = vsel %vm860_vm3, %v845_v37, %v15162_v7  ;;  %v13636_v56 = vcombine.high %v1751_v15, %v1765_v59  ;;  %v3092_v42 = vcombine.low %v3084_v20, %v3091_v28  ;;  %v885_v1 = vsel %vm860_vm3, %v854_v9, %v15201_v19 }
 0x13d   : > { %v3144_v29 = vcombine.low %v1758_v61, %v1772_v39  ;;  %v13637_v0 = vcombine.high %v1758_v61, %v1772_v39  ;;  %v1679_v11 = vcombine.high %v15254_v6, %v15254_v6  ;;  %v3469_v50 = vcombine.low %v3460_v23, %v3467_v31  ;;  %v15432_v61 = vpop.permute.xlu1 %680  ;;  %v15448_v47 = vpop.permute.xlu0 %608 }
 0x13e   : > { %v3828_v27 = vpack.c.bf16 %v3092_v42, %v3043_v60  ;;  %v907_v48 = vsel %vm891_vm4, %v876_v12, %v15262_v44  ;;  %v916_v7 = vsel %vm891_vm4, %v885_v1, %v15271_v17  ;;  %v3495_v37 = vrot.slane %v15385_v38, %v14691_v43 }
 0x13f   : > { %v3502_v19 = vrot.slane %v15387_v55, %v14691_v43  ;;  %v15408_v9 = vrot.slane %v3142_v49, %v14691_v43  ;;  %v1680_v14 = vcombine.high %v907_v48, %v907_v48  ;;  %v15411_v6 = vrot.slane %v13636_v56, %v14691_v43 }
 0x140   : > { %13864 = vmatmul.mubr.msk.bf16.gmra.mrb[24].mxu0 %vm21973_vm7, %v3828_v27  ;;  %v1687_v44 = vrot.slane %v907_v48, %v14691_v43  ;;  %v2116_v36 = vcombine.high %v916_v7, %v916_v7  ;;  %v2123_v17 = vrot.slane %v916_v7, %v14691_v43  ;;  %v15419_v20 = vrot.slane %v3144_v29, %v14691_v43 }
 0x141   : > { %v15422_v54 = vrot.slane %v13637_v0, %v14691_v43  ;;  %v1694_v8 = vrot.slane %v1680_v14, %v14691_v43  ;;  %v855_v5 = vsel %vm22036_vm2, %v14178_v32, %v15286_v40  ;;  %13867 = vmatprep.mubr.msk.bf16.mxu0 %vm14258_vm6, %v22521_v24  ;;  %v3420_v40 = vcombine.low %v3411_v3, %v3418_v30 }
 0x142   : > { %v1695_v46 = vcombine.high %v1687_v44, %v1687_v44  ;;  %v1703_v15 = vrot.slane %v1687_v44, %v14691_v43  ;;  %v2130_v59 = vrot.slane %v2116_v36, %v14691_v43  ;;  %v2131_v31 = vcombine.high %v2123_v17, %v2123_v17 }
 0x143   : > { %v1696_v60 = vcombine.high %v1694_v8, %v1694_v8  ;;  %v1710_v28 = vrot.slane %v1694_v8, %v14691_v43  ;;  %v3427_v39 = vrot.slane %v3419_v45, %v14691_v43  ;;  %v2139_v56 = vrot.slane %v2123_v17, %v14691_v43  ;;  %v15454_v8 = vpop.permute.xlu1 %700 }
 0x144   : > { %v1717_v49 = vrot.slane %v1695_v46, %v14691_v43  ;;  %v1725_v23 = vcombine.high %v1703_v15, %v1703_v15  ;;  %v2132_v12 = vcombine.high %v2130_v59, %v2130_v59  ;;  %v3093_v29 = vcombine.low %v1679_v11, %v1703_v15 }
 0x145   : > { %v1724_v42 = vrot.slane %v1696_v60, %v14691_v43  ;;  %v1726_v1 = vcombine.high %v1710_v28, %v1710_v28  ;;  %v2153_v0 = vrot.slane %v2131_v31, %v14691_v43  ;;  %v2146_v48 = vrot.slane %v2130_v59, %v14691_v43 }
 0x146   : > { %v1727_v27 = vcombine.high %v1717_v49, %v1717_v49  ;;  %v3094_v22 = vcombine.low %v1717_v49, %v1725_v23  ;;  %v2160_v30 = vrot.slane %v2132_v12, %v14691_v43  ;;  %v3434_v14 = vrot.slane %v3420_v40, %v14691_v43 }
 0x147   : > { %v3096_v3 = vcombine.low %v1724_v42, %v1726_v1  ;;  %v3487_v45 = vcombine.low %v2139_v56, %v2153_v0  ;;  %v13642_v7 = vcombine.high %v2139_v56, %v2153_v0  ;;  %v3174_v44 = vcombine.low %v15408_v9, %v15411_v6  ;;  %v14179_v0 = vld [vmem:[%s14361_s14 + $0x90] sm:$0xff] }
 0x148   : > { %v3095_v36 = vcombine.low %v1727_v27, %v1710_v28  ;;  %v3110_v11 = vrot.slane %v3094_v22, %v14691_v43  ;;  %v3534_v17 = vcombine.low %v2146_v48, %v2160_v30  ;;  %v3103_v32 = vrot.slane %v3093_v29, %v14691_v43  ;;  %v15493_v22 = vpop.permute.xlu1 %793 }
 0x149   : > { %v3124_v46 = vrot.slane %v3096_v3, %v14691_v43  ;;  %v3476_v15 = vrot.slane %v15283_v35, %v14691_v43  ;;  %v3483_v59 = vrot.slane %v3469_v50, %v14691_v43  ;;  %v15463_v9 = vrot.slane %v3487_v45, %v14691_v43 }
 0x14a   : > { %v3117_v31 = vrot.slane %v3095_v36, %v14691_v43  ;;  %v15466_v6 = vrot.slane %v13642_v7, %v14691_v43  ;;  %v13643_v60 = vcombine.high %v2146_v48, %v2160_v30  ;;  %v3125_v28 = vcombine.low %v3103_v32, %v3110_v11 }
 0x14b   : > { %v3435_v40 = vcombine.low %v3427_v39, %v3434_v14  ;;  %v3484_v49 = vcombine.low %v3476_v15, %v3483_v59  ;;  %v886_v23 = vsel %vm860_vm3, %v855_v5, %v15317_v16  ;;  %v3175_v35 = vcombine.low %v15419_v20, %v15422_v54  ;;  %v15477_v42 = vpop.permute.xlu0 %791  ;;  %v14180_v5 = vld [vmem:[%s14361_s14 + $0xd0] sm:$0xff] }
 0x14c   : > { %v3126_v50 = vcombine.low %v3117_v31, %v3124_v46  ;;  %v15473_v12 = vrot.slane %v3534_v17, %v14691_v43  ;;  %v917_v56 = vsel %vm891_vm4, %v886_v23, %v15295_v18  ;;  %v848_v16 = vsel %vm22036_vm2, %v14179_v0, %v15358_v58  ;;  %v15521_v23 = vpop.permute.xlu1 %684  ;;  %v14181_v0 = vld [vmem:[%s14361_s14 + $0x88] sm:$0xff] }
 0x14d   : > { %v3832_v1 = vpack.c.bf16 %v3484_v49, %v3435_v40  ;;  %v2165_v29 = vcombine.high %v917_v56, %v917_v56  ;;  %v2172_v39 = vrot.slane %v917_v56, %v14691_v43  ;;  %v3518_v20 = vcombine.low %v15463_v9, %v15466_v6 }
 0x14e   : > { %v15486_v54 = vrot.slane %v13643_v60, %v14691_v43  ;;  %v856_v18 = vsel %vm22036_vm2, %v14180_v5, %v15329_v33  ;;  %v879_v27 = vsel %vm860_vm3, %v848_v16, %v15383_v10  ;;  %v3133_v3 = vrot.slane %v3125_v28, %v14691_v43 }
 0x14f   : > { %13880 = vmatmul.mubr.msk.bf16.vlgmr.msra.gmra.mrb[0].mxu1 %vm21973_vm7, %v3832_v1  ;;  %v2179_v48 = vrot.slane %v2165_v29, %v14691_v43  ;;  %v2180_v58 = vcombine.high %v2172_v39, %v2172_v39  ;;  %v910_v30 = vsel %vm891_vm4, %v879_v27, %v15393_v4  ;;  %v2188_v45 = vrot.slane %v2172_v39, %v14691_v43  ;;  %v15512_v59 = vpop.permute.xlu0 %773 }
 0x150   : > { %v1825_v7 = vcombine.high %v910_v30, %v910_v30  ;;  %v1832_v33 = vrot.slane %v910_v30, %v14691_v43  ;;  %v3140_v14 = vrot.slane %v3126_v50, %v14691_v43  ;;  %13883 = vmatprep.mubr.msk.bf16.mxu1 %vm14258_vm6, %v22521_v24  ;;  %v3182_v11 = vrot.slane %v3174_v44, %v14691_v43 }
 0x151   : > { %v2181_v10 = vcombine.high %v2179_v48, %v2179_v48  ;;  %v2202_v36 = vrot.slane %v2180_v58, %v14691_v43  ;;  %v3189_v17 = vrot.slane %v3175_v35, %v14691_v43  ;;  %v2195_v35 = vrot.slane %v2179_v48, %v14691_v43 }
 0x152   : > { %v1839_v4 = vrot.slane %v1825_v7, %v14691_v43  ;;  %v1840_v32 = vcombine.high %v1832_v33, %v1832_v33  ;;  %v15510_v46 = vrot.slane %v1832_v33, %v14691_v43  ;;  %v3141_v15 = vcombine.low %v3133_v3, %v3140_v14  ;;  %v15567_v14 = vpop.permute.xlu1 %594 }
 0x153   : > { %v2209_v31 = vrot.slane %v2181_v10, %v14691_v43  ;;  %v3536_v9 = vcombine.low %v2188_v45, %v2202_v36  ;;  %v13644_v6 = vcombine.high %v2188_v45, %v2202_v36  ;;  %v3190_v60 = vcombine.low %v3182_v11, %v3189_v17 }
 0x154   : > { %v1841_v28 = vcombine.high %v1839_v4, %v1839_v4  ;;  %v15516_v44 = vrot.slane %v1839_v4, %v14691_v43  ;;  %v1862_v40 = vrot.slane %v1840_v32, %v14691_v43  ;;  %v1870_v49 = vcombine.high %v15510_v46, %v15510_v46 }
 0x155   : > { %v3558_v50 = vrot.slane %v3536_v9, %v14691_v43  ;;  %v3565_v56 = vrot.slane %v13644_v6, %v14691_v43  ;;  %v3829_v1 = vpack.c.bf16 %v3190_v60, %v3141_v15  ;;  %v15530_v29 = vrot.slane %v3341_v34, %v14691_v43 }
 0x156   : > { %v3566_v39 = vcombine.low %v15473_v12, %v15486_v54  ;;  %v847_v16 = vsel %vm22036_vm2, %v14181_v0, %v15367_v25  ;;  %v887_v5 = vsel %vm860_vm3, %v856_v18, %v15416_v13  ;;  %v3583_v48 = vcombine.low %v2195_v35, %v2209_v31  ;;  %v15550_v13 = vpop.permute.xlu0 %592 }
 0x157   : > { %v3567_v27 = vcombine.low %v3558_v50, %v3565_v56  ;;  %v878_v58 = vsel %vm860_vm3, %v847_v16, %v15432_v61  ;;  %13868 = vmatmul.mubr.msk.bf16.gmra.mrb[28].mxu0 %vm21973_vm7, %v3829_v1  ;;  %v857_v21 = vsel %vm22036_vm2, %v14182_v53, %v15448_v47  ;;  %v15546_v34 = vrot.slane %v1841_v28, %v14691_v43  ;;  %v613_v56 = vpop.permute.xlu1 %612 }
 0x158   : > { %v1871_v25 = vcombine.high %v15516_v44, %v15516_v44  ;;  %v1872_v12 = vcombine.high %v1862_v40, %v1862_v40  ;;  %v3240_v54 = vcombine.low %v1862_v40, %v1870_v49  ;;  %13871 = vmatprep.mubr.msk.bf16.mxu0 %vm14258_vm6, %v22521_v24  ;;  %v2211_v61 = vcombine.high %v2195_v35, %v2195_v35 }
 0x159   : > { %v918_v18 = vsel %vm891_vm4, %v887_v5, %v15477_v42  ;;  %v3517_v47 = vcombine.low %v3495_v37, %v3502_v19  ;;  %v3532_v30 = vrot.slane %v3518_v20, %v14691_v43  ;;  %v888_v3 = vsel %vm860_vm3, %v857_v21, %v15454_v8 }
 0x15a   : > { %v2213_v45 = vcombine.high %v918_v18, %v918_v18  ;;  %v2220_v7 = vrot.slane %v918_v18, %v14691_v43  ;;  %v3581_v33 = vrot.slane %v3567_v27, %v14691_v43  ;;  %v3593_v42 = vrot.slane %v3583_v48, %v14691_v43  ;;  %v778_v6 = vpop.permute.xlu0 %777 }
 0x15b   : > { %v3525_v55 = vrot.slane %v3517_v47, %v14691_v43  ;;  %v3574_v10 = vrot.slane %v3566_v39, %v14691_v43  ;;  %v919_v38 = vsel %vm891_vm4, %v888_v3, %v15493_v22  ;;  %v3241_v37 = vcombine.low %v1872_v12, %v15516_v44 }
 0x15c   : > { %v2227_v19 = vrot.slane %v2213_v45, %v14691_v43  ;;  %v2228_v8 = vcombine.high %v2220_v7, %v2220_v7  ;;  %v2236_v20 = vrot.slane %v2220_v7, %v14691_v43  ;;  %v2262_v17 = vcombine.high %v919_v38, %v919_v38 }
 0x15d   : > { %v3533_v36 = vcombine.low %v3525_v55, %v3532_v30  ;;  %v3582_v11 = vcombine.low %v3574_v10, %v3581_v33  ;;  %v2269_v4 = vrot.slane %v919_v38, %v14691_v43  ;;  %v3250_v40 = vrot.slane %v3240_v54, %v14691_v43 }
 0x15e   : > { %v2229_v32 = vcombine.high %v2227_v19, %v2227_v19  ;;  %v2243_v15 = vrot.slane %v2227_v19, %v14691_v43  ;;  %v2250_v31 = vrot.slane %v2228_v8, %v14691_v43  ;;  %v2258_v9 = vcombine.high %v2236_v20, %v2236_v20  ;;  %v611_v45 = vpop.permute.xlu0 %610  ;;  %v703_v8 = vpop.permute.xlu1 %702 }
 0x15f   : > { %v3584_v22 = vcombine.low %v2211_v61, %v2236_v20  ;;  %v3833_v60 = vpack.c.bf16 %v3582_v11, %v3533_v36  ;;  %v2276_v28 = vrot.slane %v2262_v17, %v14691_v43  ;;  %v2277_v44 = vcombine.high %v2269_v4, %v2269_v4 }
 0x160   : > { %v2257_v49 = vrot.slane %v2229_v32, %v14691_v43  ;;  %v2259_v35 = vcombine.high %v2243_v15, %v2243_v15  ;;  %v2260_v50 = vcombine.high %v2250_v31, %v2250_v31  ;;  %v3257_v1 = vrot.slane %v3241_v37, %v14691_v43  ;;  %v14183_v37 = vld [vmem:[%s14361_s14 + $0x98] sm:$0xff] }
 0x161   : > { %13884 = vmatmul.mubr.msk.bf16.gmra.mrb[4].mxu1 %vm21973_vm7, %v3833_v60  ;;  %v2278_v39 = vcombine.high %v2276_v28, %v2276_v28  ;;  %v2285_v0 = vrot.slane %v2269_v4, %v14691_v43  ;;  %v2292_v16 = vrot.slane %v2276_v28, %v14691_v43  ;;  %v3585_v5 = vcombine.low %v2250_v31, %v2258_v9  ;;  %v14184_v28 = vld [vmem:[%s14361_s14 + $0xa0] sm:$0xff] }
 0x162   : > { %v3586_v27 = vcombine.low %v2260_v50, %v2243_v15  ;;  %v2261_v48 = vcombine.high %v2257_v49, %v2257_v49  ;;  %v909_v53 = vsel %vm891_vm4, %v878_v58, %v15512_v59  ;;  %13887 = vmatprep.mubr.msk.bf16.mxu1 %vm14258_vm6, %v22521_v24  ;;  %v3600_v21 = vrot.slane %v3584_v22, %v14691_v43 }
 0x163   : > { %v3632_v12 = vcombine.low %v2257_v49, %v2259_v35  ;;  %v2299_v54 = vrot.slane %v2277_v44, %v14691_v43  ;;  %v2307_v61 = vcombine.high %v2285_v0, %v2285_v0  ;;  %v2306_v47 = vrot.slane %v2278_v39, %v14691_v43  ;;  %v687_v49 = vpop.permute.xlu0 %686 }
 0x164   : > { %v3614_v18 = vrot.slane %v3586_v27, %v14691_v43  ;;  %v2308_v30 = vcombine.high %v2292_v16, %v2292_v16  ;;  %v3633_v3 = vcombine.low %v2261_v48, %v2285_v0  ;;  %v15596_v7 = vcombine.low %v15546_v34, %v1871_v25 }
 0x165   : > { %v2309_v59 = vcombine.high %v2299_v54, %v2299_v54  ;;  %v1777_v58 = vcombine.high %v909_v53, %v909_v53  ;;  %v1784_v33 = vrot.slane %v909_v53, %v14691_v43  ;;  %v15599_v55 = vcombine.low %v3250_v40, %v3257_v1  ;;  %v14186_v53 = vld [vmem:[%s14361_s14 + $0xe0] sm:$0xff] }
 0x166   : > { %v3607_v10 = vrot.slane %v3585_v5, %v14691_v43  ;;  %v3634_v38 = vcombine.low %v2299_v54, %v2307_v61  ;;  %v849_v19 = vsel %vm22036_vm2, %v14183_v37, %v15550_v13  ;;  %v3649_v36 = vrot.slane %v3633_v3, %v14691_v43 }
 0x167   : > { %v3635_v20 = vcombine.low %v2309_v59, %v2292_v16  ;;  %v1791_v25 = vrot.slane %v1777_v58, %v14691_v43  ;;  %v1792_v11 = vcombine.high %v1784_v33, %v1784_v33  ;;  %v15607_v17 = vcombine.low %v3593_v42, %v3600_v21 }
 0x168   : > { %v15609_v4 = vcombine.low %v3607_v10, %v3614_v18  ;;  %v3642_v32 = vrot.slane %v3632_v12, %v14691_v43  ;;  %v15612_v15 = vcombine.low %v2306_v47, %v2308_v30  ;;  %v880_v22 = vsel %vm860_vm3, %v849_v19, %v15521_v23 }
 0x169   : > { %v1793_v31 = vcombine.high %v1791_v25, %v1791_v25  ;;  %v1807_v9 = vrot.slane %v1791_v25, %v14691_v43  ;;  %v1814_v13 = vrot.slane %v1792_v11, %v14691_v43  ;;  %v3656_v60 = vrot.slane %v3634_v38, %v14691_v43 }
 0x16a   : > { %v3663_v42 = vrot.slane %v3635_v20, %v14691_v43  ;;  %v850_v44 = vsel %vm22036_vm2, %v14184_v28, %v15567_v14  ;;  %v911_v40 = vsel %vm891_vm4, %v880_v22, %v778_v6  ;;  %v15624_v35 = vcombine.low %v3642_v32, %v3649_v36  ;;  %v780_v14 = vpop.permute.xlu1 %779  ;;  %v14185_v6 = vld [vmem:[%s14361_s14 + $0xe8] sm:$0xff] }
 0x16b   : > { %v1800_v50 = vrot.slane %v1784_v33, %v14691_v43  ;;  %v1821_v1 = vrot.slane %v1793_v31, %v14691_v43  ;;  %v1823_v23 = vcombine.high %v1807_v9, %v1807_v9  ;;  %v1873_v39 = vcombine.high %v15546_v34, %v15546_v34 }
 0x16c   : > { %v3264_v0 = vrot.slane %v15596_v7, %v14691_v43  ;;  %v1874_v16 = vcombine.high %v911_v40, %v911_v40  ;;  %v1881_v5 = vrot.slane %v911_v40, %v14691_v43  ;;  %v859_v48 = vsel %vm22036_vm2, %v14185_v6, %v613_v56 }
 0x16d   : > { %v3191_v27 = vcombine.low %v1800_v50, %v1814_v13  ;;  %v858_v21 = vsel %vm22036_vm2, %v14186_v53, %v611_v45  ;;  %v881_v12 = vsel %vm860_vm3, %v850_v44, %v687_v49  ;;  %v3665_v54 = vcombine.low %v3656_v60, %v3663_v42 }
 0x16e   : > { %v1888_v61 = vrot.slane %v1874_v16, %v14691_v43  ;;  %v1889_v34 = vcombine.high %v1881_v5, %v1881_v5  ;;  %v1897_v18 = vrot.slane %v1881_v5, %v14691_v43  ;;  %v13638_v47 = vcombine.high %v1800_v50, %v1814_v13  ;;  %v798_v50 = vpop.permute.xlu1 %797 }
 0x16f   : > { %v3193_v30 = vcombine.low %v1807_v9, %v1821_v1  ;;  %v3194_v3 = vcombine.low %v1823_v23, %v15510_v46  ;;  %v912_v59 = vsel %vm891_vm4, %v881_v12, %v780_v14  ;;  %v889_v45 = vsel %vm860_vm3, %v858_v21, %v703_v8  ;;  %v705_v9 = vpop.permute.xlu0 %704 }
 0x170   : > { %v1890_v58 = vcombine.high %v1888_v61, %v1888_v61  ;;  %v1904_v56 = vrot.slane %v1888_v61, %v14691_v43  ;;  %v1911_v33 = vrot.slane %v1889_v34, %v14691_v43  ;;  %v15646_v10 = vrot.slane %v3191_v27, %v14691_v43 }
 0x171   : > { %v1919_v38 = vcombine.high %v1897_v18, %v1897_v18  ;;  %v3243_v37 = vcombine.low %v1873_v39, %v1897_v18  ;;  %v1922_v19 = vcombine.high %v912_v59, %v912_v59  ;;  %v1929_v46 = vrot.slane %v912_v59, %v14691_v43 }
 0x172   : > { %v1918_v20 = vrot.slane %v1890_v58, %v14691_v43  ;;  %v1920_v36 = vcombine.high %v1904_v56, %v1904_v56  ;;  %v1921_v25 = vcombine.high %v1911_v33, %v1911_v33  ;;  %v15651_v11 = vrot.slane %v13638_v47, %v14691_v43 }
 0x173   : > { %v3215_v32 = vrot.slane %v3193_v30, %v14691_v43  ;;  %v3222_v31 = vrot.slane %v3194_v3, %v14691_v43  ;;  %v1936_v8 = vrot.slane %v1922_v19, %v14691_v43  ;;  %v1937_v22 = vcombine.high %v1929_v46, %v1929_v46 }
 0x174   : > { %v3290_v13 = vcombine.low %v1921_v25, %v1904_v56  ;;  %v3623_v60 = vrot.slane %v15607_v17, %v14691_v43  ;;  %v3630_v42 = vrot.slane %v15609_v4, %v14691_v43  ;;  %v3271_v28 = vrot.slane %v3243_v37, %v14691_v43 }
 0x175   : > { %v3289_v44 = vcombine.low %v1911_v33, %v1919_v38  ;;  %v3291_v40 = vcombine.low %v1918_v20, %v1920_v36  ;;  %v1938_v49 = vcombine.high %v1936_v8, %v1936_v8  ;;  %v1945_v23 = vrot.slane %v1929_v46, %v14691_v43 }
 0x176   : > { %v3306_v1 = vrot.slane %v3290_v13, %v14691_v43  ;;  %v1952_v39 = vrot.slane %v1936_v8, %v14691_v43  ;;  %v1959_v16 = vrot.slane %v1937_v22, %v14691_v43  ;;  %v3672_v17 = vrot.slane %v15624_v35, %v14691_v43 }
 0x177   : > { %v1966_v5 = vrot.slane %v1938_v49, %v14691_v43  ;;  %v3679_v4 = vrot.slane %v3665_v54, %v14691_v43  ;;  %v890_v14 = vsel %vm860_vm3, %v859_v48, %v705_v9  ;;  %v3631_v53 = vcombine.low %v3623_v60, %v3630_v42 }
 0x178   : > { %v3292_v27 = vcombine.low %v1945_v23, %v1959_v16  ;;  %v13639_v6 = vcombine.high %v1945_v23, %v1959_v16  ;;  %v921_v21 = vsel %vm891_vm4, %v890_v14, %v798_v50  ;;  %v796_v47 = vpop.permute.xlu0 %795  ;;  %v3223_v30 = vcombine.low %v15646_v10, %v15651_v11 }
 0x179   : > { %v3339_v12 = vcombine.low %v1952_v39, %v1966_v5  ;;  %v13640_v61 = vcombine.high %v1952_v39, %v1966_v5  ;;  %v3680_v34 = vcombine.low %v3672_v17, %v3679_v4  ;;  %v2359_v18 = vcombine.high %v921_v21, %v921_v21 }
 0x17a   : > { %v3224_v3 = vcombine.low %v3215_v32, %v3222_v31  ;;  %v3320_v35 = vrot.slane %v3292_v27, %v14691_v43  ;;  %v2366_v54 = vrot.slane %v921_v21, %v14691_v43  ;;  %v3299_v48 = vrot.slane %v3289_v44, %v14691_v43 }
 0x17b   : > { %v3313_v59 = vrot.slane %v3291_v40, %v14691_v43  ;;  %v3834_v58 = vpack.c.bf16 %v3680_v34, %v3631_v53  ;;  %v2373_v56 = vrot.slane %v2359_v18, %v14691_v43  ;;  %v3355_v33 = vrot.slane %v3339_v12, %v14691_v43 }
 0x17c   : > { %v3362_v38 = vrot.slane %v13640_v61, %v14691_v43  ;;  %v2374_v37 = vcombine.high %v2366_v54, %v2366_v54  ;;  %v920_v19 = vsel %vm891_vm4, %v889_v45, %v796_v47  ;;  %v3273_v10 = vcombine.low %v3264_v0, %v3271_v28 }
 0x17d   : > { %v3321_v20 = vcombine.low %v3299_v48, %v3306_v1  ;;  %v3348_v36 = vrot.slane %v13639_v6, %v14691_v43  ;;  %13888 = vmatmul.mubr.msk.bf16.gmra.mrb[8].mxu1 %vm21973_vm7, %v3834_v58  ;;  %v2375_v25 = vcombine.high %v2373_v56, %v2373_v56  ;;  %v3322_v46 = vcombine.low %v3313_v59, %v3320_v35 }
 0x17e   : > { %v2396_v11 = vrot.slane %v2374_v37, %v14691_v43  ;;  %v2310_v32 = vcombine.high %v920_v19, %v920_v19  ;;  %v2317_v31 = vrot.slane %v920_v19, %v14691_v43  ;;  %13891 = vmatprep.mubr.msk.bf16.mxu1 %vm14258_vm6, %v22521_v24  ;;  %v2382_v45 = vrot.slane %v2366_v54, %v14691_v43 }
 0x17f   : > { %v2389_v7 = vrot.slane %v2373_v56, %v14691_v43  ;;  %v2403_v0 = vrot.slane %v2375_v25, %v14691_v43  ;;  %v3238_v8 = vrot.slane %v3224_v3, %v14691_v43  ;;  %v3370_v9 = vcombine.low %v3348_v36, %v3355_v33 }
 0x180   : > { %v3371_v13 = vcombine.low %v3362_v38, %v15530_v29  ;;  %v2324_v22 = vrot.slane %v2310_v32, %v14691_v43  ;;  %v2325_v60 = vcombine.high %v2317_v31, %v2317_v31  ;;  %v3231_v28 = vrot.slane %v3223_v30, %v14691_v43 }
 0x181   : > { %v3733_v42 = vcombine.low %v2389_v7, %v2403_v0  ;;  %v3280_v44 = vrot.slane %v15599_v55, %v14691_v43  ;;  %v3287_v40 = vrot.slane %v3273_v10, %v14691_v43  ;;  %v3731_v49 = vcombine.low %v2382_v45, %v2396_v11 }
 0x182   : > { %v13647_v50 = vcombine.high %v2382_v45, %v2396_v11  ;;  %v2326_v1 = vcombine.high %v2324_v22, %v2324_v22  ;;  %v2333_v23 = vrot.slane %v2317_v31, %v14691_v43  ;;  %v2340_v39 = vrot.slane %v2324_v22, %v14691_v43 }
 0x183   : > { %v2347_v29 = vrot.slane %v2325_v60, %v14691_v43  ;;  %v3239_v16 = vcombine.low %v3231_v28, %v3238_v8  ;;  %v3288_v5 = vcombine.low %v3280_v44, %v3287_v40  ;;  %v3761_v17 = vrot.slane %v3733_v42, %v14691_v43  ;;  %v22549_v60 = vld [vmem:[#allocation7_spill] sm:$0xff]  ;;  %v15747_v44 = vld [vmem:[%s21892_s5] ss:$0 sm:$0xff] }
 0x184   : > { %v2354_v4 = vrot.slane %v2326_v1, %v14691_v43  ;;  %v3378_v14 = vrot.slane %v3370_v9, %v14691_v43  ;;  %v3385_v55 = vrot.slane %v3371_v13, %v14691_v43  ;;  %v3336_v21 = vrot.slane %v3322_v46, %v14691_v43  ;;  %v15738_v13 = vld [vmem:[%s21891_s4] ss:$0 sm:$0xff] }
 0x185   : > { %v3682_v27 = vcombine.low %v2333_v23, %v2347_v29  ;;  %v13645_v6 = vcombine.high %v2333_v23, %v2347_v29  ;;  %v3830_v53 = vpack.c.bf16 %v3288_v5, %v3239_v16  ;;  %v3754_v12 = vrot.slane %v13647_v50, %v14691_v43 }
 0x186   : > { %v3691_v61 = vrot.slane %v15612_v15, %v14691_v43  ;;  %v3684_v34 = vcombine.low %v2340_v39, %v2354_v4  ;;  %v13646_v18 = vcombine.high %v2340_v39, %v2354_v4  ;;  %v3747_v47 = vrot.slane %v3731_v49, %v14691_v43 }
 0x187   : > { %v3698_v30 = vrot.slane %v3682_v27, %v14691_v43  ;;  %13872 = vmatmul.mubr.msk.bf16.gmra.mrb[32].mxu0 %vm21973_vm7, %v3830_v53  ;;  %v3329_v3 = vrot.slane %v3321_v20, %v14691_v43  ;;  %v3386_v35 = vcombine.low %v3378_v14, %v3385_v55  ;;  %v3763_v54 = vcombine.low %v3754_v12, %v3761_v17 }
 0x188   : > { %v3705_v48 = vrot.slane %v13645_v6, %v14691_v43  ;;  %v3712_v59 = vrot.slane %v3684_v34, %v14691_v43  ;;  %v3740_v58 = vrot.slane %v13646_v18, %v14691_v43  ;;  %13875 = vmatprep.mubr.msk.bf16.mxu0 %vm14258_vm6, %v22521_v24  ;;  %v2405_v37 = vcombine.high %v2389_v7, %v2389_v7 }
 0x189   : > { %v3713_v15 = vcombine.low %v3691_v61, %v3698_v30  ;;  %v3337_v56 = vcombine.low %v3329_v3, %v3336_v21  ;;  %v3777_v25 = vrot.slane %v3763_v54, %v14691_v43  ;;  %v7159_v0 = vcombine.high %v22521_v24, %v22521_v24 }
 0x18a   : > { %v3714_v33 = vcombine.low %v3705_v48, %v3712_v59  ;;  %v3762_v38 = vcombine.low %v3740_v58, %v3747_v47  ;;  %v3785_v31 = vrot.slane %v2405_v37, %v14691_v43  ;;  %v7166_v8 = vrot.slane %v22521_v24, %v14597_v51 }
 0x18b   : > { %v3831_v19 = vpack.c.bf16 %v3386_v35, %v3337_v56  ;;  %v3721_v10 = vrot.slane %v3713_v15, %v14691_v43  ;;  %v7173_v22 = vrot.slane %v7159_v0, %v14597_v51  ;;  %v15742_v42 = vsub.s32 1, %v22549_v60 }
 0x18c   : > { %v3728_v20 = vrot.slane %v3714_v33, %v14691_v43  ;;  %v3770_v36 = vrot.slane %v3762_v38, %v14691_v43  ;;  %v3792_v45 = vrot.slane %v3785_v31, %v14691_v43  ;;  %v7174_v9 = vcombine.high %v7166_v8, %v7166_v8 }
 0x18d   : > { %v15751_v49 = vrot.slane %v7166_v8, %v15742_v42  ;;  %v15757_v1 = vsub.s32 0, %v22549_v60  ;;  %v15759_v23 = vstv %s442_s28  ;;  %v7175_v29 = vcombine.high %v7173_v22, %v7173_v22  ;;  %s14263_s28 = smov 24  }
 0x18e   : > { %v3729_v46 = vcombine.low %v3721_v10, %v3728_v20  ;;  %v3778_v11 = vcombine.low %v3770_v36, %v3777_v25  ;;  %v3836_v7 = vpack.c.bf16 %v3792_v45, %v3792_v45  ;;  %v15754_v50 = vrot.slane %v7174_v9, %v15742_v42  ;;  %22550 = vst [vmem:[#allocation21_spill] sm:$0xff] %v15759_v23 }
 0x18f   : > { %13876 = vmatmul.mubr.msk.bf16.gmra.mrb[36].mxu0 %vm21973_vm7, %v3831_v19  ;;  %v15764_v4 = vrot.slane %v7174_v9, %v15757_v1  ;;  %v15767_v14 = vrot.slane %v7173_v22, %v15742_v42  ;;  %v15770_v55 = vrot.slane %v7173_v22, %v15757_v1  ;;  %v15778_v21 = vrot.slane %v7175_v29, %v15757_v1 }
 0x190   : > { %v3835_v32 = vpack.c.bf16 %v3778_v11, %v3729_v46  ;;  %v8237_v53 = vsel %vm22114_vm10, %v15754_v50, %v15751_v49  ;;  %v15782_v34 = vrot.slane %v7175_v29, %v15742_v42  ;;  %v15794_v56 = vrot.slane %v7166_v8, %v15757_v1 }
 0x191   : > { %22551 = vst [vmem:[#allocation23_spill] sm:$0xff] %v15764_v4  ;;  %22552 = vst [vmem:[#allocation22_spill] sm:$0xff] %v15770_v55  ;;  %v8238_v30 = vsel %vm22035_vm12, %v15767_v14, %v8237_v53  ;;  %v8317_v3 = vsel %vm22114_vm10, %v15770_v55, %v15764_v4  ;;  %vm22062_vm4 = vcmask 1045509   ;;  %vm9274_vm9 = vcmask 228352  }
 0x192   : > { %13892 = vmatmul.mubr.msk.bf16.gmra.mrb[12].mxu1 %vm21973_vm7, %v3835_v32  ;;  %22553 = vst [vmem:[#allocation5_spill] sm:$0xff] %v15778_v21  ;;  %v8239_v33 = vsel %vm22088_vm14, %v15782_v34, %v8238_v30  ;;  %v8318_v38 = vsel %vm22035_vm12, %v15778_v21, %v8317_v3 }
 0x193   : > { %13895 = vmatprep.mubr.msk.bf16.mxu1 %vm14258_vm6, %v22521_v24 }
 0x19a   : > { %13896 = vmatmul.mubr.msk.bf16.gmra.mrb[16].mxu1 %vm21973_vm7, %v3836_v7 }
 0x1b1   : > { %v3949_v28 = vpop.f32.mrb[0].mxu0 }
 0x1b2   : > { %v4074_v40 = vmul.f32 %v15738_v13, %v3949_v28  ;;  %v13841_v24 = vpop.f32.mrb[1].mxu0 }
 0x1b3   : > { %v3952_v39 = vpop.f32.mrb[2].mxu0 }
 0x1b4   : > { %v4110_v16 = vadd.f32 %v15747_v44, %v4074_v40  ;;  %v4075_v5 = vmul.f32 %v15738_v13, %v3952_v39  ;;  %v13842_v17 = vpop.f32.mrb[3].mxu0 }
 0x1b6   : > { %vm4139_vm11 = vcmp.gt.f32.partialorder %v4110_v16, 0.0  ;;  %v4169_v27 = vmul.f32 %v15759_v23, %v4110_v16  ;;  %v4111_v6 = vadd.f32 %v15747_v44, %v4075_v5 }
 0x1b8   : > { %v4198_v12 = vsel %vm4139_vm11, %v4110_v16, %v4169_v27  ;;  %vm4140_vm13 = vcmp.gt.f32.partialorder %v4111_v6, 0.0  ;;  %v4170_v61 = vmul.f32 %v15759_v23, %v4111_v6  ;;  %vm22040_vm11 = vcmask 1046534  }
 0x1b9   : > { %v4256_v18 = vcombine.high %v4198_v12, %v4198_v12  ;;  %v4263_v47 = vrot.slane %v4198_v12, %v14691_v43 }
 0x1ba   : > { %v4199_v35 = vsel %vm4140_vm13, %v4111_v6, %v4170_v61  ;;  %v3957_v32 = vpop.f32.mrb[4].mxu0  ;;  %vm22039_vm13 = vcmask 1047559  }
 0x1bb   : > { %v4270_v54 = vrot.slane %v4256_v18, %v14691_v43  ;;  %v4271_v48 = vcombine.high %v4263_v47, %v4263_v47  ;;  %v4279_v59 = vrot.slane %v4263_v47, %v14691_v43  ;;  %v4305_v58 = vcombine.high %v4199_v35, %v4199_v35  ;;  %v13845_v8 = vpop.f32.mrb[5].mxu0 }
 0x1bc   : > { %v4312_v15 = vrot.slane %v4199_v35, %v14691_v43  ;;  %v3960_v24 = vpop.f32.mrb[6].mxu0 }
 0x1bd   : > { %v4272_v37 = vcombine.high %v4270_v54, %v4270_v54  ;;  %v4286_v19 = vrot.slane %v4270_v54, %v14691_v43  ;;  %v4293_v10 = vrot.slane %v4271_v48, %v14691_v43  ;;  %v4301_v20 = vcombine.high %v4279_v59, %v4279_v59  ;;  %v13846_v17 = vpop.f32.mrb[7].mxu0 }
 0x1be   : > { %v5642_v36 = vcombine.low %v4279_v59, %v4279_v59  ;;  %v4319_v25 = vrot.slane %v4305_v58, %v14691_v43  ;;  %v4320_v46 = vcombine.high %v4312_v15, %v4312_v15  ;;  %v4328_v11 = vrot.slane %v4312_v15, %v14691_v43 }
 0x1bf   : > { %v4300_v31 = vrot.slane %v4272_v37, %v14691_v43  ;;  %v4302_v45 = vcombine.high %v4286_v19, %v4286_v19  ;;  %v4303_v7 = vcombine.high %v4293_v10, %v4293_v10  ;;  %v5643_v0 = vcombine.low %v4293_v10, %v4301_v20 }
 0x1c0   : > { %v5652_v9 = vrot.slane %v5642_v36, %v14691_v43  ;;  %v4321_v22 = vcombine.high %v4319_v25, %v4319_v25  ;;  %v4335_v28 = vrot.slane %v4319_v25, %v14691_v43  ;;  %v4342_v40 = vrot.slane %v4320_v46, %v14691_v43 }
 0x1c1   : > { %v5644_v39 = vcombine.low %v4303_v7, %v4286_v19  ;;  %v5645_v29 = vcombine.low %v4300_v31, %v4302_v45  ;;  %v5659_v16 = vrot.slane %v5643_v0, %v14691_v43  ;;  %v4304_v5 = vcombine.high %v4300_v31, %v4300_v31 }
 0x1c2   : > { %v4349_v27 = vrot.slane %v4321_v22, %v14691_v43  ;;  %v4350_v6 = vcombine.high %v4328_v11, %v4328_v11  ;;  %v4351_v53 = vcombine.high %v4335_v28, %v4335_v28  ;;  %v4352_v12 = vcombine.high %v4342_v40, %v4342_v40 }
 0x1c3   : > { %v5666_v61 = vrot.slane %v5644_v39, %v14691_v43  ;;  %v5673_v18 = vrot.slane %v5645_v29, %v14691_v43  ;;  %v5674_v47 = vcombine.low %v5652_v9, %v5659_v16  ;;  %v5691_v30 = vcombine.low %v4304_v5, %v4328_v11 }
 0x1c4   : > { %v5692_v3 = vcombine.low %v4342_v40, %v4350_v6  ;;  %v5693_v35 = vcombine.low %v4352_v12, %v4335_v28  ;;  %v5694_v54 = vcombine.low %v4349_v27, %v4351_v53  ;;  %v4076_v58 = vmul.f32 %v15738_v13, %v3957_v32 }
 0x1c5   : > { %v5675_v48 = vcombine.low %v5666_v61, %v5673_v18  ;;  %v5701_v59 = vrot.slane %v5691_v30, %v14691_v43  ;;  %v8319_v15 = vsel %vm22088_vm14, %v15794_v56, %v8318_v38  ;;  %v8240_v20 = vsel %vm22087_vm1, %v15751_v49, %v8239_v33 }
 0x1c6   : > { %v5708_v37 = vrot.slane %v5692_v3, %v14691_v43  ;;  %v5715_v19 = vrot.slane %v5693_v35, %v14691_v43  ;;  %v5722_v10 = vrot.slane %v5694_v54, %v14691_v43  ;;  %v5682_v36 = vrot.slane %v5674_v47, %v14691_v43 }
 0x1c7   : > { %v5689_v25 = vrot.slane %v5675_v48, %v14691_v43  ;;  %v4112_v46 = vadd.f32 %v15747_v44, %v4076_v58  ;;  %v4077_v11 = vmul.f32 %v15738_v13, %v3960_v24  ;;  %v8320_v38 = vsel %vm22087_vm1, %v15764_v4, %v8319_v15 }
 0x1c8   : > { %v5723_v32 = vcombine.low %v5701_v59, %v5708_v37  ;;  %v5724_v31 = vcombine.low %v5715_v19, %v5722_v10  ;;  %v13669_v8 = vcombine.high %v4349_v27, %v4349_v27  ;;  %v8241_v9 = vsel %vm22062_vm4, %v15754_v50, %v8240_v20 }
 0x1c9   : > { %v5690_v45 = vcombine.low %v5682_v36, %v5689_v25  ;;  %vm4141_vm6 = vcmp.gt.f32.partialorder %v4112_v46, 0.0  ;;  %v4171_v7 = vmul.f32 %v15759_v23, %v4112_v46  ;;  %v4113_v49 = vadd.f32 %v15747_v44, %v4077_v11 }
 0x1ca   : > { %v5731_v33 = vrot.slane %v5723_v32, %v14691_v43  ;;  %v5738_v0 = vrot.slane %v5724_v31, %v14691_v43  ;;  %v8321_v16 = vsel %vm22062_vm4, %v15770_v55, %v8320_v38  ;;  %v8242_v12 = vsel %vm22040_vm11, %v15767_v14, %v8241_v9 }
 0x1cb   : > { %v7128_v22 = vsel %vm7127_vm15, 0.0, %v5690_v45  ;;  %v4200_v28 = vsel %vm4141_vm6, %v4112_v46, %v4171_v7  ;;  %vm4142_vm8 = vcmp.gt.f32.partialorder %v4113_v49, 0.0  ;;  %v4172_v40 = vmul.f32 %v15759_v23, %v4113_v49 }
 0x1cc   : > { %v7176_v24 = vcombine.high %v7128_v22, %v7128_v22  ;;  %v5739_v39 = vcombine.low %v5731_v33, %v5738_v0  ;;  %v4354_v29 = vcombine.high %v4200_v28, %v4200_v28  ;;  %v15838_v5 = vrot.slane %v7128_v22, %v14597_v51 }
 0x1cd   : > { %v4361_v17 = vrot.slane %v4200_v28, %v14691_v43  ;;  %v4201_v27 = vsel %vm4142_vm8, %v4113_v49, %v4172_v40  ;;  %v5750_v18 = vrot.slane %v13669_v8, %v14691_v43  ;;  %v8322_v47 = vsel %vm22040_vm11, %v15778_v21, %v8321_v16 }
 0x1ce   : > { %v4368_v50 = vrot.slane %v4354_v29, %v14691_v43  ;;  %v4403_v6 = vcombine.high %v4201_v27, %v4201_v27  ;;  %v4410_v53 = vrot.slane %v4201_v27, %v14691_v43  ;;  %v13701_v30 = vcombine.low %v5738_v0, %v5738_v0 }
 0x1cf   : > { %v4369_v61 = vcombine.high %v4361_v17, %v4361_v17  ;;  %v15850_v48 = vrot.slane %v7176_v24, %v14597_v51  ;;  %v4377_v59 = vrot.slane %v4361_v17, %v14691_v43  ;;  %v15857_v15 = vcombine.high %v15838_v5, %v15838_v5 }
 0x1d0   : > { %v4370_v3 = vcombine.high %v4368_v50, %v4368_v50  ;;  %v4417_v35 = vrot.slane %v4403_v6, %v14691_v43  ;;  %v4418_v54 = vcombine.high %v4410_v53, %v4410_v53  ;;  %v4384_v58 = vrot.slane %v4368_v50, %v14691_v43 }
 0x1d1   : > { %v4391_v14 = vrot.slane %v4369_v61, %v14691_v43  ;;  %v4426_v10 = vrot.slane %v4410_v53, %v14691_v43  ;;  %v15864_v11 = vrot.slane %v5739_v39, %v14597_v51  ;;  %v15873_v0 = vcombine.high %v15850_v48, %v15850_v48 }
 0x1d2   : > { %v4398_v37 = vrot.slane %v4370_v3, %v14691_v43  ;;  %v4419_v19 = vcombine.high %v4417_v35, %v4417_v35  ;;  %v4440_v20 = vrot.slane %v4418_v54, %v14691_v43  ;;  %v4433_v46 = vrot.slane %v4417_v35, %v14691_v43 }
 0x1d3   : > { %v5741_v36 = vcombine.low %v4377_v59, %v4391_v14  ;;  %v13670_v25 = vcombine.high %v4377_v59, %v4391_v14  ;;  %v15880_v39 = vrot.slane %v13701_v30, %v14597_v51  ;;  %v15884_v29 = vcombine.high %v15864_v11, %v15864_v11 }
 0x1d4   : > { %v5743_v32 = vcombine.low %v4384_v58, %v4398_v37  ;;  %v13671_v31 = vcombine.high %v4384_v58, %v4398_v37  ;;  %v15867_v38 = vrot.slane %v4419_v19, %v14691_v43  ;;  %v5790_v45 = vcombine.low %v4426_v10, %v4440_v20 }
 0x1d5   : > { %v5757_v7 = vrot.slane %v5741_v36, %v14691_v43  ;;  %v5764_v49 = vrot.slane %v13670_v25, %v14691_v43  ;;  %v13672_v33 = vcombine.high %v4426_v10, %v4440_v20  ;;  %v13673_v24 = vcombine.high %v4433_v46, %v4433_v46 }
 0x1d6   : > { %v5771_v8 = vrot.slane %v5743_v32, %v14691_v43  ;;  %v5799_v9 = vrot.slane %v13671_v31, %v14691_v43  ;;  %v5792_v22 = vcombine.low %v4433_v46, %v15867_v38  ;;  %v5806_v28 = vrot.slane %v5790_v45, %v14691_v43 }
 0x1d7   : > { %v5772_v40 = vcombine.low %v5750_v18, %v5757_v7  ;;  %v5813_v17 = vrot.slane %v13672_v33, %v14691_v43  ;;  %v8400_v6 = vrot.slane %v15838_v5, %v15757_v1  ;;  %v15892_v53 = vrot.slane %v15857_v15, %v15757_v1 }
 0x1d8   : > { %v5773_v16 = vcombine.low %v5764_v49, %v5771_v8  ;;  %v5820_v27 = vrot.slane %v5792_v22, %v14691_v43  ;;  %v5821_v50 = vcombine.low %v5799_v9, %v5806_v28  ;;  %v15896_v61 = vrot.slane %v15850_v48, %v15757_v1 }
 0x1d9   : > { %v15900_v18 = vrot.slane %v15873_v0, %v15757_v1  ;;  %v5780_v30 = vrot.slane %v5772_v40, %v14691_v43  ;;  %v15906_v54 = vsel %vm22039_vm13, %v15782_v34, %v8242_v12  ;;  %v15911_v58 = vsel %vm22039_vm13, %v15794_v56, %v8322_v47  ;;  %v3965_v31 = vpop.f32.mrb[8].mxu0 }
 0x1da   : > { %v5787_v3 = vrot.slane %v5773_v16, %v14691_v43  ;;  %v5822_v35 = vcombine.low %v5813_v17, %v5820_v27  ;;  %22554 = vst [vmem:[#allocation24_spill] sm:$0xff] %v15906_v54  ;;  %v5829_v59 = vrot.slane %v5821_v50, %v14691_v43  ;;  %22555 = vst [vmem:[#allocation25_spill] sm:$0xff] %v15911_v58  ;;  %v13849_v9 = vpop.f32.mrb[9].mxu0 }
 0x1db   : > { %v15915_v14 = vcombine.high %v15880_v39, %v15880_v39  ;;  %v8653_v37 = vsel %vm22114_vm10, %v15892_v53, %v8400_v6  ;;  %v15922_v34 = vrot.slane %v15864_v11, %v15757_v1  ;;  %v15927_v47 = vrot.slane %v13673_v24, %v14691_v43  ;;  %v3968_v40 = vpop.f32.mrb[10].mxu0 }
 0x1dc   : > { %v5788_v19 = vcombine.low %v5780_v30, %v5787_v3  ;;  %v5836_v10 = vrot.slane %v5822_v35, %v14691_v43  ;;  %v8654_v12 = vsel %vm22035_vm12, %v15896_v61, %v8653_v37  ;;  %v15931_v20 = vrot.slane %v15884_v29, %v15757_v1  ;;  %v13850_v6 = vpop.f32.mrb[11].mxu0 }
 0x1dd   : > { %22556 = vst [vmem:[#allocation6_spill] sm:$0xff] %v15922_v34  ;;  %v15935_v36 = vrot.slane %v15880_v39, %v15757_v1  ;;  %v8655_v25 = vsel %vm22088_vm14, %v15900_v18, %v8654_v12  ;;  %v4078_v8 = vmul.f32 %v15738_v13, %v3965_v31  ;;  %v4451_v28 = vcombine.high %v15867_v38, %v15867_v38 }
 0x1de   : > { %22557 = vst [vmem:[#allocation36_spill] sm:$0xff] %v15931_v20  ;;  %v7129_v46 = vsel %vm7127_vm15, 0.0, %v5788_v19  ;;  %v5837_v32 = vcombine.low %v5829_v59, %v5836_v10  ;;  %v13702_v45 = vcombine.low %v5836_v10, %v5836_v10  ;;  %v8656_v7 = vsel %vm22087_vm1, %v15922_v34, %v8655_v25 }
 0x1df   : > { %22558 = vst [vmem:[#allocation37_spill] sm:$0xff] %v15935_v36  ;;  %v7210_v49 = vcombine.high %v7129_v46, %v7129_v46  ;;  %v15943_v33 = vrot.slane %v7129_v46, %v14597_v51  ;;  %v8657_v22 = vsel %vm22062_vm4, %v15931_v20, %v8656_v7  ;;  %v4114_v27 = vadd.f32 %v15747_v44, %v4078_v8 }
 0x1e0   : > { %v15951_v24 = vrot.slane %v5837_v32, %v14597_v51  ;;  %v15954_v16 = vrot.slane %v13702_v45, %v14597_v51  ;;  %v15958_v17 = vsel %vm22040_vm11, %v15935_v36, %v8657_v22  ;;  %v4079_v50 = vmul.f32 %v15738_v13, %v3968_v40 }
 0x1e1   : > { %22559 = vst [vmem:[#allocation38_spill] sm:$0xff] %v15943_v33  ;;  %v15963_v30 = vrot.slane %v7210_v49, %v14597_v51  ;;  %v15967_v38 = vcombine.high %v15943_v33, %v15943_v33  ;;  %v15971_v3 = vrot.slane %v15915_v14, %v15757_v1  ;;  %vm4143_vm6 = vcmp.gt.f32.partialorder %v4114_v27, 0.0 }
 0x1e2   : > { %v4173_v19 = vmul.f32 %v15759_v23, %v4114_v27  ;;  %v4115_v10 = vadd.f32 %v15747_v44, %v4079_v50  ;;  %v15983_v12 = vcombine.high %v15951_v24, %v15951_v24  ;;  %v15991_v46 = vcombine.high %v15954_v16, %v15954_v16 }
 0x1e3   : > { %v15987_v25 = vcombine.high %v15963_v30, %v15963_v30  ;;  %v8020_v49 = vrot.slane %v15967_v38, %v15742_v42  ;;  %v8016_v22 = vrot.slane %v15943_v33, %v15742_v42  ;;  %v8024_v6 = vrot.slane %v15963_v30, %v15742_v42 }
 0x1e4   : > { %v4202_v45 = vsel %vm4143_vm6, %v4114_v27, %v4173_v19  ;;  %vm4144_vm8 = vcmp.gt.f32.partialorder %v4115_v10, 0.0  ;;  %v4174_v7 = vmul.f32 %v15759_v23, %v4115_v10 }
 0x1e5   : > { %v4452_v8 = vcombine.high %v4202_v45, %v4202_v45  ;;  %v4459_v9 = vrot.slane %v4202_v45, %v14691_v43  ;;  %v8244_v35 = vsel %vm22114_vm10, %v8020_v49, %v8016_v22 }
 0x1e6   : > { %v4203_v50 = vsel %vm4144_vm8, %v4115_v10, %v4174_v7 }
 0x1e7   : > { %v4466_v31 = vrot.slane %v4452_v8, %v14691_v43  ;;  %v4467_v32 = vcombine.high %v4459_v9, %v4459_v9  ;;  %v4475_v45 = vrot.slane %v4459_v9, %v14691_v43  ;;  %v4501_v37 = vcombine.high %v4203_v50, %v4203_v50  ;;  %v3973_v63 = vpop.f32.mrb[12].mxu0 }
 0x1e8   : > { %v4508_v59 = vrot.slane %v4203_v50, %v14691_v43  ;;  %v13853_v57 = vpop.f32.mrb[13].mxu0  ;;  %v4080_v55 = vmul.f32 %v15738_v13, %v3973_v63  ;;  %v16041_v63 = vrot.slane %v15967_v38, %v15757_v1 }
 0x1e9   : > { %v4468_v27 = vcombine.high %v4466_v31, %v4466_v31  ;;  %v4482_v40 = vrot.slane %v4466_v31, %v14691_v43  ;;  %v4489_v19 = vrot.slane %v4467_v32, %v14691_v43  ;;  %v4497_v8 = vcombine.high %v4475_v45, %v4475_v45  ;;  %v3976_v32 = vpop.f32.mrb[14].mxu0 }
 0x1ea   : > { %v5839_v2 = vcombine.low %v4451_v28, %v4475_v45  ;;  %v4515_v9 = vrot.slane %v4501_v37, %v14691_v43  ;;  %v4516_v26 = vcombine.high %v4508_v59, %v4508_v59  ;;  %v4524_v50 = vrot.slane %v4508_v59, %v14691_v43  ;;  %v13854_v60 = vpop.f32.mrb[15].mxu0 }
 0x1eb   : > { %v4496_v10 = vrot.slane %v4468_v27, %v14691_v43  ;;  %v4498_v41 = vcombine.high %v4482_v40, %v4482_v40  ;;  %v4499_v62 = vcombine.high %v4489_v19, %v4489_v19  ;;  %v5840_v7 = vcombine.low %v4489_v19, %v4497_v8 }
 0x1ec   : > { %v5855_v49 = vrot.slane %v5839_v2, %v14691_v43  ;;  %v4517_v22 = vcombine.high %v4515_v9, %v4515_v9  ;;  %v4538_v31 = vrot.slane %v4516_v26, %v14691_v43  ;;  %v8245_v28 = vsel %vm22035_vm12, %v8024_v6, %v8244_v35 }
 0x1ed   : > { %v5841_v45 = vcombine.low %v4499_v62, %v4482_v40  ;;  %v5887_v37 = vcombine.low %v4496_v10, %v4498_v41  ;;  %v4500_v52 = vcombine.high %v4496_v10, %v4496_v10  ;;  %v4531_v59 = vrot.slane %v4515_v9, %v14691_v43 }
 0x1ee   : > { %v5870_v27 = vcombine.low %v15927_v47, %v5855_v49  ;;  %v4545_v21 = vrot.slane %v4517_v22, %v14691_v43  ;;  %v4546_v19 = vcombine.high %v4524_v50, %v4524_v50  ;;  %v4548_v57 = vcombine.high %v4538_v31, %v4538_v31 }
 0x1ef   : > { %v5862_v2 = vrot.slane %v5840_v7, %v14691_v43  ;;  %v5869_v8 = vrot.slane %v5841_v45, %v14691_v43  ;;  %v5888_v26 = vcombine.low %v4500_v52, %v4524_v50  ;;  %v5897_v41 = vrot.slane %v5887_v37, %v14691_v43  ;;  %v3981_v52 = vpop.f32.mrb[16].mxu0 }
 0x1f0   : > { %v5889_v35 = vcombine.low %v4538_v31, %v4546_v19  ;;  %v5890_v62 = vcombine.low %v4548_v57, %v4531_v59  ;;  %v5936_v40 = vcombine.low %v4545_v21, %v4545_v21  ;;  %v13674_v47 = vcombine.high %v4531_v59, %v4545_v21  ;;  %v13857_v21 = vpop.f32.mrb[17].mxu0 }
 0x1f1   : > { %v5871_v6 = vcombine.low %v5862_v2, %v5869_v8  ;;  %v5904_v60 = vrot.slane %v5888_v26, %v14691_v43  ;;  %v4116_v10 = vadd.f32 %v15747_v44, %v4080_v55  ;;  %v4081_v49 = vmul.f32 %v15738_v13, %v3976_v32  ;;  %v3984_v32 = vpop.f32.mrb[18].mxu0 }
 0x1f2   : > { %v5911_v9 = vrot.slane %v5889_v35, %v14691_v43  ;;  %v5918_v7 = vrot.slane %v5890_v62, %v14691_v43  ;;  %v5878_v50 = vrot.slane %v5870_v27, %v14691_v43  ;;  %v5946_v55 = vrot.slane %v5936_v40, %v14691_v43  ;;  %v13858_v2 = vpop.f32.mrb[19].mxu0 }
 0x1f3   : > { %v5885_v22 = vrot.slane %v5871_v6, %v14691_v43  ;;  %v5919_v31 = vcombine.low %v5897_v41, %v5904_v60  ;;  %vm4145_vm6 = vcmp.gt.f32.partialorder %v4116_v10, 0.0  ;;  %v4175_v37 = vmul.f32 %v15759_v23, %v4116_v10 }
 0x1f4   : > { %v5920_v45 = vcombine.low %v5911_v9, %v5918_v7  ;;  %v4117_v59 = vadd.f32 %v15747_v44, %v4081_v49  ;;  %v5953_v38 = vrot.slane %v13674_v47, %v14691_v43  ;;  %v4082_v27 = vmul.f32 %v15738_v13, %v3981_v52 }
 0x1f5   : > { %v5886_v19 = vcombine.low %v5878_v50, %v5885_v22  ;;  %v5927_v57 = vrot.slane %v5919_v31, %v14691_v43  ;;  %v4204_v26 = vsel %vm4145_vm6, %v4116_v10, %v4175_v37  ;;  %v4083_v40 = vmul.f32 %v15738_v13, %v3984_v32 }
 0x1f6   : > { %v16052_v8 = vrot.slane %v5920_v45, %v14691_v43  ;;  %vm4146_vm8 = vcmp.gt.f32.partialorder %v4117_v59, 0.0  ;;  %v4176_v35 = vmul.f32 %v15759_v23, %v4117_v59  ;;  %v4550_v62 = vcombine.high %v4204_v26, %v4204_v26 }
 0x1f7   : > { %v4557_v41 = vrot.slane %v4204_v26, %v14691_v43  ;;  %v22560_v6 = vrot.slane %v15987_v25, %v15742_v42  ;;  %v16066_v10 = vrot.slane %v15963_v30, %v15757_v1  ;;  %v16070_v7 = vrot.slane %v15987_v25, %v15757_v1 }
 0x1f8   : > { %v16062_v47 = vcombine.low %v5927_v57, %v16052_v8  ;;  %v4205_v9 = vsel %vm4146_vm8, %v4117_v59, %v4176_v35  ;;  %v5968_v49 = vcombine.low %v5946_v55, %v5953_v38  ;;  %v4564_v52 = vrot.slane %v4550_v62, %v14691_v43 }
 0x1f9   : > { %v8246_v60 = vsel %vm22088_vm14, %v22560_v6, %v8245_v28  ;;  %v4565_v50 = vcombine.high %v4557_v41, %v4557_v41  ;;  %v4599_v22 = vcombine.high %v4205_v9, %v4205_v9  ;;  %v4573_v31 = vrot.slane %v4557_v41, %v14691_v43 }
 0x1fa   : > { %v4606_v28 = vrot.slane %v4205_v9, %v14691_v43  ;;  %v4118_v21 = vadd.f32 %v15747_v44, %v4082_v27  ;;  %v22561_v45 = vrot.slane %v15951_v24, %v15742_v42  ;;  %v4566_v37 = vcombine.high %v4564_v52, %v4564_v52 }
 0x1fb   : > { %v4587_v25 = vrot.slane %v4565_v50, %v14691_v43  ;;  %v4613_v55 = vrot.slane %v4599_v22, %v14691_v43  ;;  %v4119_v59 = vadd.f32 %v15747_v44, %v4083_v40  ;;  %v4580_v32 = vrot.slane %v4564_v52, %v14691_v43 }
 0x1fc   : > { %v8247_v30 = vsel %vm22087_vm1, %v22561_v45, %v8246_v60  ;;  %v4614_v57 = vcombine.high %v4606_v28, %v4606_v28  ;;  %vm4147_vm6 = vcmp.gt.f32.partialorder %v4118_v21, 0.0  ;;  %v4177_v38 = vmul.f32 %v15759_v23, %v4118_v21 }
 0x1fd   : > { %v4594_v27 = vrot.slane %v4566_v37, %v14691_v43  ;;  %v5938_v2 = vcombine.low %v4573_v31, %v4587_v25  ;;  %v13675_v26 = vcombine.high %v4573_v31, %v4587_v25  ;;  %v4615_v35 = vcombine.high %v4613_v55, %v4613_v55 }
 0x1fe   : > { %v4622_v62 = vrot.slane %v4606_v28, %v14691_v43  ;;  %v4629_v41 = vrot.slane %v4613_v55, %v14691_v43  ;;  %v4636_v6 = vrot.slane %v4614_v57, %v14691_v43  ;;  %v4206_v60 = vsel %vm4147_vm6, %v4118_v21, %v4177_v38 }
 0x1ff   : > { %v5960_v40 = vrot.slane %v5938_v2, %v14691_v43  ;;  %v5967_v9 = vrot.slane %v13675_v26, %v14691_v43  ;;  %v5985_v52 = vcombine.low %v4580_v32, %v4594_v27  ;;  %v13676_v50 = vcombine.high %v4580_v32, %v4594_v27 }
 0x200   : > { %v4643_v22 = vrot.slane %v4615_v35, %v14691_v43  ;;  %v4645_v45 = vcombine.high %v4629_v41, %v4629_v41  ;;  %v5987_v37 = vcombine.low %v4622_v62, %v4636_v6  ;;  %v13677_v4 = vcombine.high %v4622_v62, %v4636_v6 }
 0x201   : > { %v16093_v31 = vsel %vm7127_vm15, 0.0, %v5886_v19  ;;  %v5969_v28 = vcombine.low %v5960_v40, %v5967_v9  ;;  %v5995_v25 = vrot.slane %v5985_v52, %v14691_v43  ;;  %v6002_v55 = vrot.slane %v13676_v50, %v14691_v43 }
 0x202   : > { %v5976_v21 = vrot.slane %v5968_v49, %v14691_v43  ;;  %v6009_v57 = vrot.slane %v5987_v37, %v14691_v43  ;;  %v6016_v38 = vrot.slane %v13677_v4, %v14691_v43  ;;  %v6035_v32 = vcombine.low %v4643_v22, %v4645_v45 }
 0x203   : > { %v5983_v27 = vrot.slane %v5969_v28, %v14691_v43  ;;  %v6017_v2 = vcombine.low %v5995_v25, %v6002_v55  ;;  %v4648_v26 = vcombine.high %v4206_v60, %v4206_v60  ;;  %vm4148_vm8 = vcmp.gt.f32.partialorder %v4119_v59, 0.0 }
 0x204   : > { %v6018_v35 = vcombine.low %v6009_v57, %v6016_v38  ;;  %v6034_v19 = vcombine.low %v4629_v41, %v4629_v41  ;;  %v4655_v62 = vrot.slane %v4206_v60, %v14691_v43  ;;  %v4178_v6 = vmul.f32 %v15759_v23, %v4119_v59 }
 0x205   : > { %v5984_v40 = vcombine.low %v5976_v21, %v5983_v27  ;;  %v6025_v9 = vrot.slane %v6017_v2, %v14691_v43  ;;  %v4662_v49 = vrot.slane %v4648_v26, %v14691_v43  ;;  %v22562_v4 = vrot.slane %v15983_v12, %v15742_v42 }
 0x206   : > { %v6032_v50 = vrot.slane %v6018_v35, %v14691_v43  ;;  %v6051_v45 = vrot.slane %v6035_v32, %v14691_v43  ;;  %v4663_v37 = vcombine.high %v4655_v62, %v4655_v62  ;;  %v4671_v41 = vrot.slane %v4655_v62, %v14691_v43 }
 0x207   : > { %v8248_v52 = vsel %vm22062_vm4, %v22562_v4, %v8247_v30  ;;  %v7131_v60 = vsel %vm7127_vm15, 0.0, %v5984_v40  ;;  %v4664_v28 = vcombine.high %v4662_v49, %v4662_v49  ;;  %v4678_v25 = vrot.slane %v4662_v49, %v14691_v43  ;;  %v16121_v49 = vpop.f32.mrb[20].mxu0 }
 0x208   : > { %v4207_v55 = vsel %vm4148_vm8, %v4119_v59, %v4178_v6  ;;  %v7278_v21 = vcombine.high %v7131_v60, %v7131_v60  ;;  %v6033_v57 = vcombine.low %v6025_v9, %v6032_v50  ;;  %v6044_v38 = vrot.slane %v6034_v19, %v14691_v43  ;;  %v13861_v9 = vpop.f32.mrb[21].mxu0 }
 0x209   : > { %v4647_v27 = vcombine.high %v4643_v22, %v4643_v22  ;;  %v4685_v30 = vrot.slane %v4663_v37, %v14691_v43  ;;  %v4692_v2 = vrot.slane %v4664_v28, %v14691_v43  ;;  %v4693_v32 = vcombine.high %v4671_v41, %v4671_v41 }
 0x20a   : > { %v4694_v26 = vcombine.high %v4678_v25, %v4678_v25  ;;  %v16119_v35 = vrot.slane %v7131_v60, %v14597_v51  ;;  %v6066_v62 = vcombine.low %v6044_v38, %v6051_v45  ;;  %v4697_v4 = vcombine.high %v4207_v55, %v4207_v55 }
 0x20b   : > { %v6036_v40 = vcombine.low %v4647_v27, %v4671_v41  ;;  %v16124_v59 = vrot.slane %v7278_v21, %v14597_v51  ;;  %v4695_v6 = vcombine.high %v4685_v30, %v4685_v30  ;;  %v6037_v19 = vcombine.low %v4685_v30, %v4693_v32  ;;  %v16132_v41 = vpop.f32.mrb[22].mxu0 }
 0x20c   : > { %22563 = vst [vmem:[#allocation39_spill] sm:$0xff] %v16119_v35  ;;  %v6084_v22 = vcombine.low %v4692_v2, %v4694_v26  ;;  %v4696_v37 = vcombine.high %v4692_v2, %v4692_v2  ;;  %v4704_v28 = vrot.slane %v4207_v55, %v14691_v43  ;;  %v4711_v33 = vrot.slane %v4697_v4, %v14691_v43  ;;  %v13862_v55 = vpop.f32.mrb[23].mxu0 }
 0x20d   : > { %v22564_v60 = vrot.slane %v15954_v16, %v15742_v42  ;;  %v6058_v38 = vrot.slane %v6036_v40, %v14691_v43  ;;  %v6065_v21 = vrot.slane %v6037_v19, %v14691_v43  ;;  %v6083_v27 = vcombine.low %v4695_v6, %v4678_v25 }
 0x20e   : > { %v22565_v30 = vrot.slane %v15991_v46, %v15742_v42  ;;  %v6100_v32 = vrot.slane %v6084_v22, %v14691_v43  ;;  %v4712_v26 = vcombine.high %v4704_v28, %v4704_v28  ;;  %v4713_v4 = vcombine.high %v4711_v33, %v4711_v33 }
 0x20f   : > { %v8249_v45 = vsel %vm22040_vm11, %v22564_v60, %v8248_v52  ;;  %v4720_v52 = vrot.slane %v4704_v28, %v14691_v43  ;;  %v6067_v9 = vcombine.low %v6058_v38, %v6065_v21  ;;  %v6093_v60 = vrot.slane %v6083_v27, %v14691_v43 }
 0x210   : > { %v16140_v2 = vsel %vm22039_vm13, %v22565_v30, %v8249_v45  ;;  %v4727_v40 = vrot.slane %v4711_v33, %v14691_v43  ;;  %v4734_v6 = vrot.slane %v4712_v26, %v14691_v43  ;;  %v4741_v19 = vrot.slane %v4713_v4, %v14691_v43 }
 0x211   : > { %v13970_v25 = vpack.i.bf16 %v16140_v2, %v15906_v54  ;;  %v4742_v45 = vcombine.high %v4720_v52, %v4720_v52  ;;  %v6085_v30 = vcombine.low %v4696_v37, %v4720_v52  ;;  %v6074_v22 = vrot.slane %v6066_v62, %v14691_v43 }
 0x212   : > { %v16152_v55 = vrot.slane %v6033_v57, %v14597_v51  ;;  %v6081_v28 = vrot.slane %v6067_v9, %v14691_v43  ;;  %v13704_v33 = vcombine.low %v6032_v50, %v6032_v50  ;;  %v13678_v27 = vcombine.high %v4734_v6, %v4734_v6 }
 0x213   : > { %13971 = vrot.lane.b32.xlu0 %v13970_v25, %s14259_s18  ;;  %v6086_v38 = vcombine.low %v4734_v6, %v4742_v45  ;;  %v6107_v21 = vrot.slane %v6085_v30, %v14691_v43  ;;  %v6133_v26 = vcombine.low %v4727_v40, %v4741_v19  ;;  %v7293_v37 = vcombine.high %v16119_v35, %v16119_v35 }
 0x214   : > { %v6082_v54 = vcombine.low %v6074_v22, %v6081_v28  ;;  %v7294_v62 = vcombine.high %v16124_v59, %v16124_v59  ;;  %v7309_v57 = vrot.slane %v13704_v33, %v14597_v51  ;;  %v6115_v4 = vcombine.low %v6093_v60, %v6100_v32 }
 0x215   : > { %v6114_v52 = vrot.slane %v6086_v38, %v14691_v43  ;;  %v13679_v9 = vcombine.high %v4727_v40, %v4741_v19  ;;  %v16165_v50 = vrot.slane %v15951_v24, %v15757_v1  ;;  %v16171_v6 = vrot.slane %v16093_v31, %v14597_v51  ;;  %v16178_v24 = vpop.f32.mrb[24].mxu0 }
 0x216   : > { %v7132_v45 = vsel %vm7127_vm15, 0.0, %v6082_v54  ;;  %v6149_v30 = vrot.slane %v6133_v26, %v14691_v43  ;;  %v6142_v32 = vrot.slane %v13678_v27, %v14691_v43  ;;  %v7310_v60 = vcombine.high %v16152_v55, %v16152_v55  ;;  %22566 = vst [vmem:[#allocation40_spill] sm:$0xff] %v16178_v24  ;;  %v13865_v38 = vpop.f32.mrb[25].mxu0 }
 0x217   : > { %v6116_v22 = vcombine.low %v6107_v21, %v6114_v52  ;;  %v7311_v40 = vcombine.high %v7309_v57, %v7309_v57  ;;  %v8048_v19 = vrot.slane %v16119_v35, %v15742_v42  ;;  %v8052_v28 = vrot.slane %v7293_v37, %v15742_v42  ;;  %v16193_v25 = vpop.f32.mrb[26].mxu0 }
 0x218   : > { %v8056_v33 = vrot.slane %v16124_v59, %v15742_v42  ;;  %v8060_v54 = vrot.slane %v7294_v62, %v15742_v42  ;;  %v6123_v21 = vrot.slane %v6115_v4, %v14691_v43  ;;  %v7312_v27 = vcombine.high %v7132_v45, %v7132_v45  ;;  %22568 = vst [vmem:[#allocation42_spill] sm:$0xff] %v16193_v25  ;;  %v13866_v20 = vpop.f32.mrb[27].mxu0 }
 0x219   : > { %v16188_v26 = vrot.slane %v6116_v22, %v14691_v43  ;;  %v16191_v52 = vrot.slane %v13679_v9, %v14691_v43  ;;  %v16196_v24 = vrot.slane %v7132_v45, %v14597_v51  ;;  %v6164_v35 = vcombine.low %v6142_v32, %v6149_v30 }
 0x21a   : > { %v8064_v36 = vrot.slane %v16152_v55, %v15742_v42  ;;  %v8251_v38 = vsel %vm22114_vm10, %v8052_v28, %v8048_v19  ;;  %v8068_v22 = vrot.slane %v7310_v60, %v15742_v42  ;;  %v8072_v34 = vrot.slane %v7309_v57, %v15742_v42 }
 0x21b   : > { %22567 = vst [vmem:[#allocation41_spill] sm:$0xff] %v16188_v26  ;;  %22569 = vst [vmem:[#allocation43_spill] sm:$0xff] %v16196_v24  ;;  %v6131_v4 = vcombine.low %v6123_v21, %v16188_v26  ;;  %v8252_v9 = vsel %vm22035_vm12, %v8056_v33, %v8251_v38  ;;  %v8076_v25 = vrot.slane %v7311_v40, %v15742_v42 }
 0x21c   : > { %v8253_v45 = vsel %vm22088_vm14, %v8060_v54, %v8252_v9  ;;  %v16209_v30 = vrot.slane %v15983_v12, %v15757_v1  ;;  %v8324_v20 = vsel %vm22114_vm10, %v16066_v10, %v16041_v63  ;;  %v16217_v19 = vrot.slane %v15954_v16, %v15757_v1 }
 0x21d   : > { %v8254_v32 = vsel %vm22087_vm1, %v8064_v36, %v8253_v45  ;;  %v8325_v28 = vsel %vm22035_vm12, %v16070_v7, %v8324_v20  ;;  %v16222_v33 = vrot.slane %v7293_v37, %v15757_v1  ;;  %v16229_v21 = vrot.slane %v16124_v59, %v15757_v1 }
 0x21e   : > { %22570 = vst [vmem:[#allocation44_spill] sm:$0xff] %v16209_v30  ;;  %22571 = vst [vmem:[#allocation45_spill] sm:$0xff] %v16217_v19  ;;  %v8255_v54 = vsel %vm22062_vm4, %v8068_v22, %v8254_v32  ;;  %v8326_v12 = vsel %vm22088_vm14, %v16165_v50, %v8325_v28  ;;  %v16232_v36 = vrot.slane %v7294_v62, %v15757_v1 }
 0x21f   : > { %v16235_v16 = vrot.slane %v7312_v27, %v14597_v51  ;;  %v8256_v38 = vsel %vm22040_vm11, %v8072_v34, %v8255_v54  ;;  %v16240_v37 = vrot.slane %v15991_v46, %v15757_v1  ;;  %v8327_v22 = vsel %vm22087_vm1, %v16209_v30, %v8326_v12 }
 0x220   : > { %22572 = vst [vmem:[#allocation46_spill] sm:$0xff] %v16232_v36  ;;  %v16246_v9 = vcombine.high %v16196_v24, %v16196_v24  ;;  %v16249_v59 = vrot.slane %v6164_v35, %v14691_v43  ;;  %v16252_v62 = vsel %vm22039_vm13, %v8076_v25, %v8256_v38  ;;  %v8328_v34 = vsel %vm22062_vm4, %v16217_v19, %v8327_v22 }
 0x221   : > { %22573 = vst [vmem:[#allocation47_spill] sm:$0xff] %v16235_v16  ;;  %22574 = vst [vmem:[#allocation48_spill] sm:$0xff] %v16240_v37  ;;  %v8329_v46 = vsel %vm22040_vm11, %v16240_v37, %v8328_v34  ;;  %v16260_v27 = vrot.slane %v16152_v55, %v15757_v1  ;;  %v8331_v45 = vsel %vm22114_vm10, %v16229_v21, %v16222_v33 }
 0x222   : > { %22575 = vst [vmem:[#allocation49_spill] sm:$0xff] %v16246_v9  ;;  %22576 = vst [vmem:[#allocation50_spill] sm:$0xff] %v16252_v62  ;;  %v4084_v35 = vmul.f32 %v15738_v13, %v16121_v49  ;;  %v16269_v25 = vsel %vm22039_vm13, %v15794_v56, %v8329_v46  ;;  %v16272_v20 = vrot.slane %v7310_v60, %v15757_v1 }
 0x223   : > { %22577 = vst [vmem:[#allocation51_spill] sm:$0xff] %v16260_v27  ;;  %v8332_v32 = vsel %vm22035_vm12, %v16232_v36, %v8331_v45  ;;  %v4085_v55 = vmul.f32 %v15738_v13, %v16132_v41  ;;  %v13975_v28 = vpack.i.bf16 %v16269_v25, %v15911_v58  ;;  %v16281_v54 = vrot.slane %v7309_v57, %v15757_v1  ;;  %v16311_v45 = vpop.f32.mrb[0].mxu1 }
 0x224   : > { %22578 = vst [vmem:[#allocation52_spill] sm:$0xff] %v16272_v20  ;;  %v8333_v49 = vsel %vm22088_vm14, %v16260_v27, %v8332_v32  ;;  %v4120_v12 = vadd.f32 %v15747_v44, %v4084_v35  ;;  %v16287_v60 = vrot.slane %v7311_v40, %v15757_v1  ;;  %v13703_v13 = vcombine.low %v16052_v8, %v16052_v8 }
 0x225   : > { %22579 = vst [vmem:[#allocation53_spill] sm:$0xff] %v16281_v54  ;;  %v8334_v38 = vsel %vm22087_vm1, %v16272_v20, %v8333_v49  ;;  %v4121_v22 = vadd.f32 %v15747_v44, %v4085_v55  ;;  %13976 = vrot.lane.b32.xlu0 %v13975_v28, %s14260_s19  ;;  %v22581_v40 = vcombine.high %v16093_v31, %v16093_v31  ;;  %v13881_v28 = vpop.f32.mrb[1].mxu1 }
 0x226   : > { %22580 = vst [vmem:[#allocation54_spill] sm:$0xff] %v16287_v60  ;;  %v8335_v41 = vsel %vm22062_vm4, %v16281_v54, %v8334_v38  ;;  %vm4149_vm6 = vcmp.gt.f32.partialorder %v4120_v12, 0.0  ;;  %v4179_v57 = vmul.f32 %v15759_v23, %v4120_v12  ;;  %v16309_v46 = vrot.slane %v16062_v47, %v14597_v51 }
 0x227   : > { %v16302_v34 = vrot.slane %v22581_v40, %v14597_v51  ;;  %v8336_v44 = vsel %vm22040_vm11, %v16287_v60, %v8335_v41  ;;  %vm4150_vm8 = vcmp.gt.f32.partialorder %v4121_v22, 0.0  ;;  %v4180_v8 = vmul.f32 %v15759_v23, %v4121_v22  ;;  %v16326_v40 = vpop.f32.mrb[2].mxu1 }
 0x228   : > { %v16316_v32 = vrot.slane %v6131_v4, %v14597_v51  ;;  %v4208_v31 = vsel %vm4149_vm6, %v4120_v12, %v4179_v57  ;;  %v16319_v55 = vrot.slane %v13703_v13, %v14597_v51  ;;  %v16324_v47 = vcombine.high %v16171_v6, %v16171_v6  ;;  %v13882_v57 = vpop.f32.mrb[3].mxu1 }
 0x229   : > { %v4746_v49 = vcombine.high %v4208_v31, %v4208_v31  ;;  %v4753_v38 = vrot.slane %v4208_v31, %v14691_v43  ;;  %v4209_v41 = vsel %vm4150_vm8, %v4121_v22, %v4180_v8  ;;  %v16330_v35 = vsel %vm22039_vm13, %v15794_v56, %v8336_v44 }
 0x22a   : > { %22582 = vst [vmem:[#allocation55_spill] sm:$0xff] %v16316_v32  ;;  %22583 = vst [vmem:[#allocation56_spill] sm:$0xff] %v16330_v35  ;;  %v4795_v4 = vcombine.high %v4209_v41, %v4209_v41  ;;  %v4802_v12 = vrot.slane %v4209_v41, %v14691_v43  ;;  %v16335_v13 = vcombine.high %v16302_v34, %v16302_v34 }
 0x22b   : > { %v4760_v22 = vrot.slane %v4746_v49, %v14691_v43  ;;  %v4761_v8 = vcombine.high %v4753_v38, %v4753_v38  ;;  %v16340_v31 = vcombine.high %v16309_v46, %v16309_v46  ;;  %v8432_v28 = vrot.slane %v16171_v6, %v15757_v1 }
 0x22c   : > { %v4809_v44 = vrot.slane %v4795_v4, %v14691_v43  ;;  %v4810_v58 = vcombine.high %v4802_v12, %v4802_v12  ;;  %v4818_v41 = vrot.slane %v4802_v12, %v14691_v43  ;;  %v16348_v9 = vcombine.high %v16319_v55, %v16319_v55 }
 0x22d   : > { %v4762_v57 = vcombine.high %v4760_v22, %v4760_v22  ;;  %v4769_v49 = vrot.slane %v4753_v38, %v14691_v43  ;;  %v4783_v24 = vrot.slane %v4761_v8, %v14691_v43  ;;  %v16354_v32 = vrot.slane %v16324_v47, %v15757_v1  ;;  %v16364_v8 = vpop.f32.mrb[28].mxu0 }
 0x22e   : > { %v4811_v26 = vcombine.high %v4809_v44, %v4809_v44  ;;  %v4825_v16 = vrot.slane %v4809_v44, %v14691_v43  ;;  %v4832_v4 = vrot.slane %v4810_v58, %v14691_v43  ;;  %v16360_v12 = vrot.slane %v16302_v34, %v15757_v1  ;;  %22584 = vst [vmem:[#allocation57_spill] sm:$0xff] %v16364_v8  ;;  %v13869_v58 = vpop.f32.mrb[29].mxu0 }
 0x22f   : > { %v4776_v51 = vrot.slane %v4760_v22, %v14691_v43  ;;  %v4790_v60 = vrot.slane %v4762_v57, %v14691_v43  ;;  %v6135_v38 = vcombine.low %v4769_v49, %v4783_v24  ;;  %v13680_v54 = vcombine.high %v4769_v49, %v4783_v24  ;;  %v16375_v57 = vpop.f32.mrb[30].mxu0 }
 0x230   : > { %v4842_v37 = vcombine.high %v4832_v4, %v4832_v4  ;;  %v6184_v20 = vcombine.low %v4818_v41, %v4832_v4  ;;  %v13682_v19 = vcombine.high %v4818_v41, %v4818_v41  ;;  %v16368_v44 = vrot.slane %v16335_v13, %v15757_v1  ;;  %22585 = vst [vmem:[#allocation58_spill] sm:$0xff] %v16375_v57  ;;  %v13870_v8 = vpop.f32.mrb[31].mxu0 }
 0x231   : > { %v6163_v27 = vrot.slane %v6135_v38, %v14691_v43  ;;  %v6182_v30 = vcombine.low %v4776_v51, %v4790_v60  ;;  %v13681_v23 = vcombine.high %v4776_v51, %v4790_v60  ;;  %v16373_v22 = vrot.slane %v16309_v46, %v15757_v1 }
 0x232   : > { %v16378_v24 = vrot.slane %v4811_v26, %v14691_v43  ;;  %v4841_v49 = vcombine.high %v4825_v16, %v4825_v16  ;;  %v6212_v41 = vrot.slane %v6184_v20, %v14691_v43  ;;  %v6231_v4 = vcombine.low %v4842_v37, %v4825_v16 }
 0x233   : > { %v6165_v58 = vcombine.low %v16191_v52, %v6163_v27  ;;  %v6191_v38 = vrot.slane %v13680_v54, %v14691_v43  ;;  %v6198_v51 = vrot.slane %v6182_v30, %v14691_v43  ;;  %v6205_v60 = vrot.slane %v13681_v23, %v14691_v43 }
 0x234   : > { %v6240_v36 = vrot.slane %v13682_v19, %v14691_v43  ;;  %v6247_v57 = vrot.slane %v6231_v4, %v14691_v43  ;;  %v8659_v26 = vsel %vm22039_vm13, %v15971_v3, %v15958_v17  ;;  %v8660_v16 = vsel %vm22114_vm10, %v16354_v32, %v8432_v28 }
 0x235   : > { %v6179_v37 = vrot.slane %v6165_v58, %v14691_v43  ;;  %v6213_v52 = vcombine.low %v6191_v38, %v6198_v51  ;;  %v6214_v27 = vcombine.low %v6205_v60, %v6212_v41  ;;  %v8661_v30 = vsel %vm22035_vm12, %v16360_v12, %v8660_v16  ;;  %v16427_v16 = vpop.f32.mrb[4].mxu1 }
 0x236   : > { %v16395_v20 = vcombine.low %v6240_v36, %v6247_v57  ;;  %v8452_v23 = vrot.slane %v16340_v31, %v15757_v1  ;;  %v8456_v19 = vrot.slane %v16319_v55, %v15757_v1  ;;  %v8662_v17 = vsel %vm22088_vm14, %v16368_v44, %v8661_v30 }
 0x237   : > { %v6180_v54 = vcombine.low %v16249_v59, %v6179_v37  ;;  %v16405_v28 = vrot.slane %v6213_v52, %v14691_v43  ;;  %v16408_v8 = vrot.slane %v6214_v27, %v14691_v43  ;;  %v8663_v36 = vsel %vm22087_vm1, %v16373_v22, %v8662_v17 }
 0x238   : > { %v14015_v57 = vpack.i.bf16 %v16252_v62, %v16140_v2  ;;  %v14020_v41 = vpack.i.bf16 %v16330_v35, %v16269_v25  ;;  %v8460_v4 = vrot.slane %v16348_v9, %v15757_v1  ;;  %v8664_v59 = vsel %vm22062_vm4, %v8452_v23, %v8663_v36 }
 0x239   : > { %v16422_v38 = vcombine.low %v16378_v24, %v4841_v49  ;;  %v8665_v51 = vsel %vm22040_vm11, %v8456_v19, %v8664_v59  ;;  %v8756_v60 = vrot.slane %v15884_v29, %v15742_v42  ;;  %v6270_v37 = vrot.slane %v16395_v20, %v14691_v43  ;;  %v13885_v49 = vpop.f32.mrb[5].mxu1  ;;  %v22608_v20 = vld [vmem:[#allocation8_spill] sm:$0xff] }
 0x23a   : > { %v8666_v52 = vsel %vm22039_vm13, %v8460_v4, %v8665_v51  ;;  %v8760_v27 = vrot.slane %v15880_v39, %v15742_v42  ;;  %v8772_v30 = vrot.slane %v16324_v47, %v15742_v42  ;;  %v8768_v36 = vrot.slane %v16171_v6, %v15742_v42  ;;  %v16442_v58 = vpop.f32.mrb[6].mxu1 }
 0x23b   : > { %v13980_v17 = vpack.i.bf16 %v8666_v52, %v8659_v26  ;;  %v8776_v29 = vrot.slane %v16302_v34, %v15742_v42  ;;  %v8780_v59 = vrot.slane %v16335_v13, %v15742_v42  ;;  %v16445_v51 = vsel %vm7127_vm15, 0.0, %v6180_v54  ;;  %v13886_v26 = vpop.f32.mrb[7].mxu1 }
 0x23c   : > { %v8764_v39 = vrot.slane %v15915_v14, %v15742_v42  ;;  %v8784_v47 = vrot.slane %v16309_v46, %v15742_v42  ;;  %v8788_v6 = vrot.slane %v16340_v31, %v15742_v42  ;;  %v8792_v34 = vrot.slane %v16319_v55, %v15742_v42  ;;  %v22592_v26 = vld [vmem:[#allocation36_spill] sm:$0xff] }
 0x23d   : > { %13981 = vrot.lane.b32.xlu0 %v13980_v17, %s14261_s20  ;;  %v8796_v13 = vrot.slane %v16348_v9, %v15742_v42  ;;  %v22586_v54 = vrot.slane %v15838_v5, %v15742_v42  ;;  %v22587_v14 = vrot.slane %v15857_v15, %v15742_v42  ;;  %v8996_v31 = vsel %vm22114_vm10, %v8772_v30, %v8768_v36 }
 0x23e   : > { %v22588_v52 = vrot.slane %v15850_v48, %v15742_v42  ;;  %v8997_v55 = vsel %vm22035_vm12, %v8776_v29, %v8996_v31  ;;  %v9069_v9 = vsel %vm22114_vm10, %v15896_v61, %v15892_v53  ;;  %v9076_v5 = vsel %vm22114_vm10, %v16360_v12, %v16354_v32  ;;  %v22591_v12 = vld [vmem:[#allocation6_spill] sm:$0xff] }
 0x23f   : > { %v8989_v46 = vsel %vm22114_vm10, %v22587_v14, %v22586_v54  ;;  %v22589_v15 = vrot.slane %v15873_v0, %v15742_v42  ;;  %v8998_v17 = vsel %vm22088_vm14, %v8780_v59, %v8997_v55  ;;  %v9070_v48 = vsel %vm22035_vm12, %v15900_v18, %v9069_v9 }
 0x240   : > { %v8990_v49 = vsel %vm22035_vm12, %v22588_v52, %v8989_v46  ;;  %v9077_v36 = vsel %vm22035_vm12, %v16368_v44, %v9076_v5  ;;  %v22590_v53 = vrot.slane %v15864_v11, %v15742_v42  ;;  %v8999_v32 = vsel %vm22087_vm1, %v8784_v47, %v8998_v17  ;;  %v22593_v47 = vld [vmem:[#allocation37_spill] sm:$0xff]  ;;  %v22597_v17 = vld [vmem:[#allocation42_spill] sm:$0xff] }
 0x241   : > { %v8991_v30 = vsel %vm22088_vm14, %v22589_v15, %v8990_v49  ;;  %v9071_v0 = vsel %vm22088_vm14, %v22591_v12, %v9070_v48  ;;  %v9078_v29 = vsel %vm22088_vm14, %v16373_v22, %v9077_v36  ;;  %v9000_v18 = vsel %vm22062_vm4, %v8788_v6, %v8999_v32  ;;  %v16543_v32 = vld [vmem:[%s21892_s5] ss:$0 sm:$0xff] }
 0x242   : > { %v8992_v61 = vsel %vm22087_vm1, %v22590_v53, %v8991_v30  ;;  %v9072_v44 = vsel %vm22087_vm1, %v22592_v26, %v9071_v0  ;;  %v9079_v54 = vsel %vm22087_vm1, %v8452_v23, %v9078_v29  ;;  %v9001_v14 = vsel %vm22040_vm11, %v8792_v34, %v9000_v18  ;;  %v22594_v34 = vld [vmem:[#allocation38_spill] sm:$0xff]  ;;  %v22599_v18 = vld [vmem:[#allocation21_spill] sm:$0xff] }
 0x243   : > { %v8993_v59 = vsel %vm22062_vm4, %v8756_v60, %v8992_v61  ;;  %v9073_v46 = vsel %vm22062_vm4, %v22593_v47, %v9072_v44  ;;  %v9080_v31 = vsel %vm22062_vm4, %v8456_v19, %v9079_v54  ;;  %v9002_v60 = vsel %vm22039_vm13, %v8796_v13, %v9001_v14  ;;  %v22595_v13 = vld [vmem:[#allocation39_spill] sm:$0xff]  ;;  %v22598_v29 = vld [vmem:[#allocation46_spill] sm:$0xff]  ;;  %v22603_v14 = vld [vmem:[#allocation52_spill] sm:$0xff] }
 0x244   : > { %v8994_v11 = vsel %vm22040_vm11, %v8760_v27, %v8993_v59  ;;  %v9074_v6 = vsel %vm22040_vm11, %v15971_v3, %v9073_v46  ;;  %v9081_v52 = vsel %vm22040_vm11, %v8460_v4, %v9080_v31  ;;  %v7705_v55 = vrot.slane %v22594_v34, %v15757_v1  ;;  %v16523_v3 = vld [vmem:[%s21891_s4] ss:$0 sm:$0xff]  ;;  %v22596_v4 = vld [vmem:[#allocation40_spill] sm:$0xff] }
 0x245   : > { %v8995_v22 = vsel %vm22039_vm13, %v8764_v39, %v8994_v11  ;;  %v9075_v23 = vsel %vm22039_vm13, %v15794_v56, %v9074_v6  ;;  %v9082_v27 = vsel %vm22039_vm13, %v15794_v56, %v9081_v52  ;;  %v7737_v9 = vrot.slane %v22595_v13, %v15757_v1  ;;  %v22602_v11 = vld [vmem:[#allocation45_spill] sm:$0xff]  ;;  %v22604_v31 = vld [vmem:[#allocation48_spill] sm:$0xff] }
 0x246   : > { %v13985_v49 = vpack.i.bf16 %v9002_v60, %v8995_v22  ;;  %v13990_v39 = vpack.i.bf16 %v9082_v27, %v9075_v23  ;;  %v4086_v5 = vmul.f32 %v16523_v3, %v22596_v4  ;;  %v7940_v15 = vsel %vm22114_vm10, %v16041_v63, %v7705_v55  ;;  %v22605_v60 = vld [vmem:[#allocation53_spill] sm:$0xff]  ;;  %v22606_v23 = vld [vmem:[#allocation54_spill] sm:$0xff] }
 0x247   : > { %v4843_v30 = vcombine.high %v16378_v24, %v16378_v24  ;;  %v4087_v48 = vmul.f32 %v16523_v3, %v22597_v17  ;;  %v4094_v36 = vmul.f32 %v16523_v3, %v16311_v45  ;;  %v7941_v53 = vsel %vm22035_vm12, %v16066_v10, %v7940_v15 }
 0x248   : > { %13986 = vrot.lane.b32.xlu0 %v13985_v49, %s14252_s16  ;;  %v7947_v61 = vsel %vm22114_vm10, %v16222_v33, %v7737_v9  ;;  %v4122_v63 = vadd.f32 %v16543_v32, %v4086_v5  ;;  %v4095_v24 = vmul.f32 %v16523_v3, %v16326_v40  ;;  %v7942_v12 = vsel %vm22088_vm14, %v16070_v7, %v7941_v53  ;;  %v22600_v7 = vld [vmem:[#allocation44_spill] sm:$0xff] }
 0x249   : > { %v7948_v45 = vsel %vm22035_vm12, %v16229_v21, %v7947_v61  ;;  %v4123_v10 = vadd.f32 %v16543_v32, %v4087_v48  ;;  %v4130_v33 = vadd.f32 %v16543_v32, %v4094_v36  ;;  %v7943_v0 = vsel %vm22087_vm1, %v16165_v50, %v7942_v12  ;;  %v22601_v21 = vld [vmem:[#allocation51_spill] sm:$0xff] }
 0x24a   : > { %v7949_v59 = vsel %vm22088_vm14, %v22598_v29, %v7948_v45  ;;  %vm4151_vm6 = vcmp.gt.f32.partialorder %v4122_v63, 0.0  ;;  %v4181_v26 = vmul.f32 %v22599_v18, %v4122_v63  ;;  %v7944_v40 = vsel %vm22062_vm4, %v22600_v7, %v7943_v0 }
 0x24b   : > { %v7950_v44 = vsel %vm22087_vm1, %v22601_v21, %v7949_v59  ;;  %vm4152_vm8 = vcmp.gt.f32.partialorder %v4123_v10, 0.0  ;;  %v4182_v54 = vmul.f32 %v22599_v18, %v4123_v10  ;;  %v7945_v50 = vsel %vm22040_vm11, %v22602_v11, %v7944_v40 }
 0x24c   : > { %13991 = vrot.lane.b32.xlu0 %v13990_v39, %s14262_s27  ;;  %v7951_v47 = vsel %vm22062_vm4, %v22603_v14, %v7950_v44  ;;  %v4210_v46 = vsel %vm4151_vm6, %v4122_v63, %v4181_v26  ;;  %vm4159_vm7 = vcmp.gt.f32.partialorder %v4130_v33, 0.0  ;;  %v16571_v22 = vsel %vm22039_vm13, %v22604_v31, %v7945_v50 }
 0x24d   : > { %v7952_v6 = vsel %vm22040_vm11, %v22605_v60, %v7951_v47  ;;  %v4844_v52 = vcombine.high %v4210_v46, %v4210_v46  ;;  %v4851_v49 = vrot.slane %v4210_v46, %v14691_v43  ;;  %v6254_v34 = vrot.slane %v16422_v38, %v14691_v43 }
 0x24e   : > { %v16578_v27 = vsel %vm22039_vm13, %v22606_v23, %v7952_v6  ;;  %v4211_v55 = vsel %vm4152_vm8, %v4123_v10, %v4182_v54  ;;  %v4189_v39 = vmul.f32 %v22599_v18, %v4130_v33  ;;  %v16589_v36 = vadd.f32 %v16543_v32, %v4095_v24 }
 0x24f   : > { %22607 = vst [vmem:[#allocation6_spill] sm:$0xff] %v16578_v27  ;;  %v14010_v13 = vpack.i.bf16 %v16578_v27, %v16571_v22  ;;  %v4858_v9 = vrot.slane %v4844_v52, %v14691_v43  ;;  %v4859_v4 = vcombine.high %v4851_v49, %v4851_v49  ;;  %v4867_v5 = vrot.slane %v4851_v49, %v14691_v43 }
 0x250   : > { %v4893_v15 = vcombine.high %v4211_v55, %v4211_v55  ;;  %v4900_v17 = vrot.slane %v4211_v55, %v14691_v43  ;;  %v4218_v48 = vsel %vm4159_vm7, %v4130_v33, %v4189_v39  ;;  %v16606_v31 = vpop.f32.mrb[8].mxu1  ;;  %vm4160_vm7 = vcmp.gt.f32.partialorder %v16589_v36, 0.0 }
 0x251   : > { %14011 = vrot.lane.b32.xlu0 %v14010_v13, %s14263_s28  ;;  %v4860_v38 = vcombine.high %v4858_v9, %v4858_v9  ;;  %v4874_v53 = vrot.slane %v4858_v9, %v14691_v43  ;;  %v4881_v61 = vrot.slane %v4859_v4, %v14691_v43  ;;  %v4889_v63 = vcombine.high %v4867_v5, %v4867_v5  ;;  %v13889_v2 = vpop.f32.mrb[9].mxu1 }
 0x252   : > { %v6233_v12 = vcombine.low %v4843_v30, %v4867_v5  ;;  %v4907_v45 = vrot.slane %v4893_v15, %v14691_v43  ;;  %v4908_v10 = vcombine.high %v4900_v17, %v4900_v17  ;;  %v4916_v0 = vrot.slane %v4900_v17, %v14691_v43 }
 0x253   : > { %v4888_v33 = vrot.slane %v4860_v38, %v14691_v43  ;;  %v4890_v29 = vcombine.high %v4874_v53, %v4874_v53  ;;  %v4891_v24 = vcombine.high %v4881_v61, %v4881_v61  ;;  %v6279_v59 = vcombine.low %v4881_v61, %v4889_v63 }
 0x254   : > { %v6261_v26 = vrot.slane %v6233_v12, %v14691_v43  ;;  %v4909_v7 = vcombine.high %v4907_v45, %v4907_v45  ;;  %v4923_v40 = vrot.slane %v4907_v45, %v14691_v43  ;;  %v4930_v21 = vrot.slane %v4908_v10, %v14691_v43 }
 0x255   : > { %14016 = vrot.lane.b32.xlu0 %v14015_v57, %s14264_s29  ;;  %v6280_v30 = vcombine.low %v4891_v24, %v4874_v53  ;;  %v6281_v44 = vcombine.low %v4888_v33, %v4890_v29  ;;  %v6289_v54 = vrot.slane %v6279_v59, %v14691_v43  ;;  %v4892_v11 = vcombine.high %v4888_v33, %v4888_v33 }
 0x256   : > { %v6263_v50 = vcombine.low %v6254_v34, %v6261_v26  ;;  %v4937_v14 = vrot.slane %v4909_v7, %v14691_v43  ;;  %v6328_v47 = vcombine.low %v4930_v21, %v4930_v21  ;;  %v13683_v46 = vcombine.high %v4916_v0, %v4930_v21  ;;  %v16612_v34 = vpop.f32.mrb[10].mxu1 }
 0x257   : > { %v6296_v60 = vrot.slane %v6280_v30, %v14691_v43  ;;  %v6282_v6 = vcombine.low %v4892_v11, %v4916_v0  ;;  %v6303_v52 = vrot.slane %v6281_v44, %v14691_v43  ;;  %v5236_v49 = vcombine.high %v4218_v48, %v4218_v48  ;;  %v13890_v15 = vpop.f32.mrb[11].mxu1 }
 0x258   : > { %v6277_v57 = vrot.slane %v6263_v50, %v14691_v43  ;;  %v6330_v23 = vcombine.low %v4923_v40, %v4937_v14  ;;  %v13684_v55 = vcombine.high %v4923_v40, %v4937_v14  ;;  %v6338_v39 = vrot.slane %v6328_v47, %v14691_v43 }
 0x259   : > { %v6311_v13 = vcombine.low %v6289_v54, %v6296_v60  ;;  %v6310_v9 = vrot.slane %v6282_v6, %v14691_v43  ;;  %v6345_v4 = vrot.slane %v13683_v46, %v14691_v43  ;;  %14021 = vrot.lane.b32.xlu0 %v14020_v41, %s14251_s15  ;;  %v5243_v5 = vrot.slane %v4218_v48, %v14691_v43 }
 0x25a   : > { %v6278_v17 = vcombine.low %v6270_v37, %v6277_v57  ;;  %v6352_v38 = vrot.slane %v6330_v23, %v14691_v43  ;;  %v6359_v53 = vrot.slane %v13684_v55, %v14691_v43  ;;  %v5250_v61 = vrot.slane %v5236_v49, %v14691_v43  ;;  %v16653_v14 = vpop.f32.mrb[32].mxu0 }
 0x25b   : > { %v7346_v63 = vcombine.high %v16445_v51, %v16445_v51  ;;  %v6312_v12 = vcombine.low %v6303_v52, %v6310_v9  ;;  %v6360_v45 = vcombine.low %v6338_v39, %v6345_v4  ;;  %v5251_v25 = vcombine.high %v5243_v5, %v5243_v5  ;;  %v22614_v52 = vld [vmem:[#allocation57_spill] sm:$0xff]  ;;  %v13873_v2 = vpop.f32.mrb[33].mxu0 }
 0x25c   : > { %v7134_v41 = vsel %vm7127_vm15, 0.0, %v6278_v17  ;;  %v6361_v48 = vcombine.low %v6352_v38, %v6359_v53  ;;  %v5252_v10 = vcombine.high %v5250_v61, %v5250_v61  ;;  %v16631_v0 = vrot.slane %v5243_v5, %v14691_v43  ;;  %v16673_v39 = vpop.f32.mrb[34].mxu0 }
 0x25d   : > { %v16635_v37 = vrot.slane %v16445_v51, %v22608_v20  ;;  %v6319_v33 = vrot.slane %v6311_v13, %v14691_v43  ;;  %v16639_v29 = vrot.slane %v6312_v12, %v14691_v43  ;;  %v6368_v24 = vrot.slane %v6360_v45, %v14691_v43  ;;  %v13874_v15 = vpop.f32.mrb[35].mxu0 }
 0x25e   : > { %v6375_v59 = vrot.slane %v6361_v48, %v14691_v43  ;;  %v5273_v26 = vrot.slane %v5251_v25, %v14691_v43  ;;  %v5280_v7 = vrot.slane %v5252_v10, %v14691_v43  ;;  %v7380_v40 = vcombine.high %v7134_v41, %v7134_v41 }
 0x25f   : > { %22609 = vst [vmem:[#allocation36_spill] sm:$0xff] %v16635_v37  ;;  %22610 = vst [vmem:[#allocation37_spill] sm:$0xff] %v16639_v29  ;;  %v16647_v21 = vrot.slane %v7134_v41, %v22608_v20  ;;  %v6327_v51 = vcombine.low %v6319_v33, %v16639_v29  ;;  %v5266_v30 = vrot.slane %v5250_v61, %v14691_v43 }
 0x260   : > { %v6376_v44 = vcombine.low %v6368_v24, %v6375_v59  ;;  %v5281_v54 = vcombine.high %v16631_v0, %v16631_v0  ;;  %v5283_v11 = vcombine.high %v5273_v26, %v5273_v26  ;;  %v6720_v50 = vcombine.low %v5280_v7, %v5280_v7  ;;  %v22621_v59 = vld [vmem:[#allocation58_spill] sm:$0xff] }
 0x261   : > { %22611 = vst [vmem:[#allocation38_spill] sm:$0xff] %v16647_v21  ;;  %v22612_v47 = vcombine.low %v16405_v28, %v16408_v8  ;;  %v13692_v60 = vcombine.high %v5266_v30, %v5280_v7  ;;  %v4190_v6 = vmul.f32 %v22599_v18, %v16589_v36  ;;  %v4088_v49 = vmul.f32 %v16523_v3, %v22614_v52 }
 0x262   : > { %v16666_v57 = vrot.slane %v7346_v63, %v22608_v20  ;;  %v16670_v23 = vcombine.high %v16635_v37, %v16635_v37  ;;  %v7135_v55 = vsel %vm7127_vm15, 0.0, %v6376_v44  ;;  %v6673_v28 = vcombine.low %v5273_v26, %v5281_v54  ;;  %v16705_v44 = vpop.f32.mrb[36].mxu0 }
 0x263   : > { %v16659_v46 = vrot.slane %v22612_v47, %v22608_v20  ;;  %v16676_v13 = vrot.slane %v7380_v40, %v22608_v20  ;;  %v16680_v9 = vcombine.high %v16647_v21, %v16647_v21  ;;  %v6674_v4 = vcombine.low %v5283_v11, %v5266_v30 }
 0x264   : > { %22615 = vst [vmem:[#allocation40_spill] sm:$0xff] %v16666_v57  ;;  %22616 = vst [vmem:[#allocation42_spill] sm:$0xff] %v16670_v23  ;;  %v4219_v5 = vsel %vm4160_vm7, %v16589_v36, %v4190_v6  ;;  %v6730_v17 = vrot.slane %v6720_v50, %v14691_v43  ;;  %v6737_v38 = vrot.slane %v13692_v60, %v14691_v43  ;;  %v13877_v60 = vpop.f32.mrb[37].mxu0 }
 0x265   : > { %22613 = vst [vmem:[#allocation39_spill] sm:$0xff] %v16659_v46  ;;  %22617 = vst [vmem:[#allocation46_spill] sm:$0xff] %v16676_v13  ;;  %v5285_v53 = vcombine.high %v4219_v5, %v4219_v5  ;;  %v5292_v61 = vrot.slane %v4219_v5, %v14691_v43  ;;  %v7414_v12 = vcombine.high %v7135_v55, %v7135_v55 }
 0x266   : > { %22618 = vst [vmem:[#allocation21_spill] sm:$0xff] %v16680_v9  ;;  %v16691_v45 = vrot.slane %v7135_v55, %v22608_v20  ;;  %v4124_v25 = vadd.f32 %v16543_v32, %v4088_v49  ;;  %v16695_v41 = vrot.slane %v6327_v51, %v22608_v20  ;;  %v6695_v36 = vrot.slane %v6673_v28, %v14691_v43  ;;  %v16716_v55 = vpop.f32.mrb[38].mxu0 }
 0x267   : > { %v5299_v48 = vrot.slane %v5285_v53, %v14691_v43  ;;  %v5300_v10 = vcombine.high %v5292_v61, %v5292_v61  ;;  %v6702_v33 = vrot.slane %v6674_v4, %v14691_v43  ;;  %v4089_v26 = vmul.f32 %v16523_v3, %v22621_v59  ;;  %v13878_v15 = vpop.f32.mrb[39].mxu0 }
 0x268   : > { %22619 = vst [vmem:[#allocation44_spill] sm:$0xff] %v16691_v45  ;;  %22620 = vst [vmem:[#allocation51_spill] sm:$0xff] %v16695_v41  ;;  %vm4153_vm6 = vcmp.gt.f32.partialorder %v4124_v25, 0.0  ;;  %v4183_v24 = vmul.f32 %v22599_v18, %v4124_v25  ;;  %v6752_v7 = vcombine.low %v6730_v17, %v6737_v38  ;;  %v5308_v30 = vrot.slane %v5292_v61, %v14691_v43  ;;  %v16720_v17 = vpop.f32.mrb[12].mxu1 }
 0x269   : > { %v5301_v40 = vcombine.high %v5299_v48, %v5299_v48  ;;  %v5322_v51 = vrot.slane %v5300_v10, %v14691_v43  ;;  %v16708_v54 = vrot.slane %v7414_v12, %v22608_v20  ;;  %v16712_v11 = vcombine.high %v16691_v45, %v16691_v45 }
 0x26a   : > { %v4212_v50 = vsel %vm4153_vm6, %v4124_v25, %v4183_v24  ;;  %v4125_v47 = vadd.f32 %v16543_v32, %v4089_v26  ;;  %v6704_v28 = vcombine.low %v6695_v36, %v6702_v33  ;;  %v6760_v38 = vrot.slane %v6752_v7, %v14691_v43  ;;  %v13893_v25 = vpop.f32.mrb[13].mxu1 }
 0x26b   : > { %22622 = vst [vmem:[#allocation45_spill] sm:$0xff] %v16708_v54  ;;  %22623 = vst [vmem:[#allocation52_spill] sm:$0xff] %v16712_v11  ;;  %v5329_v6 = vrot.slane %v5301_v40, %v14691_v43  ;;  %v6722_v52 = vcombine.low %v5308_v30, %v5322_v51  ;;  %v13693_v49 = vcombine.high %v5308_v30, %v5322_v51  ;;  %v16729_v59 = vpop.f32.mrb[14].mxu1 }
 0x26c   : > { %v4942_v2 = vcombine.high %v4212_v50, %v4212_v50  ;;  %v4949_v4 = vrot.slane %v4212_v50, %v14691_v43  ;;  %vm4154_vm8 = vcmp.gt.f32.partialorder %v4125_v47, 0.0  ;;  %v4184_v5 = vmul.f32 %v22599_v18, %v4125_v47  ;;  %v13894_v51 = vpop.f32.mrb[15].mxu1 }
 0x26d   : > { %v5315_v53 = vrot.slane %v5299_v48, %v14691_v43  ;;  %v6744_v61 = vrot.slane %v6722_v52, %v14691_v43  ;;  %v6751_v12 = vrot.slane %v13693_v49, %v14691_v43  ;;  %v4096_v24 = vmul.f32 %v16523_v3, %v16427_v16 }
 0x26e   : > { %v4956_v10 = vrot.slane %v4942_v2, %v14691_v43  ;;  %v4957_v36 = vcombine.high %v4949_v4, %v4949_v4  ;;  %v4213_v33 = vsel %vm4154_vm8, %v4125_v47, %v4184_v5  ;;  %v4965_v50 = vrot.slane %v4949_v4, %v14691_v43 }
 0x26f   : > { %v6753_v26 = vcombine.low %v6744_v61, %v6751_v12  ;;  %v6769_v40 = vcombine.low %v5315_v53, %v5329_v6  ;;  %v13694_v30 = vcombine.high %v5315_v53, %v5329_v6  ;;  %v4991_v7 = vcombine.high %v4213_v33, %v4213_v33 }
 0x270   : > { %v4958_v48 = vcombine.high %v4956_v10, %v4956_v10  ;;  %v4979_v60 = vrot.slane %v4957_v36, %v14691_v43  ;;  %v4998_v52 = vrot.slane %v4213_v33, %v14691_v43  ;;  %v4972_v47 = vrot.slane %v4956_v10, %v14691_v43 }
 0x271   : > { %v6767_v49 = vrot.slane %v6753_v26, %v14691_v43  ;;  %v5005_v16 = vrot.slane %v4991_v7, %v14691_v43  ;;  %v4097_v2 = vmul.f32 %v16523_v3, %v16442_v58  ;;  %v4132_v25 = vadd.f32 %v16543_v32, %v4096_v24  ;;  %v16744_v7 = vpop.f32.mrb[16].mxu1 }
 0x272   : > { %v4986_v6 = vrot.slane %v4958_v48, %v14691_v43  ;;  %v6377_v5 = vcombine.low %v4965_v50, %v4979_v60  ;;  %v13685_v15 = vcombine.high %v4965_v50, %v4979_v60  ;;  %v5006_v53 = vcombine.high %v4998_v52, %v4998_v52  ;;  %v13897_v50 = vpop.f32.mrb[17].mxu1 }
 0x273   : > { %v6768_v61 = vcombine.low %v6760_v38, %v6767_v49  ;;  %v5007_v4 = vcombine.high %v5005_v16, %v5005_v16  ;;  %v5014_v12 = vrot.slane %v4998_v52, %v14691_v43  ;;  %v6779_v36 = vrot.slane %v6769_v40, %v14691_v43  ;;  %v4064_v52 = vpop.f32.mrb[18].mxu1 }
 0x274   : > { %v6786_v10 = vrot.slane %v13694_v30, %v14691_v43  ;;  %v6379_v33 = vcombine.low %v4972_v47, %v4986_v6  ;;  %v13686_v26 = vcombine.high %v4972_v47, %v4986_v6  ;;  %v6387_v58 = vrot.slane %v6377_v5, %v14691_v43  ;;  %v13898_v5 = vpop.f32.mrb[19].mxu1 }
 0x275   : > { %v5021_v51 = vrot.slane %v5005_v16, %v14691_v43  ;;  %v5028_v48 = vrot.slane %v5006_v53, %v14691_v43  ;;  %v16750_v38 = vrot.slane %v5007_v4, %v14691_v43  ;;  %v7139_v24 = vsel %vm7127_vm15, 0.0, %v6768_v61 }
 0x276   : > { %v6394_v40 = vrot.slane %v13685_v15, %v14691_v43  ;;  %v6401_v30 = vrot.slane %v6379_v33, %v14691_v43  ;;  %v6408_v60 = vrot.slane %v13686_v26, %v14691_v43  ;;  %v16757_v49 = vrot.slane %v6704_v28, %v14691_v43 }
 0x277   : > { %v5036_v47 = vcombine.high %v5014_v12, %v5014_v12  ;;  %v5037_v16 = vcombine.high %v5021_v51, %v5021_v51  ;;  %v5038_v6 = vcombine.high %v5028_v48, %v5028_v48  ;;  %v6801_v53 = vcombine.low %v6779_v36, %v6786_v10 }
 0x278   : > { %v6410_v4 = vcombine.low %v6401_v30, %v6408_v60  ;;  %v6426_v63 = vcombine.low %v5014_v12, %v5014_v12  ;;  %vm4161_vm7 = vcmp.gt.f32.partialorder %v4132_v25, 0.0  ;;  %v7550_v50 = vcombine.high %v7139_v24, %v7139_v24 }
 0x279   : > { %v6427_v61 = vcombine.low %v5028_v48, %v5036_v47  ;;  %v6428_v19 = vcombine.low %v5038_v6, %v5021_v51  ;;  %v6429_v15 = vcombine.low %v16750_v38, %v5037_v16  ;;  %v6409_v33 = vcombine.low %v6387_v58, %v6394_v40 }
 0x27a   : > { %v6436_v26 = vrot.slane %v6426_v63, %v14691_v43  ;;  %v4191_v52 = vmul.f32 %v22599_v18, %v4132_v25  ;;  %v4133_v28 = vadd.f32 %v16543_v32, %v4097_v2  ;;  %v4098_v12 = vmul.f32 %v16523_v3, %v16606_v31 }
 0x27b   : > { %v6443_v27 = vrot.slane %v6427_v61, %v14691_v43  ;;  %v6450_v5 = vrot.slane %v6428_v19, %v14691_v43  ;;  %v6457_v36 = vrot.slane %v6429_v15, %v14691_v43  ;;  %v16769_v10 = vrot.slane %v6801_v53, %v14691_v43 }
 0x27c   : > { %v16772_v58 = vrot.slane %v6410_v4, %v14691_v43  ;;  %v4220_v63 = vsel %vm4161_vm7, %v4132_v25, %v4191_v52  ;;  %vm4162_vm6 = vcmp.gt.f32.partialorder %v4133_v28, 0.0  ;;  %v16776_v19 = vrot.slane %v7139_v24, %v22608_v20 }
 0x27d   : > { %v6458_v51 = vcombine.low %v6436_v26, %v6443_v27  ;;  %v6459_v48 = vcombine.low %v6450_v5, %v6457_v36  ;;  %v5334_v2 = vcombine.high %v4220_v63, %v4220_v63  ;;  %v5341_v40 = vrot.slane %v4220_v63, %v14691_v43 }
 0x27e   : > { %v6417_v30 = vrot.slane %v6409_v33, %v14691_v43  ;;  %v4192_v31 = vmul.f32 %v22599_v18, %v4133_v28  ;;  %v4134_v60 = vadd.f32 %v16543_v32, %v4098_v12  ;;  %v16782_v47 = vrot.slane %v7550_v50, %v22608_v20 }
 0x27f   : > { %v6473_v25 = vrot.slane %v6459_v48, %v14691_v43  ;;  %v5348_v27 = vrot.slane %v5334_v2, %v14691_v43  ;;  %v5349_v16 = vcombine.high %v5341_v40, %v5341_v40  ;;  %v6466_v53 = vrot.slane %v6458_v51, %v14691_v43 }
 0x280   : > { %v6425_v6 = vcombine.low %v6417_v30, %v16772_v58  ;;  %v5357_v24 = vrot.slane %v5341_v40, %v14691_v43  ;;  %v4221_v4 = vsel %vm4162_vm6, %v4133_v28, %v4192_v31  ;;  %v4193_v50 = vmul.f32 %v22599_v18, %v4134_v60 }
 0x281   : > { %v5350_v61 = vcombine.high %v5348_v27, %v5348_v27  ;;  %v5364_v15 = vrot.slane %v5348_v27, %v14691_v43  ;;  %v5371_v33 = vrot.slane %v5349_v16, %v14691_v43  ;;  %v16795_v26 = vcombine.high %v16776_v19, %v16776_v19 }
 0x282   : > { %v6474_v52 = vcombine.low %v6466_v53, %v6473_v25  ;;  %v5383_v5 = vcombine.high %v4221_v4, %v4221_v4  ;;  %vm4163_vm8 = vcmp.gt.f32.partialorder %v4134_v60, 0.0  ;;  %v5390_v28 = vrot.slane %v4221_v4, %v14691_v43 }
 0x283   : > { %v5378_v36 = vrot.slane %v5350_v61, %v14691_v43  ;;  %v5380_v12 = vcombine.high %v5364_v15, %v5364_v15  ;;  %v6771_v63 = vcombine.low %v5357_v24, %v5371_v33  ;;  %v16802_v48 = vrot.slane %v6425_v6, %v22608_v20 }
 0x284   : > { %v13695_v2 = vcombine.high %v5357_v24, %v5371_v33  ;;  %v6818_v40 = vcombine.low %v5364_v15, %v5364_v15  ;;  %v5397_v25 = vrot.slane %v5383_v5, %v14691_v43  ;;  %v4222_v27 = vsel %vm4163_vm8, %v4134_v60, %v4193_v50 }
 0x285   : > { %22624 = vst [vmem:[#allocation48_spill] sm:$0xff] %v16802_v48  ;;  %v6793_v30 = vrot.slane %v6771_v63, %v14691_v43  ;;  %v6819_v31 = vcombine.low %v5378_v36, %v5380_v12  ;;  %v7136_v16 = vsel %vm7127_vm15, 0.0, %v6474_v52  ;;  %v5382_v61 = vcombine.high %v5378_v36, %v5378_v36 }
 0x286   : > { %v6800_v53 = vrot.slane %v13695_v2, %v14691_v43  ;;  %v4099_v4 = vmul.f32 %v16523_v3, %v16612_v34  ;;  %v6828_v51 = vrot.slane %v6818_v40, %v14691_v43  ;;  %v5398_v6 = vcombine.high %v5390_v28, %v5390_v28 }
 0x287   : > { %v5399_v45 = vcombine.high %v5397_v25, %v5397_v25  ;;  %v5406_v24 = vrot.slane %v5390_v28, %v14691_v43  ;;  %v6835_v33 = vrot.slane %v6819_v31, %v14691_v43  ;;  %v5413_v5 = vrot.slane %v5397_v25, %v14691_v43 }
 0x288   : > { %v6802_v15 = vcombine.low %v6793_v30, %v6800_v53  ;;  %v5432_v60 = vcombine.high %v4222_v27, %v4222_v27  ;;  %v5420_v50 = vrot.slane %v5398_v6, %v14691_v43  ;;  %v5439_v12 = vrot.slane %v4222_v27, %v14691_v43 }
 0x289   : > { %v5427_v52 = vrot.slane %v5399_v45, %v14691_v43  ;;  %v5428_v36 = vcombine.high %v5406_v24, %v5406_v24  ;;  %v5429_v63 = vcombine.high %v5413_v5, %v5413_v5  ;;  %v6820_v2 = vcombine.low %v5382_v61, %v5406_v24 }
 0x28a   : > { %v16818_v34 = vrot.slane %v6802_v15, %v14691_v43  ;;  %v5446_v28 = vrot.slane %v5432_v60, %v14691_v43  ;;  %v7448_v40 = vcombine.high %v7136_v16, %v7136_v16  ;;  %v5430_v30 = vcombine.high %v5420_v50, %v5420_v50 }
 0x28b   : > { %v6821_v31 = vcombine.low %v5420_v50, %v5428_v36  ;;  %v4135_v25 = vadd.f32 %v16543_v32, %v4099_v4  ;;  %v6850_v6 = vcombine.low %v6828_v51, %v6835_v33  ;;  %v6842_v45 = vrot.slane %v6820_v2, %v14691_v43 }
 0x28c   : > { %v6817_v53 = vcombine.low %v16769_v10, %v16818_v34  ;;  %v6868_v62 = vcombine.low %v5427_v52, %v5429_v63  ;;  %v6867_v15 = vcombine.low %v5430_v30, %v5413_v5  ;;  %v5447_v9 = vcombine.high %v5439_v12, %v5439_v12 }
 0x28d   : > { %v6849_v27 = vrot.slane %v6821_v31, %v14691_v43  ;;  %v5448_v21 = vcombine.high %v5446_v28, %v5446_v28  ;;  %v5431_v24 = vcombine.high %v5427_v52, %v5427_v52  ;;  %v5455_v60 = vrot.slane %v5439_v12, %v14691_v43 }
 0x28e   : > { %v6884_v61 = vrot.slane %v6868_v62, %v14691_v43  ;;  %v5462_v50 = vrot.slane %v5446_v28, %v14691_v43  ;;  %v6877_v36 = vrot.slane %v6867_v15, %v14691_v43  ;;  %v5469_v10 = vrot.slane %v5447_v9, %v14691_v43 }
 0x28f   : > { %v6851_v4 = vcombine.low %v6842_v45, %v6849_v27  ;;  %v5476_v51 = vrot.slane %v5448_v21, %v14691_v43  ;;  %v5477_v33 = vcombine.high %v5455_v60, %v5455_v60  ;;  %v6869_v63 = vcombine.low %v5431_v24, %v5455_v60 }
 0x290   : > { %vm4164_vm7 = vcmp.gt.f32.partialorder %v4135_v25, 0.0  ;;  %v4194_v5 = vmul.f32 %v22599_v18, %v4135_v25  ;;  %v16834_v2 = vrot.slane %v7136_v16, %v22608_v20  ;;  %v6858_v62 = vrot.slane %v6850_v6, %v14691_v43 }
 0x291   : > { %v6865_v52 = vrot.slane %v6851_v4, %v14691_v43  ;;  %v6917_v12 = vcombine.low %v5462_v50, %v5476_v51  ;;  %v6899_v28 = vcombine.low %v6877_v36, %v6884_v61  ;;  %v6870_v30 = vcombine.low %v5469_v10, %v5477_v33 }
 0x292   : > { %v13696_v31 = vcombine.high %v5469_v10, %v5469_v10  ;;  %v4223_v45 = vsel %vm4164_vm7, %v4135_v25, %v4194_v5  ;;  %v16839_v9 = vrot.slane %v7448_v40, %v22608_v20  ;;  %v6891_v27 = vrot.slane %v6869_v63, %v14691_v43 }
 0x293   : > { %v6866_v21 = vcombine.low %v6858_v62, %v6865_v52  ;;  %v13697_v15 = vcombine.high %v5462_v50, %v5476_v51  ;;  %v6898_v24 = vrot.slane %v6870_v30, %v14691_v43  ;;  %v6933_v16 = vrot.slane %v6917_v12, %v14691_v43 }
 0x294   : > { %v5481_v60 = vcombine.high %v4223_v45, %v4223_v45  ;;  %v5488_v6 = vrot.slane %v4223_v45, %v14691_v43  ;;  %v16847_v61 = vcombine.high %v16834_v2, %v16834_v2  ;;  %v16852_v40 = vrot.slane %v6817_v53, %v22608_v20 }
 0x295   : > { %v4090_v50 = vmul.f32 %v16523_v3, %v16653_v14  ;;  %v6907_v4 = vrot.slane %v6899_v28, %v14691_v43  ;;  %v6900_v36 = vcombine.low %v6891_v27, %v6898_v24  ;;  %v6926_v10 = vrot.slane %v13696_v31, %v14691_v43 }
 0x296   : > { %v5495_v51 = vrot.slane %v5481_v60, %v14691_v43  ;;  %v16860_v33 = vsel %vm7127_vm15, 0.0, %v6866_v21  ;;  %v6940_v63 = vrot.slane %v13697_v15, %v14691_v43  ;;  %v5496_v5 = vcombine.high %v5488_v6, %v5488_v6 }
 0x297   : > { %22625 = vst [vmem:[#allocation53_spill] sm:$0xff] %v16860_v33  ;;  %v4126_v62 = vadd.f32 %v16543_v32, %v4090_v50  ;;  %v16865_v53 = vrot.slane %v6900_v36, %v14691_v43  ;;  %v6948_v52 = vcombine.low %v6926_v10, %v6933_v16  ;;  %v5039_v12 = vcombine.high %v16750_v38, %v16750_v38 }
 0x298   : > { %v5497_v14 = vcombine.high %v5495_v51, %v5495_v51  ;;  %v5504_v28 = vrot.slane %v5488_v6, %v14691_v43  ;;  %v5518_v30 = vrot.slane %v5496_v5, %v14691_v43  ;;  %v5511_v21 = vrot.slane %v5495_v51, %v14691_v43 }
 0x299   : > { %22626 = vst [vmem:[#allocation54_spill] sm:$0xff] %v16865_v53  ;;  %vm4155_vm6 = vcmp.gt.f32.partialorder %v4126_v62, 0.0  ;;  %v4185_v31 = vmul.f32 %v22599_v18, %v4126_v62  ;;  %v16873_v45 = vcombine.low %v6907_v4, %v16865_v53  ;;  %v22628_v15 = vcombine.low %v16408_v8, %v16408_v8 }
 0x29a   : > { %v5525_v27 = vrot.slane %v5497_v14, %v14691_v43  ;;  %v16887_v16 = vrot.slane %v16860_v33, %v22608_v20  ;;  %v6919_v60 = vcombine.low %v5504_v28, %v5518_v30  ;;  %v16890_v50 = vrot.slane %v6948_v52, %v14691_v43 }
 0x29b   : > { %22627 = vst [vmem:[#allocation8_spill] sm:$0xff] %v16873_v45  ;;  %v16881_v24 = vrot.slane %v22628_v15, %v22608_v20  ;;  %v4214_v6 = vsel %vm4155_vm6, %v4126_v62, %v4185_v31  ;;  %v13698_v51 = vcombine.high %v5504_v28, %v5518_v30  ;;  %v16896_v5 = vcombine.high %v16666_v57, %v16666_v57 }
 0x29c   : > { %22630 = vst [vmem:[#allocation58_spill] sm:$0xff] %v16887_v16  ;;  %v6966_v4 = vcombine.low %v5511_v21, %v5525_v27  ;;  %v5040_v36 = vcombine.high %v4214_v6, %v4214_v6  ;;  %v5047_v10 = vrot.slane %v4214_v6, %v14691_v43  ;;  %v6947_v8 = vrot.slane %v6919_v60, %v14691_v43 }
 0x29d   : > { %22629 = vst [vmem:[#allocation57_spill] sm:$0xff] %v16881_v24  ;;  %22631 = vst [vmem:[#allocation59_spill] sm:$0xff] %v16896_v5  ;;  %v16900_v14 = vcombine.high %v16659_v46, %v16659_v46  ;;  %v16905_v52 = vcombine.high %v16881_v24, %v16881_v24  ;;  %v16909_v15 = vcombine.high %v16708_v54, %v16708_v54 }
 0x29e   : > { %v5054_v62 = vrot.slane %v5040_v36, %v14691_v43  ;;  %v5055_v31 = vcombine.high %v5047_v10, %v5047_v10  ;;  %v6949_v28 = vcombine.low %v6940_v63, %v6947_v8  ;;  %v13699_v30 = vcombine.high %v5511_v21, %v5525_v27 }
 0x29f   : > { %22632 = vst [vmem:[#allocation60_spill] sm:$0xff] %v16900_v14  ;;  %22633 = vst [vmem:[#allocation61_spill] sm:$0xff] %v16905_v52  ;;  %v5063_v60 = vrot.slane %v5047_v10, %v14691_v43  ;;  %v22635_v6 = vcombine.low %v16772_v58, %v16772_v58  ;;  %v16919_v36 = vrot.slane %v6966_v4, %v14691_v43 }
 0x2a0   : > { %22634 = vst [vmem:[#allocation62_spill] sm:$0xff] %v16909_v15  ;;  %v5056_v25 = vcombine.high %v5054_v62, %v5054_v62  ;;  %v5070_v41 = vrot.slane %v5054_v62, %v14691_v43  ;;  %v5077_v29 = vrot.slane %v5055_v31, %v14691_v43  ;;  %v16924_v13 = vrot.slane %v6949_v28, %v14691_v43 }
 0x2a1   : > { %v16916_v38 = vrot.slane %v22635_v6, %v22608_v20  ;;  %v16927_v63 = vrot.slane %v13698_v51, %v14691_v43  ;;  %v5085_v21 = vcombine.high %v5063_v60, %v5063_v60  ;;  %v6475_v27 = vcombine.low %v5039_v12, %v5063_v60 }
 0x2a2   : > { %v16930_v58 = vrot.slane %v5056_v25, %v14691_v43  ;;  %v5086_v10 = vcombine.high %v5070_v41, %v5070_v41  ;;  %v5087_v8 = vcombine.high %v5077_v29, %v5077_v29  ;;  %v16934_v4 = vcombine.high %v16802_v48, %v16802_v48 }
 0x2a3   : > { %22636 = vst [vmem:[#allocation63_spill] sm:$0xff] %v16916_v38  ;;  %v6964_v62 = vcombine.low %v16890_v50, %v16924_v13  ;;  %v16939_v31 = vrot.slane %v13699_v30, %v14691_v43  ;;  %v6476_v28 = vcombine.low %v5077_v29, %v5085_v21  ;;  %v16943_v51 = vcombine.high %v16916_v38, %v16916_v38 }
 0x2a4   : > { %22637 = vst [vmem:[#allocation64_spill] sm:$0xff] %v16934_v4  ;;  %v6477_v12 = vcombine.low %v5087_v8, %v5070_v41  ;;  %v6478_v60 = vcombine.low %v16930_v58, %v5086_v10  ;;  %v16950_v6 = vrot.slane %v16670_v23, %v15757_v1  ;;  %v6485_v13 = vrot.slane %v6475_v27, %v14691_v43 }
 0x2a5   : > { %22638 = vst [vmem:[#allocation65_spill] sm:$0xff] %v16943_v51  ;;  %v6492_v50 = vrot.slane %v6476_v28, %v14691_v43  ;;  %v16956_v29 = vrot.slane %v16666_v57, %v15757_v1  ;;  %v16960_v30 = vrot.slane %v16896_v5, %v15757_v1  ;;  %v16966_v10 = vrot.slane %v16659_v46, %v15757_v1 }
 0x2a6   : > { %22639 = vst [vmem:[#allocation66_spill] sm:$0xff] %v16950_v6  ;;  %v6499_v41 = vrot.slane %v6477_v12, %v14691_v43  ;;  %v6506_v21 = vrot.slane %v6478_v60, %v14691_v43  ;;  %v16970_v27 = vrot.slane %v16900_v14, %v15757_v1  ;;  %v16974_v28 = vrot.slane %v16881_v24, %v15757_v1 }
 0x2a7   : > { %22640 = vst [vmem:[#allocation67_spill] sm:$0xff] %v16956_v29  ;;  %22641 = vst [vmem:[#allocation68_spill] sm:$0xff] %v16960_v30  ;;  %v6507_v8 = vcombine.low %v6485_v13, %v6492_v50  ;;  %v16978_v25 = vrot.slane %v16712_v11, %v15757_v1  ;;  %v16982_v12 = vrot.slane %v16708_v54, %v15757_v1 }
 0x2a8   : > { %22642 = vst [vmem:[#allocation69_spill] sm:$0xff] %v16966_v10  ;;  %22643 = vst [vmem:[#allocation70_spill] sm:$0xff] %v16970_v27  ;;  %v6508_v60 = vcombine.low %v6499_v41, %v6506_v21  ;;  %v16986_v35 = vrot.slane %v16905_v52, %v15757_v1  ;;  %v16990_v13 = vrot.slane %v16909_v15, %v15757_v1 }
 0x2a9   : > { %22644 = vst [vmem:[#allocation71_spill] sm:$0xff] %v16974_v28  ;;  %22645 = vst [vmem:[#allocation72_spill] sm:$0xff] %v16978_v25  ;;  %v16994_v50 = vrot.slane %v16802_v48, %v15757_v1  ;;  %v6515_v11 = vrot.slane %v6507_v8, %v14691_v43  ;;  %v16999_v24 = vrot.slane %v16934_v4, %v15757_v1 }
 0x2aa   : > { %22646 = vst [vmem:[#allocation73_spill] sm:$0xff] %v16982_v12  ;;  %22647 = vst [vmem:[#allocation74_spill] sm:$0xff] %v16986_v35  ;;  %v17003_v41 = vrot.slane %v16916_v38, %v15757_v1  ;;  %v8338_v21 = vsel %vm22114_vm10, %v16956_v29, %v16950_v6  ;;  %v17009_v15 = vrot.slane %v6508_v60, %v14691_v43 }
 0x2ab   : > { %22648 = vst [vmem:[#allocation75_spill] sm:$0xff] %v16990_v13  ;;  %22649 = vst [vmem:[#allocation76_spill] sm:$0xff] %v16994_v50  ;;  %v8339_v48 = vsel %vm22035_vm12, %v16960_v30, %v8338_v21  ;;  %v8345_v8 = vsel %vm22114_vm10, %v16982_v12, %v16978_v25  ;;  %v4091_v4 = vmul.f32 %v16523_v3, %v16673_v39 }
 0x2ac   : > { %22650 = vst [vmem:[#allocation77_spill] sm:$0xff] %v16999_v24  ;;  %22651 = vst [vmem:[#allocation78_spill] sm:$0xff] %v17003_v41  ;;  %v17020_v38 = vrot.slane %v16943_v51, %v15757_v1  ;;  %v8340_v29 = vsel %vm22088_vm14, %v16966_v10, %v8339_v48  ;;  %v8346_v60 = vsel %vm22035_vm12, %v16990_v13, %v8345_v8 }
 0x2ad   : > { %v4092_v21 = vmul.f32 %v16523_v3, %v16705_v44  ;;  %v17029_v30 = vcombine.low %v6515_v11, %v17009_v15  ;;  %v8341_v12 = vsel %vm22087_vm1, %v16970_v27, %v8340_v29  ;;  %v8347_v39 = vsel %vm22088_vm14, %v16994_v50, %v8346_v60 }
 0x2ae   : > { %22652 = vst [vmem:[#allocation79_spill] sm:$0xff] %v17020_v38  ;;  %v4127_v51 = vadd.f32 %v16543_v32, %v4091_v4  ;;  %v8342_v48 = vsel %vm22062_vm4, %v16974_v28, %v8341_v12  ;;  %v8348_v8 = vsel %vm22087_vm1, %v16999_v24, %v8347_v39  ;;  %v4093_v44 = vmul.f32 %v16523_v3, %v16716_v55 }
 0x2af   : > { %v4128_v13 = vadd.f32 %v16543_v32, %v4092_v21  ;;  %v13687_v11 = vcombine.high %v16930_v58, %v16930_v58  ;;  %v8343_v29 = vsel %vm22040_vm11, %v16986_v35, %v8342_v48  ;;  %v8349_v4 = vsel %vm22062_vm4, %v17003_v41, %v8348_v8 }
 0x2b0   : > { %vm4156_vm8 = vcmp.gt.f32.partialorder %v4127_v51, 0.0  ;;  %v17051_v12 = vsel %vm22039_vm13, %v15794_v56, %v8343_v29  ;;  %v8350_v60 = vsel %vm22040_vm11, %v17020_v38, %v8349_v4  ;;  %v4186_v21 = vmul.f32 %v22599_v18, %v4127_v51 }
 0x2b1   : > { %22653 = vst [vmem:[#allocation80_spill] sm:$0xff] %v17051_v12  ;;  %vm4157_vm7 = vcmp.gt.f32.partialorder %v4128_v13, 0.0  ;;  %v17058_v55 = vsel %vm22039_vm13, %v15794_v56, %v8350_v60  ;;  %v4187_v58 = vmul.f32 %v22599_v18, %v4128_v13  ;;  %v4129_v39 = vadd.f32 %v16543_v32, %v4093_v44 }
 0x2b2   : > { %v4100_v48 = vmul.f32 %v16523_v3, %v16720_v17  ;;  %v17065_v8 = vsel %vm7127_vm15, 0.0, %v6964_v62  ;;  %v14075_v29 = vpack.i.bf16 %v17058_v55, %v17051_v12  ;;  %v4215_v4 = vsel %vm4156_vm8, %v4127_v51, %v4186_v21 }
 0x2b3   : > { %v4101_v38 = vmul.f32 %v16523_v3, %v16729_v59  ;;  %v5089_v35 = vcombine.high %v4215_v4, %v4215_v4  ;;  %v5096_v60 = vrot.slane %v4215_v4, %v14691_v43  ;;  %v4216_v41 = vsel %vm4157_vm7, %v4128_v13, %v4187_v58 }
 0x2b4   : > { %vm4158_vm6 = vcmp.gt.f32.partialorder %v4129_v39, 0.0  ;;  %14076 = vrot.lane.b32.xlu0 %v14075_v29, %s14251_s15  ;;  %v6534_v44 = vrot.slane %v13687_v11, %v14691_v43  ;;  %v5138_v17 = vcombine.high %v4216_v41, %v4216_v41  ;;  %v5145_v62 = vrot.slane %v4216_v41, %v14691_v43 }
 0x2b5   : > { %v4188_v24 = vmul.f32 %v22599_v18, %v4129_v39  ;;  %v5103_v28 = vrot.slane %v5089_v35, %v14691_v43  ;;  %v5104_v51 = vcombine.high %v5096_v60, %v5096_v60  ;;  %v5112_v21 = vrot.slane %v5096_v60, %v14691_v43 }
 0x2b6   : > { %v17079_v3 = vadd.f32 %v16543_v32, %v4100_v48  ;;  %v5152_v59 = vrot.slane %v5138_v17, %v14691_v43  ;;  %v5153_v13 = vcombine.high %v5145_v62, %v5145_v62  ;;  %v17083_v29 = vadd.f32 %v16543_v32, %v4101_v38 }
 0x2b7   : > { %v4217_v58 = vsel %vm4158_vm6, %v4129_v39, %v4188_v24  ;;  %v5105_v11 = vcombine.high %v5103_v28, %v5103_v28  ;;  %v5126_v41 = vrot.slane %v5104_v51, %v14691_v43  ;;  %v5161_v4 = vrot.slane %v5145_v62, %v14691_v43 }
 0x2b8   : > { %v5187_v50 = vcombine.high %v4217_v58, %v4217_v58  ;;  %v5119_v35 = vrot.slane %v5103_v28, %v14691_v43  ;;  %v5154_v27 = vcombine.high %v5152_v59, %v5152_v59  ;;  %v5168_v60 = vrot.slane %v5152_v59, %v14691_v43 }
 0x2b9   : > { %v5175_v48 = vrot.slane %v5153_v13, %v14691_v43  ;;  %v5133_v17 = vrot.slane %v5105_v11, %v14691_v43  ;;  %v6525_v10 = vcombine.low %v5112_v21, %v5126_v41  ;;  %v13688_v24 = vcombine.high %v5112_v21, %v5126_v41 }
 0x2ba   : > { %v5194_v32 = vrot.slane %v4217_v58, %v14691_v43  ;;  %v5182_v38 = vrot.slane %v5154_v27, %v14691_v43  ;;  %v5201_v62 = vrot.slane %v5187_v50, %v14691_v43  ;;  %v13691_v6 = vcombine.high %v5168_v60, %v5168_v60 }
 0x2bb   : > { %v6574_v39 = vcombine.low %v5161_v4, %v5175_v48  ;;  %v13690_v51 = vcombine.high %v5161_v4, %v5175_v48  ;;  %v6527_v25 = vcombine.low %v5119_v35, %v5133_v17  ;;  %v6541_v28 = vrot.slane %v6525_v10, %v14691_v43 }
 0x2bc   : > { %v13689_v54 = vcombine.high %v5119_v35, %v5133_v17  ;;  %v6548_v59 = vrot.slane %v13688_v24, %v14691_v43  ;;  %v6576_v13 = vcombine.low %v5168_v60, %v5182_v38  ;;  %v5186_v4 = vcombine.high %v5182_v38, %v5182_v38 }
 0x2bd   : > { %v6590_v11 = vrot.slane %v6574_v39, %v14691_v43  ;;  %v6597_v21 = vrot.slane %v13690_v51, %v14691_v43  ;;  %v6555_v58 = vrot.slane %v6527_v25, %v14691_v43  ;;  %v6556_v41 = vcombine.low %v6534_v44, %v6541_v28 }
 0x2be   : > { %v6583_v27 = vrot.slane %v13689_v54, %v14691_v43  ;;  %v6604_v50 = vrot.slane %v6576_v13, %v14691_v43  ;;  %v5202_v48 = vcombine.high %v5194_v32, %v5194_v32  ;;  %v5203_v12 = vcombine.high %v5201_v62, %v5201_v62 }
 0x2bf   : > { %v5210_v10 = vrot.slane %v5194_v32, %v14691_v43  ;;  %v6557_v35 = vcombine.low %v6548_v59, %v6555_v58  ;;  %v6564_v17 = vrot.slane %v6556_v41, %v14691_v43  ;;  %v5217_v24 = vrot.slane %v5201_v62, %v14691_v43 }
 0x2c0   : > { %v6605_v60 = vcombine.low %v6583_v27, %v6590_v11  ;;  %v6606_v39 = vcombine.low %v6597_v21, %v6604_v50  ;;  %v5224_v51 = vrot.slane %v5202_v48, %v14691_v43  ;;  %v5231_v25 = vrot.slane %v5203_v12, %v14691_v43  ;;  %v17113_v12 = vpop.permute.xlu0 %13971 }
 0x2c1   : > { %v5232_v44 = vcombine.high %v5210_v10, %v5210_v10  ;;  %v6571_v54 = vrot.slane %v6557_v35, %v14691_v43  ;;  %v5233_v28 = vcombine.high %v5217_v24, %v5217_v24  ;;  %v6623_v13 = vcombine.low %v5186_v4, %v5210_v10 }
 0x2c2   : > { %v6613_v38 = vrot.slane %v6605_v60, %v14691_v43  ;;  %v17109_v32 = vrot.slane %v6606_v39, %v14691_v43  ;;  %v5234_v59 = vcombine.high %v5224_v51, %v5224_v51  ;;  %v5235_v58 = vcombine.high %v5231_v25, %v5231_v25 }
 0x2c3   : > { %v6624_v11 = vcombine.low %v5224_v51, %v5232_v44  ;;  %v6572_v41 = vcombine.low %v6564_v17, %v6571_v54  ;;  %v6632_v62 = vrot.slane %v13691_v6, %v14691_v43  ;;  %v6639_v21 = vrot.slane %v6623_v13, %v14691_v43 }
 0x2c4   : > { %v6671_v27 = vcombine.low %v5231_v25, %v5233_v28  ;;  %v22654_v50 = vcombine.low %v16927_v63, %v16919_v36  ;;  %v6621_v10 = vcombine.low %v6613_v38, %v17109_v32  ;;  %v6625_v35 = vcombine.low %v5234_v59, %v5217_v24 }
 0x2c5   : > { %v17126_v6 = vrot.slane %v17065_v8, %v22608_v20  ;;  %v17130_v17 = vrot.slane %v17029_v30, %v22608_v20  ;;  %v6654_v60 = vcombine.low %v6632_v62, %v6639_v21  ;;  %v6672_v39 = vcombine.low %v5235_v58, %v16631_v0 }
 0x2c6   : > { %v17119_v48 = vrot.slane %v22654_v50, %v14691_v43  ;;  %v7137_v36 = vsel %vm7127_vm15, 0.0, %v6572_v41  ;;  %v6646_v63 = vrot.slane %v6624_v11, %v14691_v43  ;;  %v6653_v51 = vrot.slane %v6625_v35, %v14691_v43  ;;  %v17151_v11 = vpop.permute.xlu0 %13976 }
 0x2c7   : > { %vm4165_vm8 = vcmp.gt.f32.partialorder %v17079_v3, 0.0  ;;  %v6681_v24 = vrot.slane %v6671_v27, %v14691_v43  ;;  %v6688_v25 = vrot.slane %v6672_v39, %v14691_v43  ;;  %v4195_v44 = vmul.f32 %v22599_v18, %v17079_v3 }
 0x2c8   : > { %vm4166_vm7 = vcmp.gt.f32.partialorder %v17083_v29, 0.0  ;;  %v6655_v30 = vcombine.low %v6646_v63, %v6653_v51  ;;  %v6662_v54 = vrot.slane %v6654_v60, %v14691_v43  ;;  %v4196_v38 = vmul.f32 %v22599_v18, %v17083_v29 }
 0x2c9   : > { %v7482_v28 = vcombine.high %v7137_v36, %v7137_v36  ;;  %v17148_v13 = vrot.slane %v7137_v36, %v22608_v20  ;;  %v6703_v59 = vcombine.low %v6681_v24, %v6688_v25  ;;  %v4224_v58 = vsel %vm4165_vm8, %v17079_v3, %v4195_v44 }
 0x2ca   : > { %v6669_v41 = vrot.slane %v6655_v30, %v14691_v43  ;;  %v5530_v62 = vcombine.high %v4224_v58, %v4224_v58  ;;  %v5537_v21 = vrot.slane %v4224_v58, %v14691_v43  ;;  %v4225_v27 = vsel %vm4166_vm7, %v17083_v29, %v4196_v38  ;;  %v17174_v44 = vpop.permute.xlu0 %13981 }
 0x2cb   : > { %vm22115_vm6 = vcmask 31744   ;;  %v17157_v50 = vrot.slane %v6621_v10, %v22608_v20  ;;  %v6711_v35 = vrot.slane %v6703_v59, %v14691_v43  ;;  %v5579_v60 = vcombine.high %v4225_v27, %v4225_v27 }
 0x2cc   : > { %v5586_v39 = vrot.slane %v4225_v27, %v14691_v43  ;;  %v6670_v36 = vcombine.low %v6662_v54, %v6669_v41  ;;  %v5544_v3 = vrot.slane %v5530_v62, %v14691_v43  ;;  %v5545_v63 = vcombine.high %v5537_v21, %v5537_v21 }
 0x2cd   : > { %v5553_v51 = vrot.slane %v5537_v21, %v14691_v43  ;;  %v17164_v24 = vrot.slane %v7482_v28, %v22608_v20  ;;  %v17168_v29 = vcombine.high %v17148_v13, %v17148_v13  ;;  %v17171_v10 = vcombine.low %v6711_v35, %v16757_v49 }
 0x2ce   : > { %v5593_v25 = vrot.slane %v5579_v60, %v14691_v43  ;;  %v7138_v30 = vsel %vm7127_vm15, 0.0, %v6670_v36  ;;  %v5546_v54 = vcombine.high %v5544_v3, %v5544_v3  ;;  %v5560_v38 = vrot.slane %v5544_v3, %v14691_v43 }
 0x2cf   : > { %v5567_v59 = vrot.slane %v5545_v63, %v14691_v43  ;;  %v13700_v28 = vcombine.high %v5553_v51, %v5553_v51  ;;  %v5594_v58 = vcombine.high %v5586_v39, %v5586_v39  ;;  %v5602_v62 = vrot.slane %v5586_v39, %v14691_v43 }
 0x2d0   : > { %v5595_v41 = vcombine.high %v5593_v25, %v5593_v25  ;;  %v5574_v21 = vrot.slane %v5546_v54, %v14691_v43  ;;  %v5576_v27 = vcombine.high %v5560_v38, %v5560_v38  ;;  %v7516_v60 = vcombine.high %v7138_v30, %v7138_v30 }
 0x2d1   : > { %v5577_v35 = vcombine.high %v5567_v59, %v5567_v59  ;;  %v6968_v4 = vcombine.low %v5553_v51, %v5567_v59  ;;  %v5609_v0 = vrot.slane %v5593_v25, %v14691_v43  ;;  %v13974_v36 = vunpack.i.h.bf16 %v17113_v12  ;;  %v17188_v51 = vpop.permute.xlu0 %13986 }
 0x2d2   : > { %v7016_v14 = vcombine.low %v5574_v21, %v5576_v27  ;;  %v5578_v46 = vcombine.high %v5574_v21, %v5574_v21  ;;  %v7024_v5 = vrot.slane %v13700_v28, %v14691_v43  ;;  %v5616_v39 = vrot.slane %v5594_v58, %v14691_v43  ;;  %22655 = vst [vmem:[#allocation81_spill] sm:$0xff] %v17188_v51  ;;  %v14189_v28 = vld [vmem:[%s21891_s4] ss:$0 sm:$0xff] }
 0x2d3   : > { %v6996_v3 = vrot.slane %v6968_v4, %v14691_v43  ;;  %v7015_v63 = vcombine.low %v5577_v35, %v5560_v38  ;;  %v5623_v54 = vrot.slane %v5595_v41, %v14691_v43  ;;  %v5624_v57 = vcombine.high %v5602_v62, %v5602_v62 }
 0x2d4   : > { %v5625_v23 = vcombine.high %v5609_v0, %v5609_v0  ;;  %v7017_v52 = vcombine.low %v5578_v46, %v5602_v62  ;;  %v5626_v37 = vcombine.high %v5616_v39, %v5616_v39  ;;  %v9223_v38 = vsel %vm22115_vm6, %v16571_v22, %v13974_v36  ;;  %v14190_v62 = vld [vmem:[%s21892_s5] ss:$0 sm:$0xff] }
 0x2d5   : > { %v6998_v25 = vcombine.low %v16939_v31, %v6996_v3  ;;  %v7031_v59 = vrot.slane %v7015_v63, %v14691_v43  ;;  %v7063_v4 = vcombine.low %v5616_v39, %v5624_v57  ;;  %v4102_v58 = vmul.f32 %v14189_v28, %v16744_v7 }
 0x2d6   : > { %v7038_v31 = vrot.slane %v7016_v14, %v14691_v43  ;;  %v7045_v27 = vrot.slane %v7017_v52, %v14691_v43  ;;  %v17204_v46 = vrot.slane %v7138_v30, %v22608_v20  ;;  %v17207_v57 = vrot.slane %v7516_v60, %v22608_v20 }
 0x2d7   : > { %v17199_v41 = vrot.slane %v6998_v25, %v14691_v43  ;;  %v7046_v21 = vcombine.low %v7024_v5, %v7031_v59  ;;  %v7064_v22 = vcombine.low %v5626_v37, %v5609_v0  ;;  %v4138_v7 = vadd.f32 %v14190_v62, %v4102_v58  ;;  %v17218_v37 = vpop.permute.xlu0 %13991 }
 0x2d8   : > { %v7047_v5 = vcombine.low %v7038_v31, %v7045_v27  ;;  %v7065_v36 = vcombine.low %v5623_v54, %v5625_v23  ;;  %v7073_v14 = vrot.slane %v7063_v4, %v14691_v43  ;;  %v13979_v60 = vunpack.i.h.bf16 %v17151_v11  ;;  %22656 = vst [vmem:[#allocation82_spill] sm:$0xff] %v17218_v37 }
 0x2d9   : > { %v7080_v52 = vrot.slane %v7064_v22, %v14691_v43  ;;  %vm4167_vm8 = vcmp.gt.f32.partialorder %v4138_v7, 0.0  ;;  %v4197_v30 = vmul.f32 %v22599_v18, %v4138_v7  ;;  %v7054_v0 = vrot.slane %v7046_v21, %v14691_v43 }
 0x2da   : > { %v7061_v3 = vrot.slane %v7047_v5, %v14691_v43  ;;  %vm9230_vm7 = vcmask 64512   ;;  %v13984_v63 = vunpack.i.h.bf16 %v17174_v44  ;;  %v17225_v23 = vcombine.high %v17204_v46, %v17204_v46 }
 0x2db   : > { %v7095_v39 = vcombine.low %v7073_v14, %v7080_v52  ;;  %v4226_v25 = vsel %vm4167_vm8, %v4138_v7, %v4197_v30  ;;  %v5627_v18 = vcombine.high %v5623_v54, %v5623_v54  ;;  %v13989_v28 = vunpack.i.h.bf16 %v17188_v51  ;;  %v17242_v52 = vpop.permute.xlu0 %14011 }
 0x2dc   : > { %v7062_v59 = vcombine.low %v7054_v0, %v7061_v3  ;;  %v5634_v4 = vrot.slane %v4226_v25, %v14691_v43  ;;  %v7087_v58 = vrot.slane %v7065_v36, %v14691_v43  ;;  %v9232_v31 = vsel %vm9230_vm7, %v9223_v38, %v13979_v60 }
 0x2dd   : > { %v9241_v7 = vsel %vm9239_vm0, %v9232_v31, %v13984_v63  ;;  %v13994_v54 = vunpack.i.h.bf16 %v17218_v37  ;;  %v7103_v5 = vrot.slane %v7095_v39, %v14691_v43  ;;  %vm9256_vm8 = vcmask 162816  }
 0x2de   : > { %v17234_v22 = vsel %vm7127_vm15, 0.0, %v7062_v59  ;;  %v5641_v62 = vrot.slane %v5634_v4, %v14691_v43  ;;  %v9249_v36 = vsel %vm22036_vm2, %v9241_v7, %v13989_v28  ;;  %v17253_v3 = vcombine.high %v17164_v24, %v17164_v24 }
 0x2df   : > { %22657 = vst [vmem:[#allocation83_spill] sm:$0xff] %v17234_v22  ;;  %v17248_v30 = vrot.slane %v17234_v22, %v22608_v20  ;;  %v22659_v63 = vcombine.low %v17109_v32, %v17109_v32  ;;  %v17263_v25 = vcombine.high %v17157_v50, %v17157_v50  ;;  %v22660_v59 = vcombine.low %v16818_v34, %v16818_v34 }
 0x2e0   : > { %v7066_v60 = vcombine.low %v5627_v18, %v5641_v62  ;;  %v17273_v28 = vsel %vm9256_vm8, %v9249_v36, %v13994_v54  ;;  %v17278_v32 = vcombine.high %v16782_v47, %v16782_v47  ;;  %v17287_v34 = vcombine.high %v16852_v40, %v16852_v40 }
 0x2e1   : > { %22658 = vst [vmem:[#allocation84_spill] sm:$0xff] %v17248_v30  ;;  %v17259_v39 = vrot.slane %v22659_v63, %v22608_v20  ;;  %v17269_v18 = vrot.slane %v22660_v59, %v22608_v20  ;;  %v17291_v54 = vrot.slane %v17168_v29, %v15757_v1  ;;  %v7833_v63 = vrot.slane %v17148_v13, %v15757_v1  ;;  %v17346_v30 = vpop.permute.xlu0 %14016 }
 0x2e2   : > { %v7094_v4 = vrot.slane %v7066_v60, %v14691_v43  ;;  %v17301_v59 = vrot.slane %v17164_v24, %v15757_v1  ;;  %v17305_v38 = vrot.slane %v17253_v3, %v15757_v1  ;;  %v17309_v62 = vrot.slane %v17157_v50, %v15757_v1 }
 0x2e3   : > { %v17283_v7 = vcombine.high %v17259_v39, %v17259_v39  ;;  %v17295_v60 = vcombine.high %v17269_v18, %v17269_v18  ;;  %v7865_v14 = vrot.slane %v16776_v19, %v15757_v1  ;;  %v17326_v27 = vrot.slane %v16782_v47, %v15757_v1 }
 0x2e4   : > { %v7096_v36 = vcombine.low %v7087_v58, %v7094_v4  ;;  %v17313_v58 = vrot.slane %v17263_v25, %v15757_v1  ;;  %v17317_v4 = vrot.slane %v16795_v26, %v15757_v1  ;;  %v17330_v21 = vrot.slane %v17278_v32, %v15757_v1 }
 0x2e5   : > { %v17334_v31 = vrot.slane %v17259_v39, %v15757_v1  ;;  %v17338_v35 = vrot.slane %v17283_v7, %v15757_v1  ;;  %v17353_v45 = vrot.slane %v17287_v34, %v15757_v1  ;;  %v17361_v33 = vrot.slane %v17269_v18, %v15757_v1 }
 0x2e6   : > { %v17320_v0 = vrot.slane %v7096_v36, %v14691_v43  ;;  %22662 = vst [vmem:[#allocation86_spill] sm:$0xff] %v17330_v21  ;;  %v17342_v43 = vrot.slane %v16852_v40, %v15757_v1  ;;  %v7968_v36 = vsel %vm22114_vm10, %v17291_v54, %v7833_v63  ;;  %v7975_v16 = vsel %vm22114_vm10, %v17317_v4, %v7865_v14 }
 0x2e7   : > { %v7969_v53 = vsel %vm22035_vm12, %v17301_v59, %v7968_v36  ;;  %v17365_v63 = vrot.slane %v17295_v60, %v15757_v1  ;;  %v8144_v37 = vrot.slane %v17148_v13, %v15742_v42  ;;  %vm9265_vm15 = vcmask 195584  }
 0x2e8   : > { %22661 = vst [vmem:[#allocation85_spill] sm:$0xff] %v17320_v0  ;;  %v17349_v22 = vcombine.low %v7103_v5, %v17320_v0  ;;  %v7970_v5 = vsel %vm22088_vm14, %v17305_v38, %v7969_v53  ;;  %v14019_v0 = vunpack.i.h.bf16 %v17346_v30  ;;  %v8156_v13 = vrot.slane %v17253_v3, %v15742_v42 }
 0x2e9   : > { %v7971_v36 = vsel %vm22087_vm1, %v17309_v62, %v7970_v5  ;;  %v8152_v5 = vrot.slane %v17164_v24, %v15742_v42 }
 0x2ea   : > { %22663 = vst [vmem:[#allocation87_spill] sm:$0xff] %v17349_v22  ;;  %v7976_v22 = vsel %vm22035_vm12, %v17326_v27, %v7975_v16  ;;  %v7972_v51 = vsel %vm22062_vm4, %v17313_v58, %v7971_v36  ;;  %v8148_v16 = vrot.slane %v17168_v29, %v15742_v42  ;;  %v8160_v36 = vrot.slane %v17157_v50, %v15742_v42 }
 0x2eb   : > { %v7977_v14 = vsel %vm22088_vm14, %v17330_v21, %v7976_v22  ;;  %v7973_v22 = vsel %vm22040_vm11, %v17334_v31, %v7972_v51  ;;  %v8164_v29 = vrot.slane %v17263_v25, %v15742_v42  ;;  %v8168_v51 = vrot.slane %v17259_v39, %v15742_v42 }
 0x2ec   : > { %v7978_v53 = vsel %vm22087_vm1, %v17342_v43, %v7977_v14  ;;  %v17396_v14 = vsel %vm22039_vm13, %v17338_v35, %v7973_v22  ;;  %v8172_v50 = vrot.slane %v17283_v7, %v15742_v42  ;;  %v8184_v25 = vrot.slane %v16782_v47, %v15742_v42 }
 0x2ed   : > { %v7979_v21 = vsel %vm22062_vm4, %v17353_v45, %v7978_v53  ;;  %22664 = vst [vmem:[#allocation88_spill] sm:$0xff] %v17396_v14  ;;  %v8176_v53 = vrot.slane %v16776_v19, %v15742_v42  ;;  %v8188_v39 = vrot.slane %v17278_v32, %v15742_v42  ;;  %v8196_v7 = vrot.slane %v17287_v34, %v15742_v42 }
 0x2ee   : > { %v7980_v24 = vsel %vm22040_vm11, %v17361_v33, %v7979_v21  ;;  %v8180_v21 = vrot.slane %v16795_v26, %v15742_v42  ;;  %v8200_v19 = vrot.slane %v17269_v18, %v15742_v42  ;;  %v8204_v26 = vrot.slane %v17295_v60, %v15742_v42 }
 0x2ef   : > { %v17406_v3 = vsel %vm22039_vm13, %v17365_v63, %v7980_v24  ;;  %v8192_v24 = vrot.slane %v16852_v40, %v15742_v42  ;;  %v22666_v40 = vcombine.high %v17065_v8, %v17065_v8  ;;  %v7633_v34 = vcombine.high %v17126_v6, %v17126_v6 }
 0x2f0   : > { %22665 = vst [vmem:[#allocation89_spill] sm:$0xff] %v17406_v3  ;;  %v14090_v22 = vpack.i.bf16 %v17406_v3, %v17396_v14  ;;  %v8272_v14 = vsel %vm22114_vm10, %v8148_v16, %v8144_v37  ;;  %v8279_v32 = vsel %vm22114_vm10, %v8180_v21, %v8176_v53  ;;  %v13714_v37 = vcombine.low %v17199_v41, %v17199_v41 }
 0x2f1   : > { %v8273_v47 = vsel %vm22035_vm12, %v8152_v5, %v8272_v14  ;;  %v7632_v3 = vrot.slane %v22666_v40, %v22608_v20  ;;  %v8280_v60 = vsel %vm22035_vm12, %v8184_v25, %v8279_v32  ;;  %v22667_v16 = vcombine.low %v17119_v48, %v17199_v41 }
 0x2f2   : > { %14091 = vrot.lane.b32.xlu0 %v14090_v22, %s14263_s28  ;;  %v8274_v18 = vsel %vm22088_vm14, %v8156_v13, %v8273_v47  ;;  %v8281_v8 = vsel %vm22088_vm14, %v8188_v39, %v8280_v60  ;;  %v8208_v21 = vrot.slane %v17126_v6, %v15742_v42  ;;  %v7649_v25 = vrot.slane %v13714_v37, %v22608_v20 }
 0x2f3   : > { %v7642_v5 = vrot.slane %v22667_v16, %v22608_v20  ;;  %v8275_v14 = vsel %vm22087_vm1, %v8160_v36, %v8274_v18  ;;  %v7634_v53 = vcombine.high %v7632_v3, %v7632_v3  ;;  %v8282_v22 = vsel %vm22087_vm1, %v8192_v24, %v8281_v8  ;;  %v17469_v16 = vpop.permute.xlu0 %14021 }
 0x2f4   : > { %v8276_v13 = vsel %vm22062_vm4, %v8164_v29, %v8275_v14  ;;  %v8283_v48 = vsel %vm22062_vm4, %v8196_v7, %v8282_v22  ;;  %v8212_v41 = vrot.slane %v7633_v34, %v15742_v42  ;;  %v8216_v36 = vrot.slane %v7632_v3, %v15742_v42 }
 0x2f5   : > { %v7650_v47 = vcombine.high %v7642_v5, %v7642_v5  ;;  %v8277_v32 = vsel %vm22040_vm11, %v8168_v51, %v8276_v13  ;;  %v8284_v40 = vsel %vm22040_vm11, %v8200_v19, %v8283_v48  ;;  %v7651_v18 = vcombine.high %v7649_v25, %v7649_v25 }
 0x2f6   : > { %v17458_v39 = vsel %vm22039_vm13, %v8172_v50, %v8277_v32  ;;  %v8220_v29 = vrot.slane %v7634_v53, %v15742_v42  ;;  %v22668_v24 = vunpack.i.h.bf16 %v17242_v52  ;;  %v8285_v7 = vsel %vm22039_vm13, %v8204_v26, %v8284_v40 }
 0x2f7   : > { %v8224_v37 = vrot.slane %v7642_v5, %v15742_v42  ;;  %v14095_v19 = vpack.i.bf16 %v8285_v7, %v17458_v39  ;;  %v8228_v14 = vrot.slane %v7650_v47, %v15742_v42  ;;  %v8286_v8 = vsel %vm22114_vm10, %v8212_v41, %v8208_v21 }
 0x2f8   : > { %v9267_v60 = vsel %vm9265_vm15, %v17273_v28, %v22668_v24  ;;  %v8232_v13 = vrot.slane %v7649_v25, %v15742_v42  ;;  %v8236_v28 = vrot.slane %v7651_v18, %v15742_v42  ;;  %v8287_v22 = vsel %vm22035_vm12, %v8216_v36, %v8286_v8 }
 0x2f9   : > { %v17472_v50 = vsel %vm9274_vm9, %v9267_v60, %v14019_v0  ;;  %v8352_v26 = vsel %vm22114_vm10, %v17301_v59, %v17291_v54  ;;  %14096 = vrot.lane.b32.xlu0 %v14095_v19, %s14264_s29  ;;  %v8288_v0 = vsel %vm22088_vm14, %v8220_v29, %v8287_v22  ;;  %v17489_v21 = vrot.slane %v7633_v34, %v15757_v1 }
 0x2fa   : > { %v8353_v48 = vsel %vm22035_vm12, %v17305_v38, %v8352_v26  ;;  %v8289_v41 = vsel %vm22087_vm1, %v8224_v37, %v8288_v0  ;;  %v7897_v54 = vrot.slane %v17126_v6, %v15757_v1  ;;  %v17501_v38 = vrot.slane %v7632_v3, %v15757_v1  ;;  %v22670_v3 = vld [vmem:[#allocation23_spill] sm:$0xff] }
 0x2fb   : > { %v8354_v40 = vsel %vm22088_vm14, %v17309_v62, %v8353_v48  ;;  %v8290_v59 = vsel %vm22062_vm4, %v8228_v14, %v8289_v41  ;;  %v17504_v34 = vrot.slane %v7634_v53, %v15757_v1  ;;  %v17510_v62 = vrot.slane %v7642_v5, %v15757_v1  ;;  %v22671_v14 = vld [vmem:[#allocation22_spill] sm:$0xff] }
 0x2fc   : > { %v8355_v29 = vsel %vm22087_vm1, %v17313_v58, %v8354_v40  ;;  %v8291_v24 = vsel %vm22040_vm11, %v8232_v13, %v8290_v59  ;;  %v17513_v6 = vrot.slane %v7650_v47, %v15757_v1  ;;  %v7927_v53 = vsel %vm22114_vm10, %v22670_v3, %v15794_v56 }
 0x2fd   : > { %v8356_v60 = vsel %vm22062_vm4, %v17334_v31, %v8355_v29  ;;  %v17516_v37 = vsel %vm22039_vm13, %v8236_v28, %v8291_v24  ;;  %v7982_v19 = vsel %vm22114_vm10, %v17489_v21, %v7897_v54  ;;  %v17531_v47 = vrot.slane %v7649_v25, %v15757_v1  ;;  %v22672_v28 = vld [vmem:[#allocation5_spill] sm:$0xff] }
 0x2fe   : > { %22669 = vst [vmem:[#allocation90_spill] sm:$0xff] %v17516_v37  ;;  %v8357_v58 = vsel %vm22040_vm11, %v17338_v35, %v8356_v60  ;;  %v13995_v31 = vpack.i.bf16 %v17516_v37, %v8285_v7  ;;  %v7929_v8 = vsel %vm22035_vm12, %v22671_v14, %v7927_v53  ;;  %v17538_v13 = vrot.slane %v7651_v18, %v15757_v1 }
 0x2ff   : > { %v17528_v5 = vsel %vm22039_vm13, %v15794_v56, %v8357_v58  ;;  %v7931_v22 = vsel %vm22088_vm14, %v22672_v28, %v7929_v8  ;;  %v7983_v7 = vsel %vm22035_vm12, %v17501_v38, %v7982_v19  ;;  %v13709_v18 = vcombine.low %v17009_v15, %v17009_v15 }
 0x300   : > { %v14100_v35 = vpack.i.bf16 %v17528_v5, %v17058_v55  ;;  %13996 = vrot.lane.b32.xlu1 %v13995_v31, %s14259_s18  ;;  %v7933_v25 = vsel %vm22087_vm1, %v15794_v56, %v7931_v22  ;;  %v7984_v26 = vsel %vm22088_vm14, %v17504_v34, %v7983_v7  ;;  %v17551_v55 = vcombine.high %v16839_v9, %v16839_v9 }
 0x301   : > { %v7935_v0 = vsel %vm22062_vm4, %v22670_v3, %v7933_v25  ;;  %v7985_v48 = vsel %vm22087_vm1, %v17510_v62, %v7984_v26  ;;  %v17562_v41 = vcombine.high %v17130_v17, %v17130_v17  ;;  %v13711_v40 = vcombine.low %v16757_v49, %v16757_v49 }
 0x302   : > { %14101 = vrot.lane.b32.xlu0 %v14100_v35, %s14260_s19  ;;  %v7937_v54 = vsel %vm22040_vm11, %v22671_v14, %v7935_v0  ;;  %v7986_v15 = vsel %vm22062_vm4, %v17513_v6, %v7985_v48  ;;  %v17571_v59 = vrot.slane %v13709_v18, %v22608_v20  ;;  %v17575_v29 = vrot.slane %v17171_v10, %v22608_v20 }
 0x303   : > { %v7939_v24 = vsel %vm22039_vm13, %v22672_v28, %v7937_v54  ;;  %v7987_v60 = vsel %vm22040_vm11, %v17531_v47, %v7986_v15  ;;  %v17583_v49 = vcombine.high %v17207_v57, %v17207_v57  ;;  %v17586_v58 = vrot.slane %v13711_v40, %v22608_v20 }
 0x304   : > { %v17590_v3 = vsel %vm22039_vm13, %v17538_v13, %v7987_v60  ;;  %v22674_v10 = vunpack.i.l.bf16 %v17113_v12  ;;  %v17597_v19 = vcombine.high %v17571_v59, %v17571_v59  ;;  %v8528_v31 = vrot.slane %v16834_v2, %v15757_v1 }
 0x305   : > { %22673 = vst [vmem:[#allocation23_spill] sm:$0xff] %v17590_v3  ;;  %v14000_v14 = vpack.i.bf16 %v7939_v24, %v17590_v3  ;;  %v22675_v8 = vunpack.i.l.bf16 %v17151_v11  ;;  %v17607_v28 = vcombine.high %v17575_v29, %v17575_v29  ;;  %v17611_v12 = vcombine.high %v17586_v58, %v17586_v58  ;;  %v22677_v3 = vld [vmem:[#allocation86_spill] sm:$0xff] }
 0x306   : > { %v9222_v53 = vsel %vm22115_vm6, %v7939_v24, %v22674_v10  ;;  %v22676_v22 = vunpack.i.l.bf16 %v17174_v44  ;;  %v17618_v25 = vrot.slane %v16847_v61, %v15757_v1  ;;  %v17622_v11 = vrot.slane %v16839_v9, %v15757_v1 }
 0x307   : > { %v9231_v35 = vsel %vm9230_vm7, %v9222_v53, %v22675_v8  ;;  %v17626_v26 = vrot.slane %v17551_v55, %v15757_v1  ;;  %14001 = vrot.lane.b32.xlu1 %v14000_v14, %s14263_s28  ;;  %v17631_v18 = vrot.slane %v17130_v17, %v15757_v1  ;;  %v17635_v44 = vrot.slane %v17562_v41, %v15757_v1 }
 0x308   : > { %v9240_v7 = vsel %vm9239_vm0, %v9231_v35, %v22676_v22  ;;  %v17639_v0 = vrot.slane %v17571_v59, %v15757_v1  ;;  %v17643_v48 = vrot.slane %v17597_v19, %v15757_v1  ;;  %v8560_v40 = vrot.slane %v17204_v46, %v15757_v1 }
 0x309   : > { %v17649_v54 = vrot.slane %v17225_v23, %v15757_v1  ;;  %v17653_v15 = vrot.slane %v17207_v57, %v15757_v1  ;;  %v17657_v24 = vrot.slane %v17583_v49, %v15757_v1  ;;  %v17661_v60 = vrot.slane %v17575_v29, %v15757_v1 }
 0x30a   : > { %v17665_v10 = vrot.slane %v17607_v28, %v15757_v1  ;;  %v17669_v53 = vrot.slane %v17586_v58, %v15757_v1  ;;  %v17673_v14 = vrot.slane %v17611_v12, %v15757_v1  ;;  %v8681_v8 = vsel %vm22114_vm10, %v17618_v25, %v8528_v31 }
 0x30b   : > { %v8688_v35 = vsel %vm22114_vm10, %v17649_v54, %v8560_v40  ;;  %v8359_v22 = vsel %vm22114_vm10, %v17326_v27, %v17317_v4  ;;  %v8366_v36 = vsel %vm22114_vm10, %v17501_v38, %v17489_v21  ;;  %v8682_v51 = vsel %vm22035_vm12, %v17622_v11, %v8681_v8 }
 0x30c   : > { %v8689_v32 = vsel %vm22035_vm12, %v17653_v15, %v8688_v35  ;;  %v8360_v31 = vsel %vm22035_vm12, %v22677_v3, %v8359_v22  ;;  %v8367_v40 = vsel %vm22035_vm12, %v17504_v34, %v8366_v36  ;;  %v8683_v37 = vsel %vm22088_vm14, %v17626_v26, %v8682_v51 }
 0x30d   : > { %v8690_v27 = vsel %vm22088_vm14, %v17657_v24, %v8689_v32  ;;  %v8361_v4 = vsel %vm22088_vm14, %v17342_v43, %v8360_v31  ;;  %v8368_v21 = vsel %vm22088_vm14, %v17510_v62, %v8367_v40  ;;  %v8684_v38 = vsel %vm22087_vm1, %v17631_v18, %v8683_v37  ;;  %v22678_v31 = vld [vmem:[#allocation81_spill] sm:$0xff] }
 0x30e   : > { %v8691_v3 = vsel %vm22087_vm1, %v17661_v60, %v8690_v27  ;;  %v8362_v36 = vsel %vm22087_vm1, %v17353_v45, %v8361_v4  ;;  %v8369_v51 = vsel %vm22087_vm1, %v17513_v6, %v8368_v21  ;;  %v8685_v32 = vsel %vm22062_vm4, %v17635_v44, %v8684_v38 }
 0x30f   : > { %v8692_v43 = vsel %vm22062_vm4, %v17665_v10, %v8691_v3  ;;  %v8363_v34 = vsel %vm22062_vm4, %v17361_v33, %v8362_v36  ;;  %v8370_v62 = vsel %vm22062_vm4, %v17531_v47, %v8369_v51  ;;  %v8686_v37 = vsel %vm22040_vm11, %v17639_v0, %v8685_v32  ;;  %v22681_v3 = vld [vmem:[#allocation82_spill] sm:$0xff] }
 0x310   : > { %v8693_v45 = vsel %vm22040_vm11, %v17669_v53, %v8692_v43  ;;  %v8364_v6 = vsel %vm22040_vm11, %v17365_v63, %v8363_v34  ;;  %v8371_v8 = vsel %vm22040_vm11, %v17538_v13, %v8370_v62  ;;  %v8687_v35 = vsel %vm22039_vm13, %v17643_v48, %v8686_v37 }
 0x311   : > { %v8694_v33 = vsel %vm22039_vm13, %v17673_v14, %v8693_v45  ;;  %v17731_v47 = vsel %vm22039_vm13, %v15794_v56, %v8364_v6  ;;  %v17735_v22 = vsel %vm22039_vm13, %v15794_v56, %v8371_v8  ;;  %v22679_v40 = vunpack.i.l.bf16 %v22678_v31 }
 0x312   : > { %v14105_v27 = vpack.i.bf16 %v8694_v33, %v8687_v35  ;;  %v14120_v13 = vpack.i.bf16 %v17731_v47, %v17528_v5  ;;  %v14005_v4 = vpack.i.bf16 %v17735_v22, %v17731_v47  ;;  %v22680_v21 = vunpack.i.h.bf16 %v17469_v16  ;;  %v22686_v33 = vld [vmem:[#allocation53_spill] sm:$0xff] }
 0x313   : > { %v9248_v63 = vsel %vm22036_vm2, %v9240_v7, %v22679_v40  ;;  %v22682_v36 = vunpack.i.l.bf16 %v22681_v3  ;;  %v8864_v32 = vrot.slane %v16834_v2, %v15742_v42  ;;  %v8868_v7 = vrot.slane %v16847_v61, %v15742_v42 }
 0x314   : > { %v9284_v38 = vsel %vm860_vm3, %v17472_v50, %v22680_v21  ;;  %14106 = vrot.lane.b32.xlu0 %v14105_v27, %s14261_s20  ;;  %14006 = vrot.lane.b32.xlu1 %v14005_v4, %s14260_s19  ;;  %v22683_v43 = vunpack.i.l.bf16 %v17242_v52  ;;  %v8872_v50 = vrot.slane %v16839_v9, %v15742_v42  ;;  %v8876_v62 = vrot.slane %v17551_v55, %v15742_v42  ;;  %v22690_v4 = vld [vmem:[#allocation8_spill] sm:$0xff] }
 0x315   : > { %v9257_v51 = vsel %vm9256_vm8, %v9248_v63, %v22682_v36  ;;  %v22684_v2 = vunpack.i.l.bf16 %v17346_v30  ;;  %v8880_v61 = vrot.slane %v17130_v17, %v15742_v42  ;;  %v8884_v45 = vrot.slane %v17562_v41, %v15742_v42  ;;  %v22689_v63 = vld [vmem:[#allocation54_spill] sm:$0xff] }
 0x316   : > { %v9266_v34 = vsel %vm9265_vm15, %v9257_v51, %v22683_v43  ;;  %v8888_v52 = vrot.slane %v17571_v59, %v15742_v42  ;;  %v22685_v6 = vunpack.i.l.bf16 %v17469_v16  ;;  %v8892_v55 = vrot.slane %v17597_v19, %v15742_v42  ;;  %v22691_v51 = vld [vmem:[#allocation83_spill] sm:$0xff] }
 0x317   : > { %v9275_v37 = vsel %vm9274_vm9, %v9266_v34, %v22684_v2  ;;  %v8896_v30 = vrot.slane %v17204_v46, %v15742_v42  ;;  %v8900_v8 = vrot.slane %v17225_v23, %v15742_v42  ;;  %v8904_v41 = vrot.slane %v17207_v57, %v15742_v42 }
 0x318   : > { %v9283_v9 = vsel %vm860_vm3, %v9275_v37, %v22685_v6  ;;  %v8908_v59 = vrot.slane %v17583_v49, %v15742_v42  ;;  %v8912_v16 = vrot.slane %v17575_v29, %v15742_v42  ;;  %v8916_v35 = vrot.slane %v17607_v28, %v15742_v42  ;;  %v22688_v28 = vld [vmem:[#allocation58_spill] sm:$0xff] }
 0x319   : > { %v9291_v17 = vpack.c.bf16 %v9284_v38, %v9283_v9  ;;  %v8920_v19 = vrot.slane %v17586_v58, %v15742_v42  ;;  %v8924_v46 = vrot.slane %v17611_v12, %v15742_v42  ;;  %v9017_v23 = vsel %vm22114_vm10, %v8868_v7, %v8864_v32 }
 0x31a   : > { %v9018_v57 = vsel %vm22035_vm12, %v8872_v50, %v9017_v23  ;;  %v9024_v49 = vsel %vm22114_vm10, %v8900_v8, %v8896_v30  ;;  %v22687_v29 = vcombine.high %v22686_v33, %v22686_v33  ;;  %v17806_v58 = vcombine.high %v22688_v28, %v22688_v28 }
 0x31b   : > { %13905 = vmatprep.mubr.msk.bf16.mxu1 %vm9315_vm5, %v9291_v17  ;;  %v9019_v12 = vsel %vm22088_vm14, %v8876_v62, %v9018_v57  ;;  %v9025_v40 = vsel %vm22035_vm12, %v8904_v41, %v9024_v49  ;;  %v13713_v27 = vcombine.low %v22689_v63, %v22689_v63  ;;  %v17814_v21 = vrot.slane %v22690_v4, %v22608_v20  ;;  %v22694_v17 = vld [vmem:[#allocation85_spill] sm:$0xff] }
 0x31c   : > { %v17802_v31 = vrot.slane %v22687_v29, %v22608_v20  ;;  %v9020_v38 = vsel %vm22087_vm1, %v8880_v61, %v9019_v12  ;;  %v9026_v3 = vsel %vm22088_vm14, %v8908_v59, %v9025_v40  ;;  %v22692_v32 = vcombine.high %v22691_v51, %v22691_v51  ;;  %v22693_v61 = vld [vmem:[#allocation84_spill] sm:$0xff]  ;;  %v22695_v59 = vld [vmem:[#allocation87_spill] sm:$0xff] }
 0x31d   : > { %v9021_v43 = vsel %vm22062_vm4, %v8884_v45, %v9020_v38  ;;  %v9027_v34 = vsel %vm22087_vm1, %v8912_v16, %v9026_v3  ;;  %v17831_v50 = vrot.slane %v13713_v27, %v22608_v20  ;;  %v17835_v62 = vcombine.high %v17814_v21, %v17814_v21  ;;  %v14166_v38 = vld [vmem:[%s21889_s2] sm:$0xff]  }
 0x31e   : > { %v17820_v36 = vcombine.high %v17802_v31, %v17802_v31  ;;  %v17826_v7 = vrot.slane %v22692_v32, %v22608_v20  ;;  %v9022_v2 = vsel %vm22040_vm11, %v8888_v52, %v9021_v43  ;;  %v9028_v37 = vsel %vm22062_vm4, %v8916_v35, %v9027_v34  ;;  %13899 = vmatprep.subr.bf16.mxu1 %v14166_v38 }
 0x31f   : > { %v17841_v6 = vcombine.high %v22693_v61, %v22693_v61  ;;  %v9023_v9 = vsel %vm22039_vm13, %v8892_v55, %v9022_v2  ;;  %v9029_v30 = vsel %vm22040_vm11, %v8920_v19, %v9028_v37  ;;  %v17851_v8 = vcombine.high %v17831_v50, %v17831_v50  ;;  %13900 = vmatpush3.bf16.msra.mxu1 %v14166_v38 }
 0x320   : > { %v17845_v45 = vcombine.high %v17826_v7, %v17826_v7  ;;  %v13715_v52 = vcombine.low %v22694_v17, %v22694_v17  ;;  %v9030_v41 = vsel %vm22039_vm13, %v8924_v46, %v9029_v30  ;;  %v17858_v16 = vrot.slane %v22695_v59, %v22608_v20 }
 0x321   : > { %v8592_v35 = vrot.slane %v22688_v28, %v15757_v1  ;;  %v17864_v55 = vrot.slane %v17806_v58, %v15757_v1  ;;  %v14110_v19 = vpack.i.bf16 %v9030_v41, %v9023_v9  ;;  %v17871_v57 = vrot.slane %v17802_v31, %v15757_v1 }
 0x322   : > { %v17867_v23 = vrot.slane %v13715_v52, %v22608_v20  ;;  %v17875_v46 = vrot.slane %v17820_v36, %v15757_v1  ;;  %v17879_v49 = vcombine.high %v17858_v16, %v17858_v16  ;;  %v17883_v33 = vrot.slane %v17814_v21, %v15757_v1 }
 0x323   : > { %v17887_v29 = vrot.slane %v17835_v62, %v15757_v1  ;;  %v17891_v12 = vrot.slane %v17831_v50, %v15757_v1  ;;  %14111 = vrot.lane.b32.xlu0 %v14110_v19, %s14252_s16  ;;  %v17900_v63 = vrot.slane %v17851_v8, %v15757_v1  ;;  %v8624_v27 = vrot.slane %v22693_v61, %v15757_v1 }
 0x324   : > { %v17896_v40 = vcombine.high %v17867_v23, %v17867_v23  ;;  %v8628_v4 = vrot.slane %v17841_v6, %v15757_v1  ;;  %v8632_v3 = vrot.slane %v17826_v7, %v15757_v1  ;;  %v17913_v51 = vrot.slane %v17845_v45, %v15757_v1 }
 0x325   : > { %v17917_v32 = vrot.slane %v17858_v16, %v15757_v1  ;;  %v17921_v43 = vrot.slane %v17879_v49, %v15757_v1  ;;  %v17925_v34 = vrot.slane %v17867_v23, %v15757_v1  ;;  %v8695_v37 = vsel %vm22114_vm10, %v17864_v55, %v8592_v35 }
 0x326   : > { %v17929_v2 = vrot.slane %v17896_v40, %v15757_v1  ;;  %v8702_v9 = vsel %vm22114_vm10, %v8628_v4, %v8624_v27  ;;  %v8696_v30 = vsel %vm22035_vm12, %v17871_v57, %v8695_v37  ;;  %v9097_v52 = vsel %vm22114_vm10, %v17622_v11, %v17618_v25 }
 0x327   : > { %v8703_v17 = vsel %vm22035_vm12, %v8632_v3, %v8702_v9  ;;  %v9104_v41 = vsel %vm22114_vm10, %v17653_v15, %v17649_v54  ;;  %v8697_v59 = vsel %vm22088_vm14, %v17875_v46, %v8696_v30  ;;  %v9098_v19 = vsel %vm22035_vm12, %v17626_v26, %v9097_v52 }
 0x328   : > { %v8704_v35 = vsel %vm22088_vm14, %v17913_v51, %v8703_v17  ;;  %v9105_v27 = vsel %vm22035_vm12, %v17657_v24, %v9104_v41  ;;  %v8698_v25 = vsel %vm22087_vm1, %v17883_v33, %v8697_v59  ;;  %v9099_v54 = vsel %vm22088_vm14, %v17631_v18, %v9098_v19 }
 0x329   : > { %v8705_v11 = vsel %vm22087_vm1, %v17917_v32, %v8704_v35  ;;  %v9106_v15 = vsel %vm22088_vm14, %v17661_v60, %v9105_v27  ;;  %v8699_v38 = vsel %vm22062_vm4, %v17887_v29, %v8698_v25  ;;  %v9100_v24 = vsel %vm22087_vm1, %v17635_v44, %v9099_v54 }
 0x32a   : > { %v8706_v26 = vsel %vm22062_vm4, %v17921_v43, %v8705_v11  ;;  %v9107_v37 = vsel %vm22087_vm1, %v17665_v10, %v9106_v15  ;;  %v8700_v9 = vsel %vm22040_vm11, %v17891_v12, %v8699_v38  ;;  %v9101_v60 = vsel %vm22062_vm4, %v17639_v0, %v9100_v24 }
 0x32b   : > { %v8707_v18 = vsel %vm22040_vm11, %v17925_v34, %v8706_v26  ;;  %v9108_v30 = vsel %vm22062_vm4, %v17669_v53, %v9107_v37  ;;  %v8701_v17 = vsel %vm22039_vm13, %v17900_v63, %v8700_v9  ;;  %v9102_v10 = vsel %vm22040_vm11, %v17643_v48, %v9101_v60  ;;  %v22696_v60 = vld [vmem:[#allocation36_spill] sm:$0xff] }
 0x32c   : > { %v8708_v44 = vsel %vm22039_vm13, %v17929_v2, %v8707_v18  ;;  %v9109_v52 = vsel %vm22040_vm11, %v17673_v14, %v9108_v30  ;;  %v9103_v59 = vsel %vm22039_vm13, %v15794_v56, %v9102_v10  ;;  %v8928_v53 = vrot.slane %v22688_v28, %v15742_v42 }
 0x32d   : > { %v14025_v41 = vpack.i.bf16 %v8708_v44, %v8701_v17  ;;  %v9110_v0 = vsel %vm22039_vm13, %v15794_v56, %v9109_v52  ;;  %v8932_v19 = vrot.slane %v17806_v58, %v15742_v42  ;;  %v8936_v48 = vrot.slane %v17802_v31, %v15742_v42  ;;  %v22698_v44 = vld [vmem:[#allocation40_spill] sm:$0xff]  ;;  %v22699_v52 = vld [vmem:[#allocation59_spill] sm:$0xff] }
 0x32e   : > { %v14115_v35 = vpack.i.bf16 %v9110_v0, %v9103_v59  ;;  %v8940_v14 = vrot.slane %v17820_v36, %v15742_v42  ;;  %v8944_v27 = vrot.slane %v17814_v21, %v15742_v42  ;;  %v8948_v25 = vrot.slane %v17835_v62, %v15742_v42  ;;  %v22700_v59 = vld [vmem:[#allocation39_spill] sm:$0xff] }
 0x32f   : > { %14026 = vrot.lane.b32.xlu1 %v14025_v41, %s14261_s20  ;;  %v8952_v28 = vrot.slane %v17831_v50, %v15742_v42  ;;  %v8956_v58 = vrot.slane %v17851_v8, %v15742_v42  ;;  %v8960_v31 = vrot.slane %v22693_v61, %v15742_v42  ;;  %v8964_v36 = vrot.slane %v17841_v6, %v15742_v42 }
 0x330   : > { %14116 = vrot.lane.b32.xlu0 %v14115_v35, %s14262_s27  ;;  %v8968_v21 = vrot.slane %v17826_v7, %v15742_v42  ;;  %v8972_v62 = vrot.slane %v17845_v45, %v15742_v42  ;;  %v8976_v50 = vrot.slane %v17858_v16, %v15742_v42  ;;  %v8980_v8 = vrot.slane %v17879_v49, %v15742_v42 }
 0x331   : > { %v8984_v11 = vrot.slane %v17867_v23, %v15742_v42  ;;  %v8988_v61 = vrot.slane %v17896_v40, %v15742_v42  ;;  %v9031_v6 = vsel %vm22114_vm10, %v8932_v19, %v8928_v53  ;;  %v9038_v54 = vsel %vm22114_vm10, %v8964_v36, %v8960_v31  ;;  %v22701_v53 = vld [vmem:[#allocation60_spill] sm:$0xff]  ;;  %v22702_v19 = vld [vmem:[#allocation57_spill] sm:$0xff] }
 0x332   : > { %v9111_v7 = vsel %vm22114_vm10, %v17871_v57, %v17864_v55  ;;  %v9118_v45 = vsel %vm22114_vm10, %v8632_v3, %v8628_v4  ;;  %v9032_v16 = vsel %vm22035_vm12, %v8936_v48, %v9031_v6  ;;  %v9039_v49 = vsel %vm22035_vm12, %v8968_v21, %v9038_v54  ;;  %v22706_v21 = vld [vmem:[#allocation47_spill] sm:$0xff] }
 0x333   : > { %v9112_v23 = vsel %vm22035_vm12, %v17875_v46, %v9111_v7  ;;  %v9119_v40 = vsel %vm22035_vm12, %v17913_v51, %v9118_v45  ;;  %v9033_v15 = vsel %vm22088_vm14, %v8940_v14, %v9032_v16  ;;  %v9040_v38 = vsel %vm22088_vm14, %v8972_v62, %v9039_v49  ;;  %v22703_v14 = vld [vmem:[#allocation61_spill] sm:$0xff]  ;;  %v22710_v7 = vld [vmem:[#allocation46_spill] sm:$0xff] }
 0x334   : > { %14121 = vrot.lane.b32.xlu0 %v14120_v13, %s14251_s15  ;;  %v9113_v55 = vsel %vm22088_vm14, %v17883_v33, %v9112_v23  ;;  %v9120_v57 = vsel %vm22088_vm14, %v17917_v32, %v9119_v40  ;;  %v9034_v46 = vsel %vm22087_vm1, %v8944_v27, %v9033_v15  ;;  %v9041_v4 = vsel %vm22087_vm1, %v8976_v50, %v9040_v38  ;;  %v22707_v50 = vld [vmem:[#allocation41_spill] sm:$0xff]  ;;  %v22713_v40 = vld [vmem:[#allocation51_spill] sm:$0xff] }
 0x335   : > { %v9114_v3 = vsel %vm22087_vm1, %v17887_v29, %v9113_v55  ;;  %v9121_v51 = vsel %vm22087_vm1, %v17921_v43, %v9120_v57  ;;  %v9035_v26 = vsel %vm22062_vm4, %v8948_v25, %v9034_v46  ;;  %v9042_v5 = vsel %vm22062_vm4, %v8980_v8, %v9041_v4  ;;  %v22711_v16 = vld [vmem:[#allocation37_spill] sm:$0xff]  ;;  %v22714_v57 = vld [vmem:[#allocation43_spill] sm:$0xff] }
 0x336   : > { %v9115_v47 = vsel %vm22062_vm4, %v17891_v12, %v9114_v3  ;;  %v9122_v13 = vsel %vm22062_vm4, %v17925_v34, %v9121_v51  ;;  %v9036_v33 = vsel %vm22040_vm11, %v8952_v28, %v9035_v26  ;;  %v9043_v32 = vsel %vm22040_vm11, %v8984_v11, %v9042_v5  ;;  %v22704_v28 = vld [vmem:[#allocation56_spill] sm:$0xff]  ;;  %v22715_v4 = vld [vmem:[#allocation49_spill] sm:$0xff] }
 0x337   : > { %v9116_v29 = vsel %vm22040_vm11, %v17900_v63, %v9115_v47  ;;  %v9123_v43 = vsel %vm22040_vm11, %v17929_v2, %v9122_v13  ;;  %v9037_v24 = vsel %vm22039_vm13, %v8956_v58, %v9036_v33  ;;  %v9044_v37 = vsel %vm22039_vm13, %v8988_v61, %v9043_v32  ;;  %v22697_v63 = vld [vmem:[#allocation42_spill] sm:$0xff]  ;;  %v22705_v58 = vld [vmem:[#allocation80_spill] sm:$0xff]  ;;  %v22709_v61 = vld [vmem:[#allocation55_spill] sm:$0xff] }
 0x338   : > { %v9117_v12 = vsel %vm22039_vm13, %v15794_v56, %v9116_v29  ;;  %v9124_v34 = vsel %vm22039_vm13, %v15794_v56, %v9123_v43  ;;  %v14030_v9 = vpack.i.bf16 %v9044_v37, %v9037_v24  ;;  %v8080_v30 = vrot.slane %v22696_v60, %v15742_v42  ;;  %v14167_v2 = vld [vmem:[%s21889_s2 + $0x8] sm:$0xff]  }
 0x339   : > { %v14035_v18 = vpack.i.bf16 %v9124_v34, %v9117_v12  ;;  %v8084_v17 = vrot.slane %v22697_v63, %v15742_v42  ;;  %v8088_v10 = vrot.slane %v22698_v44, %v15742_v42  ;;  %v8092_v41 = vrot.slane %v22699_v52, %v15742_v42  ;;  %13901 = vmatprep.subr.bf16.mxu1 %v14167_v2  ;;  %v22716_v37 = vld [vmem:[#allocation38_spill] sm:$0xff]  ;;  %v22717_v34 = vld [vmem:[#allocation21_spill] sm:$0xff] }
 0x33a   : > { %v8096_v0 = vrot.slane %v22700_v59, %v15742_v42  ;;  %v8100_v35 = vrot.slane %v22701_v53, %v15742_v42  ;;  %14031 = vrot.lane.b32.xlu1 %v14030_v9, %s14252_s16  ;;  %v8104_v48 = vrot.slane %v22702_v19, %v15742_v42  ;;  %v8108_v27 = vrot.slane %v22703_v14, %v15742_v42 }
 0x33b   : > { %v8258_v25 = vsel %vm22114_vm10, %v8084_v17, %v8080_v30  ;;  %v14045_v31 = vpack.i.bf16 %v22705_v58, %v22704_v28  ;;  %v18093_v62 = vcombine.high %v22706_v21, %v22706_v21  ;;  %v22708_v8 = vcombine.low %v22707_v50, %v22707_v50  ;;  %13902 = vmatpush3.bf16.msra.mxu1 %v14167_v2 }
 0x33c   : > { %v8259_v36 = vsel %vm22035_vm12, %v8088_v10, %v8258_v25  ;;  %v18103_v6 = vcombine.high %v22709_v61, %v22709_v61  ;;  %v18108_v45 = vcombine.high %v22710_v7, %v22710_v7  ;;  %v22712_v49 = vcombine.low %v22711_v16, %v22711_v16 }
 0x33d   : > { %v18099_v11 = vrot.slane %v22708_v8, %v22608_v20  ;;  %v8260_v54 = vsel %vm22088_vm14, %v8092_v41, %v8259_v36  ;;  %v18118_v15 = vcombine.high %v22713_v40, %v22713_v40  ;;  %v8464_v46 = vrot.slane %v22714_v57, %v15757_v1 }
 0x33e   : > { %v18114_v23 = vrot.slane %v22712_v49, %v22608_v20  ;;  %v8261_v38 = vsel %vm22087_vm1, %v8096_v0, %v8260_v54  ;;  %v8468_v3 = vrot.slane %v22715_v4, %v15757_v1  ;;  %14036 = vrot.lane.b32.xlu1 %v14035_v18, %s14262_s27  ;;  %v8472_v5 = vrot.slane %v22706_v21, %v15757_v1  ;;  %v22718_v18 = vld [vmem:[#allocation50_spill] sm:$0xff] }
 0x33f   : > { %v18123_v55 = vcombine.high %v18099_v11, %v18099_v11  ;;  %v8262_v51 = vsel %vm22062_vm4, %v8100_v35, %v8261_v38  ;;  %v8476_v47 = vrot.slane %v18093_v62, %v15757_v1  ;;  %v8480_v33 = vrot.slane %v22709_v61, %v15757_v1 }
 0x340   : > { %v18133_v26 = vcombine.high %v18114_v23, %v18114_v23  ;;  %v8263_v13 = vsel %vm22040_vm11, %v8104_v48, %v8262_v51  ;;  %v18144_v32 = vrot.slane %v18103_v6, %v15757_v1  ;;  %v18148_v29 = vrot.slane %v18099_v11, %v15757_v1 }
 0x341   : > { %v18151_v43 = vsel %vm22039_vm13, %v8108_v27, %v8263_v13  ;;  %v18155_v24 = vrot.slane %v18123_v55, %v15757_v1  ;;  %v8496_v12 = vrot.slane %v22716_v37, %v15757_v1  ;;  %v8500_v9 = vrot.slane %v22717_v34, %v15757_v1 }
 0x342   : > { %v14040_v30 = vpack.i.bf16 %v18151_v43, %v22718_v18  ;;  %v8504_v63 = vrot.slane %v22710_v7, %v15757_v1  ;;  %v8508_v17 = vrot.slane %v18108_v45, %v15757_v1  ;;  %v8512_v2 = vrot.slane %v22713_v40, %v15757_v1 }
 0x343   : > { %v8516_v44 = vrot.slane %v18118_v15, %v15757_v1  ;;  %v8520_v10 = vrot.slane %v18114_v23, %v15757_v1  ;;  %v8524_v52 = vrot.slane %v18133_v26, %v15757_v1  ;;  %v8667_v41 = vsel %vm22114_vm10, %v8468_v3, %v8464_v46 }
 0x344   : > { %14041 = vrot.lane.b32.xlu1 %v14040_v30, %s14259_s18  ;;  %v8668_v59 = vsel %vm22035_vm12, %v8472_v5, %v8667_v41  ;;  %v8674_v0 = vsel %vm22114_vm10, %v8500_v9, %v8496_v12  ;;  %v8800_v53 = vrot.slane %v22714_v57, %v15742_v42  ;;  %v8804_v35 = vrot.slane %v22715_v4, %v15742_v42 }
 0x345   : > { %v8669_v19 = vsel %vm22088_vm14, %v8476_v47, %v8668_v59  ;;  %v8675_v48 = vsel %vm22035_vm12, %v8504_v63, %v8674_v0  ;;  %v8808_v14 = vrot.slane %v22706_v21, %v15742_v42  ;;  %v8812_v27 = vrot.slane %v18093_v62, %v15742_v42 }
 0x346   : > { %v8670_v25 = vsel %vm22087_vm1, %v8480_v33, %v8669_v19  ;;  %v8676_v28 = vsel %vm22088_vm14, %v8508_v17, %v8675_v48  ;;  %v8816_v58 = vrot.slane %v22709_v61, %v15742_v42  ;;  %v8820_v36 = vrot.slane %v18103_v6, %v15742_v42 }
 0x347   : > { %v8671_v50 = vsel %vm22062_vm4, %v18144_v32, %v8670_v25  ;;  %v8677_v8 = vsel %vm22087_vm1, %v8512_v2, %v8676_v28  ;;  %v8824_v21 = vrot.slane %v18099_v11, %v15742_v42  ;;  %v8828_v62 = vrot.slane %v18123_v55, %v15742_v42  ;;  %v22720_v28 = vld [vmem:[#allocation52_spill] sm:$0xff] }
 0x348   : > { %14046 = vrot.lane.b32.xlu1 %v14045_v31, %s14260_s19  ;;  %v8672_v54 = vsel %vm22040_vm11, %v18148_v29, %v8671_v50  ;;  %v8678_v61 = vsel %vm22062_vm4, %v8516_v44, %v8677_v8  ;;  %v8832_v6 = vrot.slane %v22716_v37, %v15742_v42  ;;  %v8836_v16 = vrot.slane %v22717_v34, %v15742_v42 }
 0x349   : > { %v8673_v49 = vsel %vm22039_vm13, %v18155_v24, %v8672_v54  ;;  %v8679_v11 = vsel %vm22040_vm11, %v8520_v10, %v8678_v61  ;;  %v8840_v38 = vrot.slane %v22710_v7, %v15742_v42  ;;  %v8844_v31 = vrot.slane %v18108_v45, %v15742_v42  ;;  %v22726_v61 = vld [vmem:[#allocation48_spill] sm:$0xff] }
 0x34a   : > { %v8680_v55 = vsel %vm22039_vm13, %v8524_v52, %v8679_v11  ;;  %v8848_v57 = vrot.slane %v22713_v40, %v15742_v42  ;;  %v8852_v46 = vrot.slane %v18118_v15, %v15742_v42  ;;  %v8856_v4 = vrot.slane %v18114_v23, %v15742_v42  ;;  %v22728_v11 = vld [vmem:[#allocation73_spill] sm:$0xff] }
 0x34b   : > { %v14050_v51 = vpack.i.bf16 %v8680_v55, %v8673_v49  ;;  %v8860_v13 = vrot.slane %v18133_v26, %v15742_v42  ;;  %v9003_v7 = vsel %vm22114_vm10, %v8804_v35, %v8800_v53  ;;  %v9010_v37 = vsel %vm22114_vm10, %v8836_v16, %v8832_v6  ;;  %v22727_v16 = vld [vmem:[#allocation68_spill] sm:$0xff] }
 0x34c   : > { %v9004_v45 = vsel %vm22035_vm12, %v8808_v14, %v9003_v7  ;;  %v9011_v12 = vsel %vm22035_vm12, %v8840_v38, %v9010_v37  ;;  %v9083_v40 = vsel %vm22114_vm10, %v8472_v5, %v8468_v3  ;;  %v9090_v34 = vsel %vm22114_vm10, %v8504_v63, %v8500_v9 }
 0x34d   : > { %14051 = vrot.lane.b32.xlu1 %v14050_v51, %s14261_s20  ;;  %v9005_v23 = vsel %vm22088_vm14, %v8812_v27, %v9004_v45  ;;  %v9012_v15 = vsel %vm22088_vm14, %v8844_v31, %v9011_v12  ;;  %v9084_v26 = vsel %vm22035_vm12, %v8476_v47, %v9083_v40  ;;  %v9091_v18 = vsel %vm22035_vm12, %v8508_v17, %v9090_v34  ;;  %v22719_v27 = vld [vmem:[#allocation44_spill] sm:$0xff]  ;;  %v22732_v45 = vld [vmem:[#allocation70_spill] sm:$0xff]  ;;  %s435_s20 = scalar_lea.vmem %s21898_s11, %s13798_s30 }
 0x34e   : > { %v9006_v30 = vsel %vm22087_vm1, %v8816_v58, %v9005_v23  ;;  %v9013_v41 = vsel %vm22087_vm1, %v8848_v57, %v9012_v15  ;;  %v9085_v59 = vsel %vm22088_vm14, %v8480_v33, %v9084_v26  ;;  %v9092_v3 = vsel %vm22088_vm14, %v8512_v2, %v9091_v18  ;;  %v22729_v31 = vld [vmem:[#allocation64_spill] sm:$0xff]  ;;  %v22734_v23 = vld [vmem:[#allocation63_spill] sm:$0xff] }
 0x34f   : > { %v9007_v5 = vsel %vm22062_vm4, %v8820_v36, %v9006_v30  ;;  %v9014_v9 = vsel %vm22062_vm4, %v8852_v46, %v9013_v41  ;;  %v9086_v63 = vsel %vm22087_vm1, %v18144_v32, %v9085_v59  ;;  %v9093_v0 = vsel %vm22087_vm1, %v8516_v44, %v9092_v3  ;;  %v14168_v46 = vld [vmem:[%s21889_s2 + $0x10] ss:$0 sps:$4 sm:$0x33]   ;;  %v22733_v40 = vld [vmem:[#allocation76_spill] sm:$0xff]  ;;  %v22736_v41 = vld [vmem:[#allocation77_spill] sm:$0xff] }
 0x350   : > { %v9008_v47 = vsel %vm22040_vm11, %v8824_v21, %v9007_v5  ;;  %v9015_v17 = vsel %vm22040_vm11, %v8856_v4, %v9014_v9  ;;  %v9087_v53 = vsel %vm22062_vm4, %v18148_v29, %v9086_v63  ;;  %v9094_v33 = vsel %vm22062_vm4, %v8520_v10, %v9093_v0  ;;  %v22724_v21 = vld [vmem:[#allocation67_spill] sm:$0xff]  ;;  %v22730_v4 = vld [vmem:[#allocation69_spill] sm:$0xff]  ;;  %v22737_v5 = vld [vmem:[#allocation78_spill] sm:$0xff] }
 0x351   : > { %v9009_v2 = vsel %vm22039_vm13, %v8828_v62, %v9008_v47  ;;  %v9016_v35 = vsel %vm22039_vm13, %v8860_v13, %v9015_v17  ;;  %v9088_v19 = vsel %vm22040_vm11, %v18155_v24, %v9087_v53  ;;  %v9095_v32 = vsel %vm22040_vm11, %v8524_v52, %v9094_v33  ;;  %v22721_v24 = vld [vmem:[#allocation66_spill] sm:$0xff]  ;;  %v22725_v62 = vld [vmem:[#allocation72_spill] sm:$0xff]  ;;  %v22731_v13 = vld [vmem:[#allocation75_spill] sm:$0xff] }
 0x352   : > { %v14055_v48 = vpack.i.bf16 %v9016_v35, %v9009_v2  ;;  %v9089_v44 = vsel %vm22039_vm13, %v15794_v56, %v9088_v19  ;;  %v9096_v14 = vsel %vm22039_vm13, %v15794_v56, %v9095_v32  ;;  %v7769_v29 = vrot.slane %v22696_v60, %v15757_v1  ;;  %v22722_v56 = vld [vmem:[#allocation45_spill] sm:$0xff]  ;;  %v22723_v60 = vld [vmem:[#allocation62_spill] sm:$0xff]  ;;  %v22735_v18 = vld [vmem:[#allocation71_spill] sm:$0xff] }
 0x353   : > { %v14060_v10 = vpack.i.bf16 %v9096_v14, %v9089_v44  ;;  %v7801_v25 = vrot.slane %v22719_v27, %v15757_v1  ;;  %v8116_v58 = vrot.slane %v22720_v28, %v15742_v42  ;;  %v8112_v36 = vrot.slane %v22719_v27, %v15742_v42  ;;  %v22738_v47 = vld [vmem:[#allocation74_spill] sm:$0xff]  ;;  %v22739_v53 = vld [vmem:[#allocation79_spill] sm:$0xff]  ;;  %v22740_v2 = vld [vmem:[#allocation65_spill] sm:$0xff] }
 0x354   : > { %14056 = vrot.lane.b32.xlu1 %v14055_v48, %s14252_s16  ;;  %v7954_v52 = vsel %vm22114_vm10, %v22721_v24, %v7769_v29  ;;  %v8120_v50 = vrot.slane %v22722_v56, %v15742_v42  ;;  %v8124_v8 = vrot.slane %v22723_v60, %v15742_v42  ;;  %v8128_v6 = vrot.slane %v22726_v61, %v15742_v42  ;;  %v9456_v29 = vld [vmem:[%s21890_s3] sm:$0x3]  ;;  %v22741_v27 = vld [vmem:[#allocation90_spill] sm:$0xff]  ;;  %v18351_v60 = vpop.permute.xlu0 %14076 }
 0x355   : > { %v7955_v1 = vsel %vm22035_vm12, %v22724_v21, %v7954_v52  ;;  %v7961_v54 = vsel %vm22114_vm10, %v22725_v62, %v7801_v25  ;;  %v8132_v55 = vrot.slane %v22729_v31, %v15742_v42  ;;  %v8265_v57 = vsel %vm22114_vm10, %v8116_v58, %v8112_v36  ;;  %v22742_v25 = vld [vmem:[#allocation24_spill] sm:$0xff] }
 0x356   : > { %v7956_v49 = vsel %vm22088_vm14, %v22727_v16, %v7955_v1  ;;  %v7962_v38 = vsel %vm22035_vm12, %v22728_v11, %v7961_v54  ;;  %v8266_v37 = vsel %vm22035_vm12, %v8120_v50, %v8265_v57  ;;  %v8136_v15 = vrot.slane %v22734_v23, %v15742_v42  ;;  %v22745_v23 = vld [vmem:[#allocation23_spill] sm:$0xff] }
 0x357   : > { %v7957_v51 = vsel %vm22087_vm1, %v22730_v4, %v7956_v49  ;;  %v7963_v7 = vsel %vm22088_vm14, %v22731_v13, %v7962_v38  ;;  %v8267_v26 = vsel %vm22088_vm14, %v8124_v8, %v8266_v37  ;;  %vm9328_vm12 = vcmask 1041408   ;;  %v22744_v37 = vld [vmem:[#allocation89_spill] sm:$0xff] }
 0x358   : > { %14061 = vrot.lane.b32.xlu1 %v14060_v10, %s14262_s27  ;;  %v7958_v12 = vsel %vm22062_vm4, %v22732_v45, %v7957_v51  ;;  %v7964_v34 = vsel %vm22087_vm1, %v22733_v40, %v7963_v7  ;;  %v8268_v3 = vsel %vm22087_vm1, %v8128_v6, %v8267_v26  ;;  %13931 = vmatprep.subr.msk.bf16.mxu1 %vm9328_vm12, %v14168_v46  ;;  %v9330_v0 = vsel %vm9328_vm12, %v14168_v46, 0  ;;  %s13799_s27 = sshll.u32 %s23987_s22, 4 }
 0x359   : > { %v7959_v30 = vsel %vm22040_vm11, %v22735_v18, %v7958_v12  ;;  %v7965_v59 = vsel %vm22062_vm4, %v22736_v41, %v7964_v34  ;;  %v8269_v63 = vsel %vm22062_vm4, %v8132_v55, %v8268_v3  ;;  %v8140_v35 = vrot.slane %v22740_v2, %v15742_v42  ;;  %13904 = vmatpush3.bf16.msra.mxu1 %v9330_v0 }
 0x35a   : > { %v7966_v9 = vsel %vm22040_vm11, %v22737_v5, %v7965_v59  ;;  %v7960_v17 = vsel %vm22039_vm13, %v22738_v47, %v7959_v30  ;;  %v8270_v19 = vsel %vm22040_vm11, %v8136_v15, %v8269_v63  ;;  %13932 = vmatprep.subr.msk.bf16.mxu1 %vm9328_vm12, %v9456_v29  ;;  %v18335_v10 = vsel %vm9328_vm12, %v9456_v29, 0  ;;  %v22746_v47 = vld [vmem:[#allocation6_spill] sm:$0xff] }
 0x35b   : > { %v18318_v33 = vsel %vm22039_vm13, %v22739_v53, %v7966_v9  ;;  %v8271_v48 = vsel %vm22039_vm13, %v8140_v35, %v8270_v19  ;;  %v14085_v28 = vpack.i.bf16 %v22742_v25, %v22741_v27  ;;  %v14079_v11 = vunpack.i.h.bf16 %v18351_v60 }
 0x35c   : > { %v14065_v32 = vpack.i.bf16 %v18318_v33, %v7960_v17  ;;  %v14070_v44 = vpack.i.bf16 %v8271_v48, %v18151_v43  ;;  %v14080_v14 = vpack.i.bf16 %v17458_v39, %v8271_v48  ;;  %v22743_v43 = vld [vmem:[#allocation25_spill] sm:$0xff]  ;;  %v14078_v31 = vunpack.i.l.bf16 %v18351_v60 }
 0x35d   : > { %v14125_v58 = vpack.i.bf16 %v22743_v43, %v17735_v22 }
 0x35e   : > { %14066 = vrot.lane.b32.xlu1 %v14065_v32, %s14263_s28  ;;  %s440_s28 = scalar_lea.vmem %s21899_s12, %s13799_s27 }
 0x362   : > { %14071 = vrot.lane.b32.xlu1 %v14070_v44, %s14264_s29 }
 0x364   : > { %v18353_v21 = vpop.permute.xlu0 %14091 }
 0x365   : > { %v14094_v55 = vunpack.i.h.bf16 %v18353_v21  ;;  %v14093_v57 = vunpack.i.l.bf16 %v18353_v21 }
 0x366   : > { %14081 = vrot.lane.b32.xlu1 %v14080_v14, %s14259_s18 }
 0x36a   : > { %14086 = vrot.lane.b32.xlu1 %v14085_v28, %s14264_s29 }
 0x36b   : > { %v18355_v62 = vpop.permute.xlu0 %14096 }
 0x36c   : > { %v14099_v46 = vunpack.i.h.bf16 %v18355_v62  ;;  %v14098_v4 = vunpack.i.l.bf16 %v18355_v62  ;;  %v14191_v62 = vld [vmem:[%s14361_s14 + $0x8] sm:$0xff] }
 0x36e   : > { %14126 = vrot.lane.b32.xlu1 %v14125_v58, %s14251_s15  ;;  %s18910_s15 = sld [smem:[#allocation2 + $0x1]] }
 0x372   : > { %v13997_v39 = vpop.permute.xlu1 %13996 }
 0x373   : > { %v13998_v6 = vunpack.i.l.bf16 %v13997_v39  ;;  %v13999_v38 = vunpack.i.h.bf16 %v13997_v39 }
 0x374   : > { %v18357_v54 = vpop.permute.xlu0 %14101 }
 0x375   : > { %v14104_v51 = vunpack.i.h.bf16 %v18357_v54  ;;  %v9228_v45 = vsel %vm22115_vm6, %v22744_v37, %v13998_v6  ;;  %v14103_v12 = vunpack.i.l.bf16 %v18357_v54  ;;  %v9229_v15 = vsel %vm22115_vm6, %v22745_v23, %v13999_v38 }
 0x379   : > { %v18343_v24 = vpop.permute.xlu1 %14001 }
 0x37a   : > { %v14004_v26 = vunpack.i.h.bf16 %v18343_v24  ;;  %v14003_v14 = vunpack.i.l.bf16 %v18343_v24 }
 0x386   : > { %v14007_v52 = vpop.permute.xlu1 %14006  ;;  %v18359_v16 = vpop.permute.xlu0 %14106 }
 0x387   : > { %v14009_v41 = vunpack.i.h.bf16 %v14007_v52  ;;  %v14008_v59 = vunpack.i.l.bf16 %v14007_v52  ;;  %v14109_v29 = vunpack.i.h.bf16 %v18359_v16  ;;  %v14108_v28 = vunpack.i.l.bf16 %v18359_v16 }
 0x395   : > { %v18374_v3 = vpop.permute.xlu0 %14111 }
 0x3a1   : > { %v18345_v36 = vpop.permute.xlu1 %14026 }
 0x3a2   : > { %v14117_v6 = vpop.permute.xlu0 %14116  ;;  %v14028_v38 = vunpack.i.l.bf16 %v18345_v36 }
 0x3ac   : > { %v18347_v56 = vpop.permute.xlu1 %14031 }
 0x3b0   : > { %v18349_v50 = vpop.permute.xlu1 %14036 }
 0x3b6   : > { %v14042_v8 = vpop.permute.xlu1 %14041 }
 0x3b7   : > { %v14044_v13 = vunpack.i.h.bf16 %v14042_v8  ;;  %v14043_v7 = vunpack.i.l.bf16 %v14042_v8 }
 0x3b9   : > { %v9225_v0 = vsel %vm22115_vm6, %v7960_v17, %v14044_v13  ;;  %v9224_v53 = vsel %vm22115_vm6, %v22746_v47, %v14043_v7  ;;  %v9237_v17 = vsel %vm9230_vm7, %v9228_v45, %v14008_v59  ;;  %v14034_v13 = vunpack.i.h.bf16 %v18347_v56  ;;  %v22747_v47 = vld [vmem:[#allocation88_spill] sm:$0xff] }
 0x3ba   : > { %v14047_v1 = vpop.permute.xlu1 %14046  ;;  %v14033_v45 = vunpack.i.l.bf16 %v18347_v56  ;;  %v14114_v59 = vunpack.i.h.bf16 %v18374_v3 }
 0x3bb   : > { %v14049_v40 = vunpack.i.h.bf16 %v14047_v1  ;;  %v14048_v34 = vunpack.i.l.bf16 %v14047_v1 }
 0x3bd   : > { %v9233_v19 = vsel %vm9230_vm7, %v9224_v53, %v14048_v34  ;;  %v9234_v32 = vsel %vm9230_vm7, %v9225_v0, %v14049_v40  ;;  %v14039_v40 = vunpack.i.h.bf16 %v18349_v50  ;;  %v9246_v0 = vsel %vm9239_vm0, %v9237_v17, %v14028_v38 }
 0x3be   : > { %v9616_v38 = vrot.slane %v14191_v62, %v22608_v20 }
 0x3bf   : > { %v14052_v22 = vpop.permute.xlu1 %14051 }
 0x3c0   : > { %v14054_v18 = vunpack.i.h.bf16 %v14052_v22  ;;  %v14053_v30 = vunpack.i.l.bf16 %v14052_v22  ;;  %v9238_v22 = vsel %vm9230_vm7, %v9229_v15, %v14009_v41 }
 0x3c2   : > { %v9242_v27 = vsel %vm9239_vm0, %v9233_v19, %v14053_v30  ;;  %v9243_v25 = vsel %vm9239_vm0, %v9234_v32, %v14054_v18  ;;  %v14038_v18 = vunpack.i.l.bf16 %v18349_v50  ;;  %v9254_v50 = vsel %vm22036_vm2, %v9246_v0, %v14033_v45 }
 0x3c6   : > { %v14057_v61 = vpop.permute.xlu1 %14056 }
 0x3c7   : > { %v14059_v5 = vunpack.i.h.bf16 %v14057_v61  ;;  %v14058_v9 = vunpack.i.l.bf16 %v14057_v61  ;;  %v14029_v61 = vunpack.i.h.bf16 %v18345_v36 }
 0x3c9   : > { %v9250_v43 = vsel %vm22036_vm2, %v9242_v27, %v14058_v9  ;;  %v9251_v58 = vsel %vm22036_vm2, %v9243_v25, %v14059_v5  ;;  %v14113_v5 = vunpack.i.l.bf16 %v18374_v3  ;;  %v14119_v9 = vunpack.i.h.bf16 %v14117_v6 }
 0x3ca   : > { %v14062_v49 = vpop.permute.xlu1 %14061  ;;  %v9247_v56 = vsel %vm9239_vm0, %v9238_v22, %v14029_v61 }
 0x3cb   : > { %v14064_v2 = vunpack.i.h.bf16 %v14062_v49  ;;  %v14063_v35 = vunpack.i.l.bf16 %v14062_v49  ;;  %v9255_v53 = vsel %vm22036_vm2, %v9247_v56, %v14034_v13  ;;  %v14267_v56 = vmov 1987475062  }
 0x3cc   : > { %v9264_v32 = vsel %vm9256_vm8, %v9255_v53, %v14039_v40  ;;  %v22748_v40 = vld [vmem:[#allocation7_spill] sm:$0xff]  ;;  %v10496_v0 = vunpack.c.l.s4 %v14267_v56  ;;  %v14193_v53 = vld [vmem:[%s14361_s14 + $0x18] sm:$0xff] }
 0x3cd   : > { %v9259_v52 = vsel %vm9256_vm8, %v9250_v43, %v14063_v35  ;;  %v9260_v60 = vsel %vm9256_vm8, %v9251_v58, %v14064_v2  ;;  %v14122_v2 = vpop.permute.xlu0 %14121 }
 0x3ce   : > { %v14124_v54 = vunpack.i.h.bf16 %v14122_v2  ;;  %v14123_v43 = vunpack.i.l.bf16 %v14122_v2  ;;  %v9643_v2 = vcombine.high %v14193_v53, %v14193_v53 }
 0x3d0   : > { %v14067_v63 = vpop.permute.xlu1 %14066 }
 0x3d1   : > { %v14069_v48 = vunpack.i.h.bf16 %v14067_v63  ;;  %v14068_v44 = vunpack.i.l.bf16 %v14067_v63  ;;  %v14118_v63 = vunpack.i.l.bf16 %v14117_v6 }
 0x3d3   : > { %v9268_v49 = vsel %vm9265_vm15, %v9259_v52, %v14068_v44  ;;  %v9269_v16 = vsel %vm9265_vm15, %v9260_v60, %v14069_v48 }
 0x3d4   : > { %v14072_v39 = vpop.permute.xlu1 %14071 }
 0x3d5   : > { %v14074_v8 = vunpack.i.h.bf16 %v14072_v39  ;;  %v14073_v1 = vunpack.i.l.bf16 %v14072_v39 }
 0x3d7   : > { %v9277_v7 = vsel %vm9274_vm9, %v9268_v49, %v14073_v1  ;;  %v9278_v37 = vsel %vm9274_vm9, %v9269_v16, %v14074_v8  ;;  %v14265_v49 = vmov 1414812756  }
 0x3d8   : > { %v9285_v34 = vsel %vm860_vm3, %v9277_v7, %v14078_v31  ;;  %v9286_v23 = vsel %vm860_vm3, %v9278_v37, %v14079_v11  ;;  %v14082_v15 = vpop.permute.xlu1 %14081  ;;  %v10489_v16 = vunpack.c.l.s4 %v14265_v49  ;;  %v10278_v37 = vrot.slane %v9616_v38, 7  ;;  %v14195_v49 = vld [vmem:[%s14361_s14 + $0x20] sm:$0xff] }
 0x3d9   : > { %v9292_v30 = vpack.c.bf16 %v9286_v23, %v9285_v34  ;;  %v14084_v41 = vunpack.i.h.bf16 %v14082_v15  ;;  %v14083_v36 = vunpack.i.l.bf16 %v14082_v15  ;;  %v14192_v23 = vld [vmem:[%s14361_s14] sm:$0xff] }
 0x3da   : > { %v10490_v7 = vunpack.c.0.s8 %v10489_v16  ;;  %v9592_v15 = vcombine.high %v14192_v23, %v14192_v23  ;;  %v9660_v16 = vcombine.high %v14195_v49, %v14195_v49 }
 0x3db   : > { %v9227_v31 = vsel %vm22115_vm6, %v22747_v47, %v14084_v41  ;;  %v9226_v11 = vsel %vm22115_vm6, %v18318_v33, %v14083_v36  ;;  %13906 = vmatmul.mubr.msk.bf16.vlgmr.msra.gmra.mrb[20].mxu1 %vm9315_vm5, %v9292_v30  ;;  %v9263_v33 = vsel %vm9256_vm8, %v9254_v50, %v14038_v18  ;;  %v9624_v18 = vcombine.high %v9616_v38, %v9616_v38  ;;  %v22749_v30 = vld [vmem:[#allocation9_spill] sm:$0xff] }
 0x3dc   : > { %v9235_v3 = vsel %vm9230_vm7, %v9226_v11, %v14103_v12  ;;  %v9236_v35 = vsel %vm9230_vm7, %v9227_v31, %v14104_v51  ;;  %v14087_v19 = vpop.permute.xlu1 %14086  ;;  %13914 = vmatpush3.bf16.msra.mxu1 %v18335_v10  ;;  %v9272_v58 = vsel %vm9265_vm15, %v9263_v33, %v14003_v14  ;;  %v18458_v34 = vsub.s32 %v10490_v7, %v22748_v40  ;;  %v22778_v7 = vld [vmem:[#allocation10_spill] sm:$0xff] }
 0x3dd   : > { %v9244_v48 = vsel %vm9239_vm0, %v9235_v3, %v14108_v28  ;;  %v9245_v44 = vsel %vm9239_vm0, %v9236_v35, %v14109_v29  ;;  %v14089_v12 = vunpack.i.h.bf16 %v14087_v19  ;;  %v14088_v17 = vunpack.i.l.bf16 %v14087_v19 }
 0x3de   : > { %v9252_v27 = vsel %vm22036_vm2, %v9244_v48, %v14113_v5  ;;  %v9253_v25 = vsel %vm22036_vm2, %v9245_v44, %v14114_v59  ;;  %v9273_v28 = vsel %vm9265_vm15, %v9264_v32, %v14004_v26  ;;  %v18462_v41 = vadd.s32 1, %v22749_v30  ;;  %v14194_v32 = vld [vmem:[%s14361_s14 + $0x10] sm:$0xff] }
 0x3df   : > { %v9261_v51 = vsel %vm9256_vm8, %v9252_v27, %v14118_v63  ;;  %v9262_v10 = vsel %vm9256_vm8, %v9253_v25, %v14119_v9  ;;  %v9281_v26 = vsel %vm9274_vm9, %v9272_v58, %v14088_v17  ;;  %v9282_v1 = vsel %vm9274_vm9, %v9273_v28, %v14089_v12 }
 0x3e0   : > { %v14127_v39 = vpop.permute.xlu1 %14126  ;;  %v9270_v29 = vsel %vm9265_vm15, %v9261_v51, %v14093_v57  ;;  %v9271_v52 = vsel %vm9265_vm15, %v9262_v10, %v14094_v55  ;;  %22750 = vst [vmem:[#allocation22_spill] sm:$0xff] %v18462_v41  ;;  %v9599_v36 = vrot.slane %v14192_v23, %v22608_v20  ;;  %vm18465_vm0 = vcmp.gt.f32.partialorder %v9616_v38, %v10278_v37 }
 0x3e1   : > { %v14129_v60 = vunpack.i.h.bf16 %v14127_v39  ;;  %v14128_v8 = vunpack.i.l.bf16 %v14127_v39  ;;  %v9279_v14 = vsel %vm9274_vm9, %v9270_v29, %v14098_v4  ;;  %v9280_v24 = vsel %vm9274_vm9, %v9271_v52, %v14099_v46 }
 0x3e2   : > { %v9287_v57 = vsel %vm860_vm3, %v9279_v14, %v14123_v43  ;;  %v9288_v21 = vsel %vm860_vm3, %v9280_v24, %v14124_v54  ;;  %v9609_v46 = vcombine.high %v14191_v62, %v14191_v62  ;;  %v22753_v5 = vmov 0 }
 0x3e3   : > { %v9289_v55 = vsel %vm860_vm3, %v9281_v26, %v14128_v8  ;;  %v9290_v22 = vsel %vm860_vm3, %v9282_v1, %v14129_v60  ;;  %v9293_v61 = vpack.c.bf16 %v9288_v21, %v9287_v57  ;;  %v14266_v9 = vmov 842150450  }
 0x3e4   : > { %v9294_v6 = vpack.c.bf16 %v9290_v22, %v9289_v55  ;;  %v9623_v4 = vrot.slane %v9609_v46, %v22608_v20  ;;  %v10482_v63 = vunpack.c.l.s4 %v14266_v9  ;;  %v18475_v47 = vrot.slane %v18462_v41, %v18458_v34 }
 0x3e5   : > { %13909 = vmatprep.mubr.msk.bf16.mxu1 %vm9315_vm5, %v9293_v61  ;;  %v18479_v31 = vrot.slane %v22749_v30, %v18458_v34  ;;  %v9606_v11 = vrot.slane %v9592_v15, %v22608_v20  ;;  %v10279_v3 = vrot.slane %v9624_v18, 7  ;;  %v11054_v35 = vsel %vm18465_vm0, %v9616_v38, %v10278_v37 }
 0x3e6   : > { %13910 = vmatmul.mubr.msk.bf16.gmra.mrb[24].mxu1 %vm9315_vm5, %v9294_v6  ;;  %v9625_v13 = vcombine.high %v9623_v4, %v9623_v4  ;;  %22756 = vst [vmem:[#allocation86_spill] sm:$0xff] %v18475_v47  ;;  %v10280_v50 = vrot.slane %v9623_v4, 7  ;;  %v9607_v33 = vcombine.high %v9599_v36, %v9599_v36  ;;  %v9626_v48 = vcombine.high %v14194_v32, %v14194_v32 }
 0x3e7   : > { %22757 = vst [vmem:[#allocation81_spill] sm:$0xff] %v18479_v31  ;;  %v18489_v44 = vrot.slane %v14194_v32, %v22608_v20  ;;  %v10483_v27 = vunpack.c.0.s8 %v10482_v63  ;;  %v10497_v25 = vunpack.c.0.s8 %v10496_v0  ;;  %v10700_v12 = vrot.slane %v18475_v47, 7 }
 0x3e8   : > { %v10281_v45 = vrot.slane %v9625_v13, 7  ;;  %v10956_v17 = vrot.slane %v18479_v31, 7  ;;  %v9608_v54 = vcombine.high %v9606_v11, %v9606_v11  ;;  %vm18493_vm5 = vcmp.gt.f32.partialorder %v9623_v4, %v10280_v50 }
 0x3e9   : > { %v22758_v43 = vmov 0  ;;  %v11186_v51 = vrot.slane %v11054_v35, 7  ;;  %v18498_v58 = vrot.slane %v9643_v2, %v22608_v20  ;;  %vm18500_vm9 = vcmp.gt.f32.partialorder %v9624_v18, %v10279_v3 }
 0x3ea   : > { %vm18469_vm3 = vcmp.gt.f32.partialorder %v9625_v13, %v10281_v45  ;;  %v22759_v43 = vsel %vm18493_vm5, 4294967295, %v22758_v43  ;;  %v22762_v28 = vmov 0  ;;  %v10274_v39 = vrot.slane %v9599_v36, 7 }
 0x3eb   : > { %v22754_v5 = vsel %vm18469_vm3, 4294967295, %v22753_v5  ;;  %v11057_v19 = vsel %vm18469_vm3, %v9625_v13, %v10281_v45  ;;  %22760 = vst [vmem:[#allocation82_spill] sm:$0xff] %v22759_v43  ;;  %22761 = vst [vmem:[#allocation53_spill] sm:$0xff] %v18498_v58  ;;  %v22763_v28 = vsel %vm18500_vm9, 4294967295, %v22762_v28  ;;  %v10275_v29 = vrot.slane %v9607_v33, 7  ;;  %v14200_v43 = vld [vmem:[%s14361_s14 + $0x48] sm:$0xff] }
 0x3ec   : > { %22755 = vst [vmem:[#allocation5_spill] sm:$0xff] %v22754_v5  ;;  %v11192_v10 = vrot.slane %v11057_v19, 7  ;;  %22764 = vst [vmem:[#allocation58_spill] sm:$0xff] %v22763_v28  ;;  %v10276_v52 = vrot.slane %v9606_v11, 7  ;;  %v18505_v60 = vrot.slane %v9626_v48, %v22608_v20  ;;  %v18509_v8 = vcombine.high %v18489_v44, %v18489_v44 }
 0x3ed   : > { %v18512_v14 = vsub.s32 %v10483_v27, %v22748_v40  ;;  %v18515_v24 = vsub.s32 %v10497_v25, %v22748_v40  ;;  %v18519_v26 = vsel %vm18465_vm0, %v10700_v12, %v10956_v17  ;;  %v11056_v1 = vsel %vm18493_vm5, %v9623_v4, %v10280_v50 }
 0x3ee   : > { %22765 = vst [vmem:[#allocation54_spill] sm:$0xff] %v18505_v60  ;;  %22766 = vst [vmem:[#allocation8_spill] sm:$0xff] %v18509_v8  ;;  %v18524_v57 = vrot.slane %v14193_v53, %v22608_v20  ;;  %v10277_v21 = vrot.slane %v9608_v54, 7  ;;  %v11055_v55 = vsel %vm18500_vm9, %v9624_v18, %v10279_v3  ;;  %v18528_v22 = vrot.slane %v11186_v51, 2 }
 0x3ef   : > { %22767 = vst [vmem:[#allocation83_spill] sm:$0xff] %v18515_v24  ;;  %22768 = vst [vmem:[#allocation84_spill] sm:$0xff] %v18519_v26  ;;  %v18530_v61 = vrot.slane %v11192_v10, 2  ;;  %v18534_v6 = vcombine.high %v18498_v58, %v18498_v58  ;;  %vm18536_vm12 = vcmp.gt.f32.partialorder %v9599_v36, %v10274_v39  ;;  %vm18540_vm7 = vcmp.gt.f32.partialorder %v9607_v33, %v10275_v29 }
 0x3f0   : > { %22769 = vst [vmem:[#allocation85_spill] sm:$0xff] %v18528_v22  ;;  %vm18544_vm8 = vcmp.gt.f32.partialorder %v9606_v11, %v10276_v52  ;;  %v18551_v38 = vcombine.high %v18505_v60, %v18505_v60  ;;  %v11190_v13 = vrot.slane %v11056_v1, 7  ;;  %v10480_v37 = vrot.slane %v18462_v41, %v22778_v7 }
 0x3f1   : > { %22770 = vst [vmem:[#allocation87_spill] sm:$0xff] %v18530_v61  ;;  %22771 = vst [vmem:[#allocation36_spill] sm:$0xff] %v18534_v6  ;;  %v10736_v45 = vrot.slane %v22749_v30, %v22778_v7  ;;  %v11188_v40 = vrot.slane %v11055_v55, 7  ;;  %vm18558_vm15 = vcmp.gt.f32.partialorder %v9608_v54, %v10277_v21  ;;  %v22779_v15 = vmov 0 }
 0x3f2   : > { %v22780_v15 = vsel %vm18558_vm15, 4294967295, %v22779_v15  ;;  %v9667_v18 = vrot.slane %v14195_v49, %v22608_v20  ;;  %vm22038_vm0 = vcmp.gt.f32.partialorder %v18524_v57, %v18528_v22  ;;  %v11050_v59 = vsel %vm18536_vm12, %v9599_v36, %v10274_v39 }
 0x3f3   : > { %22781 = vst [vmem:[#allocation42_spill] sm:$0xff] %v22780_v15  ;;  %v11051_v9 = vsel %vm18540_vm7, %v9607_v33, %v10275_v29  ;;  %v11052_v63 = vsel %vm18544_vm8, %v9606_v11, %v10276_v52  ;;  %vm22037_vm2 = vcmp.gt.f32.partialorder %v18534_v6, %v18530_v61  ;;  %v18575_v56 = vrot.slane %v18462_v41, %v18512_v14 }
 0x3f4   : > { %v9674_v0 = vrot.slane %v9660_v16, %v22608_v20  ;;  %v18579_v50 = vadd.s32 32, %v22749_v30  ;;  %v10698_v53 = vrot.slane %v10480_v37, 7  ;;  %v18583_v36 = vrot.slane %v22749_v30, %v18512_v14 }
 0x3f5   : > { %22782 = vst [vmem:[#allocation40_spill] sm:$0xff] %v18575_v56  ;;  %v10954_v2 = vrot.slane %v10736_v45, 7  ;;  %v11053_v11 = vsel %vm18558_vm15, %v9608_v54, %v10277_v21  ;;  %v11178_v3 = vrot.slane %v11050_v59, 7  ;;  %v11180_v35 = vrot.slane %v11051_v9, 7 }
 0x3f6   : > { %22783 = vst [vmem:[#allocation59_spill] sm:$0xff] %v18579_v50  ;;  %22784 = vst [vmem:[#allocation39_spill] sm:$0xff] %v18583_v36  ;;  %v11182_v19 = vrot.slane %v11052_v63, 7  ;;  %v9675_v33 = vcombine.high %v9667_v18, %v9667_v18  ;;  %v18587_v32 = vrot.slane %v11190_v13, 2  ;;  %v18591_v48 = vcombine.high %v18524_v57, %v18524_v57 }
 0x3f7   : > { %v18598_v27 = vsel %vm22038_vm0, %v18524_v57, %v18528_v22  ;;  %v18605_v25 = vsel %vm22037_vm2, %v18534_v6, %v18530_v61  ;;  %v10699_v12 = vrot.slane %v18575_v56, 7  ;;  %v9676_v17 = vcombine.high %v9674_v0, %v9674_v0 }
 0x3f8   : > { %22785 = vst [vmem:[#allocation60_spill] sm:$0xff] %v18587_v32  ;;  %22786 = vst [vmem:[#allocation57_spill] sm:$0xff] %v18591_v48  ;;  %v10282_v54 = vrot.slane %v9667_v18, 7  ;;  %v18609_v51 = vadd.s32 1, %v18579_v50  ;;  %v10955_v10 = vrot.slane %v18583_v36, 7  ;;  %v18614_v39 = vsel %vm18536_vm12, %v10698_v53, %v10954_v2 }
 0x3f9   : > { %22787 = vst [vmem:[#allocation61_spill] sm:$0xff] %v18605_v25  ;;  %22789 = vst [vmem:[#allocation80_spill] sm:$0xff] %v18614_v39  ;;  %v10987_v29 = vsel %vm18540_vm7, %v10480_v37, %v10736_v45  ;;  %v11184_v52 = vrot.slane %v11053_v11, 7  ;;  %v18618_v1 = vrot.slane %v11178_v3, 2  ;;  %v18620_v21 = vrot.slane %v11180_v35, 2 }
 0x3fa   : > { %22788 = vst [vmem:[#allocation56_spill] sm:$0xff] %v18609_v51  ;;  %v18622_v55 = vrot.slane %v11182_v19, 2  ;;  %v10283_v49 = vrot.slane %v9675_v33, 7  ;;  %v18624_v16 = vrot.slane %v11188_v40, 2  ;;  %v10284_v62 = vrot.slane %v9674_v0, 7 }
 0x3fb   : > { %22790 = vst [vmem:[#allocation47_spill] sm:$0xff] %v18618_v1  ;;  %22791 = vst [vmem:[#allocation41_spill] sm:$0xff] %v18620_v21  ;;  %v10285_v9 = vrot.slane %v9676_v17, 7  ;;  %vm18628_vm12 = vcmp.gt.f32.partialorder %v9667_v18, %v10282_v54  ;;  %v10508_v46 = vrot.slane %v18609_v51, %v22778_v7  ;;  %v10764_v37 = vrot.slane %v18579_v50, %v22778_v7 }
 0x3fc   : > { %22792 = vst [vmem:[#allocation55_spill] sm:$0xff] %v18622_v55  ;;  %22793 = vst [vmem:[#allocation46_spill] sm:$0xff] %v18624_v16  ;;  %v18638_v45 = vsel %vm18544_vm8, %v10699_v12, %v10955_v10  ;;  %v18640_v40 = vrot.slane %v11184_v52, 2  ;;  %v18643_v2 = vrot.slane %v10987_v29, 9  ;;  %vm22061_vm7 = vcmp.gt.f32.partialorder %v18489_v44, %v18618_v1  ;;  %v14196_v52 = vld [vmem:[%s14361_s14 + $0x28] sm:$0xff] }
 0x3fd   : > { %22796 = vst [vmem:[#allocation37_spill] sm:$0xff] %v18638_v45  ;;  %vm22060_vm2 = vcmp.gt.f32.partialorder %v18509_v8, %v18620_v21  ;;  %vm22058_vm0 = vcmp.gt.f32.partialorder %v18505_v60, %v18622_v55  ;;  %vm18651_vm13 = vcmp.gt.f32.partialorder %v9675_v33, %v10283_v49  ;;  %vm18655_vm8 = vcmp.gt.f32.partialorder %v9674_v0, %v10284_v62 }
 0x3fe   : > { %22797 = vst [vmem:[#allocation51_spill] sm:$0xff] %v18643_v2  ;;  %v18661_v3 = vrot.slane %v18609_v51, %v18512_v14  ;;  %v18665_v35 = vrot.slane %v18579_v50, %v18512_v14  ;;  %v11058_v19 = vsel %vm18628_vm12, %v9667_v18, %v10282_v54  ;;  %vm18669_vm11 = vcmp.gt.f32.partialorder %v9676_v17, %v10285_v9 }
 0x3ff   : > { %v22804_v12 = vmov 0  ;;  %v10702_v10 = vrot.slane %v10508_v46, 7  ;;  %v10958_v29 = vrot.slane %v10764_v37, 7  ;;  %v9677_v23 = vcombine.high %v14196_v52, %v14196_v52 }
 0x400   : > { %22802 = vst [vmem:[#allocation43_spill] sm:$0xff] %v18661_v3  ;;  %22803 = vst [vmem:[#allocation49_spill] sm:$0xff] %v18665_v35  ;;  %v22805_v12 = vsel %vm18669_vm11, 4294967295, %v22804_v12  ;;  %v18680_v59 = vsel %vm22061_vm7, %v18489_v44, %v18618_v1  ;;  %v11059_v18 = vsel %vm18651_vm13, %v9675_v33, %v10283_v49  ;;  %v9684_v54 = vrot.slane %v14196_v52, %v22608_v20 }
 0x401   : > { %22806 = vst [vmem:[#allocation38_spill] sm:$0xff] %v22805_v12  ;;  %v18690_v13 = vsel %vm22060_vm2, %v18509_v8, %v18620_v21  ;;  %v18697_v53 = vsel %vm22058_vm0, %v18505_v60, %v18622_v55  ;;  %v11060_v33 = vsel %vm18655_vm8, %v9674_v0, %v10284_v62  ;;  %v11194_v49 = vrot.slane %v11058_v19, 7  ;;  %v14197_v0 = vld [vmem:[%s14361_s14 + $0x40] sm:$0xff] }
 0x402   : > { %22807 = vst [vmem:[#allocation21_spill] sm:$0xff] %v18690_v13  ;;  %22808 = vst [vmem:[#allocation50_spill] sm:$0xff] %v18697_v53  ;;  %v10703_v52 = vrot.slane %v18661_v3, 7  ;;  %v10959_v50 = vrot.slane %v18665_v35, 7  ;;  %v10995_v51 = vsel %vm18651_vm13, %v10508_v46, %v10764_v37  ;;  %v11061_v61 = vsel %vm18669_vm11, %v9676_v17, %v10285_v9  ;;  %v14198_v35 = vld [vmem:[%s14361_s14 + $0x30] sm:$0xff] }
 0x403   : > { %v18709_v22 = vsel %vm18628_vm12, %v10702_v10, %v10958_v29  ;;  %v11196_v26 = vrot.slane %v11059_v18, 7  ;;  %v18712_v55 = vrot.slane %v9677_v23, %v22608_v20  ;;  %v9735_v62 = vrot.slane %v14197_v0, %v22608_v20 }
 0x404   : > { %22809 = vst [vmem:[#allocation44_spill] sm:$0xff] %v18709_v22  ;;  %v11198_v19 = vrot.slane %v11060_v33, 7  ;;  %v10286_v3 = vrot.slane %v9684_v54, 7  ;;  %v9694_v45 = vcombine.high %v14198_v35, %v14198_v35  ;;  %v9728_v4 = vcombine.high %v14197_v0, %v14197_v0 }
 0x405   : > { %v18719_v9 = vrot.slane %v11194_v49, 2  ;;  %v18722_v63 = vrot.slane %v14198_v35, %v22608_v20  ;;  %v18727_v37 = vsel %vm18655_vm8, %v10703_v52, %v10959_v50  ;;  %v11200_v10 = vrot.slane %v11061_v61, 7 }
 0x406   : > { %22812 = vst [vmem:[#allocation45_spill] sm:$0xff] %v18727_v37  ;;  %v18730_v18 = vrot.slane %v11196_v26, 2  ;;  %v18732_v33 = vrot.slane %v10995_v51, 9  ;;  %v9693_v49 = vcombine.high %v18712_v55, %v18712_v55  ;;  %v9743_v0 = vcombine.high %v9735_v62, %v9735_v62  ;;  %v14199_v26 = vld [vmem:[%s14361_s14 + $0x38] sm:$0xff] }
 0x407   : > { %22810 = vst [vmem:[#allocation52_spill] sm:$0xff] %v18719_v9  ;;  %22811 = vst [vmem:[#allocation66_spill] sm:$0xff] %v18722_v63  ;;  %v18736_v17 = vrot.slane %v11198_v19, 2  ;;  %vm18738_vm13 = vcmp.gt.f32.partialorder %v9684_v54, %v10286_v3  ;;  %v22816_v35 = vmov 0  ;;  %v18743_v50 = vrot.slane %v9694_v45, %v22608_v20 }
 0x408   : > { %22813 = vst [vmem:[#allocation62_spill] sm:$0xff] %v18730_v18  ;;  %22814 = vst [vmem:[#allocation67_spill] sm:$0xff] %v18732_v33  ;;  %v22817_v35 = vsel %vm18738_vm13, 4294967295, %v22816_v35  ;;  %v9742_v61 = vrot.slane %v9728_v4, %v22608_v20  ;;  %v18746_v11 = vcombine.high %v9684_v54, %v9684_v54  ;;  %vm22057_vm12 = vcmp.gt.f32.partialorder %v18722_v63, %v18719_v9 }
 0x409   : > { %22815 = vst [vmem:[#allocation72_spill] sm:$0xff] %v18736_v17  ;;  %22818 = vst [vmem:[#allocation48_spill] sm:$0xff] %v22817_v35  ;;  %v9711_v51 = vcombine.high %v14199_v26, %v14199_v26  ;;  %v18752_v52 = vadd.s32 64, %v22749_v30  ;;  %v18754_v19 = vrot.slane %v11200_v10, 2  ;;  %v18759_v45 = vcombine.high %v18722_v63, %v18722_v63 }
 0x40a   : > { %22819 = vst [vmem:[#allocation68_spill] sm:$0xff] %v18743_v50  ;;  %v10290_v23 = vrot.slane %v9735_v62, 7  ;;  %v10289_v4 = vrot.slane %v9693_v49, 7  ;;  %v11062_v46 = vsel %vm18738_vm13, %v9684_v54, %v10286_v3  ;;  %v18764_v33 = vrot.slane %v14199_v26, %v22608_v20 }
 0x40b   : > { %22820 = vst [vmem:[#allocation73_spill] sm:$0xff] %v18752_v52  ;;  %22821 = vst [vmem:[#allocation64_spill] sm:$0xff] %v18754_v19  ;;  %v10291_v22 = vrot.slane %v9743_v0, 7  ;;  %vm22074_vm8 = vcmp.gt.f32.partialorder %v18743_v50, %v18736_v17  ;;  %v11898_v10 = vsel %vm22057_vm12, %v18722_v63, %v18719_v9  ;;  %v9744_v29 = vcombine.high %v9742_v61, %v9742_v61 }
 0x40c   : > { %22822 = vst [vmem:[#allocation69_spill] sm:$0xff] %v18759_v45  ;;  %v10292_v37 = vrot.slane %v9742_v61, 7  ;;  %v18776_v54 = vrot.slane %v9711_v51, %v22608_v20  ;;  %v18779_v26 = vadd.s32 1, %v18752_v52  ;;  %v11202_v35 = vrot.slane %v11062_v46, 7 }
 0x40d   : > { %v18783_v21 = vcombine.high %v18743_v50, %v18743_v50  ;;  %vm22076_vm12 = vcmp.gt.f32.partialorder %v18759_v45, %v18730_v18  ;;  %vm18787_vm0 = vcmp.gt.f32.partialorder %v9735_v62, %v10290_v23  ;;  %vm18791_vm2 = vcmp.gt.f32.partialorder %v9693_v49, %v10289_v4 }
 0x40e   : > { %22823 = vst [vmem:[#allocation75_spill] sm:$0xff] %v18776_v54  ;;  %22824 = vst [vmem:[#allocation70_spill] sm:$0xff] %v18779_v26  ;;  %v22828_v3 = vmov 0  ;;  %v11900_v46 = vsel %vm22074_vm8, %v18743_v50, %v18736_v17  ;;  %v12026_v51 = vrot.slane %v11898_v10, 7  ;;  %vm18800_vm7 = vcmp.gt.f32.partialorder %v9743_v0, %v10291_v22 }
 0x40f   : > { %22825 = vst [vmem:[#allocation76_spill] sm:$0xff] %v18783_v21  ;;  %v22829_v3 = vsel %vm18791_vm2, 4294967295, %v22828_v3  ;;  %v10293_v2 = vrot.slane %v9744_v29, 7  ;;  %vm18804_vm4 = vcmp.gt.f32.partialorder %v9742_v61, %v10292_v37  ;;  %v10792_v39 = vrot.slane %v18752_v52, %v22778_v7 }
 0x410   : > { %22830 = vst [vmem:[#allocation63_spill] sm:$0xff] %v22829_v3  ;;  %v9752_v5 = vrot.slane %v14200_v43, %v22608_v20  ;;  %v18817_v10 = vsel %vm22076_vm12, %v18759_v45, %v18730_v18  ;;  %v10536_v17 = vrot.slane %v18779_v26, %v22778_v7  ;;  %v11066_v28 = vsel %vm18787_vm0, %v9735_v62, %v10290_v23 }
 0x411   : > { %22835 = vst [vmem:[#allocation71_spill] sm:$0xff] %v18817_v10  ;;  %v9745_v47 = vcombine.high %v14200_v43, %v14200_v43  ;;  %v11065_v31 = vsel %vm18791_vm2, %v9693_v49, %v10289_v4  ;;  %v12028_v15 = vrot.slane %v11900_v46, 7  ;;  %v18827_v56 = vcombine.high %v18776_v54, %v18776_v54 }
 0x412   : > { %v11067_v18 = vsel %vm18800_vm7, %v9743_v0, %v10291_v22  ;;  %vm18832_vm8 = vcmp.gt.f32.partialorder %v18722_v63, %v12026_v51  ;;  %v22837_v36 = vmov 0  ;;  %v18838_v43 = vrot.slane %v18779_v26, %v18512_v14  ;;  %v14201_v26 = vld [vmem:[%s14361_s14 + $0x50] sm:$0xff] }
 0x413   : > { %22836 = vst [vmem:[#allocation77_spill] sm:$0xff] %v18827_v56  ;;  %v22838_v36 = vsel %vm18832_vm8, 4294967295, %v22837_v36  ;;  %v18842_v62 = vrot.slane %v18752_v52, %v18512_v14  ;;  %v11068_v23 = vsel %vm18804_vm4, %v9742_v61, %v10292_v37  ;;  %vm18846_vm12 = vcmp.gt.f32.partialorder %v9744_v29, %v10293_v2 }
 0x414   : > { %22839 = vst [vmem:[#allocation78_spill] sm:$0xff] %v22838_v36  ;;  %22840 = vst [vmem:[#allocation74_spill] sm:$0xff] %v18838_v43  ;;  %v22842_v49 = vmov 0  ;;  %v10962_v22 = vrot.slane %v10792_v39, 7  ;;  %v11210_v0 = vrot.slane %v11066_v28, 7  ;;  %v10294_v4 = vrot.slane %v9752_v5, 7 }
 0x415   : > { %22841 = vst [vmem:[#allocation79_spill] sm:$0xff] %v18842_v62  ;;  %v22843_v49 = vsel %vm18846_vm12, 4294967295, %v22842_v49  ;;  %v10706_v46 = vrot.slane %v10536_v17, 7  ;;  %v11212_v3 = vrot.slane %v11067_v18, 7  ;;  %v18851_v41 = vrot.slane %v9745_v47, %v22608_v20 }
 0x416   : > { %22844 = vst [vmem:[#allocation65_spill] sm:$0xff] %v22843_v49  ;;  %v18855_v24 = vrot.slane %v14201_v26, %v22608_v20  ;;  %v18857_v52 = vrot.slane %v11202_v35, 2  ;;  %v11208_v56 = vrot.slane %v11065_v31, 7  ;;  %v11214_v37 = vrot.slane %v11068_v23, 7 }
 0x417   : > { %22845 = vst [vmem:[#allocation90_spill] sm:$0xff] %v18851_v41  ;;  %v9762_v61 = vcombine.high %v14201_v26, %v14201_v26  ;;  %vm18861_vm1 = vcmp.gt.f32.partialorder %v18743_v50, %v12028_v15  ;;  %v22848_v28 = vmov 0  ;;  %v18868_v47 = vsel %vm18832_vm8, %v18722_v63, %v12026_v51 }
 0x418   : > { %22846 = vst [vmem:[#allocation24_spill] sm:$0xff] %v18855_v24  ;;  %22847 = vst [vmem:[#allocation25_spill] sm:$0xff] %v18857_v52  ;;  %v22849_v28 = vsel %vm18861_vm1, 4294967295, %v22848_v28  ;;  %v11069_v18 = vsel %vm18846_vm12, %v9744_v29, %v10293_v2  ;;  %v10707_v35 = vrot.slane %v18838_v43, 7  ;;  %v10963_v31 = vrot.slane %v18842_v62, 7 }
 0x419   : > { %22850 = vst [vmem:[#allocation89_spill] sm:$0xff] %v22849_v28  ;;  %22851 = vst [vmem:[#allocation23_spill] sm:$0xff] %v18868_v47  ;;  %v18874_v26 = vrot.slane %v11210_v0, 2  ;;  %vm18876_vm14 = vcmp.gt.f32.partialorder %v9752_v5, %v10294_v4  ;;  %v22853_v23 = vmov 0  ;;  %v18882_v45 = vsel %vm18787_vm0, %v10706_v46, %v10962_v22  ;;  %v22934_v47 = vld [vmem:[#allocation16_spill] sm:$0xff] }
 0x41a   : > { %v22854_v23 = vsel %vm18876_vm14, 4294967295, %v22853_v23  ;;  %22856 = vst [vmem:[#allocation7_spill] sm:$0xff] %v18882_v45  ;;  %v18884_v36 = vrot.slane %v11212_v3, 2  ;;  %v9761_v51 = vcombine.high %v18851_v41, %v18851_v41  ;;  %v18890_v2 = vcombine.high %v18855_v24, %v18855_v24 }
 0x41b   : > { %22852 = vst [vmem:[#allocation6_spill] sm:$0xff] %v18874_v26  ;;  %22855 = vst [vmem:[#allocation88_spill] sm:$0xff] %v22854_v23  ;;  %v18892_v29 = vrot.slane %v11208_v56, 2  ;;  %v18894_v0 = vrot.slane %v11214_v37, 2  ;;  %v11216_v49 = vrot.slane %v11069_v18, 7  ;;  %v18897_v9 = vrot.slane %v9762_v61, %v22608_v20 }
 0x41c   : > { %22857 = vst [vmem:[#allocation9_spill] sm:$0xff] %v18884_v36  ;;  %22858 = vst [vmem:[#allocation10_spill] sm:$0xff] %v18890_v2  ;;  %v18902_v3 = vsel %vm18861_vm1, %v18743_v50, %v12028_v15  ;;  %v11003_v46 = vsel %vm18800_vm7, %v10536_v17, %v10792_v39  ;;  %v11070_v56 = vsel %vm18876_vm14, %v9752_v5, %v10294_v4  ;;  %v10297_v15 = vrot.slane %v9761_v51, 7  ;;  %v14202_v39 = vld [vmem:[%s14361_s14 + $0x58] sm:$0xff]  ;;  %v14203_v17 = vld [vmem:[%s14361_s14 + $0x60] sm:$0xff] }
 0x41d   : > { %22859 = vst [vmem:[#allocation91_spill] sm:$0xff] %v18892_v29  ;;  %22860 = vst [vmem:[#allocation92_spill] sm:$0xff] %v18894_v0  ;;  %v18914_v37 = vsel %vm18804_vm4, %v10707_v35, %v10963_v31  ;;  %v18917_v18 = vcombine.high %v9752_v5, %v9752_v5  ;;  %vm22092_vm0 = vcmp.gt.f32.partialorder %v18855_v24, %v18874_v26  ;;  %v18925_v22 = vrot.slane %v11216_v49, 2 }
 0x41e   : > { %22861 = vst [vmem:[#allocation93_spill] sm:$0xff] %v18897_v9  ;;  %22862 = vst [vmem:[#allocation94_spill] sm:$0xff] %v18902_v3  ;;  %vm22112_vm7 = vcmp.gt.f32.partialorder %v18890_v2, %v18884_v36  ;;  %v9779_v12 = vcombine.high %v14202_v39, %v14202_v39  ;;  %v9796_v4 = vcombine.high %v14203_v17, %v14203_v17  ;;  %v18927_v1 = vrot.slane %v11003_v46, 9  ;;  %v18946_v46 = vld [vmem:[%s21893_s6] ss:$0 sm:$0xff] }
 0x41f   : > { %22863 = vst [vmem:[#allocation95_spill] sm:$0xff] %v18914_v37  ;;  %22864 = vst [vmem:[#allocation96_spill] sm:$0xff] %v18917_v18  ;;  %v11218_v35 = vrot.slane %v11070_v56, 7  ;;  %vm22111_vm4 = vcmp.gt.f32.partialorder %v18897_v9, %v18894_v0  ;;  %v18937_v31 = vsel %vm22092_vm0, %v18855_v24, %v18874_v26  ;;  %v18940_v61 = vrot.slane %v14202_v39, %v22608_v20 }
 0x420   : > { %22865 = vst [vmem:[#allocation97_spill] sm:$0xff] %v18925_v22  ;;  %22866 = vst [vmem:[#allocation98_spill] sm:$0xff] %v18927_v1  ;;  %v9803_v49 = vrot.slane %v14203_v17, %v22608_v20  ;;  %v18952_v37 = vcombine.high %v18897_v9, %v18897_v9  ;;  %v18959_v39 = vsel %vm22112_vm7, %v18890_v2, %v18884_v36  ;;  %v22870_v17 = vmov 0  ;;  %v18979_v36 = vld [vmem:[%s21894_s7] ss:$0 sm:$0xff] }
 0x421   : > { %22867 = vst [vmem:[#allocation99_spill] sm:$0xff] %v18940_v61  ;;  %22869 = vst [vmem:[#allocation101_spill] sm:$0xff] %v18959_v39  ;;  %vm18961_vm0 = vcmp.gt.f32.partialorder %v9761_v51, %v10297_v15  ;;  %v18970_v5 = vsel %vm22111_vm4, %v18897_v9, %v18894_v0  ;;  %v18973_v56 = vrot.slane %v9779_v12, %v22608_v20  ;;  %v18981_v45 = vrot.slane %v11218_v35, 2 }
 0x422   : > { %22868 = vst [vmem:[#allocation100_spill] sm:$0xff] %v18952_v37  ;;  %v22871_v17 = vsel %vm18961_vm0, 4294967295, %v22870_v17  ;;  %v9810_v1 = vrot.slane %v9796_v4, %v22608_v20  ;;  %v18985_v43 = vadd.s32 96, %v22749_v30  ;;  %v18989_v28 = vcombine.high %v9803_v49, %v9803_v49 }
 0x423   : > { %22872 = vst [vmem:[#allocation102_spill] sm:$0xff] %v22871_v17  ;;  %22873 = vst [vmem:[#allocation103_spill] sm:$0xff] %v18973_v56  ;;  %v18992_v4 = vstv %s18910_s15  ;;  %v18997_v35 = vsel %vm18961_vm0, %v9761_v51, %v10297_v15  ;;  %v10298_v23 = vrot.slane %v9803_v49, 7  ;;  %v19038_v53 = vcombine.high %v18973_v56, %v18973_v56 }
 0x424   : > { %22874 = vst [vmem:[#allocation104_spill] sm:$0xff] %v18981_v45  ;;  %22875 = vst [vmem:[#allocation105_spill] sm:$0xff] %v18985_v43  ;;  %v19002_v12 = vcombine.high %v9810_v1, %v9810_v1  ;;  %v19007_v29 = vadd.s32 1, %v18985_v43 }
 0x425   : > { %vm19014_vm7 = vcmp.gt.f32.partialorder %v9803_v49, %v10298_v23  ;;  %22882 = vst [vmem:[#allocation108_spill] sm:$0xff] %v19038_v53 }
 0x426   : > { %22876 = vst [vmem:[#allocation106_spill] sm:$0xff] %v19007_v29  ;;  %v11074_v6 = vsel %vm19014_vm7, %v9803_v49, %v10298_v23  ;;  %v14204_v23 = vld [vmem:[%s14361_s14 + $0x68] sm:$0xff]  ;;  %v22886_v49 = vrot.slane %v18937_v31, 7  ;;  %v22901_v58 = vrot.slane %v19002_v12, 7 }
 0x4ae   : > { %v13907_v26 = vpop.f32.mrb[20].mxu1 }
 0x4af   : > { %v9406_v0 = vmul.f32 %v13907_v26, %v18946_v46  ;;  %v9366_v62 = vpop.f32.mrb[21].mxu1 }
 0x4b0   : > { %v9404_v50 = vmul.f32 %v18946_v46, %v9366_v62  ;;  %v13908_v63 = vpop.f32.mrb[22].mxu1  ;;  %v10300_v62 = vrot.slane %v9810_v1, 7 }
 0x4b1   : > { %v9421_v2 = vadd.f32 %v18979_v36, %v9406_v0  ;;  %v9407_v45 = vmul.f32 %v13908_v63, %v18946_v46  ;;  %v9369_v26 = vpop.f32.mrb[23].mxu1  ;;  %v10299_v0 = vrot.slane %v18989_v28, 7 }
 0x4b2   : > { %v9419_v39 = vadd.f32 %v18979_v36, %v9404_v50  ;;  %v9405_v22 = vmul.f32 %v18946_v46, %v9369_v26  ;;  %v19021_v26 = vrot.slane %v18985_v43, %v22778_v7  ;;  %vm19029_vm0 = vcmp.gt.f32.partialorder %v9810_v1, %v10300_v62 }
 0x4b3   : > { %v9438_v51 = vmul.f32 %v18992_v4, %v9421_v2  ;;  %v9422_v15 = vadd.f32 %v18979_v36, %v9407_v45  ;;  %vm9429_vm4 = vcmp.gt.f32.partialorder %v9421_v2, 0.0  ;;  %v19025_v45 = vrot.slane %v18985_v43, %v18512_v14 }
 0x4b4   : > { %v9436_v63 = vmul.f32 %v18992_v4, %v9419_v39  ;;  %v9420_v37 = vadd.f32 %v18979_v36, %v9405_v22  ;;  %vm9427_vm10 = vcmp.gt.f32.partialorder %v9419_v39, 0.0  ;;  %v19042_v22 = vrot.slane %v19007_v29, %v22778_v7 }
 0x4b5   : > { %vm9430_vm6 = vcmp.gt.f32.partialorder %v9422_v15, 0.0  ;;  %v9439_v50 = vmul.f32 %v18992_v4, %v9422_v15  ;;  %22879 = vst [vmem:[#allocation107_spill] sm:$0xff] %v19025_v45  ;;  %v9446_v3 = vsel %vm9429_vm4, %v9421_v2, %v9438_v51  ;;  %v11226_v51 = vrot.slane %v11074_v6, 7 }
 0x4b6   : > { %vm9428_vm14 = vcmp.gt.f32.partialorder %v9420_v37, 0.0  ;;  %v9437_v61 = vmul.f32 %v18992_v4, %v9420_v37  ;;  %v9444_v25 = vsel %vm9427_vm10, %v9419_v39, %v9436_v63  ;;  %vm19058_vm10 = vcmp.gt.f32.partialorder %v18855_v24, %v22886_v49 }
 0x4b7   : > { %v9447_v10 = vsel %vm9430_vm6, %v9422_v15, %v9439_v50  ;;  %vm19045_vm6 = vcmp.gt.f32.partialorder %v18989_v28, %v10299_v0  ;;  %v22887_v39 = vmov 0  ;;  %v22892_v50 = vmov 0 }
 0x4b8   : > { %v9453_v41 = vpack.c.bf16 %v9447_v10, %v9446_v3  ;;  %v9445_v60 = vsel %vm9428_vm14, %v9420_v37, %v9437_v61  ;;  %v19051_v10 = vrot.slane %v19007_v29, %v18512_v14  ;;  %v9813_v3 = vcombine.high %v14204_v23, %v14204_v23 }
 0x4b9   : > { %v13911_v18 = vpop.f32.mrb[24].mxu1  ;;  %v9452_v8 = vpack.c.bf16 %v9445_v60, %v9444_v25  ;;  %v22888_v39 = vsel %vm19058_vm10, 4294967295, %v22887_v39  ;;  %v10966_v60 = vrot.slane %v19021_v26, 7  ;;  %v11076_v25 = vsel %vm19029_vm0, %v9810_v1, %v10300_v62 }
 0x4ba   : > { %22885 = vst [vmem:[#allocation109_spill] sm:$0xff] %v19051_v10  ;;  %v9410_v37 = vmul.f32 %v13911_v18, %v18946_v46  ;;  %v9382_v61 = vpop.f32.mrb[25].mxu1  ;;  %22889 = vst [vmem:[#allocation110_spill] sm:$0xff] %v22888_v39  ;;  %vm22890_vm14 = vcmask 31744   ;;  %v22891_v18 = vrot.slane %v18970_v5, 7  ;;  %v22895_v49 = vrot.slane %v19002_v12, 7 }
 0x4bb   : > { %v9408_v15 = vmul.f32 %v18946_v46, %v9382_v61  ;;  %v13912_v63 = vpop.f32.mrb[26].mxu1  ;;  %13915 = vmatprep.mubr.msk.bf16.mxu1 %vm22890_vm14, %v9452_v8  ;;  %v22896_v43 = vmov 0  ;;  %v10967_v6 = vrot.slane %v19025_v45, 7  ;;  %v11075_v61 = vsel %vm19045_vm6, %v18989_v28, %v10299_v0 }
 0x4bc   : > { %vm19070_vm4 = vcmp.gt.f32.partialorder %v18897_v9, %v22891_v18  ;;  %vm19077_vm12 = vcmp.gt.f32.partialorder %v19002_v12, %v22895_v49  ;;  %v9425_v1 = vadd.f32 %v18979_v36, %v9410_v37  ;;  %v9411_v8 = vmul.f32 %v13912_v63, %v18946_v46  ;;  %v9385_v62 = vpop.f32.mrb[27].mxu1  ;;  %13916 = vmatmul.mubr.msk.bf16.vlgmr.msra.gmra.mrb[28].mxu1 %vm22890_vm14, %v9453_v41 }
 0x4bd   : > { %v22893_v50 = vsel %vm19070_vm4, 4294967295, %v22892_v50  ;;  %v22897_v43 = vsel %vm19077_vm12, 4294967295, %v22896_v43  ;;  %v9820_v18 = vrot.slane %v14204_v23, %v22608_v20  ;;  %v9423_v49 = vadd.f32 %v18979_v36, %v9408_v15  ;;  %v14205_v23 = vld [vmem:[%s14361_s14 + $0x70] sm:$0xff] }
 0x4be   : > { %22894 = vst [vmem:[#allocation111_spill] sm:$0xff] %v22893_v50  ;;  %22898 = vst [vmem:[#allocation112_spill] sm:$0xff] %v22897_v43  ;;  %v9409_v29 = vmul.f32 %v18946_v46, %v9385_v62  ;;  %v11230_v45 = vrot.slane %v11076_v25, 7  ;;  %v19092_v37 = vrot.slane %v9813_v3, %v22608_v20  ;;  %v9442_v63 = vmul.f32 %v18992_v4, %v9425_v1  ;;  %v14206_v3 = vld [vmem:[%s14361_s14 + $0xa8] sm:$0xff] }
 0x4bf   : > { %v9426_v53 = vadd.f32 %v18979_v36, %v9411_v8  ;;  %v19096_v41 = vrot.slane %v11226_v51, 2  ;;  %vm9433_vm14 = vcmp.gt.f32.partialorder %v9425_v1, 0.0  ;;  %v9440_v28 = vmul.f32 %v18992_v4, %v9423_v49 }
 0x4c0   : > { %v9424_v0 = vadd.f32 %v18979_v36, %v9409_v29  ;;  %v9830_v15 = vcombine.high %v14205_v23, %v14205_v23  ;;  %vm9431_vm1 = vcmp.gt.f32.partialorder %v9423_v49, 0.0  ;;  %v10302_v25 = vrot.slane %v9820_v18, 7 }
 0x4c1   : > { %22899 = vst [vmem:[#allocation113_spill] sm:$0xff] %v19096_v41  ;;  %vm9434_vm8 = vcmp.gt.f32.partialorder %v9426_v53, 0.0  ;;  %v9443_v46 = vmul.f32 %v18992_v4, %v9426_v53  ;;  %v9949_v62 = vcombine.high %v14206_v3, %v14206_v3  ;;  %v9829_v51 = vcombine.high %v19092_v37, %v19092_v37 }
 0x4c2   : > { %vm9432_vm13 = vcmp.gt.f32.partialorder %v9424_v0, 0.0  ;;  %v9441_v56 = vmul.f32 %v18992_v4, %v9424_v0  ;;  %v19107_v8 = vrot.slane %v14205_v23, %v22608_v20  ;;  %v9450_v13 = vsel %vm9433_vm14, %v9425_v1, %v9442_v63 }
 0x4c3   : > { %v9451_v36 = vsel %vm9434_vm8, %v9426_v53, %v9443_v46  ;;  %v10710_v29 = vrot.slane %v19042_v22, 7  ;;  %v9448_v54 = vsel %vm9431_vm1, %v9423_v49, %v9440_v28  ;;  %v10711_v19 = vrot.slane %v19051_v10, 7 }
 0x4c4   : > { %22900 = vst [vmem:[#allocation114_spill] sm:$0xff] %v19107_v8  ;;  %v9449_v52 = vsel %vm9432_vm13, %v9424_v0, %v9441_v56  ;;  %v9455_v21 = vpack.c.bf16 %v9451_v36, %v9450_v13  ;;  %v11077_v4 = vsel %vm19077_vm12, %v19002_v12, %v22901_v58  ;;  %v11228_v32 = vrot.slane %v11075_v61, 7  ;;  %v14208_v36 = vld [vmem:[%s14361_s14 + $0xc0] sm:$0xff] }
 0x4c5   : > { %v9454_v48 = vpack.c.bf16 %v9449_v52, %v9448_v54  ;;  %v19116_v16 = vrot.slane %v11230_v45, 2  ;;  %vm19118_vm2 = vcmp.gt.f32.partialorder %v9820_v18, %v10302_v25  ;;  %v22903_v1 = vmov 0 }
 0x4c6   : > { %v22904_v1 = vsel %vm19118_vm2, 4294967295, %v22903_v1  ;;  %v19123_v53 = vrot.slane %v9830_v15, %v22608_v20  ;;  %v19126_v13 = vrot.slane %v9949_v62, %v22608_v20  ;;  %v22907_v56 = vrot.slane %v18997_v35, 7  ;;  %v14207_v15 = vld [vmem:[%s14361_s14 + $0xb0] sm:$0xff] }
 0x4c7   : > { %22902 = vst [vmem:[#allocation115_spill] sm:$0xff] %v19116_v16  ;;  %22905 = vst [vmem:[#allocation116_spill] sm:$0xff] %v22904_v1  ;;  %v22908_v58 = vrot.slane %v18937_v31, 7  ;;  %v10305_v54 = vrot.slane %v9829_v51, 7  ;;  %vm22172_vm1 = vcmp.gt.f32.partialorder %v19107_v8, %v19096_v41  ;;  %vm22909_vm13 = vcmask 31744  }
 0x4c8   : > { %22906 = vst [vmem:[#allocation117_spill] sm:$0xff] %v19123_v53  ;;  %v19130_v49 = vrot.slane %v22907_v56, 2  ;;  %13919 = vmatprep.mubr.msk.bf16.mxu1 %vm22909_vm13, %v9454_v48  ;;  %v22910_v12 = vrot.slane %v18970_v5, 7  ;;  %v19151_v31 = vsel %vm19014_vm7, %v10710_v29, %v10966_v60  ;;  %v11011_v45 = vsel %vm19045_vm6, %v19042_v22, %v19021_v26  ;;  %vm22912_vm8 = vmmov %vm22909_vm13  ;;  %v14210_v26 = vld [vmem:[%s14361_s14 + $0x78] sm:$0xff] }
 0x4c9   : > { %v19137_v52 = vsel %vm19058_vm10, %v18855_v24, %v22908_v58  ;;  %22911 = vst [vmem:[#allocation118_spill] sm:$0xff] %v19151_v31  ;;  %v11232_v61 = vrot.slane %v11077_v4, 7  ;;  %13920 = vmatmul.mubr.msk.bf16.gmra.mrb[32].mxu1 %vm22912_vm8, %v9455_v21  ;;  %v19160_v48 = vsel %vm19029_vm0, %v10711_v19, %v10967_v6  ;;  %v19162_v5 = vrot.slane %v11228_v32, 2 }
 0x4ca   : > { %v19147_v35 = vsel %vm19070_vm4, %v18897_v9, %v22910_v12  ;;  %22913 = vst [vmem:[#allocation119_spill] sm:$0xff] %v19160_v48  ;;  %v11078_v63 = vsel %vm19118_vm2, %v9820_v18, %v10302_v25  ;;  %v19168_v17 = vcombine.high %v19107_v8, %v19107_v8  ;;  %vm22163_vm7 = vcmp.gt.f32.partialorder %v19123_v53, %v19116_v16 }
 0x4cb   : > { %22914 = vst [vmem:[#allocation120_spill] sm:$0xff] %v19162_v5  ;;  %v11914_v21 = vsel %vm22172_vm1, %v19107_v8, %v19096_v41  ;;  %v9956_v32 = vrot.slane %v14206_v3, %v22608_v20  ;;  %v9965_v19 = vcombine.high %v19126_v13, %v19126_v13  ;;  %v19183_v22 = vcombine.high %v9820_v18, %v9820_v18 }
 0x4cc   : > { %22915 = vst [vmem:[#allocation121_spill] sm:$0xff] %v19168_v17  ;;  %vm19185_vm0 = vcmp.gt.f32.partialorder %v9829_v51, %v10305_v54  ;;  %v22916_v2 = vmov 0  ;;  %v19189_v60 = vrot.slane %v11232_v61, 2  ;;  %v19191_v6 = vrot.slane %v11011_v45, 9 }
 0x4cd   : > { %v22917_v2 = vsel %vm19185_vm0, 4294967295, %v22916_v2  ;;  %v11234_v0 = vrot.slane %v11078_v63, 7  ;;  %vm22171_vm6 = vcmp.gt.f32.partialorder %v19168_v17, %v19162_v5  ;;  %v11916_v18 = vsel %vm22163_vm7, %v19123_v53, %v19116_v16 }
 0x4ce   : > { %22918 = vst [vmem:[#allocation122_spill] sm:$0xff] %v22917_v2  ;;  %22919 = vst [vmem:[#allocation123_spill] sm:$0xff] %v19189_v60  ;;  %v12042_v23 = vrot.slane %v11914_v21, 7  ;;  %v9966_v46 = vcombine.high %v14207_v15, %v14207_v15  ;;  %v11081_v25 = vsel %vm19185_vm0, %v9829_v51, %v10305_v54  ;;  %v10318_v3 = vrot.slane %v9956_v32, 7 }
 0x4cf   : > { %22920 = vst [vmem:[#allocation124_spill] sm:$0xff] %v19191_v6  ;;  %v10321_v62 = vrot.slane %v9965_v19, 7  ;;  %v10000_v29 = vcombine.high %v14208_v36, %v14208_v36  ;;  %v19209_v58 = vcombine.high %v19123_v53, %v19123_v53  ;;  %v9964_v12 = vcombine.high %v9956_v32, %v9956_v32 }
 0x4d0   : > { %v19211_v45 = vrot.slane %v11234_v0, 2  ;;  %v19218_v51 = vsel %vm22171_vm6, %v19168_v17, %v19162_v5  ;;  %v12044_v54 = vrot.slane %v11916_v18, 7  ;;  %v10007_v61 = vrot.slane %v14208_v36, %v22608_v20  ;;  %v14209_v0 = vld [vmem:[%s14361_s14 + $0xb8] sm:$0xff] }
 0x4d1   : > { %22921 = vst [vmem:[#allocation125_spill] sm:$0xff] %v19209_v58  ;;  %22923 = vst [vmem:[#allocation127_spill] sm:$0xff] %v19218_v51  ;;  %v11240_v63 = vrot.slane %v11081_v25, 7  ;;  %vm19222_vm14 = vcmp.gt.f32.partialorder %v19107_v8, %v12042_v23  ;;  %v22924_v21 = vmov 0  ;;  %v19227_v15 = vrot.slane %v9966_v46, %v22608_v20  ;;  %v14214_v51 = vld [vmem:[%s14361_s14 + $0xd0] sm:$0xff] }
 0x4d2   : > { %22922 = vst [vmem:[#allocation126_spill] sm:$0xff] %v19211_v45  ;;  %v22925_v21 = vsel %vm19222_vm14, 4294967295, %v22924_v21  ;;  %v9983_v28 = vcombine.high %v14209_v0, %v14209_v0  ;;  %v9847_v56 = vcombine.high %v14210_v26, %v14210_v26  ;;  %vm19231_vm13 = vcmp.gt.f32.partialorder %v9956_v32, %v10318_v3 }
 0x4d3   : > { %22926 = vst [vmem:[#allocation128_spill] sm:$0xff] %v22925_v21  ;;  %22927 = vst [vmem:[#allocation129_spill] sm:$0xff] %v19227_v15  ;;  %v22928_v4 = vmov 0  ;;  %vm19235_vm8 = vcmp.gt.f32.partialorder %v9965_v19, %v10321_v62  ;;  %v22931_v18 = vmov 0  ;;  %v10014_v25 = vrot.slane %v10000_v29, %v22608_v20 }
 0x4d4   : > { %v22929_v4 = vsel %vm19231_vm13, 4294967295, %v22928_v4  ;;  %v22932_v18 = vsel %vm19235_vm8, 4294967295, %v22931_v18  ;;  %v19243_v46 = vcombine.high %v22934_v47, %v22934_v47  ;;  %v10319_v16 = vrot.slane %v9964_v12, 7 }
 0x4d5   : > { %22930 = vst [vmem:[#allocation130_spill] sm:$0xff] %v22929_v4  ;;  %22933 = vst [vmem:[#allocation131_spill] sm:$0xff] %v22932_v18  ;;  %v19246_v48 = vadd.s32 192, %v22749_v30  ;;  %vm19249_vm7 = vcmp.gt.f32.partialorder %v19123_v53, %v12044_v54  ;;  %v22937_v5 = vmov 0  ;;  %v19254_v6 = vrot.slane %v14209_v0, %v22608_v20 }
 0x4d6   : > { %22935 = vst [vmem:[#allocation16_spill] sm:$0xff] %v19243_v46  ;;  %v22938_v5 = vsel %vm19249_vm7, 4294967295, %v22937_v5  ;;  %v10320_v29 = vrot.slane %v19126_v13, 7  ;;  %v10015_v41 = vcombine.high %v10007_v61, %v10007_v61  ;;  %v19260_v36 = vsel %vm19222_vm14, %v19107_v8, %v12042_v23  ;;  %v14211_v8 = vld [vmem:[%s14361_s14 + $0x80] sm:$0xff] }
 0x4d7   : > { %22936 = vst [vmem:[#allocation132_spill] sm:$0xff] %v19246_v48  ;;  %22939 = vst [vmem:[#allocation133_spill] sm:$0xff] %v22938_v5  ;;  %v19263_v31 = vrot.slane %v9983_v28, %v22608_v20  ;;  %v11094_v1 = vsel %vm19231_vm13, %v9956_v32, %v10318_v3  ;;  %v11097_v2 = vsel %vm19235_vm8, %v9965_v19, %v10321_v62  ;;  %v19269_v43 = vrot.slane %v11240_v63, 2 }
 0x4d8   : > { %22940 = vst [vmem:[#allocation134_spill] sm:$0xff] %v19254_v6  ;;  %22941 = vst [vmem:[#allocation135_spill] sm:$0xff] %v19260_v36  ;;  %v19273_v0 = vcombine.high %v19227_v15, %v19227_v15  ;;  %v19276_v10 = vrot.slane %v9847_v56, %v22608_v20  ;;  %v10016_v23 = vcombine.high %v10014_v25, %v10014_v25  ;;  %v22947_v32 = vmov 0 }
 0x4d9   : > { %22942 = vst [vmem:[#allocation136_spill] sm:$0xff] %v19263_v31  ;;  %22943 = vst [vmem:[#allocation137_spill] sm:$0xff] %v19269_v43  ;;  %v19281_v28 = vsel %vm19249_vm7, %v19123_v53, %v12044_v54  ;;  %vm19283_vm6 = vcmp.gt.f32.partialorder %v9964_v12, %v10319_v16  ;;  %v10322_v19 = vrot.slane %v10007_v61, 7  ;;  %v19288_v3 = vadd.s32 1, %v19246_v48 }
 0x4da   : > { %22944 = vst [vmem:[#allocation138_spill] sm:$0xff] %v19273_v0  ;;  %22945 = vst [vmem:[#allocation139_spill] sm:$0xff] %v19276_v10  ;;  %v22948_v32 = vsel %vm19283_vm6, 4294967295, %v22947_v32  ;;  %vm19291_vm1 = vcmp.gt.f32.partialorder %v19126_v13, %v10320_v29  ;;  %v22951_v62 = vmov 0  ;;  %v11266_v56 = vrot.slane %v11094_v1, 7 }
 0x4db   : > { %22946 = vst [vmem:[#allocation140_spill] sm:$0xff] %v19281_v28  ;;  %22949 = vst [vmem:[#allocation141_spill] sm:$0xff] %v22948_v32  ;;  %v22952_v62 = vsel %vm19291_vm1, 4294967295, %v22951_v62  ;;  %v11272_v63 = vrot.slane %v11097_v2, 7  ;;  %v10323_v4 = vrot.slane %v10015_v41, 7  ;;  %v19299_v18 = vcombine.high %v19263_v31, %v19263_v31 }
 0x4dc   : > { %22950 = vst [vmem:[#allocation142_spill] sm:$0xff] %v19288_v3  ;;  %22953 = vst [vmem:[#allocation143_spill] sm:$0xff] %v22952_v62  ;;  %v19302_v5 = vrot.slane %v14210_v26, %v22608_v20  ;;  %v10324_v21 = vrot.slane %v10014_v25, 7  ;;  %v19306_v53 = vcombine.high %v19276_v10, %v19276_v10  ;;  %v19310_v1 = vsel %vm19283_vm6, %v9964_v12, %v10319_v16 }
 0x4dd   : > { %22954 = vst [vmem:[#allocation144_spill] sm:$0xff] %v19299_v18  ;;  %22956 = vst [vmem:[#allocation146_spill] sm:$0xff] %v19310_v1  ;;  %v10325_v2 = vrot.slane %v10016_v23, 7  ;;  %v9864_v0 = vcombine.high %v14211_v8, %v14211_v8  ;;  %v19316_v54 = vsel %vm19291_vm1, %v19126_v13, %v10320_v29  ;;  %vm19318_vm13 = vcmp.gt.f32.partialorder %v10007_v61, %v10322_v19 }
 0x4de   : > { %22955 = vst [vmem:[#allocation145_spill] sm:$0xff] %v19306_v53  ;;  %22957 = vst [vmem:[#allocation147_spill] sm:$0xff] %v19316_v54  ;;  %v19324_v31 = vrot.slane %v19288_v3, %v22778_v7  ;;  %v9871_v32 = vrot.slane %v14211_v8, %v22608_v20  ;;  %v19327_v16 = vrot.slane %v11266_v56, 2  ;;  %v19329_v12 = vrot.slane %v11272_v63, 2  ;;  %v14212_v54 = vld [vmem:[%s14361_s14 + $0xc8] sm:$0xff] }
 0x4df   : > { %vm19331_vm8 = vcmp.gt.f32.partialorder %v10015_v41, %v10323_v4  ;;  %v19337_v13 = vrot.slane %v19246_v48, %v22778_v7  ;;  %vm19339_vm1 = vcmp.gt.f32.partialorder %v10014_v25, %v10324_v21  ;;  %v19345_v8 = vrot.slane %v19288_v3, %v18512_v14 }
 0x4e0   : > { %22960 = vst [vmem:[#allocation148_spill] sm:$0xff] %v19327_v16  ;;  %22961 = vst [vmem:[#allocation149_spill] sm:$0xff] %v19329_v12  ;;  %v19349_v56 = vrot.slane %v19246_v48, %v18512_v14  ;;  %v19352_v63 = vadd.s32 128, %v22749_v30  ;;  %vm19356_vm6 = vcmp.gt.f32.partialorder %v10016_v23, %v10325_v2  ;;  %v22969_v39 = vmov 0 }
 0x4e1   : > { %22966 = vst [vmem:[#allocation150_spill] sm:$0xff] %v19345_v8  ;;  %v22970_v39 = vsel %vm19356_vm6, 4294967295, %v22969_v39  ;;  %v9878_v6 = vrot.slane %v9864_v0, %v22608_v20  ;;  %v10722_v3 = vrot.slane %v19324_v31, 7  ;;  %v11098_v9 = vsel %vm19318_vm13, %v10007_v61, %v10322_v19 }
 0x4e2   : > { %22967 = vst [vmem:[#allocation151_spill] sm:$0xff] %v19349_v56  ;;  %22968 = vst [vmem:[#allocation152_spill] sm:$0xff] %v19352_v63  ;;  %v11099_v48 = vsel %vm19331_vm8, %v10015_v41, %v10323_v4  ;;  %v9879_v24 = vcombine.high %v9871_v32, %v9871_v32  ;;  %vm22214_vm7 = vcmp.gt.f32.partialorder %v19299_v18, %v19329_v12  ;;  %v10978_v16 = vrot.slane %v19337_v13, 7 }
 0x4e3   : > { %22971 = vst [vmem:[#allocation153_spill] sm:$0xff] %v22970_v39  ;;  %v11100_v62 = vsel %vm19339_vm1, %v10014_v25, %v10324_v21  ;;  %v10017_v1 = vcombine.high %v14212_v54, %v14212_v54  ;;  %v10723_v0 = vrot.slane %v19345_v8, 7  ;;  %v10979_v53 = vrot.slane %v19349_v56, 7 }
 0x4e4   : > { %v11035_v41 = vsel %vm19331_vm8, %v19324_v31, %v19337_v13  ;;  %v19379_v4 = vadd.s32 1, %v19352_v63  ;;  %v11101_v61 = vsel %vm19356_vm6, %v10016_v23, %v10325_v2  ;;  %v11274_v19 = vrot.slane %v11098_v9, 7 }
 0x4e5   : > { %v11276_v21 = vrot.slane %v11099_v48, 7  ;;  %v9880_v25 = vcombine.high %v9878_v6, %v9878_v6  ;;  %v19388_v8 = vsel %vm22214_vm7, %v19299_v18, %v19329_v12  ;;  %v11278_v56 = vrot.slane %v11100_v62, 7 }
 0x4e6   : > { %22972 = vst [vmem:[#allocation154_spill] sm:$0xff] %v19379_v4  ;;  %22973 = vst [vmem:[#allocation155_spill] sm:$0xff] %v19388_v8  ;;  %v10306_v50 = vrot.slane %v9871_v32, 7  ;;  %v10307_v31 = vrot.slane %v9879_v24, 7  ;;  %v19392_v13 = vsel %vm19318_vm13, %v10722_v3, %v10978_v16  ;;  %v10308_v39 = vrot.slane %v9878_v6, 7  ;;  %v14213_v3 = vld [vmem:[%s14361_s14 + $0x88] sm:$0xff] }
 0x4e7   : > { %22974 = vst [vmem:[#allocation156_spill] sm:$0xff] %v19392_v13  ;;  %v10848_v9 = vrot.slane %v19352_v63, %v22778_v7  ;;  %v19397_v48 = vrot.slane %v10017_v1, %v22608_v20  ;;  %v10592_v23 = vrot.slane %v19379_v4, %v22778_v7  ;;  %v19403_v2 = vrot.slane %v19379_v4, %v18512_v14  ;;  %v23019_v13 = vld [vmem:[#allocation11_spill] sm:$0xff] }
 0x4e8   : > { %v19407_v62 = vrot.slane %v19352_v63, %v18512_v14  ;;  %v9881_v26 = vcombine.high %v14213_v3, %v14213_v3  ;;  %v19412_v16 = vsel %vm19339_vm1, %v10723_v0, %v10979_v53  ;;  %v19414_v12 = vrot.slane %v11274_v19, 2 }
 0x4e9   : > { %22975 = vst [vmem:[#allocation157_spill] sm:$0xff] %v19397_v48  ;;  %22976 = vst [vmem:[#allocation158_spill] sm:$0xff] %v19403_v2  ;;  %v11280_v1 = vrot.slane %v11101_v61, 7  ;;  %v10309_v18 = vrot.slane %v9880_v25, 7  ;;  %v19416_v8 = vrot.slane %v11276_v21, 2  ;;  %vm19418_vm13 = vcmp.gt.f32.partialorder %v9871_v32, %v10306_v50 }
 0x4ea   : > { %22977 = vst [vmem:[#allocation159_spill] sm:$0xff] %v19407_v62  ;;  %22978 = vst [vmem:[#allocation160_spill] sm:$0xff] %v19412_v16  ;;  %vm19422_vm8 = vcmp.gt.f32.partialorder %v9879_v24, %v10307_v31  ;;  %v10024_v43 = vrot.slane %v14212_v54, %v22608_v20  ;;  %v19427_v29 = vrot.slane %v11278_v56, 2  ;;  %vm19429_vm1 = vcmp.gt.f32.partialorder %v9878_v6, %v10308_v39 }
 0x4eb   : > { %22979 = vst [vmem:[#allocation161_spill] sm:$0xff] %v19414_v12  ;;  %22980 = vst [vmem:[#allocation162_spill] sm:$0xff] %v19416_v8  ;;  %v10970_v0 = vrot.slane %v10848_v9, 7  ;;  %v10033_v61 = vcombine.high %v19397_v48, %v19397_v48  ;;  %v10714_v19 = vrot.slane %v10592_v23, 7  ;;  %v10715_v21 = vrot.slane %v19403_v2, 7 }
 0x4ec   : > { %22985 = vst [vmem:[#allocation163_spill] sm:$0xff] %v19427_v29  ;;  %v10971_v36 = vrot.slane %v19407_v62, 7  ;;  %v19438_v28 = vrot.slane %v9881_v26, %v22608_v20  ;;  %vm19440_vm7 = vcmp.gt.f32.partialorder %v9880_v25, %v10309_v18  ;;  %v22989_v54 = vmov 0 }
 0x4ed   : > { %v22990_v54 = vsel %vm19440_vm7, 4294967295, %v22989_v54  ;;  %v11082_v56 = vsel %vm19418_vm13, %v9871_v32, %v10306_v50  ;;  %v11083_v17 = vsel %vm19422_vm8, %v9879_v24, %v10307_v31  ;;  %v10034_v10 = vcombine.high %v14214_v51, %v14214_v51 }
 0x4ee   : > { %22988 = vst [vmem:[#allocation164_spill] sm:$0xff] %v19438_v28  ;;  %22991 = vst [vmem:[#allocation165_spill] sm:$0xff] %v22990_v54  ;;  %v11084_v2 = vsel %vm19429_vm1, %v9878_v6, %v10308_v39  ;;  %v10326_v45 = vrot.slane %v10024_v43, 7  ;;  %v9888_v62 = vrot.slane %v14213_v3, %v22608_v20  ;;  %v9897_v26 = vcombine.high %v19438_v28, %v19438_v28  ;;  %v14220_v54 = vld [vmem:[%s14361_s14 + $0x98] sm:$0xff] }
 0x4ef   : > { %v19454_v58 = vrot.slane %v11280_v1, 2  ;;  %v11019_v32 = vsel %vm19422_vm8, %v10592_v23, %v10848_v9  ;;  %v10329_v50 = vrot.slane %v10033_v61, 7  ;;  %v19461_v24 = vsel %vm19418_vm13, %v10714_v19, %v10970_v0 }
 0x4f0   : > { %22993 = vst [vmem:[#allocation167_spill] sm:$0xff] %v19461_v24  ;;  %v11085_v39 = vsel %vm19440_vm7, %v9880_v25, %v10309_v18  ;;  %v11242_v6 = vrot.slane %v11082_v56, 7  ;;  %v19466_v31 = vrot.slane %v14214_v51, %v22608_v20  ;;  %v19470_v3 = vsel %vm19429_vm1, %v10715_v21, %v10971_v36 }
 0x4f1   : > { %22992 = vst [vmem:[#allocation166_spill] sm:$0xff] %v19454_v58  ;;  %22995 = vst [vmem:[#allocation169_spill] sm:$0xff] %v19470_v3  ;;  %v11244_v1 = vrot.slane %v11083_v17, 7  ;;  %v11246_v60 = vrot.slane %v11084_v2, 7  ;;  %v19473_v63 = vrot.slane %v10034_v10, %v22608_v20  ;;  %v19475_v9 = vrot.slane %v11035_v41, 9 }
 0x4f2   : > { %22994 = vst [vmem:[#allocation168_spill] sm:$0xff] %v19466_v31  ;;  %vm19477_vm13 = vcmp.gt.f32.partialorder %v10024_v43, %v10326_v45  ;;  %v22998_v4 = vmov 0  ;;  %v10310_v18 = vrot.slane %v9888_v62, 7  ;;  %v10313_v25 = vrot.slane %v9897_v26, 7 }
 0x4f3   : > { %22996 = vst [vmem:[#allocation170_spill] sm:$0xff] %v19473_v63  ;;  %22997 = vst [vmem:[#allocation171_spill] sm:$0xff] %v19475_v9  ;;  %v22999_v4 = vsel %vm19477_vm13, 4294967295, %v22998_v4  ;;  %v11248_v23 = vrot.slane %v11085_v39, 7  ;;  %vm19483_vm8 = vcmp.gt.f32.partialorder %v10033_v61, %v10329_v50  ;;  %v23001_v36 = vmov 0 }
 0x4f4   : > { %23000 = vst [vmem:[#allocation172_spill] sm:$0xff] %v22999_v4  ;;  %v23002_v36 = vsel %vm19483_vm8, 4294967295, %v23001_v36  ;;  %v19487_v10 = vrot.slane %v11242_v6, 2  ;;  %v19489_v17 = vrot.slane %v11019_v32, 9  ;;  %vm22230_vm1 = vcmp.gt.f32.partialorder %v19466_v31, %v19414_v12 }
 0x4f5   : > { %23003 = vst [vmem:[#allocation173_spill] sm:$0xff] %v23002_v36  ;;  %v19494_v2 = vrot.slane %v11244_v1, 2  ;;  %v19496_v0 = vrot.slane %v11246_v60, 2  ;;  %v11102_v19 = vsel %vm19477_vm13, %v10024_v43, %v10326_v45  ;;  %vm22237_vm6 = vcmp.gt.f32.partialorder %v19473_v63, %v19427_v29  ;;  %v14217_v36 = vld [vmem:[%s14361_s14 + $0xe0] sm:$0xff] }
 0x4f6   : > { %23004 = vst [vmem:[#allocation174_spill] sm:$0xff] %v19487_v10  ;;  %23005 = vst [vmem:[#allocation175_spill] sm:$0xff] %v19489_v17  ;;  %v11105_v21 = vsel %vm19483_vm8, %v10033_v61, %v10329_v50  ;;  %vm19504_vm7 = vcmp.gt.f32.partialorder %v9888_v62, %v10310_v18  ;;  %v23008_v56 = vmov 0  ;;  %vm19508_vm14 = vcmp.gt.f32.partialorder %v9897_v26, %v10313_v25  ;;  %v14215_v50 = vld [vmem:[%s14361_s14 + $0xa0] sm:$0xff] }
 0x4f7   : > { %23006 = vst [vmem:[#allocation176_spill] sm:$0xff] %v19494_v2  ;;  %23007 = vst [vmem:[#allocation177_spill] sm:$0xff] %v19496_v0  ;;  %v23009_v56 = vsel %vm19504_vm7, 4294967295, %v23008_v56  ;;  %v23011_v32 = vmov 0  ;;  %v19514_v60 = vcombine.high %v19466_v31, %v19466_v31  ;;  %v19516_v39 = vrot.slane %v11248_v23, 2  ;;  %v14216_v23 = vld [vmem:[%s14361_s14 + $0x90] sm:$0xff] }
 0x4f8   : > { %23010 = vst [vmem:[#allocation178_spill] sm:$0xff] %v23009_v56  ;;  %v23012_v32 = vsel %vm19508_vm14, 4294967295, %v23011_v32  ;;  %v19518_v45 = vcombine.high %v10024_v43, %v10024_v43  ;;  %v11938_v61 = vsel %vm22230_vm1, %v19466_v31, %v19414_v12  ;;  %v9932_v6 = vcombine.high %v14215_v50, %v14215_v50 }
 0x4f9   : > { %23013 = vst [vmem:[#allocation179_spill] sm:$0xff] %v23012_v32  ;;  %23014 = vst [vmem:[#allocation180_spill] sm:$0xff] %v19514_v60  ;;  %v19527_v51 = vcombine.high %v9888_v62, %v9888_v62  ;;  %v11940_v43 = vsel %vm22237_vm6, %v19473_v63, %v19427_v29  ;;  %v9898_v41 = vcombine.high %v14216_v23, %v14216_v23  ;;  %v11282_v53 = vrot.slane %v11102_v19, 7 }
 0x4fa   : > { %23015 = vst [vmem:[#allocation181_spill] sm:$0xff] %v19516_v39  ;;  %23016 = vst [vmem:[#allocation182_spill] sm:$0xff] %v19518_v45  ;;  %v11288_v16 = vrot.slane %v11105_v21, 7  ;;  %v11086_v9 = vsel %vm19504_vm7, %v9888_v62, %v10310_v18  ;;  %v11089_v50 = vsel %vm19508_vm14, %v9897_v26, %v10313_v25  ;;  %vm22239_vm1 = vcmp.gt.f32.partialorder %v19514_v60, %v19416_v8  ;;  %v14218_v18 = vld [vmem:[%s14361_s14 + $0xe8] sm:$0xff] }
 0x4fb   : > { %23017 = vst [vmem:[#allocation183_spill] sm:$0xff] %v19527_v51  ;;  %v12066_v1 = vrot.slane %v11938_v61, 7  ;;  %v19542_v12 = vrot.slane %v14216_v23, %v22608_v20  ;;  %v9947_v29 = vcombine.high %v23019_v13, %v23019_v13  ;;  %v12068_v19 = vrot.slane %v11940_v43, 7 }
 0x4fc   : > { %v9946_v21 = vrot.slane %v9932_v6, %v22608_v20  ;;  %v10068_v62 = vcombine.high %v14217_v36, %v14217_v36  ;;  %v11250_v25 = vrot.slane %v11086_v9, 7  ;;  %v19552_v61 = vrot.slane %v9898_v41, %v22608_v20 }
 0x4fd   : > { %23018 = vst [vmem:[#allocation184_spill] sm:$0xff] %v19542_v12  ;;  %v19554_v23 = vrot.slane %v11282_v53, 2  ;;  %v19556_v3 = vrot.slane %v11288_v16, 2  ;;  %v11256_v13 = vrot.slane %v11089_v50, 7  ;;  %v19563_v36 = vsel %vm22239_vm1, %v19514_v60, %v19416_v8 }
 0x4fe   : > { %23020 = vst [vmem:[#allocation11_spill] sm:$0xff] %v19552_v61  ;;  %23023 = vst [vmem:[#allocation187_spill] sm:$0xff] %v19563_v36  ;;  %vm19566_vm6 = vcmp.gt.f32.partialorder %v19466_v31, %v12066_v1  ;;  %v23024_v6 = vmov 0  ;;  %v19572_v9 = vcombine.high %v19542_v12, %v19542_v12  ;;  %v10315_v16 = vrot.slane %v9947_v29, 7 }
 0x4ff   : > { %23021 = vst [vmem:[#allocation185_spill] sm:$0xff] %v19554_v23  ;;  %23022 = vst [vmem:[#allocation186_spill] sm:$0xff] %v19556_v3  ;;  %v23025_v6 = vsel %vm19566_vm6, 4294967295, %v23024_v6  ;;  %v19578_v53 = vcombine.high %v19473_v63, %v19473_v63  ;;  %vm19581_vm1 = vcmp.gt.f32.partialorder %v19473_v63, %v12068_v19  ;;  %v23029_v41 = vmov 0 }
 0x500   : > { %23026 = vst [vmem:[#allocation188_spill] sm:$0xff] %v23025_v6  ;;  %23027 = vst [vmem:[#allocation189_spill] sm:$0xff] %v19572_v9  ;;  %v23030_v41 = vsel %vm19581_vm1, 4294967295, %v23029_v41  ;;  %v10316_v43 = vrot.slane %v9946_v21, 7  ;;  %v19586_v50 = vrot.slane %v10068_v62, %v22608_v20  ;;  %v19588_v4 = vrot.slane %v11250_v25, 2 }
 0x501   : > { %23028 = vst [vmem:[#allocation190_spill] sm:$0xff] %v19578_v53  ;;  %23031 = vst [vmem:[#allocation191_spill] sm:$0xff] %v23030_v41  ;;  %v19595_v8 = vrot.slane %v14218_v18, %v22608_v20  ;;  %v19597_v17 = vrot.slane %v11256_v13, 2  ;;  %v19602_v24 = vsel %vm19566_vm6, %v19466_v31, %v12066_v1  ;;  %vm23035_vm8 = vcmp.gt.f32.partialorder %v19542_v12, %v19487_v10  ;;  %v23039_v1 = vld [vmem:[#allocation26_spill] sm:$0xff] }
 0x502   : > { %23032 = vst [vmem:[#allocation192_spill] sm:$0xff] %v19588_v4  ;;  %23034 = vst [vmem:[#allocation194_spill] sm:$0xff] %v19602_v24  ;;  %v11922_v62 = vsel %vm23035_vm8, %v19542_v12, %v19487_v10  ;;  %v9948_v25 = vcombine.high %v9946_v21, %v9946_v21  ;;  %v19612_v26 = vsel %vm19581_vm1, %v19473_v63, %v12068_v19  ;;  %v14219_v10 = vld [vmem:[%s14361_s14 + $0xd8] sm:$0xff]  ;;  %v10332_v63 = vrot.slane %v19586_v50, 7 }
 0x503   : > { %23033 = vst [vmem:[#allocation193_spill] sm:$0xff] %v19597_v17  ;;  %23036 = vst [vmem:[#allocation195_spill] sm:$0xff] %v19612_v26  ;;  %vm22265_vm13 = vcmp.gt.f32.partialorder %v19572_v9, %v19494_v2  ;;  %vm19616_vm7 = vcmp.gt.f32.partialorder %v9947_v29, %v10315_v16  ;;  %v10083_v6 = vcombine.high %v23039_v1, %v23039_v1  ;;  %v12050_v32 = vrot.slane %v11922_v62, 7 }
 0x504   : > { %vm23040_vm8 = vcmp.gt.f32.partialorder %v19552_v61, %v19496_v0  ;;  %v10051_v41 = vcombine.high %v14219_v10, %v14219_v10  ;;  %vm19628_vm1 = vcmp.gt.f32.partialorder %v9946_v21, %v10316_v43  ;;  %v9915_v1 = vcombine.high %v14220_v54, %v14220_v54 }
 0x505   : > { %v11924_v31 = vsel %vm23040_vm8, %v19552_v61, %v19496_v0  ;;  %v10334_v26 = vrot.slane %v19595_v8, 7  ;;  %v19642_v0 = vsel %vm22265_vm13, %v19572_v9, %v19494_v2  ;;  %v19645_v60 = vrot.slane %v14220_v54, %v22608_v20  ;;  %v23047_v54 = vld [vmem:[#allocation12_spill] sm:$0xff] }
 0x506   : > { %23043 = vst [vmem:[#allocation26_spill] sm:$0xff] %v19642_v0  ;;  %v10317_v36 = vrot.slane %v9948_v25, 7  ;;  %v11091_v23 = vsel %vm19616_vm7, %v9947_v29, %v10315_v16  ;;  %v12052_v56 = vrot.slane %v11924_v31, 7  ;;  %v11092_v62 = vsel %vm19628_vm1, %v9946_v21, %v10316_v43  ;;  %v23054_v21 = vld [vmem:[#allocation13_spill] sm:$0xff] }
 0x507   : > { %23044 = vst [vmem:[#allocation196_spill] sm:$0xff] %v19645_v60  ;;  %v10331_v24 = vrot.slane %v10083_v6, 7  ;;  %v10085_v53 = vcombine.high %v14218_v18, %v14218_v18  ;;  %v19653_v58 = vcombine.high %v19552_v61, %v19552_v61  ;;  %v19656_v2 = vrot.slane %v10051_v41, %v22608_v20  ;;  %v14221_v60 = vld [vmem:[%s14361_s14 + $0xf0] sm:$0xff] }
 0x508   : > { %v19660_v48 = vrot.slane %v23047_v54, %v18512_v14  ;;  %vm19663_vm8 = vcmp.gt.f32.partialorder %v19586_v50, %v10332_v63  ;;  %vm19668_vm13 = vcmp.gt.f32.partialorder %v19542_v12, %v12050_v32  ;;  %v23051_v31 = vmov 0 }
 0x509   : > { %23045 = vst [vmem:[#allocation197_spill] sm:$0xff] %v19653_v58  ;;  %23046 = vst [vmem:[#allocation198_spill] sm:$0xff] %v19656_v2  ;;  %v23052_v31 = vsel %vm19668_vm13, 4294967295, %v23051_v31  ;;  %v19674_v18 = vrot.slane %v23054_v21, %v18512_v14  ;;  %v11260_v16 = vrot.slane %v11091_v23, 7  ;;  %vm19677_vm6 = vcmp.gt.f32.partialorder %v19595_v8, %v10334_v26  ;;  %v23069_v58 = vld [vmem:[#allocation14_spill] sm:$0xff] }
 0x50a   : > { %23048 = vst [vmem:[#allocation199_spill] sm:$0xff] %v19660_v48  ;;  %23053 = vst [vmem:[#allocation200_spill] sm:$0xff] %v23052_v31  ;;  %v19683_v54 = vrot.slane %v9915_v1, %v22608_v20  ;;  %vm19685_vm14 = vcmp.gt.f32.partialorder %v9948_v25, %v10317_v36  ;;  %v23059_v45 = vmov 0  ;;  %v11262_v17 = vrot.slane %v11092_v62, 7 }
 0x50b   : > { %23055 = vst [vmem:[#allocation201_spill] sm:$0xff] %v19674_v18  ;;  %v23060_v45 = vsel %vm19685_vm14, 4294967295, %v23059_v45  ;;  %vm19690_vm2 = vcmp.gt.f32.partialorder %v19552_v61, %v12052_v56  ;;  %v23062_v21 = vmov 0  ;;  %vm19694_vm0 = vcmp.gt.f32.partialorder %v10083_v6, %v10331_v24 }
 0x50c   : > { %23058 = vst [vmem:[#allocation202_spill] sm:$0xff] %v19683_v54  ;;  %23061 = vst [vmem:[#allocation203_spill] sm:$0xff] %v23060_v45  ;;  %v23063_v21 = vsel %vm19690_vm2, 4294967295, %v23062_v21  ;;  %v11108_v1 = vsel %vm19663_vm8, %v19586_v50, %v10332_v63  ;;  %v19702_v43 = vrot.slane %v10085_v53, %v22608_v20  ;;  %v19707_v62 = vsel %vm19668_vm13, %v19542_v12, %v12050_v32  ;;  %v23070_v53 = vld [vmem:[#allocation15_spill] sm:$0xff] }
 0x50d   : > { %23064 = vst [vmem:[#allocation204_spill] sm:$0xff] %v23063_v21  ;;  %23067 = vst [vmem:[#allocation205_spill] sm:$0xff] %v19707_v62  ;;  %v19711_v9 = vcombine.high %v19656_v2, %v19656_v2  ;;  %v10975_v0 = vrot.slane %v19660_v48, 7  ;;  %v11110_v4 = vsel %vm19677_vm6, %v19595_v8, %v10334_v26  ;;  %v10719_v63 = vrot.slane %v19674_v18, 7 }
 0x50e   : > { %v11027_v39 = vsel %vm19616_vm7, %v23070_v53, %v23069_v58  ;;  %v11093_v32 = vsel %vm19685_vm14, %v9948_v25, %v10317_v36  ;;  %v19724_v31 = vrot.slane %v11260_v16, 2  ;;  %v19726_v12 = vrot.slane %v11262_v17, 2 }
 0x50f   : > { %23068 = vst [vmem:[#allocation206_spill] sm:$0xff] %v19711_v9  ;;  %v11107_v48 = vsel %vm19694_vm0, %v10083_v6, %v10331_v24  ;;  %v11294_v2 = vrot.slane %v11108_v1, 7  ;;  %v10102_v26 = vcombine.high %v14221_v60, %v14221_v60  ;;  %v19734_v18 = vsel %vm19690_vm2, %v19552_v61, %v12052_v56  ;;  %v23091_v1 = vld [vmem:[#allocation31_spill] sm:$0xff] }
 0x510   : > { %23071 = vst [vmem:[#allocation14_spill] sm:$0xff] %v19724_v31  ;;  %23072 = vst [vmem:[#allocation15_spill] sm:$0xff] %v19726_v12  ;;  %v19738_v58 = vcombine.high %v19683_v54, %v19683_v54  ;;  %v10336_v36 = vrot.slane %v19702_v43, 7  ;;  %v11298_v25 = vrot.slane %v11110_v4, 7  ;;  %v19744_v24 = vrot.slane %v14219_v10, %v22608_v20 }
 0x511   : > { %23073 = vst [vmem:[#allocation207_spill] sm:$0xff] %v19734_v18  ;;  %v11264_v60 = vrot.slane %v11093_v32, 7  ;;  %v10084_v6 = vcombine.high %v19586_v50, %v19586_v50  ;;  %v19750_v56 = vsel %vm19628_vm1, %v10719_v63, %v10975_v0  ;;  %v19754_v13 = vrot.slane %v11027_v39, 9  ;;  %v14222_v39 = vld [vmem:[%s14361_s14 + $0xf8] sm:$0xff]  ;;  %v23086_v63 = vld [vmem:[#allocation18_spill] sm:$0xff]  ;;  %s19920_s14 = sld [smem:[#allocation2 + $0x2]] }
 0x512   : > { %23074 = vst [vmem:[#allocation208_spill] sm:$0xff] %v19738_v58  ;;  %23075 = vst [vmem:[#allocation209_spill] sm:$0xff] %v19744_v24  ;;  %v11292_v4 = vrot.slane %v11107_v48, 7  ;;  %v19758_v16 = vrot.slane %v11294_v2, 2  ;;  %v19761_v10 = vrot.slane %v10102_v26, %v22608_v20  ;;  %vm22293_vm2 = vcmp.gt.f32.partialorder %v19711_v9, %v19556_v3  ;;  %v23089_v26 = vld [vmem:[#allocation33_spill] sm:$0xff] }
 0x513   : > { %23076 = vst [vmem:[#allocation210_spill] sm:$0xff] %v19750_v56  ;;  %23077 = vst [vmem:[#allocation211_spill] sm:$0xff] %v19754_v13  ;;  %v10100_v0 = vcombine.high %v19595_v8, %v19595_v8  ;;  %vm19768_vm1 = vcmp.gt.f32.partialorder %v19702_v43, %v10336_v36  ;;  %v23080_v50 = vmov 0  ;;  %v19772_v48 = vrot.slane %v11298_v25, 2  ;;  %v23097_v56 = vld [vmem:[#allocation27_spill] sm:$0xff] }
 0x514   : > { %23078 = vst [vmem:[#allocation212_spill] sm:$0xff] %v19758_v16  ;;  %23079 = vst [vmem:[#allocation213_spill] sm:$0xff] %v19761_v10  ;;  %v23081_v50 = vsel %vm19768_vm1, 4294967295, %v23080_v50  ;;  %v19776_v2 = vrot.slane %v14222_v39, %v22608_v20  ;;  %v19778_v19 = vrot.slane %v11264_v60, 2  ;;  %vm23087_vm14 = vcmp.gt.f32.partialorder %v22934_v47, %v23086_v63 }
 0x515   : > { %23082 = vst [vmem:[#allocation214_spill] sm:$0xff] %v23081_v50  ;;  %23083 = vst [vmem:[#allocation215_spill] sm:$0xff] %v19772_v48  ;;  %v11930_v8 = vsel %vm23087_vm14, %v22934_v47, %v23086_v63  ;;  %v10333_v53 = vrot.slane %v10084_v6, 7  ;;  %v19786_v32 = vrot.slane %v11292_v4, 2  ;;  %v19790_v25 = vcombine.high %v23089_v26, %v23089_v26 }
 0x516   : > { %23084 = vst [vmem:[#allocation216_spill] sm:$0xff] %v19776_v2  ;;  %23085 = vst [vmem:[#allocation217_spill] sm:$0xff] %v19778_v19  ;;  %v11945_v60 = vsel %vm22293_vm2, %v19711_v9, %v19556_v3  ;;  %vm23092_vm7 = vcmp.gt.f32.partialorder %v23089_v26, %v23091_v1  ;;  %vm23093_vm14 = vcmp.gt.f32.partialorder %v19243_v46, %v19724_v31  ;;  %v23099_v45 = vmov 0 }
 0x517   : > { %23088 = vst [vmem:[#allocation18_spill] sm:$0xff] %v19786_v32  ;;  %23090 = vst [vmem:[#allocation33_spill] sm:$0xff] %v19790_v25  ;;  %v11946_v17 = vsel %vm23092_vm7, %v23089_v26, %v23091_v1  ;;  %v19807_v4 = vsel %vm23093_vm14, %v19243_v46, %v19724_v31  ;;  %vm23095_vm13 = vcmp.gt.f32.partialorder %v19227_v15, %v19726_v12  ;;  %v12058_v1 = vrot.slane %v11930_v8, 7 }
 0x518   : > { %23094 = vst [vmem:[#allocation31_spill] sm:$0xff] %v19807_v4  ;;  %v19814_v63 = vsel %vm23095_vm13, %v19227_v15, %v19726_v12  ;;  %v11112_v3 = vsel %vm19768_vm1, %v19702_v43, %v10336_v36  ;;  %vm22303_vm7 = vcmp.gt.f32.partialorder %v19761_v10, %v19758_v16  ;;  %v19823_v13 = vrot.slane %v23097_v56, %v18512_v14  ;;  %v23102_v12 = vld [vmem:[#allocation28_spill] sm:$0xff] }
 0x519   : > { %23096 = vst [vmem:[#allocation218_spill] sm:$0xff] %v19814_v63  ;;  %v10335_v31 = vrot.slane %v10100_v0, 7  ;;  %vm22308_vm14 = vcmp.gt.f32.partialorder %v19776_v2, %v19772_v48  ;;  %vm19827_vm2 = vcmp.gt.f32.partialorder %v10084_v6, %v10333_v53  ;;  %v19833_v50 = vrot.slane %v23102_v12, %v18512_v14  ;;  %v23210_v63 = vld [vmem:[#allocation69_spill] sm:$0xff] }
 0x51a   : > { %23098 = vst [vmem:[#allocation219_spill] sm:$0xff] %v19823_v13  ;;  %v23100_v45 = vsel %vm19827_vm2, 4294967295, %v23099_v45  ;;  %v12073_v36 = vrot.slane %v11945_v60, 7  ;;  %v12074_v21 = vrot.slane %v11946_v17, 7  ;;  %v11302_v61 = vrot.slane %v11112_v3, 7 }
 0x51b   : > { %23101 = vst [vmem:[#allocation220_spill] sm:$0xff] %v23100_v45  ;;  %23103 = vst [vmem:[#allocation221_spill] sm:$0xff] %v19833_v50  ;;  %v11948_v8 = vsel %vm22303_vm7, %v19761_v10, %v19758_v16  ;;  %v10119_v24 = vcombine.high %v14222_v39, %v14222_v39  ;;  %v19845_v15 = vrot.slane %v23102_v12, %v18458_v34  ;;  %v23106_v60 = vmov 0 }
 0x51c   : > { %v19849_v17 = vrot.slane %v23097_v56, %v18458_v34  ;;  %v11950_v3 = vsel %vm22308_vm14, %v19776_v2, %v19772_v48  ;;  %vm19857_vm13 = vcmp.gt.f32.partialorder %v22934_v47, %v12058_v1  ;;  %v10983_v39 = vrot.slane %v19823_v13, 7 }
 0x51d   : > { %23104 = vst [vmem:[#allocation222_spill] sm:$0xff] %v19845_v15  ;;  %v23107_v60 = vsel %vm19857_vm13, 4294967295, %v23106_v60  ;;  %v11109_v58 = vsel %vm19827_vm2, %v10084_v6, %v10333_v53  ;;  %vm19864_vm7 = vcmp.gt.f32.partialorder %v10100_v0, %v10335_v31  ;;  %v23109_v16 = vmov 0 }
 0x51e   : > { %23105 = vst [vmem:[#allocation223_spill] sm:$0xff] %v19849_v17  ;;  %23108 = vst [vmem:[#allocation224_spill] sm:$0xff] %v23107_v60  ;;  %v23110_v16 = vsel %vm19864_vm7, 4294967295, %v23109_v16  ;;  %vm23112_vm1 = vcmp.gt.f32.partialorder %v19790_v25, %v19786_v32  ;;  %v12076_v56 = vrot.slane %v11948_v8, 7  ;;  %vm19874_vm14 = vcmp.gt.f32.partialorder %v19711_v9, %v12073_v36 }
 0x51f   : > { %23111 = vst [vmem:[#allocation225_spill] sm:$0xff] %v23110_v16  ;;  %v11947_v48 = vsel %vm23112_vm1, %v19790_v25, %v19786_v32  ;;  %v23113_v12 = vmov 0  ;;  %vm19879_vm12 = vcmp.gt.f32.partialorder %v23089_v26, %v12074_v21  ;;  %v23116_v45 = vmov 0 }
 0x520   : > { %v23114_v12 = vsel %vm19874_vm14, 4294967295, %v23113_v12  ;;  %v23117_v45 = vsel %vm19879_vm12, 4294967295, %v23116_v45  ;;  %v23119_v6 = vrot.slane %v18746_v11, 7  ;;  %v23120_v53 = vmov 0 }
 0x521   : > { %23115 = vst [vmem:[#allocation226_spill] sm:$0xff] %v23114_v12  ;;  %23118 = vst [vmem:[#allocation227_spill] sm:$0xff] %v23117_v45  ;;  %v23123_v32 = vrot.slane %v18712_v55, 7  ;;  %v23124_v8 = vmov 0  ;;  %v10727_v13 = vrot.slane %v19833_v50, 7  ;;  %v19898_v46 = vrot.slane %v11302_v61, 2 }
 0x522   : > { %vm19886_vm2 = vcmp.gt.f32.partialorder %v18746_v11, %v23119_v6  ;;  %v19901_v4 = vrot.slane %v10119_v24, %v22608_v20  ;;  %v12078_v19 = vrot.slane %v11950_v3, 7  ;;  %v19906_v6 = vsel %vm19857_vm13, %v22934_v47, %v12058_v1  ;;  %v23130_v1 = vld [vmem:[#allocation29_spill] sm:$0xff]  ;;  %v23131_v3 = vld [vmem:[#allocation30_spill] sm:$0xff] }
 0x523   : > { %v23121_v53 = vsel %vm19886_vm2, 4294967295, %v23120_v53  ;;  %vm19893_vm1 = vcmp.gt.f32.partialorder %v18712_v55, %v23123_v32  ;;  %23127 = vst [vmem:[#allocation230_spill] sm:$0xff] %v19898_v46  ;;  %23129 = vst [vmem:[#allocation232_spill] sm:$0xff] %v19906_v6  ;;  %v10728_v62 = vrot.slane %v19845_v15, 7  ;;  %v10984_v32 = vrot.slane %v19849_v17, 7  ;;  %v23166_v45 = vld [vmem:[#allocation46_spill] sm:$0xff] }
 0x524   : > { %23122 = vst [vmem:[#allocation228_spill] sm:$0xff] %v23121_v53  ;;  %v23125_v8 = vsel %vm19893_vm1, 4294967295, %v23124_v8  ;;  %23128 = vst [vmem:[#allocation231_spill] sm:$0xff] %v19901_v4  ;;  %v11111_v18 = vsel %vm19864_vm7, %v10100_v0, %v10335_v31  ;;  %v11296_v61 = vrot.slane %v11109_v58, 7  ;;  %v12075_v50 = vrot.slane %v11947_v48, 7  ;;  %v23177_v12 = vld [vmem:[#allocation21_spill] sm:$0xff] }
 0x525   : > { %23126 = vst [vmem:[#allocation229_spill] sm:$0xff] %v23125_v8  ;;  %v12657_v20 = vsel %vm19874_vm14, %v19711_v9, %v12073_v36  ;;  %v12658_v47 = vsel %vm19879_vm12, %v23089_v26, %v12074_v21  ;;  %v11043_v31 = vsel %vm19694_vm0, %v23131_v3, %v23130_v1  ;;  %v19929_v58 = vcombine.high %v19702_v43, %v19702_v43 }
 0x526   : > { %vm19932_vm4 = vcmp.gt.f32.partialorder %v19761_v10, %v12076_v56  ;;  %v23133_v0 = vmov 0  ;;  %v19938_v21 = vsel %vm19663_vm8, %v10727_v13, %v10983_v39  ;;  %v11300_v48 = vrot.slane %v11111_v18, 7 }
 0x527   : > { %23132 = vst [vmem:[#allocation29_spill] sm:$0xff] %v19929_v58  ;;  %v23134_v0 = vsel %vm19932_vm4, 4294967295, %v23133_v0  ;;  %23136 = vst [vmem:[#allocation233_spill] sm:$0xff] %v19938_v21  ;;  %vm22325_vm12 = vcmp.gt.f32.partialorder %v19901_v4, %v19898_v46  ;;  %vm19943_vm7 = vcmp.gt.f32.partialorder %v19776_v2, %v12078_v19  ;;  %v23137_v23 = vmov 0  ;;  %v23171_v21 = vld [vmem:[#allocation76_spill] sm:$0xff] }
 0x528   : > { %23135 = vst [vmem:[#allocation30_spill] sm:$0xff] %v23134_v0  ;;  %v23138_v23 = vsel %vm19943_vm7, 4294967295, %v23137_v23  ;;  %v19951_v26 = vsel %vm19677_vm6, %v10728_v62, %v10984_v32  ;;  %v12953_v29 = vrot.slane %v12657_v20, %v15742_v42  ;;  %v12957_v13 = vrot.slane %v12658_v47, %v15742_v42  ;;  %v23182_v58 = vld [vmem:[#allocation96_spill] sm:$0xff] }
 0x529   : > { %23139 = vst [vmem:[#allocation234_spill] sm:$0xff] %v23138_v23  ;;  %23140 = vst [vmem:[#allocation235_spill] sm:$0xff] %v19951_v26  ;;  %v19955_v18 = vrot.slane %v11296_v61, 2  ;;  %v19957_v36 = vrot.slane %v11043_v31, 9  ;;  %vm19960_vm0 = vcmp.gt.f32.partialorder %v19790_v25, %v12075_v50  ;;  %v23143_v39 = vmov 0  ;;  %v23169_v26 = vld [vmem:[#allocation53_spill] sm:$0xff] }
 0x52a   : > { %v23144_v39 = vsel %vm19960_vm0, 4294967295, %v23143_v39  ;;  %v19967_v1 = vsel %vm19932_vm4, %v19761_v10, %v12076_v56  ;;  %v19976_v32 = vsel %vm22325_vm12, %v19901_v4, %v19898_v46  ;;  %v19981_v61 = vsel %vm19943_vm7, %v19776_v2, %v12078_v19 }
 0x52b   : > { %23141 = vst [vmem:[#allocation236_spill] sm:$0xff] %v19955_v18  ;;  %23142 = vst [vmem:[#allocation237_spill] sm:$0xff] %v19957_v36  ;;  %v19983_v20 = vrot.slane %v11300_v48, 2  ;;  %v19988_v47 = vcombine.high %v19761_v10, %v19761_v10  ;;  %v23152_v41 = vrot.slane %v18680_v59, 7  ;;  %v20001_v19 = vsel %vm19960_vm0, %v19790_v25, %v12075_v50  ;;  %v23170_v10 = vld [vmem:[#allocation64_spill] sm:$0xff]  ;;  %v23172_v25 = vld [vmem:[#allocation25_spill] sm:$0xff] }
 0x52c   : > { %23145 = vst [vmem:[#allocation238_spill] sm:$0xff] %v23144_v39  ;;  %23146 = vst [vmem:[#allocation239_spill] sm:$0xff] %v19967_v1  ;;  %vm23156_vm8 = vcmask 1041409   ;;  %v20010_v31 = vcombine.high %v19776_v2, %v19776_v2  ;;  %v20021_v50 = vcombine.high %v19901_v4, %v19901_v4  ;;  %v20031_v24 = vcombine.high %v18764_v33, %v18764_v33  ;;  %v23168_v2 = vld [vmem:[#allocation60_spill] sm:$0xff] }
 0x52d   : > { %23147 = vst [vmem:[#allocation240_spill] sm:$0xff] %v19976_v32  ;;  %23148 = vst [vmem:[#allocation241_spill] sm:$0xff] %v19981_v61  ;;  %vm19994_vm6 = vcmp.gt.f32.partialorder %v18489_v44, %v23152_v41  ;;  %v20006_v56 = vsel %vm23156_vm8, %v12957_v13, %v12953_v29  ;;  %v23159_v41 = vrot.slane %v18598_v27, 7  ;;  %v20027_v13 = vstv %s19920_s14  ;;  %v23167_v29 = vld [vmem:[#allocation57_spill] sm:$0xff] }
 0x52e   : > { %23149 = vst [vmem:[#allocation242_spill] sm:$0xff] %v19983_v20  ;;  %23150 = vst [vmem:[#allocation243_spill] sm:$0xff] %v19988_v47  ;;  %v23165_v0 = vrot.slane %v18712_v55, 7  ;;  %vm22353_vm8 = vcmp.gt.f32.partialorder %v23167_v29, %v23166_v45  ;;  %vm22343_vm7 = vcmp.gt.f32.partialorder %v23169_v26, %v23168_v2  ;;  %vm22347_vm4 = vcmp.gt.f32.partialorder %v23171_v21, %v23170_v10  ;;  %v23203_v47 = vld [vmem:[#allocation61_spill] sm:$0xff] }
 0x52f   : > { %23155 = vst [vmem:[#allocation244_spill] sm:$0xff] %v20001_v19  ;;  %23157 = vst [vmem:[#allocation245_spill] sm:$0xff] %v20006_v56  ;;  %vm20015_vm12 = vcmp.gt.f32.partialorder %v18524_v57, %v23159_v41  ;;  %v23164_v41 = vrot.slane %v18746_v11, 7  ;;  %vm22352_vm0 = vcmp.gt.f32.partialorder %v18764_v33, %v23172_v25  ;;  %vm23173_vm14 = vcmp.gt.f32.partialorder %v18551_v38, %v18640_v40  ;;  %v23194_v56 = vld [vmem:[#allocation90_spill] sm:$0xff] }
 0x530   : > { %23158 = vst [vmem:[#allocation246_spill] sm:$0xff] %v20010_v31  ;;  %23162 = vst [vmem:[#allocation247_spill] sm:$0xff] %v20021_v50  ;;  %v11064_v48 = vsel %vm19893_vm1, %v18712_v55, %v23165_v0  ;;  %v11893_v55 = vsel %vm23173_vm14, %v18551_v38, %v18640_v40  ;;  %v11896_v0 = vsel %vm22343_vm7, %v23169_v26, %v23168_v2  ;;  %v23178_v9 = vrot.slane %v23177_v12, 7  ;;  %v23179_v50 = vld [vmem:[#allocation8_spill] sm:$0xff] }
 0x531   : > { %23163 = vst [vmem:[#allocation248_spill] sm:$0xff] %v20027_v13  ;;  %v11063_v23 = vsel %vm19886_vm2, %v18746_v11, %v23164_v41  ;;  %v11206_v46 = vrot.slane %v11064_v48, 7  ;;  %v11895_v11 = vsel %vm22353_vm8, %v23167_v29, %v23166_v45  ;;  %v11901_v41 = vsel %vm22347_vm4, %v23171_v21, %v23170_v10 }
 0x532   : > { %v11204_v39 = vrot.slane %v11063_v23, 7  ;;  %v11902_v3 = vsel %vm22352_vm0, %v18764_v33, %v23172_v25  ;;  %v12021_v36 = vrot.slane %v11893_v55, 7  ;;  %v12023_v16 = vrot.slane %v11895_v11, 7  ;;  %v23187_v11 = vld [vmem:[#allocation50_spill] sm:$0xff] }
 0x533   : > { %v20068_v48 = vrot.slane %v11206_v46, 2  ;;  %v12024_v15 = vrot.slane %v11896_v0, 7  ;;  %v12029_v17 = vrot.slane %v11901_v41, 7  ;;  %v23176_v46 = vld [vmem:[#allocation75_spill] sm:$0xff]  ;;  %vm20087_vm4 = vcmp.gt.f32.partialorder %v23179_v50, %v23178_v9  ;;  %v23189_v41 = vld [vmem:[#allocation54_spill] sm:$0xff] }
 0x534   : > { %v20066_v23 = vrot.slane %v11204_v39, 2  ;;  %v12030_v39 = vrot.slane %v11902_v3, 7  ;;  %v23183_v61 = vrot.slane %v23182_v58, 7  ;;  %v23184_v55 = vmov 0 }
 0x535   : > { %23175 = vst [vmem:[#allocation57_spill] sm:$0xff] %v20068_v48  ;;  %vm22362_vm7 = vcmp.gt.f32.partialorder %v23176_v46, %v20068_v48  ;;  %v23188_v0 = vrot.slane %v23187_v11, 7  ;;  %vm20116_vm13 = vcmp.gt.f32.partialorder %v18551_v38, %v12021_v36  ;;  %v23195_v19 = vrot.slane %v23194_v56, 7 }
 0x536   : > { %23174 = vst [vmem:[#allocation46_spill] sm:$0xff] %v20066_v23  ;;  %vm22356_vm14 = vcmp.gt.f32.partialorder %v20031_v24, %v20066_v23  ;;  %vm20094_vm0 = vcmp.gt.f32.partialorder %v23182_v58, %v23183_v61  ;;  %v11904_v9 = vsel %vm22362_vm7, %v23176_v46, %v20068_v48  ;;  %v23196_v4 = vmov 0 }
 0x537   : > { %v23185_v55 = vsel %vm20094_vm0, 4294967295, %v23184_v55  ;;  %v11903_v3 = vsel %vm22356_vm14, %v20031_v24, %v20066_v23  ;;  %vm20111_vm8 = vcmp.gt.f32.partialorder %v23189_v41, %v23188_v0  ;;  %vm20123_vm14 = vcmp.gt.f32.partialorder %v23194_v56, %v23195_v19  ;;  %v23205_v19 = vld [vmem:[#allocation36_spill] sm:$0xff] }
 0x538   : > { %23186 = vst [vmem:[#allocation60_spill] sm:$0xff] %v23185_v55  ;;  %v23197_v4 = vsel %vm20123_vm14, 4294967295, %v23196_v4  ;;  %v12031_v32 = vrot.slane %v11903_v3, 7  ;;  %v12032_v31 = vrot.slane %v11904_v9, 7  ;;  %vm20128_vm7 = vcmp.gt.f32.partialorder %v23167_v29, %v12023_v16  ;;  %v23208_v3 = vld [vmem:[#allocation71_spill] sm:$0xff] }
 0x539   : > { %23198 = vst [vmem:[#allocation53_spill] sm:$0xff] %v23197_v4  ;;  %vm20133_vm10 = vcmp.gt.f32.partialorder %v23169_v26, %v12024_v15  ;;  %v23204_v18 = vrot.slane %v23203_v47, 7  ;;  %v23206_v6 = vmov 0  ;;  %v23209_v9 = vrot.slane %v23208_v3, 7 }
 0x53a   : > { %v23211_v13 = vmov 0  ;;  %vm20154_vm11 = vcmp.gt.f32.partialorder %v23171_v21, %v12029_v17  ;;  %v23214_v54 = vmov 0  ;;  %vm20159_vm5 = vcmp.gt.f32.partialorder %v18764_v33, %v12030_v39 }
 0x53b   : > { %vm20142_vm1 = vcmp.gt.f32.partialorder %v23205_v19, %v23204_v18  ;;  %vm20149_vm2 = vcmp.gt.f32.partialorder %v23210_v63, %v23209_v9  ;;  %v23215_v54 = vsel %vm20154_vm11, 4294967295, %v23214_v54  ;;  %v23217_v48 = vmov 0 }
 0x53c   : > { %v23207_v6 = vsel %vm20142_vm1, 4294967295, %v23206_v6  ;;  %v23212_v13 = vsel %vm20149_vm2, 4294967295, %v23211_v13  ;;  %23216 = vst [vmem:[#allocation75_spill] sm:$0xff] %v23215_v54  ;;  %v23218_v48 = vsel %vm20159_vm5, 4294967295, %v23217_v48  ;;  %vm20164_vm3 = vcmp.gt.f32.partialorder %v20031_v24, %v12031_v32 }
 0x53d   : > { %23213 = vst [vmem:[#allocation76_spill] sm:$0xff] %v23212_v13  ;;  %23219 = vst [vmem:[#allocation21_spill] sm:$0xff] %v23218_v48  ;;  %v23220_v18 = vmov 0  ;;  %vm20169_vm9 = vcmp.gt.f32.partialorder %v23176_v46, %v12032_v31  ;;  %v23223_v9 = vmov 0  ;;  %v23226_v23 = vrot.slane %v18680_v59, 7 }
 0x53e   : > { %v23221_v18 = vsel %vm20164_vm3, 4294967295, %v23220_v18  ;;  %v23224_v9 = vsel %vm20169_vm9, 4294967295, %v23223_v9  ;;  %v23227_v10 = vrot.slane %v23177_v12, 7  ;;  %v23228_v51 = vrot.slane %v23187_v11, 7 }
 0x53f   : > { %23222 = vst [vmem:[#allocation8_spill] sm:$0xff] %v23221_v18  ;;  %23225 = vst [vmem:[#allocation96_spill] sm:$0xff] %v23224_v9  ;;  %v12602_v25 = vsel %vm19994_vm6, %v18489_v44, %v23226_v23  ;;  %v12605_v59 = vsel %vm20116_vm13, %v18551_v38, %v12021_v36  ;;  %v23229_v53 = vrot.slane %v18598_v27, 7  ;;  %v12608_v23 = vsel %vm20133_vm10, %v23169_v26, %v12024_v15 }
 0x540   : > { %v12603_v28 = vsel %vm20087_vm4, %v23179_v50, %v23227_v10  ;;  %v12604_v8 = vsel %vm20111_vm8, %v23189_v41, %v23228_v51  ;;  %v12607_v10 = vsel %vm20128_vm7, %v23167_v29, %v12023_v16  ;;  %v23230_v51 = vrot.slane %v23203_v47, 7 }
 0x541   : > { %v12606_v12 = vsel %vm20015_vm12, %v18524_v57, %v23229_v53  ;;  %v23231_v27 = vrot.slane %v23208_v3, 7  ;;  %v12613_v16 = vsel %vm20154_vm11, %v23171_v21, %v12029_v17  ;;  %v12614_v15 = vsel %vm20159_vm5, %v18764_v33, %v12030_v39 }
 0x542   : > { %v12609_v36 = vsel %vm20142_vm1, %v23205_v19, %v23230_v51  ;;  %v12615_v47 = vsel %vm20164_vm3, %v20031_v24, %v12031_v32  ;;  %v12616_v11 = vsel %vm20169_vm9, %v23176_v46, %v12032_v31  ;;  %v12733_v3 = vrot.slane %v12602_v25, %v15742_v42  ;;  %v23232_v31 = vld [vmem:[#allocation94_spill] sm:$0xff] }
 0x543   : > { %v12611_v53 = vsel %vm20149_vm2, %v23210_v63, %v23231_v27  ;;  %v12737_v51 = vrot.slane %v12603_v28, %v15742_v42  ;;  %v12741_v27 = vrot.slane %v12604_v8, %v15742_v42  ;;  %v12745_v17 = vrot.slane %v12605_v59, %v15742_v42 }
 0x544   : > { %v12749_v48 = vrot.slane %v12606_v12, %v15742_v42  ;;  %v12753_v39 = vrot.slane %v12607_v10, %v15742_v42  ;;  %v12757_v18 = vrot.slane %v12608_v23, %v15742_v42  ;;  %v12761_v32 = vrot.slane %v12609_v36, %v15742_v42  ;;  %v23234_v10 = vld [vmem:[#allocation23_spill] sm:$0xff] }
 0x545   : > { %v12769_v9 = vrot.slane %v12611_v53, %v15742_v42  ;;  %v12773_v25 = vrot.slane %v23232_v31, %v15742_v42  ;;  %v12777_v54 = vrot.slane %v12613_v16, %v15742_v42  ;;  %v12781_v28 = vrot.slane %v12614_v15, %v15742_v42  ;;  %v23240_v16 = vld [vmem:[#allocation99_spill] sm:$0xff] }
 0x546   : > { %v12785_v8 = vrot.slane %v12615_v47, %v15742_v42  ;;  %v12789_v59 = vrot.slane %v12616_v11, %v15742_v42  ;;  %vm23233_vm9 = vcmask 1042434   ;;  %v23235_v23 = vrot.slane %v23234_v10, %v15742_v42 }
 0x547   : > { %v12986_v12 = vsel %vm23233_vm9, %v12737_v51, %v12733_v3  ;;  %vm23236_vm5 = vcmask 1041409   ;;  %v20245_v13 = vstv %s20137_s17  ;;  %vm23238_vm3 = vcmask 1043459   ;;  %vm23239_vm11 = vmmov %vm23233_vm9 }
 0x548   : > { %v12992_v36 = vsel %vm23236_vm5, %v23235_v23, %v12761_v32  ;;  %23237 = vst [vmem:[#allocation50_spill] sm:$0xff] %v20245_v13  ;;  %v12987_v53 = vsel %vm23238_vm3, %v12741_v27, %v12986_v12  ;;  %v20251_v15 = vcombine.high %v23240_v16, %v23240_v16  ;;  %v23242_v47 = vrot.slane %v23182_v58, 7  ;;  %vm23244_vm2 = vmmov %vm23238_vm3  ;;  %v23249_v13 = vld [vmem:[#allocation77_spill] sm:$0xff] }
 0x549   : > { %v12993_v31 = vsel %vm23239_vm11, %v12769_v9, %v12992_v36  ;;  %vm23243_vm9 = vcmask 1044484   ;;  %v23245_v32 = vrot.slane %v23194_v56, 7  ;;  %vm23246_vm11 = vcmask 1045509   ;;  %v23248_v36 = vld [vmem:[#allocation91_spill] sm:$0xff] }
 0x54a   : > { %23241 = vst [vmem:[#allocation54_spill] sm:$0xff] %v20251_v15  ;;  %v11071_v11 = vsel %vm20094_vm0, %v23182_v58, %v23242_v47  ;;  %v12988_v3 = vsel %vm23243_vm9, %v12745_v17, %v12987_v53  ;;  %v12994_v51 = vsel %vm23244_vm2, %v12773_v25, %v12993_v31  ;;  %vm23247_vm3 = vmmov %vm23243_vm9  ;;  %vm23250_vm0 = vcmask 1046534   ;;  %v23253_v53 = vld [vmem:[#allocation97_spill] sm:$0xff]  ;;  %v23254_v31 = vld [vmem:[#allocation100_spill] sm:$0xff] }
 0x54b   : > { %v11072_v9 = vsel %vm20123_vm14, %v23194_v56, %v23245_v32  ;;  %v11220_v27 = vrot.slane %v11071_v11, 7  ;;  %v12989_v12 = vsel %vm23246_vm11, %v12749_v48, %v12988_v3  ;;  %v12995_v10 = vsel %vm23247_vm3, %v12777_v54, %v12994_v51  ;;  %vm23251_vm9 = vmmov %vm23246_vm11  ;;  %v23258_v54 = vld [vmem:[#allocation104_spill] sm:$0xff]  ;;  %v23263_v3 = vld [vmem:[#allocation103_spill] sm:$0xff] }
 0x54c   : > { %v11222_v23 = vrot.slane %v11072_v9, 7  ;;  %v12990_v58 = vsel %vm23250_vm0, %v12753_v39, %v12989_v12  ;;  %v12996_v17 = vsel %vm23251_vm9, %v12781_v28, %v12995_v10  ;;  %vm22415_vm2 = vcmp.gt.f32.partialorder %v23254_v31, %v23253_v53  ;;  %vm23256_vm14 = vmmov %vm23250_vm0 }
 0x54d   : > { %v20271_v25 = vrot.slane %v11220_v27, 2  ;;  %vm23255_vm1 = vcmask 1047559   ;;  %v12997_v47 = vsel %vm23256_vm14, %v12785_v8, %v12996_v17  ;;  %vm22412_vm11 = vcmp.gt.f32.partialorder %v23240_v16, %v23258_v54 }
 0x54e   : > { %v12991_v56 = vsel %vm23255_vm1, %v12757_v18, %v12990_v58  ;;  %v20277_v48 = vrot.slane %v11222_v23, 2  ;;  %vm23259_vm3 = vmmov %vm23255_vm1  ;;  %vm23260_vm5 = vcmask 130048   ;;  %vm23261_vm9 = vcmp.gt.f32.partialorder %v23249_v13, %v23248_v36 }
 0x54f   : > { %23252 = vst [vmem:[#allocation90_spill] sm:$0xff] %v20271_v25  ;;  %v12998_v11 = vsel %vm23259_vm3, %v12789_v59, %v12997_v47  ;;  %v13050_v39 = vsel %vm23260_vm5, %v12991_v56, 0.0  ;;  %vm22406_vm0 = vcmp.gt.f32.partialorder %v20251_v15, %v20271_v25  ;;  %v11905_v18 = vsel %vm23261_vm9, %v23249_v13, %v23248_v36  ;;  %vm23262_vm1 = vmmov %vm23260_vm5  ;;  %v23266_v47 = vld [vmem:[#allocation101_spill] sm:$0xff] }
 0x550   : > { %23257 = vst [vmem:[#allocation61_spill] sm:$0xff] %v20277_v48  ;;  %v20291_v28 = vsel %vm23262_vm1, %v12998_v11, 0.0  ;;  %v13068_v8 = vrot.slane %v13050_v39, 1  ;;  %vm22405_vm14 = vcmp.gt.f32.partialorder %v23263_v3, %v20277_v48  ;;  %v11909_v59 = vsel %vm22415_vm2, %v23254_v31, %v23253_v53  ;;  %v23268_v39 = vld [vmem:[#allocation10_spill] sm:$0xff] }
 0x551   : > { %v22407_v51 = vrot.slane %v20291_v28, 1  ;;  %v11910_v32 = vsel %vm22412_vm11, %v23240_v16, %v23258_v54  ;;  %v11911_v9 = vsel %vm22406_vm0, %v20251_v15, %v20271_v25  ;;  %v11912_v27 = vsel %vm22405_vm14, %v23263_v3, %v20277_v48 }
 0x552   : > { %v12033_v12 = vrot.slane %v11905_v18, 7  ;;  %v12037_v10 = vrot.slane %v11909_v59, 7  ;;  %v12038_v23 = vrot.slane %v11910_v32, 7  ;;  %v12039_v58 = vrot.slane %v11911_v9, 7 }
 0x553   : > { %vm23264_vm5 = vcmask 1046528   ;;  %v12040_v56 = vrot.slane %v11912_v27, 7  ;;  %v23267_v11 = vrot.slane %v23266_v47, 7  ;;  %v23269_v25 = vmov 0 }
 0x554   : > { %v20319_v17 = vsel %vm23264_vm5, %v13068_v8, %v22407_v51  ;;  %v12805_v48 = vrot.slane %v19147_v35, %v15742_v42  ;;  %vm20331_vm9 = vcmp.gt.f32.partialorder %v23249_v13, %v12033_v12  ;;  %v23272_v18 = vmov 0 }
 0x555   : > { %23265 = vst [vmem:[#allocation36_spill] sm:$0xff] %v20319_v17  ;;  %vm20324_vm3 = vcmp.gt.f32.partialorder %v23268_v39, %v23267_v11  ;;  %v23273_v18 = vsel %vm20331_vm9, 4294967295, %v23272_v18  ;;  %vm20336_vm1 = vcmp.gt.f32.partialorder %v23254_v31, %v12037_v10  ;;  %v23275_v8 = vmov 0 }
 0x556   : > { %v23270_v25 = vsel %vm20324_vm3, 4294967295, %v23269_v25  ;;  %23274 = vst [vmem:[#allocation69_spill] sm:$0xff] %v23273_v18  ;;  %v23276_v8 = vsel %vm20336_vm1, 4294967295, %v23275_v8  ;;  %vm20341_vm5 = vcmp.gt.f32.partialorder %v23240_v16, %v12038_v23  ;;  %v23278_v59 = vmov 0 }
 0x557   : > { %23271 = vst [vmem:[#allocation71_spill] sm:$0xff] %v23270_v25  ;;  %23277 = vst [vmem:[#allocation94_spill] sm:$0xff] %v23276_v8  ;;  %v23279_v59 = vsel %vm20341_vm5, 4294967295, %v23278_v59  ;;  %vm20346_vm14 = vcmp.gt.f32.partialorder %v20251_v15, %v12039_v58  ;;  %v23281_v32 = vmov 0  ;;  %vm20351_vm0 = vcmp.gt.f32.partialorder %v23263_v3, %v12040_v56 }
 0x558   : > { %23280 = vst [vmem:[#allocation23_spill] sm:$0xff] %v23279_v59  ;;  %v23282_v32 = vsel %vm20346_vm14, 4294967295, %v23281_v32  ;;  %v23284_v35 = vmov 0  ;;  %v12617_v9 = vsel %vm20331_vm9, %v23249_v13, %v12033_v12  ;;  %v23287_v27 = vmov %v23267_v11 }
 0x559   : > { %23283 = vst [vmem:[#allocation91_spill] sm:$0xff] %v23282_v32  ;;  %v23285_v35 = vsel %vm20351_vm0, 4294967295, %v23284_v35  ;;  %v12619_v11 = vsel %vm20324_vm3, %v23268_v39, %v23287_v27  ;;  %v12621_v51 = vsel %vm20336_vm1, %v23254_v31, %v12037_v10  ;;  %v12622_v17 = vsel %vm20341_vm5, %v23240_v16, %v12038_v23  ;;  %v23290_v32 = vld [vmem:[#allocation83_spill] sm:$0xff]  ;;  %v23298_v16 = vld [vmem:[#allocation58_spill] sm:$0xff]  ;;  %v23301_v31 = vld [vmem:[#allocation5_spill] sm:$0xff] }
 0x55a   : > { %23286 = vst [vmem:[#allocation77_spill] sm:$0xff] %v23285_v35  ;;  %v12623_v54 = vsel %vm20346_vm14, %v20251_v15, %v12039_v58  ;;  %v12624_v12 = vsel %vm20351_vm0, %v23263_v3, %v12040_v56  ;;  %v12793_v47 = vrot.slane %v12617_v9, %v15742_v42  ;;  %v12801_v27 = vrot.slane %v12619_v11, %v15742_v42  ;;  %v23291_v35 = vld [vmem:[#allocation22_spill] sm:$0xff]  ;;  %v23294_v3 = vld [vmem:[#allocation40_spill] sm:$0xff]  ;;  %v23296_v15 = vld [vmem:[#allocation81_spill] sm:$0xff] }
 0x55b   : > { %v12809_v25 = vrot.slane %v12621_v51, %v15742_v42  ;;  %v12813_v10 = vrot.slane %v12622_v17, %v15742_v42  ;;  %v12817_v8 = vrot.slane %v12623_v54, %v15742_v42  ;;  %v12821_v23 = vrot.slane %v12624_v12, %v15742_v42  ;;  %v23293_v51 = vld [vmem:[#allocation39_spill] sm:$0xff]  ;;  %v23297_v12 = vld [vmem:[#allocation86_spill] sm:$0xff] }
 0x55c   : > { %v23288_v59 = vrot.slane %v19137_v52, %v15742_v42  ;;  %vm23289_vm11 = vcmask 1041409   ;;  %v10501_v56 = vrot.slane %v23291_v35, %v23290_v32  ;;  %v10757_v9 = vrot.slane %v22749_v30, %v23290_v32 }
 0x55d   : > { %vm23292_vm2 = vcmask 1042434   ;;  %v10989_v54 = vsel %vm18558_vm15, %v23294_v3, %v23293_v51  ;;  %vm23299_vm0 = vnez %v23298_v16  ;;  %vm23302_vm5 = vnez %v23301_v31 }
 0x55e   : > { %v12999_v58 = vsel %vm23289_vm11, %v23288_v59, %v12793_v47  ;;  %v10991_v52 = vsel %vm23299_vm0, %v23297_v12, %v23296_v15  ;;  %v11434_v59 = vadd.s32 16, %v22749_v30  ;;  %vm23300_vm11 = vcmask 1043459   ;;  %v23305_v15 = vld [vmem:[#allocation82_spill] sm:$0xff] }
 0x55f   : > { %v13000_v11 = vsel %vm23292_vm2, %v12801_v27, %v12999_v58  ;;  %v10701_v35 = vrot.slane %v10501_v56, 7  ;;  %v10957_v53 = vrot.slane %v10757_v9, 7  ;;  %v10993_v39 = vsel %vm23302_vm5, %v10501_v56, %v10757_v9 }
 0x560   : > { %v13001_v47 = vsel %vm23300_vm11, %v12805_v48, %v13000_v11  ;;  %vm23303_vm2 = vcmask 1044484   ;;  %v11448_v58 = vrot.slane %v11434_v59, %v22778_v7  ;;  %v11455_v3 = vrot.slane %v11434_v59, %v18512_v14 }
 0x561   : > { %v13002_v27 = vsel %vm23303_vm2, %v12809_v25, %v13001_v47  ;;  %v11462_v51 = vrot.slane %v11434_v59, %v18458_v34  ;;  %vm23304_vm15 = vcmask 1045509   ;;  %vm23306_vm0 = vnez %v23305_v15  ;;  %v23629_v15 = vld [vmem:[#allocation118_spill] sm:$0xff] }
 0x562   : > { %v13003_v16 = vsel %vm23304_vm15, %v12813_v10, %v13002_v27  ;;  %v10992_v17 = vsel %vm23306_vm0, %v10701_v35, %v10957_v53  ;;  %v11469_v48 = vrot.slane %v11434_v59, %v23290_v32  ;;  %v13734_v11 = vrot.slane %v10989_v54, 9  ;;  %v23315_v35 = vld [vmem:[#allocation47_spill] sm:$0xff] }
 0x563   : > { %vm23307_vm11 = vcmask 1046534   ;;  %v11666_v31 = vrot.slane %v11448_v58, 1  ;;  %v11667_v56 = vrot.slane %v11455_v3, 1  ;;  %v11668_v9 = vrot.slane %v11462_v51, 1  ;;  %v23317_v27 = vld [vmem:[#allocation51_spill] sm:$0xff] }
 0x564   : > { %v13004_v12 = vsel %vm23307_vm11, %v12817_v8, %v13003_v16  ;;  %vm23308_vm5 = vcmask 1047559   ;;  %v11669_v47 = vrot.slane %v11469_v48, 1  ;;  %v13736_v4 = vrot.slane %v10991_v52, 9  ;;  %v23313_v8 = vld [vmem:[#allocation80_spill] sm:$0xff]  ;;  %v23318_v52 = vld [vmem:[#allocation41_spill] sm:$0xff] }
 0x565   : > { %v13005_v25 = vsel %vm23308_vm5, %v12821_v23, %v13004_v12  ;;  %v13737_v55 = vrot.slane %v10992_v17, 9  ;;  %v23309_v18 = vrot.slane %v19183_v22, 7  ;;  %vm23312_vm15 = vcmask 130048   ;;  %v23323_v17 = vld [vmem:[#allocation37_spill] sm:$0xff] }
 0x566   : > { %v20420_v53 = vsel %vm23312_vm15, %v13005_v25, 0.0  ;;  %v13738_v54 = vrot.slane %v10993_v39, 9  ;;  %v23314_v59 = vrot.slane %v23313_v8, 9  ;;  %vm23316_vm0 = vcmp.gt.f32.partialorder %v18489_v44, %v23315_v35  ;;  %v23325_v25 = vld [vmem:[#allocation55_spill] sm:$0xff]  ;;  %v23330_v8 = vld [vmem:[#allocation85_spill] sm:$0xff] }
 0x567   : > { %vm20415_vm2 = vcmp.gt.f32.partialorder %v19183_v22, %v23309_v18  ;;  %vm23319_vm11 = vcmp.gt.f32.partialorder %v23179_v50, %v23318_v52  ;;  %v23320_v18 = vrot.slane %v19092_v37, 7  ;;  %v22434_v39 = vrot.slane %v20420_v53, 1 }
 0x568   : > { %v11826_v23 = vsel %vm23316_vm0, %v11448_v58, %v23314_v59  ;;  %v11827_v16 = vsel %vm23319_vm11, %v11666_v31, %v23317_v27  ;;  %v23324_v12 = vrot.slane %v23323_v17, 9  ;;  %vm23326_vm15 = vcmp.gt.f32.partialorder %v23189_v41, %v23325_v25  ;;  %v23328_v58 = vld [vmem:[#allocation84_spill] sm:$0xff]  ;;  %v23334_v41 = vld [vmem:[#allocation87_spill] sm:$0xff] }
 0x569   : > { %vm20434_vm5 = vcmp.gt.f32.partialorder %v19092_v37, %v23320_v18  ;;  %vm23327_vm0 = vcmp.gt.f32.partialorder %v18551_v38, %v18640_v40  ;;  %v23329_v31 = vrot.slane %v23328_v58, 9  ;;  %vm23331_vm11 = vcmp.gt.f32.partialorder %v18524_v57, %v23330_v8 }
 0x56a   : > { %v11828_v44 = vsel %vm23326_vm15, %v11455_v3, %v23324_v12  ;;  %v11829_v50 = vsel %vm23327_vm0, %v11667_v56, %v13734_v11  ;;  %vm23332_vm14 = vcmp.gt.f32.partialorder %v23167_v29, %v23166_v45  ;;  %vm23333_vm1 = vcmp.gt.f32.partialorder %v23169_v26, %v23168_v2 }
 0x56b   : > { %v11830_v59 = vsel %vm23331_vm11, %v11462_v51, %v23329_v31  ;;  %v11831_v35 = vsel %vm23332_vm14, %v11668_v9, %v13736_v4  ;;  %v11832_v27 = vsel %vm23333_vm1, %v11469_v48, %v13737_v55  ;;  %vm23335_vm15 = vcmp.gt.f32.partialorder %v23205_v19, %v23334_v41 }
 0x56c   : > { %v11833_v3 = vsel %vm23335_vm15, %v11669_v47, %v13738_v54  ;;  %v12210_v38 = vadd.s32 17, %v22749_v30  ;;  %v23336_v40 = vrot.slane %v20291_v28, 1  ;;  %vm23337_vm0 = vcmask 1046528  }
 0x56d   : > { %v12474_v51 = vrot.slane %v11826_v23, 7  ;;  %v12475_v45 = vrot.slane %v11827_v16, 7  ;;  %v12476_v4 = vrot.slane %v11828_v44, 7  ;;  %v12477_v19 = vrot.slane %v11829_v50, 7 }
 0x56e   : > { %v20467_v57 = vsel %vm23337_vm0, %v23336_v40, %v22434_v39  ;;  %v12224_v29 = vrot.slane %v12210_v38, %v22778_v7  ;;  %v12231_v2 = vrot.slane %v12210_v38, %v18512_v14  ;;  %v12238_v26 = vrot.slane %v12210_v38, %v18458_v34  ;;  %v23417_v39 = vld [vmem:[#allocation45_spill] sm:$0xff] }
 0x56f   : > { %v12245_v55 = vrot.slane %v12210_v38, %v23290_v32  ;;  %v12478_v30 = vrot.slane %v11830_v59, 7  ;;  %v12479_v48 = vrot.slane %v11831_v35, 7  ;;  %v12480_v11 = vrot.slane %v11832_v27, 7 }
 0x570   : > { %v12442_v56 = vrot.slane %v12224_v29, 7  ;;  %v12443_v28 = vrot.slane %v12231_v2, 7  ;;  %v12444_v9 = vrot.slane %v12238_v26, 7  ;;  %v12481_v54 = vrot.slane %v11833_v3, 7  ;;  %v23343_v3 = vld [vmem:[#allocation108_spill] sm:$0xff] }
 0x571   : > { %v12445_v47 = vrot.slane %v12245_v55, 7  ;;  %v12539_v23 = vsel %vm20087_vm4, %v12224_v29, %v12475_v45  ;;  %v12541_v52 = vsel %vm20116_vm13, %v12231_v2, %v12477_v19  ;;  %v12543_v16 = vsel %vm20128_vm7, %v12238_v26, %v12479_v48  ;;  %v23346_v45 = vld [vmem:[#allocation125_spill] sm:$0xff] }
 0x572   : > { %v12538_v18 = vsel %vm19994_vm6, %v12442_v56, %v12474_v51  ;;  %v12540_v17 = vsel %vm20111_vm8, %v12443_v28, %v12476_v4  ;;  %v12542_v12 = vsel %vm20015_vm12, %v12444_v9, %v12478_v30  ;;  %vm23338_vm4 = vnez %v23207_v6  ;;  %v23345_v51 = vld [vmem:[#allocation123_spill] sm:$0xff]  ;;  %v23347_v4 = vld [vmem:[#allocation126_spill] sm:$0xff] }
 0x573   : > { %v12544_v25 = vsel %vm20133_vm10, %v12445_v47, %v12480_v11  ;;  %v12545_v60 = vsel %vm23338_vm4, %v12245_v55, %v12481_v54  ;;  %v13165_v1 = vrot.slane %v12538_v18, %v15742_v42  ;;  %v13169_v0 = vrot.slane %v12539_v23, %v15742_v42  ;;  %v23352_v9 = vld [vmem:[#allocation139_spill] sm:$0xff] }
 0x574   : > { %v13173_v44 = vrot.slane %v12540_v17, %v15742_v42  ;;  %v13177_v62 = vrot.slane %v12541_v52, %v15742_v42  ;;  %v13181_v61 = vrot.slane %v12542_v12, %v15742_v42  ;;  %v13185_v50 = vrot.slane %v12543_v16, %v15742_v42  ;;  %v23355_v16 = vld [vmem:[#allocation127_spill] sm:$0xff]  ;;  %v23357_v17 = vld [vmem:[#allocation121_spill] sm:$0xff] }
 0x575   : > { %v13189_v43 = vrot.slane %v12544_v25, %v15742_v42  ;;  %v13193_v20 = vrot.slane %v12545_v60, %v15742_v42  ;;  %vm23339_vm12 = vcmask 1041409   ;;  %v20500_v6 = vcombine.high %v19302_v5, %v19302_v5 }
 0x576   : > { %v13418_v58 = vsel %vm23339_vm12, %v13169_v0, %v13165_v1  ;;  %v23340_v31 = vrot.slane %v19183_v22, 7  ;;  %vm23341_vm10 = vcmask 1042434   ;;  %v23342_v35 = vrot.slane %v19092_v37, 7 }
 0x577   : > { %v13419_v59 = vsel %vm23341_vm10, %v13173_v44, %v13418_v58  ;;  %vm22433_vm7 = vcmp.gt.f32.partialorder %v23343_v3, %v19130_v49  ;;  %vm23344_vm13 = vcmask 1043459   ;;  %vm22432_vm6 = vcmp.gt.f32.partialorder %v23346_v45, %v23345_v51 }
 0x578   : > { %v11079_v8 = vsel %vm20415_vm2, %v19183_v22, %v23340_v31  ;;  %v11080_v27 = vsel %vm20434_vm5, %v19092_v37, %v23342_v35  ;;  %v13420_v38 = vsel %vm23344_vm13, %v13177_v62, %v13419_v59  ;;  %vm22431_vm8 = vcmp.gt.f32.partialorder %v19302_v5, %v23347_v4  ;;  %v23374_v59 = vld [vmem:[#allocation140_spill] sm:$0xff] }
 0x579   : > { %v11236_v41 = vrot.slane %v11079_v8, 7  ;;  %v11238_v40 = vrot.slane %v11080_v27, 7  ;;  %vm23348_vm14 = vcmask 1044484   ;;  %v11913_v37 = vsel %vm22433_vm7, %v23343_v3, %v19130_v49 }
 0x57a   : > { %v13421_v22 = vsel %vm23348_vm14, %v13181_v61, %v13420_v38  ;;  %v11917_v2 = vsel %vm22432_vm6, %v23346_v45, %v23345_v51  ;;  %vm23349_vm1 = vcmask 1045509   ;;  %v11918_v19 = vsel %vm22431_vm8, %v19302_v5, %v23347_v4 }
 0x57b   : > { %v20521_v29 = vrot.slane %v11236_v41, 2  ;;  %v13422_v26 = vsel %vm23349_vm1, %v13185_v50, %v13421_v22  ;;  %v20534_v55 = vrot.slane %v11238_v40, 2  ;;  %v12041_v30 = vrot.slane %v11913_v37, 7  ;;  %v23375_v37 = vld [vmem:[#allocation135_spill] sm:$0xff] }
 0x57c   : > { %vm23350_vm11 = vcmask 1046534   ;;  %v12045_v11 = vrot.slane %v11917_v2, 7  ;;  %v12046_v56 = vrot.slane %v11918_v19, 7  ;;  %vm23351_vm0 = vcmask 1047559   ;;  %v23378_v19 = vld [vmem:[#allocation56_spill] sm:$0xff] }
 0x57d   : > { %v13423_v48 = vsel %vm23350_vm11, %v13189_v43, %v13422_v26  ;;  %vm22430_vm15 = vcmp.gt.f32.partialorder %v20500_v6, %v20521_v29  ;;  %vm22429_vm4 = vcmp.gt.f32.partialorder %v23352_v9, %v20534_v55  ;;  %vm20553_vm12 = vcmp.gt.f32.partialorder %v23343_v3, %v12041_v30 }
 0x57e   : > { %v13424_v28 = vsel %vm23351_vm0, %v13193_v20, %v13423_v48  ;;  %v11919_v47 = vsel %vm22430_vm15, %v20500_v6, %v20521_v29  ;;  %v11920_v23 = vsel %vm22429_vm4, %v23352_v9, %v20534_v55  ;;  %v23356_v18 = vrot.slane %v23355_v16, 7  ;;  %v23383_v16 = vld [vmem:[#allocation38_spill] sm:$0xff] }
 0x57f   : > { %13474 = vxpose.xlu1.b32.start [1/8] (short) (narrow) %v13424_v28, 16  ;;  %v12047_v52 = vrot.slane %v11919_v47, 7  ;;  %v23358_v12 = vmov 0  ;;  %vm20570_vm13 = vcmp.gt.f32.partialorder %v23346_v45, %v12045_v11  ;;  %v23361_v25 = vmov 0 }
 0x580   : > { %vm20565_vm10 = vcmp.gt.f32.partialorder %v23357_v17, %v23356_v18  ;;  %v23362_v25 = vsel %vm20570_vm13, 4294967295, %v23361_v25  ;;  %v12048_v60 = vrot.slane %v11920_v23, 7  ;;  %vm20575_vm14 = vcmp.gt.f32.partialorder %v19302_v5, %v12046_v56  ;;  %v23381_v23 = vld [vmem:[#allocation49_spill] sm:$0xff] }
 0x581   : > { %v23359_v12 = vsel %vm20565_vm10, 4294967295, %v23358_v12  ;;  %23363 = vst [vmem:[#allocation83_spill] sm:$0xff] %v23362_v25  ;;  %v23364_v1 = vmov 0  ;;  %v12625_v0 = vsel %vm20553_vm12, %v23343_v3, %v12041_v30  ;;  %v23367_v44 = vmov %v23356_v18 }
 0x582   : > { %23360 = vst [vmem:[#allocation101_spill] sm:$0xff] %v23359_v12  ;;  %v23365_v1 = vsel %vm20575_vm14, 4294967295, %v23364_v1  ;;  %v12627_v62 = vsel %vm20565_vm10, %v23357_v17, %v23367_v44  ;;  %vm20588_vm1 = vcmp.gt.f32.partialorder %v20500_v6, %v12047_v52  ;;  %v23368_v61 = vmov 0 }
 0x583   : > { %23366 = vst [vmem:[#allocation22_spill] sm:$0xff] %v23365_v1  ;;  %v23369_v61 = vsel %vm20588_vm1, 4294967295, %v23368_v61  ;;  %v12629_v50 = vsel %vm20570_vm13, %v23346_v45, %v12045_v11  ;;  %v12630_v43 = vsel %vm20575_vm14, %v19302_v5, %v12046_v56  ;;  %v12825_v20 = vrot.slane %v12625_v0, %v15742_v42  ;;  %v23380_v56 = vld [vmem:[#allocation59_spill] sm:$0xff]  ;;  %v23420_v1 = vld [vmem:[#allocation72_spill] sm:$0xff] }
 0x584   : > { %23370 = vst [vmem:[#allocation39_spill] sm:$0xff] %v23369_v61  ;;  %vm20600_vm11 = vcmp.gt.f32.partialorder %v23352_v9, %v12048_v60  ;;  %v23371_v58 = vmov 0  ;;  %v12631_v31 = vsel %vm20588_vm1, %v20500_v6, %v12047_v52  ;;  %v12833_v8 = vrot.slane %v12627_v62, %v15742_v42  ;;  %v23382_v52 = vld [vmem:[#allocation43_spill] sm:$0xff] }
 0x585   : > { %v23372_v58 = vsel %vm20600_vm11, 4294967295, %v23371_v58  ;;  %v12837_v35 = vrot.slane %v23374_v59, %v15742_v42  ;;  %v12632_v27 = vsel %vm20600_vm11, %v23352_v9, %v12048_v60  ;;  %v12841_v41 = vrot.slane %v12629_v50, %v15742_v42 }
 0x586   : > { %23373 = vst [vmem:[#allocation40_spill] sm:$0xff] %v23372_v58  ;;  %v12845_v38 = vrot.slane %v12630_v43, %v15742_v42  ;;  %v12849_v40 = vrot.slane %v12631_v31, %v15742_v42  ;;  %v12853_v22 = vrot.slane %v12632_v27, %v15742_v42  ;;  %v23376_v2 = vrot.slane %v23375_v37, %v15742_v42  ;;  %v23387_v31 = vld [vmem:[#allocation228_spill] sm:$0xff]  ;;  %v23390_v27 = vld [vmem:[#allocation63_spill] sm:$0xff] }
 0x587   : > { %vm23377_vm0 = vcmask 1041409   ;;  %v10522_v30 = vrot.slane %v23378_v19, %v18458_v34  ;;  %v10529_v48 = vrot.slane %v23378_v19, %v23290_v32  ;;  %vm23379_vm4 = vcmask 1042434   ;;  %v23393_v19 = vld [vmem:[#allocation48_spill] sm:$0xff] }
 0x588   : > { %v13006_v26 = vsel %vm23377_vm0, %v23376_v2, %v12825_v20  ;;  %v10778_v28 = vrot.slane %v23380_v56, %v18458_v34  ;;  %v10785_v47 = vrot.slane %v23380_v56, %v23290_v32  ;;  %vm23384_vm15 = vnez %v23383_v16  ;;  %v23419_v58 = vld [vmem:[#allocation68_spill] sm:$0xff] }
 0x589   : > { %v13007_v11 = vsel %vm23379_vm4, %v12833_v8, %v13006_v26  ;;  %v10997_v18 = vsel %vm23384_vm15, %v23382_v52, %v23381_v23  ;;  %vm23385_vm0 = vcmask 1043459   ;;  %v10704_v0 = vrot.slane %v10522_v30, 7 }
 0x58a   : > { %v13008_v60 = vsel %vm23385_vm0, %v12837_v35, %v13007_v11  ;;  %v10705_v44 = vrot.slane %v10529_v48, 7  ;;  %v11435_v62 = vadd.s32 16, %v23380_v56  ;;  %vm23386_vm8 = vcmask 1044484  }
 0x58b   : > { %v13009_v50 = vsel %vm23386_vm8, %v12841_v41, %v13008_v60  ;;  %v10960_v43 = vrot.slane %v10778_v28, 7  ;;  %v10961_v20 = vrot.slane %v10785_v47, 7  ;;  %vm23388_vm4 = vnez %v23387_v31  ;;  %v23395_v41 = vld [vmem:[#allocation229_spill] sm:$0xff] }
 0x58c   : > { %v10999_v8 = vsel %vm23388_vm4, %v10522_v30, %v10778_v28  ;;  %vm23389_vm6 = vcmask 1045509   ;;  %vm23391_vm7 = vnez %v23390_v27  ;;  %v11476_v2 = vrot.slane %v11435_v62, %v22778_v7 }
 0x58d   : > { %v13010_v59 = vsel %vm23389_vm6, %v12845_v38, %v13009_v50  ;;  %v11001_v37 = vsel %vm23391_vm7, %v10529_v48, %v10785_v47  ;;  %v11483_v35 = vrot.slane %v11435_v62, %v18512_v14  ;;  %vm23392_vm15 = vcmask 1046534  }
 0x58e   : > { %v13011_v26 = vsel %vm23392_vm15, %v12849_v40, %v13010_v59  ;;  %vm23394_vm0 = vnez %v23393_v19  ;;  %vm23396_vm8 = vnez %v23395_v41  ;;  %v11490_v52 = vrot.slane %v11435_v62, %v18458_v34 }
 0x58f   : > { %v10998_v11 = vsel %vm23394_vm0, %v10704_v0, %v10960_v43  ;;  %v11000_v23 = vsel %vm23396_vm8, %v10705_v44, %v10961_v20  ;;  %vm23397_vm4 = vcmask 1047559   ;;  %v11497_v38 = vrot.slane %v11435_v62, %v23290_v32  ;;  %v23399_v44 = vld [vmem:[#allocation183_spill] sm:$0xff]  ;;  %v23404_v62 = vld [vmem:[#allocation164_spill] sm:$0xff] }
 0x590   : > { %v13012_v30 = vsel %vm23397_vm4, %v12853_v22, %v13011_v26  ;;  %v11670_v28 = vrot.slane %v11476_v2, 1  ;;  %v11671_v48 = vrot.slane %v11483_v35, 1  ;;  %vm23398_vm7 = vcmask 130048   ;;  %v23409_v26 = vld [vmem:[#allocation44_spill] sm:$0xff] }
 0x591   : > { %v20653_v47 = vsel %vm23398_vm7, %v13012_v30, 0.0  ;;  %v11672_v16 = vrot.slane %v11490_v52, 1  ;;  %v13742_v60 = vrot.slane %v10997_v18, 9  ;;  %v13743_v40 = vrot.slane %v10998_v11, 9  ;;  %v23411_v11 = vld [vmem:[#allocation66_spill] sm:$0xff] }
 0x592   : > { %v11673_v0 = vrot.slane %v11497_v38, 1  ;;  %v13744_v43 = vrot.slane %v10999_v8, 9  ;;  %v13745_v31 = vrot.slane %v11000_v23, 9  ;;  %v23400_v20 = vrot.slane %v23399_v44, 7  ;;  %v23412_v8 = vld [vmem:[#allocation52_spill] sm:$0xff]  ;;  %v23414_v23 = vld [vmem:[#allocation67_spill] sm:$0xff] }
 0x593   : > { %v23401_v22 = vmov 0  ;;  %v23405_v59 = vrot.slane %v23404_v62, 7  ;;  %v23406_v27 = vmov 0  ;;  %v13746_v18 = vrot.slane %v11001_v37, 9  ;;  %v23415_v30 = vld [vmem:[#allocation62_spill] sm:$0xff] }
 0x594   : > { %vm20659_vm6 = vcmp.gt.f32.partialorder %v23399_v44, %v23400_v20  ;;  %v23410_v19 = vrot.slane %v23409_v26, 9  ;;  %vm23413_vm0 = vcmp.gt.f32.partialorder %v23411_v11, %v23412_v8  ;;  %vm23416_vm8 = vcmp.gt.f32.partialorder %v23210_v63, %v23415_v30  ;;  %v23427_v63 = vld [vmem:[#allocation25_spill] sm:$0xff]  ;;  %v23436_v11 = vld [vmem:[#allocation76_spill] sm:$0xff] }
 0x595   : > { %v23402_v22 = vsel %vm20659_vm6, 4294967295, %v23401_v22  ;;  %vm20666_vm15 = vcmp.gt.f32.partialorder %v23404_v62, %v23405_v59  ;;  %v11835_v20 = vsel %vm23416_vm8, %v11670_v28, %v23414_v23  ;;  %v23418_v50 = vrot.slane %v23417_v39, 9  ;;  %v23429_v39 = vld [vmem:[#allocation46_spill] sm:$0xff]  ;;  %v23440_v30 = vld [vmem:[#allocation8_spill] sm:$0xff] }
 0x596   : > { %23403 = vst [vmem:[#allocation42_spill] sm:$0xff] %v23402_v22  ;;  %v23407_v27 = vsel %vm20666_vm15, 4294967295, %v23406_v27  ;;  %v11834_v41 = vsel %vm23413_vm0, %v11476_v2, %v23410_v19  ;;  %vm23421_vm4 = vcmp.gt.f32.partialorder %v23419_v58, %v23420_v1  ;;  %v23422_v61 = vrot.slane %v20653_v47, 1  ;;  %v23425_v2 = vld [vmem:[#allocation64_spill] sm:$0xff]  ;;  %v23431_v58 = vld [vmem:[#allocation57_spill] sm:$0xff] }
 0x597   : > { %23408 = vst [vmem:[#allocation81_spill] sm:$0xff] %v23407_v27  ;;  %v11836_v59 = vsel %vm23421_vm4, %v11483_v35, %v23418_v50  ;;  %v23423_v37 = vrot.slane %v20420_v53, 1  ;;  %vm23424_vm7 = vcmask 1046528   ;;  %vm23426_vm0 = vcmp.gt.f32.partialorder %v23171_v21, %v23425_v2  ;;  %v23443_v2 = vld [vmem:[#allocation78_spill] sm:$0xff] }
 0x598   : > { %v11837_v19 = vsel %vm23426_vm0, %v11671_v48, %v13742_v60  ;;  %vm23428_vm8 = vcmp.gt.f32.partialorder %v18764_v33, %v23427_v63  ;;  %vm23430_vm11 = vcmp.gt.f32.partialorder %v20031_v24, %v23429_v39  ;;  %vm23432_vm4 = vcmp.gt.f32.partialorder %v23176_v46, %v23431_v58  ;;  %v23445_v63 = vld [vmem:[#allocation89_spill] sm:$0xff]  ;;  %v23449_v58 = vld [vmem:[#allocation96_spill] sm:$0xff] }
 0x599   : > { %v20689_v26 = vsel %vm23424_vm7, %v23423_v37, %v23422_v61  ;;  %v11838_v28 = vsel %vm23428_vm8, %v11490_v52, %v13743_v40  ;;  %v11839_v1 = vsel %vm23430_vm11, %v11672_v16, %v13744_v43  ;;  %v11840_v35 = vsel %vm23432_vm4, %v11497_v38, %v13745_v31  ;;  %v23447_v39 = vld [vmem:[#allocation21_spill] sm:$0xff] }
 0x59a   : > { %vm23433_vm7 = vcmp.gt.f32.partialorder %v23249_v13, %v23248_v36  ;;  %v12211_v61 = vadd.s32 17, %v23380_v56  ;;  %v12482_v21 = vrot.slane %v11834_v41, 7  ;;  %v12483_v48 = vrot.slane %v11835_v20, 7  ;;  %v23434_v13 = vld [vmem:[#allocation196_spill] sm:$0xff]  ;;  %v23438_v41 = vld [vmem:[#allocation75_spill] sm:$0xff] }
 0x59b   : > { %v11841_v53 = vsel %vm23433_vm7, %v11673_v0, %v13746_v18  ;;  %v12484_v60 = vrot.slane %v11836_v59, 7  ;;  %v12485_v50 = vrot.slane %v11837_v19, 7  ;;  %v12486_v33 = vrot.slane %v11838_v28, 7 }
 0x59c   : > { %v12252_v52 = vrot.slane %v12211_v61, %v22778_v7  ;;  %v12259_v24 = vrot.slane %v12211_v61, %v18512_v14  ;;  %v12266_v16 = vrot.slane %v12211_v61, %v18458_v34  ;;  %v12273_v46 = vrot.slane %v12211_v61, %v23290_v32 }
 0x59d   : > { %v12487_v38 = vrot.slane %v11839_v1, 7  ;;  %v12488_v40 = vrot.slane %v11840_v35, 7  ;;  %v12489_v43 = vrot.slane %v11841_v53, 7  ;;  %v20713_v36 = vcombine.high %v23434_v13, %v23434_v13 }
 0x59e   : > { %v12446_v56 = vrot.slane %v12252_v52, 7  ;;  %v12447_v0 = vrot.slane %v12259_v24, 7  ;;  %v12448_v31 = vrot.slane %v12266_v16, 7  ;;  %v12449_v18 = vrot.slane %v12273_v46, 7 }
 0x59f   : > { %23435 = vst [vmem:[#allocation86_spill] sm:$0xff] %v20713_v36  ;;  %vm23437_vm11 = vnez %v23436_v11  ;;  %vm23439_vm0 = vnez %v23438_v41  ;;  %vm23441_vm8 = vnez %v23440_v30  ;;  %v12553_v37 = vsel %vm20331_vm9, %v12273_v46, %v12489_v43  ;;  %v23454_v43 = vld [vmem:[#allocation137_spill] sm:$0xff] }
 0x5a0   : > { %v12547_v8 = vsel %vm23437_vm11, %v12252_v52, %v12483_v48  ;;  %v12549_v23 = vsel %vm23439_vm0, %v12259_v24, %v12485_v50  ;;  %v12551_v20 = vsel %vm23441_vm8, %v12266_v16, %v12487_v38  ;;  %vm23444_vm4 = vnez %v23443_v2  ;;  %v23457_v11 = vld [vmem:[#allocation181_spill] sm:$0xff] }
 0x5a1   : > { %v12546_v19 = vsel %vm23444_vm4, %v12446_v56, %v12482_v21  ;;  %vm23446_vm7 = vnez %v23445_v63  ;;  %vm23448_vm14 = vnez %v23447_v39  ;;  %vm23450_vm11 = vnez %v23449_v58  ;;  %v23455_v56 = vld [vmem:[#allocation145_spill] sm:$0xff]  ;;  %v23467_v58 = vld [vmem:[#allocation26_spill] sm:$0xff] }
 0x5a2   : > { %v12548_v28 = vsel %vm23446_vm7, %v12447_v0, %v12484_v60  ;;  %v12550_v1 = vsel %vm23448_vm14, %v12448_v31, %v12486_v33  ;;  %v12552_v35 = vsel %vm23450_vm11, %v12449_v18, %v12488_v40  ;;  %v13197_v53 = vrot.slane %v12546_v19, %v15742_v42 }
 0x5a3   : > { %v13201_v61 = vrot.slane %v12547_v8, %v15742_v42  ;;  %v13205_v48 = vrot.slane %v12548_v28, %v15742_v42  ;;  %v13209_v50 = vrot.slane %v12549_v23, %v15742_v42  ;;  %v13213_v52 = vrot.slane %v12550_v1, %v15742_v42  ;;  %v23458_v8 = vld [vmem:[#allocation197_spill] sm:$0xff]  ;;  %v23460_v23 = vld [vmem:[#allocation192_spill] sm:$0xff]  ;;  %v23466_v1 = vld [vmem:[#allocation202_spill] sm:$0xff] }
 0x5a4   : > { %v13217_v21 = vrot.slane %v12551_v20, %v15742_v42  ;;  %v13221_v60 = vrot.slane %v12552_v35, %v15742_v42  ;;  %v13225_v24 = vrot.slane %v12553_v37, %v15742_v42  ;;  %vm23451_vm9 = vcmask 1041409  }
 0x5a5   : > { %v13425_v33 = vsel %vm23451_vm9, %v13201_v61, %v13197_v53  ;;  %v23452_v16 = vrot.slane %v23399_v44, 7  ;;  %v23453_v38 = vrot.slane %v23404_v62, 7  ;;  %vm22444_vm14 = vcmp.gt.f32.partialorder %v23455_v56, %v23454_v43  ;;  %v23469_v53 = vld [vmem:[#allocation189_spill] sm:$0xff] }
 0x5a6   : > { %vm23456_vm0 = vcmask 1042434   ;;  %vm22440_vm8 = vcmp.gt.f32.partialorder %v23458_v8, %v23457_v11  ;;  %vm23459_vm4 = vcmask 1043459   ;;  %vm22441_vm7 = vcmp.gt.f32.partialorder %v23434_v13, %v23460_v23 }
 0x5a7   : > { %v11087_v46 = vsel %vm20659_vm6, %v23399_v44, %v23452_v16  ;;  %v11088_v40 = vsel %vm20666_vm15, %v23404_v62, %v23453_v38  ;;  %v13426_v0 = vsel %vm23456_vm0, %v13205_v48, %v13425_v33  ;;  %v11921_v44 = vsel %vm22444_vm14, %v23455_v56, %v23454_v43 }
 0x5a8   : > { %v11252_v31 = vrot.slane %v11087_v46, 7  ;;  %v11254_v18 = vrot.slane %v11088_v40, 7  ;;  %v13427_v41 = vsel %vm23459_vm4, %v13209_v50, %v13426_v0  ;;  %v11925_v62 = vsel %vm22440_vm8, %v23458_v8, %v23457_v11 }
 0x5a9   : > { %vm23461_vm11 = vcmask 1044484   ;;  %v11926_v37 = vsel %vm22441_vm7, %v23434_v13, %v23460_v23  ;;  %vm23464_vm9 = vcmask 1045509   ;;  %v12049_v19 = vrot.slane %v11921_v44, 7 }
 0x5aa   : > { %v13428_v30 = vsel %vm23461_vm11, %v13213_v52, %v13427_v41  ;;  %v20769_v20 = vrot.slane %v11252_v31, 2  ;;  %v20771_v59 = vrot.slane %v11254_v18, 2  ;;  %v12053_v63 = vrot.slane %v11925_v62, 7 }
 0x5ab   : > { %v13429_v2 = vsel %vm23464_vm9, %v13217_v21, %v13428_v30  ;;  %v12054_v28 = vrot.slane %v11926_v37, 7  ;;  %vm23465_vm0 = vcmask 1046534   ;;  %v23468_v35 = vrot.slane %v23467_v58, 7 }
 0x5ac   : > { %23462 = vst [vmem:[#allocation58_spill] sm:$0xff] %v20769_v20  ;;  %23463 = vst [vmem:[#allocation5_spill] sm:$0xff] %v20771_v59  ;;  %v13430_v39 = vsel %vm23465_vm0, %v13221_v60, %v13429_v2  ;;  %vm22443_vm4 = vcmp.gt.f32.partialorder %v20713_v36, %v20769_v20  ;;  %vm22442_vm11 = vcmp.gt.f32.partialorder %v23466_v1, %v20771_v59  ;;  %v23470_v61 = vmov 0  ;;  %v23490_v2 = vld [vmem:[#allocation207_spill] sm:$0xff] }
 0x5ad   : > { %vm20787_vm8 = vcmp.gt.f32.partialorder %v23469_v53, %v23468_v35  ;;  %vm23473_vm7 = vcmask 1047559   ;;  %v11927_v50 = vsel %vm22443_vm4, %v20713_v36, %v20769_v20  ;;  %v11928_v52 = vsel %vm22442_vm11, %v23466_v1, %v20771_v59  ;;  %v23512_v59 = vld [vmem:[#allocation53_spill] sm:$0xff]  ;;  %v23523_v20 = vld [vmem:[#allocation10_spill] sm:$0xff] }
 0x5ae   : > { %v23471_v61 = vsel %vm20787_vm8, 4294967295, %v23470_v61  ;;  %v13431_v48 = vsel %vm23473_vm7, %v13225_v24, %v13430_v39  ;;  %vm20803_vm9 = vcmp.gt.f32.partialorder %v23455_v56, %v12049_v19  ;;  %v23474_v21 = vmov 0 }
 0x5af   : > { %23472 = vst [vmem:[#allocation82_spill] sm:$0xff] %v23471_v61  ;;  %v23475_v21 = vsel %vm20803_vm9, 4294967295, %v23474_v21  ;;  %13475 = vxpose.xlu1.b32.cont [2/8] (short) (narrow) %v13431_v48, 16  ;;  %v12055_v60 = vrot.slane %v11927_v50, 7  ;;  %v12056_v24 = vrot.slane %v11928_v52, 7  ;;  %vm20808_vm7 = vcmp.gt.f32.partialorder %v23458_v8, %v12053_v63 }
 0x5b0   : > { %23476 = vst [vmem:[#allocation80_spill] sm:$0xff] %v23475_v21  ;;  %v23477_v33 = vmov 0  ;;  %vm20813_vm0 = vcmp.gt.f32.partialorder %v23434_v13, %v12054_v28  ;;  %v23480_v16 = vmov 0  ;;  %v12633_v46 = vsel %vm20803_vm9, %v23455_v56, %v12049_v19 }
 0x5b1   : > { %v23478_v33 = vsel %vm20808_vm7, 4294967295, %v23477_v33  ;;  %v23481_v16 = vsel %vm20813_vm0, 4294967295, %v23480_v16  ;;  %v23483_v38 = vmov %v23468_v35  ;;  %v12637_v0 = vsel %vm20808_vm7, %v23458_v8, %v12053_v63  ;;  %v23491_v35 = vld [vmem:[#allocation205_spill] sm:$0xff] }
 0x5b2   : > { %23479 = vst [vmem:[#allocation47_spill] sm:$0xff] %v23478_v33  ;;  %23482 = vst [vmem:[#allocation51_spill] sm:$0xff] %v23481_v16  ;;  %v12635_v40 = vsel %vm20787_vm8, %v23469_v53, %v23483_v38  ;;  %v12638_v31 = vsel %vm20813_vm0, %v23434_v13, %v12054_v28  ;;  %vm20832_vm11 = vcmp.gt.f32.partialorder %v20713_v36, %v12055_v60  ;;  %v23484_v18 = vmov 0  ;;  %v23496_v38 = vld [vmem:[#allocation73_spill] sm:$0xff]  ;;  %v23538_v13 = vld [vmem:[#allocation90_spill] sm:$0xff] }
 0x5b3   : > { %v23485_v18 = vsel %vm20832_vm11, 4294967295, %v23484_v18  ;;  %vm20837_vm4 = vcmp.gt.f32.partialorder %v23466_v1, %v12056_v24  ;;  %v23487_v41 = vmov 0  ;;  %v12857_v44 = vrot.slane %v12633_v46, %v15742_v42 }
 0x5b4   : > { %23486 = vst [vmem:[#allocation41_spill] sm:$0xff] %v23485_v18  ;;  %v23488_v41 = vsel %vm20837_vm4, 4294967295, %v23487_v41  ;;  %v12865_v62 = vrot.slane %v12635_v40, %v15742_v42  ;;  %v12639_v30 = vsel %vm20832_vm11, %v20713_v36, %v12055_v60  ;;  %v12640_v37 = vsel %vm20837_vm4, %v23466_v1, %v12056_v24  ;;  %v23495_v60 = vld [vmem:[#allocation70_spill] sm:$0xff]  ;;  %v23504_v18 = vld [vmem:[#allocation60_spill] sm:$0xff]  ;;  %v23524_v36 = vld [vmem:[#allocation9_spill] sm:$0xff] }
 0x5b5   : > { %23489 = vst [vmem:[#allocation37_spill] sm:$0xff] %v23488_v41  ;;  %v12869_v19 = vrot.slane %v23490_v2, %v15742_v42  ;;  %v12873_v63 = vrot.slane %v12637_v0, %v15742_v42  ;;  %v12877_v28 = vrot.slane %v12638_v31, %v15742_v42  ;;  %v12881_v39 = vrot.slane %v12639_v30, %v15742_v42  ;;  %v23498_v30 = vld [vmem:[#allocation79_spill] sm:$0xff]  ;;  %v23500_v2 = vld [vmem:[#allocation65_spill] sm:$0xff]  ;;  %v23522_v1 = vld [vmem:[#allocation98_spill] sm:$0xff] }
 0x5b6   : > { %v12885_v58 = vrot.slane %v12640_v37, %v15742_v42  ;;  %v23492_v48 = vrot.slane %v23491_v35, %v15742_v42  ;;  %vm23493_vm14 = vcmask 1041409   ;;  %vm23494_vm0 = vcmask 1042434   ;;  %v23499_v37 = vld [vmem:[#allocation74_spill] sm:$0xff] }
 0x5b7   : > { %v10550_v24 = vrot.slane %v23495_v60, %v18458_v34  ;;  %v10557_v46 = vrot.slane %v23495_v60, %v23290_v32  ;;  %v10806_v40 = vrot.slane %v23496_v38, %v18458_v34  ;;  %vm23497_vm4 = vcmask 1043459  }
 0x5b8   : > { %v13013_v50 = vsel %vm23493_vm14, %v23492_v48, %v12857_v44  ;;  %v10813_v31 = vrot.slane %v23496_v38, %v23290_v32  ;;  %vm23501_vm14 = vnez %v23500_v2  ;;  %vm23503_vm11 = vcmask 1045509   ;;  %v23509_v2 = vld [vmem:[#allocation88_spill] sm:$0xff] }
 0x5b9   : > { %v13014_v52 = vsel %vm23494_vm0, %v12865_v62, %v13013_v50  ;;  %v11005_v44 = vsel %vm23501_vm14, %v23499_v37, %v23498_v30  ;;  %v11436_v62 = vadd.s32 16, %v23496_v38  ;;  %vm23502_vm0 = vcmask 1044484  }
 0x5ba   : > { %v13015_v0 = vsel %vm23497_vm4, %v12869_v19, %v13014_v52  ;;  %v10708_v48 = vrot.slane %v10550_v24, 7  ;;  %v10709_v50 = vrot.slane %v10557_v46, 7  ;;  %v10964_v60 = vrot.slane %v10806_v40, 7  ;;  %v23506_v52 = vld [vmem:[#allocation102_spill] sm:$0xff] }
 0x5bb   : > { %v13016_v35 = vsel %vm23502_vm0, %v12873_v63, %v13015_v0  ;;  %v10965_v16 = vrot.slane %v10813_v31, 7  ;;  %vm23505_vm4 = vnez %v23504_v18  ;;  %vm23507_vm7 = vnez %v23506_v52 }
 0x5bc   : > { %v13017_v41 = vsel %vm23503_vm11, %v12877_v28, %v13016_v35  ;;  %v11007_v19 = vsel %vm23505_vm4, %v10550_v24, %v10806_v40  ;;  %v11009_v33 = vsel %vm23507_vm7, %v10557_v46, %v10813_v31  ;;  %vm23508_vm8 = vcmask 1046534  }
 0x5bd   : > { %v13018_v61 = vsel %vm23508_vm8, %v12881_v39, %v13017_v41  ;;  %vm23510_vm14 = vnez %v23509_v2  ;;  %v11504_v37 = vrot.slane %v11436_v62, %v22778_v7  ;;  %v11511_v63 = vrot.slane %v11436_v62, %v18512_v14  ;;  %v23518_v2 = vld [vmem:[#allocation6_spill] sm:$0xff] }
 0x5be   : > { %v11006_v30 = vsel %vm23510_vm14, %v10708_v48, %v10964_v60  ;;  %vm23511_vm0 = vcmask 1047559   ;;  %vm23513_vm11 = vnez %v23512_v59  ;;  %v11518_v18 = vrot.slane %v11436_v62, %v18458_v34  ;;  %v23515_v59 = vld [vmem:[#allocation7_spill] sm:$0xff] }
 0x5bf   : > { %v13019_v0 = vsel %vm23511_vm0, %v12885_v58, %v13018_v61  ;;  %v11008_v28 = vsel %vm23513_vm11, %v10709_v50, %v10965_v16  ;;  %v11525_v24 = vrot.slane %v11436_v62, %v23290_v32  ;;  %vm23514_vm4 = vcmask 130048   ;;  %v23517_v50 = vld [vmem:[#allocation24_spill] sm:$0xff] }
 0x5c0   : > { %v20891_v46 = vsel %vm23514_vm4, %v13019_v0, 0.0  ;;  %v11674_v41 = vrot.slane %v11504_v37, 1  ;;  %v11675_v39 = vrot.slane %v11511_v63, 1  ;;  %v13750_v40 = vrot.slane %v11005_v44, 9 }
 0x5c1   : > { %v22460_v31 = vrot.slane %v20891_v46, 1  ;;  %v11676_v35 = vrot.slane %v11518_v18, 1  ;;  %v11677_v48 = vrot.slane %v11525_v24, 1  ;;  %v13751_v60 = vrot.slane %v11006_v30, 9  ;;  %v23526_v30 = vld [vmem:[#allocation95_spill] sm:$0xff] }
 0x5c2   : > { %v13752_v52 = vrot.slane %v11007_v19, 9  ;;  %v13753_v61 = vrot.slane %v11008_v28, 9  ;;  %v13754_v58 = vrot.slane %v11009_v33, 9  ;;  %v23516_v16 = vrot.slane %v23515_v59, 9  ;;  %v23528_v28 = vld [vmem:[#allocation93_spill] sm:$0xff]  ;;  %v23529_v59 = vld [vmem:[#allocation92_spill] sm:$0xff] }
 0x5c3   : > { %vm23519_vm8 = vcmp.gt.f32.partialorder %v23517_v50, %v23518_v2  ;;  %v23520_v0 = vrot.slane %v20653_v47, 1  ;;  %vm23521_vm7 = vcmask 1046528   ;;  %vm23525_vm14 = vcmp.gt.f32.partialorder %v23523_v20, %v23524_v36  ;;  %v23531_v50 = vld [vmem:[#allocation100_spill] sm:$0xff]  ;;  %v23534_v2 = vld [vmem:[#allocation99_spill] sm:$0xff]  ;;  %v23541_v20 = vld [vmem:[#allocation61_spill] sm:$0xff] }
 0x5c4   : > { %v11842_v62 = vsel %vm23519_vm8, %v11504_v37, %v23516_v16  ;;  %v11843_v19 = vsel %vm23525_vm14, %v11674_v41, %v23522_v1  ;;  %v23527_v33 = vrot.slane %v23526_v30, 9  ;;  %vm23530_vm0 = vcmp.gt.f32.partialorder %v23528_v28, %v23529_v59  ;;  %v23532_v37 = vld [vmem:[#allocation97_spill] sm:$0xff]  ;;  %v23535_v47 = vld [vmem:[#allocation104_spill] sm:$0xff]  ;;  %v23540_v36 = vld [vmem:[#allocation103_spill] sm:$0xff]  ;;  %v13917_v59 = vpop.f32.mrb[28].mxu1 }
 0x5c5   : > { %v20904_v44 = vsel %vm23521_vm7, %v23520_v0, %v22460_v31  ;;  %vm23533_vm11 = vcmp.gt.f32.partialorder %v23531_v50, %v23532_v37  ;;  %vm23536_vm4 = vcmp.gt.f32.partialorder %v23534_v2, %v23535_v47  ;;  %v23537_v31 = vld [vmem:[#allocation54_spill] sm:$0xff]  ;;  %vm23542_vm7 = vcmp.gt.f32.partialorder %v23540_v36, %v23541_v20 }
 0x5c6   : > { %v11844_v23 = vsel %vm23530_vm0, %v11511_v63, %v23527_v33  ;;  %v11845_v16 = vsel %vm23533_vm11, %v11675_v39, %v13750_v40  ;;  %v11846_v0 = vsel %vm23536_vm4, %v11518_v18, %v13751_v60  ;;  %vm23539_vm8 = vcmp.gt.f32.partialorder %v23537_v31, %v23538_v13  ;;  %v20934_v13 = vld [vmem:[%s21895_s8] ss:$0 sm:$0xff] }
 0x5c7   : > { %v11847_v11 = vsel %vm23539_vm8, %v11676_v35, %v13752_v52  ;;  %v11848_v1 = vsel %vm23542_vm7, %v11525_v24, %v13753_v61  ;;  %vm23543_vm14 = vcmp.gt.f32.partialorder %v23343_v3, %v19130_v49  ;;  %v12212_v41 = vadd.s32 17, %v23496_v38  ;;  %v23544_v38 = vld [vmem:[#allocation134_spill] sm:$0xff] }
 0x5c8   : > { %v11849_v63 = vsel %vm23543_vm14, %v11677_v48, %v13754_v58  ;;  %v12490_v30 = vrot.slane %v11842_v62, 7  ;;  %v12491_v39 = vrot.slane %v11843_v19, 7  ;;  %v12492_v40 = vrot.slane %v11844_v23, 7  ;;  %v20943_v23 = vld [vmem:[%s21896_s9] ss:$0 sm:$0xff]  ;;  %v23545_v48 = vld [vmem:[#allocation146_spill] sm:$0xff] }
 0x5c9   : > { %v12493_v33 = vrot.slane %v11845_v16, 7  ;;  %v12494_v28 = vrot.slane %v11846_v0, 7  ;;  %v12495_v18 = vrot.slane %v11847_v11, 7  ;;  %v12496_v60 = vrot.slane %v11848_v1, 7  ;;  %v23547_v58 = vld [vmem:[#allocation147_spill] sm:$0xff]  ;;  %v9506_v0 = vpop.f32.mrb[29].mxu1 }
 0x5ca   : > { %v12280_v24 = vrot.slane %v12212_v41, %v22778_v7  ;;  %v12287_v31 = vrot.slane %v12212_v41, %v18512_v14  ;;  %v12294_v49 = vrot.slane %v12212_v41, %v18458_v34  ;;  %v12301_v3 = vrot.slane %v12212_v41, %v23290_v32  ;;  %v23550_v1 = vld [vmem:[#allocation94_spill] sm:$0xff]  ;;  %v23552_v41 = vld [vmem:[#allocation91_spill] sm:$0xff] }
 0x5cb   : > { %v12497_v11 = vrot.slane %v11849_v63, 7  ;;  %v20947_v35 = vcombine.high %v23544_v38, %v23544_v38  ;;  %v23546_v52 = vrot.slane %v23545_v48, 7  ;;  %v23548_v62 = vrot.slane %v23547_v58, 7  ;;  %v13918_v58 = vpop.f32.mrb[30].mxu1 }
 0x5cc   : > { %v12450_v50 = vrot.slane %v12280_v24, 7  ;;  %v12451_v37 = vrot.slane %v12287_v31, 7  ;;  %v12452_v16 = vrot.slane %v12294_v49, 7  ;;  %v12453_v2 = vrot.slane %v12301_v3, 7 }
 0x5cd   : > { %v20951_v61 = vrot.slane %v23546_v52, 2  ;;  %v20955_v19 = vrot.slane %v23548_v62, 2  ;;  %v9546_v47 = vmul.f32 %v13917_v59, %v20934_v13  ;;  %v20960_v20 = vsel %vm20324_vm3, %v12280_v24, %v12491_v39  ;;  %v23554_v62 = vld [vmem:[#allocation110_spill] sm:$0xff]  ;;  %v23556_v59 = vld [vmem:[#allocation111_spill] sm:$0xff] }
 0x5ce   : > { %vm23551_vm0 = vnez %v23550_v1  ;;  %vm23553_vm11 = vnez %v23552_v41  ;;  %v9544_v52 = vmul.f32 %v20934_v13, %v9506_v0  ;;  %vm23555_vm4 = vnez %v23554_v62  ;;  %v23558_v39 = vld [vmem:[#allocation23_spill] sm:$0xff] }
 0x5cf   : > { %v20964_v63 = vsel %vm23551_vm0, %v12287_v31, %v12493_v33  ;;  %v20968_v48 = vsel %vm23553_vm11, %v12294_v49, %v12495_v18  ;;  %v12554_v8 = vsel %vm23555_vm4, %v12450_v50, %v12490_v30  ;;  %vm23557_vm8 = vnez %v23556_v59  ;;  %v9509_v18 = vpop.f32.mrb[31].mxu1  ;;  %v23560_v49 = vld [vmem:[#allocation77_spill] sm:$0xff] }
 0x5d0   : > { %v20975_v53 = vsel %vm23557_vm8, %v12451_v37, %v12492_v40  ;;  %vm23559_vm3 = vnez %v23558_v39  ;;  %v9561_v33 = vadd.f32 %v20943_v23, %v9546_v47  ;;  %v9547_v31 = vmul.f32 %v13918_v58, %v20934_v13  ;;  %v23563_v58 = vld [vmem:[#allocation36_spill] sm:$0xff]  ;;  %v23564_v39 = vld [vmem:[#allocation217_spill] sm:$0xff] }
 0x5d1   : > { %v20979_v24 = vsel %vm23559_vm3, %v12452_v16, %v12494_v28  ;;  %vm23561_vm7 = vnez %v23560_v49  ;;  %v20989_v30 = vsel %vm20553_vm12, %v12301_v3, %v12497_v11  ;;  %v9559_v40 = vadd.f32 %v20943_v23, %v9544_v52  ;;  %v23562_v16 = vld [vmem:[#allocation248_spill] sm:$0xff] }
 0x5d2   : > { %v20985_v0 = vsel %vm23561_vm7, %v12453_v2, %v12496_v60  ;;  %v9545_v50 = vmul.f32 %v20934_v13, %v9509_v18  ;;  %v13229_v28 = vrot.slane %v12554_v8, %v15742_v42  ;;  %v13233_v37 = vrot.slane %v20960_v20, %v15742_v42 }
 0x5d3   : > { %vm9569_vm14 = vcmp.gt.f32.partialorder %v9561_v33, 0.0  ;;  %v9578_v47 = vmul.f32 %v23562_v16, %v9561_v33  ;;  %v9562_v36 = vadd.f32 %v20943_v23, %v9547_v31  ;;  %v13237_v60 = vrot.slane %v20975_v53, %v15742_v42 }
 0x5d4   : > { %vm9567_vm0 = vcmp.gt.f32.partialorder %v9559_v40, 0.0  ;;  %v9576_v54 = vmul.f32 %v23562_v16, %v9559_v40  ;;  %v9560_v3 = vadd.f32 %v20943_v23, %v9545_v50  ;;  %v13241_v11 = vrot.slane %v20964_v63, %v15742_v42 }
 0x5d5   : > { %v9586_v8 = vsel %vm9569_vm14, %v9561_v33, %v9578_v47  ;;  %vm9570_vm12 = vcmp.gt.f32.partialorder %v9562_v36, 0.0  ;;  %v9579_v2 = vmul.f32 %v23562_v16, %v9562_v36  ;;  %v13245_v20 = vrot.slane %v20979_v24, %v15742_v42  ;;  %v23565_v33 = vld [vmem:[#allocation138_spill] sm:$0xff] }
 0x5d6   : > { %v9584_v1 = vsel %vm9567_vm0, %v9559_v40, %v9576_v54  ;;  %vm9568_vm11 = vcmp.gt.f32.partialorder %v9560_v3, 0.0  ;;  %v9577_v41 = vmul.f32 %v23562_v16, %v9560_v3  ;;  %v13095_v53 = vadd.f32 %v20689_v26, %v9586_v8  ;;  %v23566_v24 = vld [vmem:[#allocation50_spill] sm:$0xff]  ;;  %v23567_v40 = vld [vmem:[#allocation148_spill] sm:$0xff]  ;;  %v13921_v26 = vpop.f32.mrb[32].mxu1 }
 0x5d7   : > { %v9587_v52 = vsel %vm9570_vm12, %v9562_v36, %v9579_v2  ;;  %v13093_v62 = vadd.f32 %v23563_v58, %v9584_v1  ;;  %v13249_v59 = vrot.slane %v20968_v48, %v15742_v42  ;;  %v13253_v63 = vrot.slane %v20985_v0, %v15742_v42  ;;  %v9522_v36 = vpop.f32.mrb[33].mxu1  ;;  %v23570_v2 = vld [vmem:[#allocation16_spill] sm:$0xff] }
 0x5d8   : > { %v9585_v31 = vsel %vm9568_vm11, %v9560_v3, %v9577_v41  ;;  %vm13103_vm8 = vcmp.gt.f32.partialorder %v13095_v53, 0.0  ;;  %v13112_v18 = vmul.f32 %v23566_v24, %v13095_v53  ;;  %v13096_v49 = vadd.f32 %v20904_v44, %v9587_v52  ;;  %v23568_v44 = vld [vmem:[#allocation31_spill] sm:$0xff]  ;;  %v23574_v41 = vld [vmem:[#allocation218_spill] sm:$0xff] }
 0x5d9   : > { %vm13101_vm7 = vcmp.gt.f32.partialorder %v13093_v62, 0.0  ;;  %v13110_v50 = vmul.f32 %v23566_v24, %v13093_v62  ;;  %v13094_v48 = vadd.f32 %v20467_v57, %v9585_v31  ;;  %v13257_v0 = vrot.slane %v20989_v30, %v15742_v42  ;;  %v23576_v57 = vld [vmem:[#allocation129_spill] sm:$0xff] }
 0x5da   : > { %v9550_v47 = vmul.f32 %v13921_v26, %v20934_v13  ;;  %v13120_v54 = vsel %vm13103_vm8, %v13095_v53, %v13112_v18  ;;  %vm13104_vm14 = vcmp.gt.f32.partialorder %v13096_v49, 0.0  ;;  %v13113_v3 = vmul.f32 %v23566_v24, %v13096_v49  ;;  %v13922_v53 = vpop.f32.mrb[34].mxu1 }
 0x5db   : > { %v23569_v8 = vrot.slane %v23568_v44, 7  ;;  %v23571_v1 = vmov 0  ;;  %v23575_v52 = vrot.slane %v23574_v41, 7  ;;  %v23577_v58 = vmov 0  ;;  %v9525_v27 = vpop.f32.mrb[35].mxu1 }
 0x5dc   : > { %v9548_v30 = vmul.f32 %v20934_v13, %v9522_v36  ;;  %v13118_v31 = vsel %vm13101_vm7, %v13093_v62, %v13110_v50  ;;  %vm13102_vm11 = vcmp.gt.f32.partialorder %v13094_v48, 0.0  ;;  %v13111_v18 = vmul.f32 %v23566_v24, %v13094_v48 }
 0x5dd   : > { %vm21029_vm0 = vcmp.gt.f32.partialorder %v23570_v2, %v23569_v8  ;;  %vm21036_vm12 = vcmp.gt.f32.partialorder %v23576_v57, %v23575_v52  ;;  %v9565_v26 = vadd.f32 %v20943_v23, %v9550_v47  ;;  %v9551_v8 = vmul.f32 %v13922_v53, %v20934_v13  ;;  %13126 = vxpose.xlu0.b32.start [1/8] (short) (narrow) %v13118_v31, 32 }
 0x5de   : > { %v23572_v1 = vsel %vm21029_vm0, 4294967295, %v23571_v1  ;;  %v23578_v58 = vsel %vm21036_vm12, 4294967295, %v23577_v58  ;;  %v13121_v22 = vsel %vm13104_vm14, %v13096_v49, %v13113_v3  ;;  %vm23580_vm8 = vcmask 1041409  }
 0x5df   : > { %23573 = vst [vmem:[#allocation55_spill] sm:$0xff] %v23572_v1  ;;  %23579 = vst [vmem:[#allocation84_spill] sm:$0xff] %v23578_v58  ;;  %v13432_v21 = vsel %vm23580_vm8, %v13233_v37, %v13229_v28  ;;  %v9563_v52 = vadd.f32 %v20943_v23, %v9548_v30  ;;  %v9549_v25 = vmul.f32 %v20934_v13, %v9525_v27  ;;  %vm23581_vm3 = vcmask 1042434  }
 0x5e0   : > { %v13119_v12 = vsel %vm13102_vm11, %v13094_v48, %v13111_v18  ;;  %v13433_v36 = vsel %vm23581_vm3, %v13237_v60, %v13432_v21  ;;  %vm9573_vm7 = vcmp.gt.f32.partialorder %v9565_v26, 0.0  ;;  %v9582_v62 = vmul.f32 %v23562_v16, %v9565_v26 }
 0x5e1   : > { %v9566_v50 = vadd.f32 %v20943_v23, %v9551_v8  ;;  %vm23582_vm4 = vcmask 1043459   ;;  %vm9571_vm15 = vcmp.gt.f32.partialorder %v9563_v52, 0.0  ;;  %v9580_v53 = vmul.f32 %v23562_v16, %v9563_v52  ;;  %13127 = vxpose.xlu0.b32.cont [2/8] (short) (narrow) %v13119_v12, 32 }
 0x5e2   : > { %v13434_v47 = vsel %vm23582_vm4, %v13241_v11, %v13433_v36  ;;  %v9564_v49 = vadd.f32 %v20943_v23, %v9549_v25  ;;  %vm23583_vm14 = vcmask 1044484   ;;  %v21054_v37 = vsel %vm9573_vm7, %v9565_v26, %v9582_v62  ;;  %v23588_v23 = vld [vmem:[#allocation193_spill] sm:$0xff] }
 0x5e3   : > { %v13435_v28 = vsel %vm23583_vm14, %v13245_v20, %v13434_v47  ;;  %vm9574_vm8 = vcmp.gt.f32.partialorder %v9566_v50, 0.0  ;;  %v9583_v27 = vmul.f32 %v23562_v16, %v9566_v50  ;;  %vm23584_vm3 = vcmask 1045509   ;;  %v23589_v20 = vld [vmem:[#allocation208_spill] sm:$0xff] }
 0x5e4   : > { %v13436_v21 = vsel %vm23584_vm3, %v13249_v59, %v13435_v28  ;;  %v21058_v13 = vsel %vm9571_vm15, %v9563_v52, %v9580_v53  ;;  %vm9572_vm11 = vcmp.gt.f32.partialorder %v9564_v49, 0.0  ;;  %v9581_v60 = vmul.f32 %v23562_v16, %v9564_v49  ;;  %v23590_v59 = vld [vmem:[#allocation136_spill] sm:$0xff]  ;;  %v23597_v53 = vld [vmem:[#allocation106_spill] sm:$0xff] }
 0x5e5   : > { %vm23585_vm4 = vcmask 1046534   ;;  %v21062_v48 = vsel %vm9574_vm8, %v9566_v50, %v9583_v27  ;;  %vm23587_vm6 = vcmask 1047559   ;;  %vm22474_vm7 = vcmp.gt.f32.partialorder %v23589_v20, %v23588_v23  ;;  %13128 = vxpose.xlu0.b32.cont [3/8] (short) (narrow) %v13120_v54, 32  ;;  %v23781_v52 = vld [vmem:[#allocation242_spill] sm:$0xff] }
 0x5e6   : > { %v13437_v11 = vsel %vm23585_vm4, %v13253_v63, %v13436_v21  ;;  %23586 = vst [vmem:[#allocation85_spill] sm:$0xff] %v21062_v48  ;;  %vm22473_vm14 = vcmp.gt.f32.partialorder %v20947_v35, %v20951_v61  ;;  %v21069_v12 = vsel %vm9572_vm11, %v9564_v49, %v9581_v60  ;;  %vm22472_vm15 = vcmp.gt.f32.partialorder %v23590_v59, %v20955_v19 }
 0x5e7   : > { %v13438_v25 = vsel %vm23587_vm6, %v13257_v0, %v13437_v11  ;;  %v11929_v16 = vsel %vm22474_vm7, %v23589_v20, %v23588_v23  ;;  %vm23591_vm6 = vcmp.gt.f32.partialorder %v23565_v33, %v23564_v39  ;;  %vm23592_vm8 = vcmp.gt.f32.partialorder %v23544_v38, %v23567_v40 }
 0x5e8   : > { %13476 = vxpose.xlu1.b32.cont [3/8] (short) (narrow) %v13438_v25, 16  ;;  %v11933_v63 = vsel %vm23591_vm6, %v23565_v33, %v23564_v39  ;;  %v11934_v0 = vsel %vm23592_vm8, %v23544_v38, %v23567_v40  ;;  %v11935_v3 = vsel %vm22473_vm14, %v20947_v35, %v20951_v61  ;;  %v11936_v30 = vsel %vm22472_vm15, %v23590_v59, %v20955_v19 }
 0x5e9   : > { %v12057_v31 = vrot.slane %v11929_v16, 7  ;;  %v12061_v54 = vrot.slane %v11933_v63, 7  ;;  %v12062_v18 = vrot.slane %v11934_v0, 7  ;;  %v12063_v26 = vrot.slane %v11935_v3, 7  ;;  %13129 = vxpose.xlu0.b32.cont [4/8] (short) (narrow) %v13121_v22, 32 }
 0x5ea   : > { %v12064_v8 = vrot.slane %v11936_v30, 7  ;;  %v23595_v36 = vrot.slane %v23568_v44, 7  ;;  %v23596_v50 = vrot.slane %v23574_v41, 7  ;;  %v10578_v49 = vrot.slane %v23597_v53, %v18458_v34 }
 0x5eb   : > { %vm21099_vm3 = vcmp.gt.f32.partialorder %v23589_v20, %v12057_v31  ;;  %vm21116_vm11 = vcmp.gt.f32.partialorder %v23565_v33, %v12061_v54  ;;  %v23598_v28 = vmov 0  ;;  %vm21121_vm4 = vcmp.gt.f32.partialorder %v23544_v38, %v12062_v18 }
 0x5ec   : > { %v12643_v62 = vsel %vm21029_vm0, %v23570_v2, %v23595_v36  ;;  %v12644_v47 = vsel %vm21036_vm12, %v23576_v57, %v23596_v50  ;;  %v23599_v28 = vsel %vm21116_vm11, 4294967295, %v23598_v28  ;;  %v23601_v44 = vmov 0 }
 0x5ed   : > { %23600 = vst [vmem:[#allocation87_spill] sm:$0xff] %v23599_v28  ;;  %v23602_v44 = vsel %vm21121_vm4, 4294967295, %v23601_v44  ;;  %vm21126_vm6 = vcmp.gt.f32.partialorder %v20947_v35, %v12063_v26  ;;  %v23604_v41 = vmov 0  ;;  %vm21131_vm8 = vcmp.gt.f32.partialorder %v23590_v59, %v12064_v8 }
 0x5ee   : > { %23603 = vst [vmem:[#allocation108_spill] sm:$0xff] %v23602_v44  ;;  %v23605_v41 = vsel %vm21126_vm6, 4294967295, %v23604_v41  ;;  %v23607_v27 = vmov 0  ;;  %v12641_v21 = vsel %vm21099_vm3, %v23589_v20, %v12057_v31  ;;  %v12645_v60 = vsel %vm21116_vm11, %v23565_v33, %v12061_v54 }
 0x5ef   : > { %23606 = vst [vmem:[#allocation123_spill] sm:$0xff] %v23605_v41  ;;  %v23608_v27 = vsel %vm21131_vm8, 4294967295, %v23607_v27  ;;  %v12646_v11 = vsel %vm21121_vm4, %v23544_v38, %v12062_v18  ;;  %v12647_v25 = vsel %vm21126_vm6, %v20947_v35, %v12063_v26  ;;  %v12648_v22 = vsel %vm21131_vm8, %v23590_v59, %v12064_v8  ;;  %v23610_v18 = vld [vmem:[#allocation232_spill] sm:$0xff] }
 0x5f0   : > { %23609 = vst [vmem:[#allocation125_spill] sm:$0xff] %v23608_v27  ;;  %v12889_v16 = vrot.slane %v12641_v21, %v15742_v42  ;;  %v12897_v63 = vrot.slane %v12643_v62, %v15742_v42  ;;  %v12901_v0 = vrot.slane %v12644_v47, %v15742_v42  ;;  %v12905_v3 = vrot.slane %v12645_v60, %v15742_v42  ;;  %v23613_v62 = vld [vmem:[#allocation105_spill] sm:$0xff] }
 0x5f1   : > { %v12909_v30 = vrot.slane %v12646_v11, %v15742_v42  ;;  %v12913_v31 = vrot.slane %v12647_v25, %v15742_v42  ;;  %v12917_v54 = vrot.slane %v12648_v22, %v15742_v42  ;;  %v23611_v26 = vrot.slane %v23610_v18, %v15742_v42  ;;  %v23615_v11 = vld [vmem:[#allocation107_spill] sm:$0xff]  ;;  %v23616_v25 = vld [vmem:[#allocation109_spill] sm:$0xff]  ;;  %v23617_v22 = vld [vmem:[#allocation112_spill] sm:$0xff] }
 0x5f2   : > { %vm23612_vm15 = vcmask 1041409   ;;  %v10585_v8 = vrot.slane %v23597_v53, %v23290_v32  ;;  %v10712_v50 = vrot.slane %v10578_v49, 7  ;;  %v10834_v47 = vrot.slane %v23613_v62, %v18458_v34 }
 0x5f3   : > { %v13020_v36 = vsel %vm23612_vm15, %v23611_v26, %v12889_v16  ;;  %vm23614_vm14 = vcmask 1042434   ;;  %v10841_v60 = vrot.slane %v23613_v62, %v23290_v32  ;;  %vm23618_vm7 = vnez %v23617_v22 }
 0x5f4   : > { %v13021_v21 = vsel %vm23614_vm14, %v12897_v63, %v13020_v36  ;;  %v11013_v48 = vsel %vm23618_vm7, %v23616_v25, %v23615_v11  ;;  %v11437_v18 = vadd.s32 16, %v23613_v62  ;;  %vm23619_vm15 = vcmask 1043459   ;;  %v23621_v36 = vld [vmem:[#allocation122_spill] sm:$0xff]  ;;  %v23624_v11 = vld [vmem:[#allocation116_spill] sm:$0xff] }
 0x5f5   : > { %v13022_v16 = vsel %vm23619_vm15, %v12901_v0, %v13021_v21  ;;  %v10713_v26 = vrot.slane %v10585_v8, 7  ;;  %v10968_v53 = vrot.slane %v10834_v47, 7  ;;  %v11015_v27 = vsel %vm20415_vm2, %v10578_v49, %v10834_v47 }
 0x5f6   : > { %vm23620_vm8 = vcmask 1044484   ;;  %v10969_v63 = vrot.slane %v10841_v60, 7  ;;  %vm23622_vm14 = vnez %v23621_v36  ;;  %v11532_v41 = vrot.slane %v11437_v18, %v22778_v7 }
 0x5f7   : > { %v13023_v44 = vsel %vm23620_vm8, %v12905_v3, %v13022_v16  ;;  %v11017_v58 = vsel %vm23622_vm14, %v10585_v8, %v10841_v60  ;;  %vm23623_vm4 = vcmask 1045509   ;;  %vm23625_vm7 = vnez %v23624_v11  ;;  %v23643_v11 = vld [vmem:[#allocation117_spill] sm:$0xff] }
 0x5f8   : > { %v13024_v22 = vsel %vm23623_vm4, %v12909_v30, %v13023_v44  ;;  %v11014_v25 = vsel %vm23625_vm7, %v10712_v50, %v10968_v53  ;;  %v11539_v0 = vrot.slane %v11437_v18, %v18512_v14  ;;  %v11546_v21 = vrot.slane %v11437_v18, %v18458_v34 }
 0x5f9   : > { %vm23626_vm15 = vcmask 1046534   ;;  %v11016_v49 = vsel %vm20434_vm5, %v10713_v26, %v10969_v63  ;;  %v11553_v3 = vrot.slane %v11437_v18, %v23290_v32  ;;  %v11678_v47 = vrot.slane %v11532_v41, 1  ;;  %v23631_v63 = vld [vmem:[#allocation114_spill] sm:$0xff]  ;;  %v23632_v18 = vld [vmem:[#allocation113_spill] sm:$0xff] }
 0x5fa   : > { %v13025_v10 = vsel %vm23626_vm15, %v12913_v31, %v13024_v22  ;;  %vm23627_vm2 = vcmask 1047559   ;;  %v11679_v60 = vrot.slane %v11539_v0, 1  ;;  %v11680_v16 = vrot.slane %v11546_v21, 1 }
 0x5fb   : > { %v13026_v8 = vsel %vm23627_vm2, %v12917_v54, %v13025_v10  ;;  %v13758_v44 = vrot.slane %v11013_v48, 9  ;;  %vm23628_vm4 = vcmask 130048   ;;  %v11681_v50 = vrot.slane %v11553_v3, 1  ;;  %v23634_v54 = vld [vmem:[#allocation182_spill] sm:$0xff] }
 0x5fc   : > { %v21191_v30 = vsel %vm23628_vm4, %v13026_v8, 0.0  ;;  %v13759_v53 = vrot.slane %v11014_v25, 9  ;;  %v13760_v36 = vrot.slane %v11015_v27, 9  ;;  %v13761_v31 = vrot.slane %v11016_v49, 9  ;;  %v23638_v8 = vld [vmem:[#allocation124_spill] sm:$0xff]  ;;  %v23641_v49 = vld [vmem:[#allocation119_spill] sm:$0xff] }
 0x5fd   : > { %v13762_v22 = vrot.slane %v11017_v58, 9  ;;  %v23630_v26 = vrot.slane %v23629_v15, 9  ;;  %vm23633_vm5 = vcmp.gt.f32.partialorder %v23631_v63, %v23632_v18  ;;  %v23635_v10 = vrot.slane %v23634_v54, 7  ;;  %v23639_v27 = vld [vmem:[#allocation120_spill] sm:$0xff]  ;;  %v23644_v15 = vld [vmem:[#allocation115_spill] sm:$0xff]  ;;  %v23648_v63 = vld [vmem:[#allocation157_spill] sm:$0xff] }
 0x5fe   : > { %vm23640_vm14 = vcmp.gt.f32.partialorder %v23357_v17, %v23639_v27  ;;  %v23642_v58 = vrot.slane %v23641_v49, 9  ;;  %vm23645_vm7 = vcmp.gt.f32.partialorder %v23643_v11, %v23644_v15  ;;  %vm23646_vm15 = vcmp.gt.f32.partialorder %v23346_v45, %v23345_v51  ;;  %v23661_v49 = vld [vmem:[#allocation128_spill] sm:$0xff]  ;;  %v23663_v15 = vld [vmem:[#allocation133_spill] sm:$0xff] }
 0x5ff   : > { %v11850_v28 = vsel %vm23633_vm5, %v11532_v41, %v23630_v26  ;;  %vm21202_vm8 = vcmp.gt.f32.partialorder %v23634_v54, %v23635_v10  ;;  %v11851_v25 = vsel %vm23640_vm14, %v11678_v47, %v23638_v8  ;;  %v11853_v41 = vsel %vm23646_vm15, %v11679_v60, %v13758_v44 }
 0x600   : > { %v11852_v1 = vsel %vm23645_vm7, %v11539_v0, %v23642_v58  ;;  %vm23647_vm2 = vcmp.gt.f32.partialorder %v19302_v5, %v23347_v4  ;;  %v23649_v18 = vrot.slane %v23648_v63, 7  ;;  %v23652_v47 = vrot.slane %v21191_v30, 1 }
 0x601   : > { %v11854_v26 = vsel %vm23647_vm2, %v11546_v21, %v13759_v53  ;;  %v23653_v11 = vrot.slane %v20891_v46, 1  ;;  %vm23654_vm5 = vcmask 1046528   ;;  %vm23655_vm14 = vcmp.gt.f32.partialorder %v20500_v6, %v20521_v29 }
 0x602   : > { %vm21224_vm4 = vcmp.gt.f32.partialorder %v23648_v63, %v23649_v18  ;;  %v11855_v51 = vsel %vm23655_vm14, %v11680_v16, %v13760_v36  ;;  %vm23656_vm7 = vcmp.gt.f32.partialorder %v23352_v9, %v20534_v55  ;;  %vm23657_vm15 = vcmp.gt.f32.partialorder %v23455_v56, %v23454_v43 }
 0x603   : > { %v13078_v0 = vsel %vm23654_vm5, %v23653_v11, %v23652_v47  ;;  %v11856_v5 = vsel %vm23656_vm7, %v11553_v3, %v13761_v31  ;;  %v11857_v45 = vsel %vm23657_vm15, %v11681_v50, %v13762_v22  ;;  %v12213_v21 = vadd.s32 17, %v23613_v62  ;;  %v23666_v11 = vld [vmem:[#allocation22_spill] sm:$0xff]  ;;  %v23682_v31 = vld [vmem:[#allocation155_spill] sm:$0xff] }
 0x604   : > { %v13097_v4 = vadd.f32 %v13078_v0, %v21058_v13  ;;  %v12498_v60 = vrot.slane %v11850_v28, 7  ;;  %v12499_v46 = vrot.slane %v11851_v25, 7  ;;  %v12500_v44 = vrot.slane %v11852_v1, 7 }
 0x605   : > { %v12501_v53 = vrot.slane %v11853_v41, 7  ;;  %v12502_v10 = vrot.slane %v11854_v26, 7  ;;  %v12503_v8 = vrot.slane %v11855_v51, 7  ;;  %v12308_v29 = vrot.slane %v12213_v21, %v22778_v7  ;;  %v23668_v51 = vld [vmem:[#allocation40_spill] sm:$0xff] }
 0x606   : > { %vm13105_vm2 = vcmp.gt.f32.partialorder %v13097_v4, 0.0  ;;  %v13114_v6 = vmul.f32 %v23566_v24, %v13097_v4  ;;  %v12315_v55 = vrot.slane %v12213_v21, %v18512_v14  ;;  %v12322_v9 = vrot.slane %v12213_v21, %v18458_v34 }
 0x607   : > { %v12329_v43 = vrot.slane %v12213_v21, %v23290_v32  ;;  %v12504_v56 = vrot.slane %v11856_v5, 7  ;;  %v12505_v13 = vrot.slane %v11857_v45, 7  ;;  %v12454_v28 = vrot.slane %v12308_v29, 7 }
 0x608   : > { %v13122_v62 = vsel %vm13105_vm2, %v13097_v4, %v13114_v6  ;;  %v12455_v3 = vrot.slane %v12315_v55, 7  ;;  %v12563_v16 = vsel %vm20565_vm10, %v12308_v29, %v12499_v46  ;;  %v12456_v50 = vrot.slane %v12322_v9, 7 }
 0x609   : > { %13130 = vxpose.xlu0.b32.cont [5/8] (short) (narrow) %v13122_v62, 32  ;;  %v12457_v36 = vrot.slane %v12329_v43, 7  ;;  %v12565_v22 = vsel %vm20570_vm13, %v12315_v55, %v12501_v53  ;;  %v12567_v25 = vsel %vm20588_vm1, %v12322_v9, %v12503_v8  ;;  %vm23662_vm5 = vnez %v23661_v49  ;;  %v23676_v62 = vld [vmem:[#allocation166_spill] sm:$0xff] }
 0x60a   : > { %v12562_v58 = vsel %vm23662_vm5, %v12454_v28, %v12498_v60  ;;  %vm23664_vm14 = vnez %v23663_v15  ;;  %v12569_v18 = vsel %vm20803_vm9, %v12329_v43, %v12505_v13  ;;  %v13265_v47 = vrot.slane %v12563_v16, %v15742_v42  ;;  %v23677_v28 = vld [vmem:[#allocation190_spill] sm:$0xff]  ;;  %v23679_v16 = vld [vmem:[#allocation185_spill] sm:$0xff] }
 0x60b   : > { %v12564_v41 = vsel %vm23664_vm14, %v12455_v3, %v12500_v44  ;;  %vm23667_vm10 = vnez %v23666_v11  ;;  %vm23669_vm7 = vnez %v23668_v51  ;;  %v13261_v45 = vrot.slane %v12562_v58, %v15742_v42  ;;  %v23691_v11 = vld [vmem:[#allocation180_spill] sm:$0xff] }
 0x60c   : > { %v12566_v0 = vsel %vm23667_vm10, %v12456_v50, %v12502_v10  ;;  %v12568_v5 = vsel %vm23669_vm7, %v12457_v36, %v12504_v56  ;;  %v13269_v4 = vrot.slane %v12564_v41, %v15742_v42  ;;  %v13273_v21 = vrot.slane %v12565_v22, %v15742_v42  ;;  %v23671_v10 = vld [vmem:[#allocation209_spill] sm:$0xff]  ;;  %v23686_v41 = vld [vmem:[#allocation144_spill] sm:$0xff] }
 0x60d   : > { %v13277_v60 = vrot.slane %v12566_v0, %v15742_v42  ;;  %v13281_v46 = vrot.slane %v12567_v25, %v15742_v42  ;;  %v13285_v44 = vrot.slane %v12568_v5, %v15742_v42  ;;  %v13289_v53 = vrot.slane %v12569_v18, %v15742_v42  ;;  %v23689_v18 = vld [vmem:[#allocation187_spill] sm:$0xff]  ;;  %v23696_v5 = vld [vmem:[#allocation198_spill] sm:$0xff] }
 0x60e   : > { %vm23670_vm13 = vcmask 1041409   ;;  %v21276_v6 = vcombine.high %v23671_v10, %v23671_v10  ;;  %v23673_v29 = vrot.slane %v23634_v54, 7  ;;  %vm23674_vm1 = vcmask 1042434  }
 0x60f   : > { %v13439_v8 = vsel %vm23670_vm13, %v13265_v47, %v13261_v45  ;;  %v23675_v43 = vrot.slane %v23648_v63, 7  ;;  %vm22486_vm9 = vcmp.gt.f32.partialorder %v23677_v28, %v23676_v62  ;;  %vm23678_vm15 = vcmask 1043459  }
 0x610   : > { %23672 = vst [vmem:[#allocation126_spill] sm:$0xff] %v21276_v6  ;;  %v11103_v55 = vsel %vm21202_vm8, %v23634_v54, %v23673_v29  ;;  %v13440_v9 = vsel %vm23674_vm1, %v13269_v4, %v13439_v8  ;;  %vm22485_vm2 = vcmp.gt.f32.partialorder %v23671_v10, %v23679_v16  ;;  %v11941_v54 = vsel %vm22486_vm9, %v23677_v28, %v23676_v62 }
 0x611   : > { %v11104_v56 = vsel %vm21224_vm4, %v23648_v63, %v23675_v43  ;;  %v11284_v13 = vrot.slane %v11103_v55, 7  ;;  %v13441_v3 = vsel %vm23678_vm15, %v13273_v21, %v13440_v9  ;;  %vm23680_vm5 = vcmask 1044484  }
 0x612   : > { %v11286_v1 = vrot.slane %v11104_v56, 7  ;;  %v13442_v50 = vsel %vm23680_vm5, %v13277_v60, %v13441_v3  ;;  %v11942_v63 = vsel %vm22485_vm2, %v23671_v10, %v23679_v16  ;;  %v12065_v22 = vrot.slane %v23682_v31, 7  ;;  %v23707_v3 = vld [vmem:[#allocation195_spill] sm:$0xff]  ;;  %v23757_v16 = vld [vmem:[#allocation192_spill] sm:$0xff] }
 0x613   : > { %v21300_v36 = vrot.slane %v11284_v13, 2  ;;  %vm23683_vm14 = vcmask 1045509   ;;  %v12069_v49 = vrot.slane %v11941_v54, 7  ;;  %v12070_v58 = vrot.slane %v11942_v63, 7 }
 0x614   : > { %v13443_v27 = vsel %vm23683_vm14, %v13281_v46, %v13442_v50  ;;  %v21309_v25 = vrot.slane %v11286_v1, 2  ;;  %vm23685_vm10 = vcmask 1046534   ;;  %vm21315_vm13 = vcmp.gt.f32.partialorder %v23686_v41, %v12065_v22 }
 0x615   : > { %23681 = vst [vmem:[#allocation139_spill] sm:$0xff] %v21300_v36  ;;  %v13444_v15 = vsel %vm23685_vm10, %v13285_v44, %v13443_v27  ;;  %vm22484_vm7 = vcmp.gt.f32.partialorder %v21276_v6, %v21300_v36  ;;  %v23690_v47 = vrot.slane %v23689_v18, 7  ;;  %v23692_v0 = vmov 0  ;;  %v23714_v18 = vld [vmem:[#allocation154_spill] sm:$0xff] }
 0x616   : > { %23684 = vst [vmem:[#allocation127_spill] sm:$0xff] %v21309_v25  ;;  %vm23695_vm15 = vcmask 1047559   ;;  %vm22483_vm5 = vcmp.gt.f32.partialorder %v23696_v5, %v21309_v25  ;;  %v11943_v45 = vsel %vm22484_vm7, %v21276_v6, %v21300_v36  ;;  %vm21335_vm14 = vcmp.gt.f32.partialorder %v23677_v28, %v12069_v49  ;;  %v23751_v36 = vld [vmem:[#allocation177_spill] sm:$0xff] }
 0x617   : > { %vm21322_vm1 = vcmp.gt.f32.partialorder %v23691_v11, %v23690_v47  ;;  %v13445_v51 = vsel %vm23695_vm15, %v13289_v53, %v13444_v15  ;;  %v23697_v4 = vmov 0  ;;  %v11944_v21 = vsel %vm22483_vm5, %v23696_v5, %v21309_v25  ;;  %v23748_v25 = vld [vmem:[#allocation169_spill] sm:$0xff] }
 0x618   : > { %v23693_v0 = vsel %vm21322_vm1, 4294967295, %v23692_v0  ;;  %v23698_v4 = vsel %vm21335_vm14, 4294967295, %v23697_v4  ;;  %13477 = vxpose.xlu1.b32.cont [4/8] (short) (narrow) %v13445_v51, 16  ;;  %v12071_v60 = vrot.slane %v11943_v45, 7  ;;  %vm21345_vm10 = vcmp.gt.f32.partialorder %v23671_v10, %v12070_v58 }
 0x619   : > { %23694 = vst [vmem:[#allocation121_spill] sm:$0xff] %v23693_v0  ;;  %23699 = vst [vmem:[#allocation140_spill] sm:$0xff] %v23698_v4  ;;  %v23700_v46 = vmov 0  ;;  %v12649_v44 = vsel %vm21315_vm13, %v23686_v41, %v12065_v22  ;;  %v12072_v53 = vrot.slane %v11944_v21, 7  ;;  %v23703_v8 = vmov %v23690_v47  ;;  %v23744_v4 = vld [vmem:[#allocation175_spill] sm:$0xff]  ;;  %v23746_v0 = vld [vmem:[#allocation176_spill] sm:$0xff] }
 0x61a   : > { %v23701_v46 = vsel %vm21345_vm10, 4294967295, %v23700_v46  ;;  %v12651_v29 = vsel %vm21322_vm1, %v23691_v11, %v23703_v8  ;;  %v12653_v55 = vsel %vm21335_vm14, %v23677_v28, %v12069_v49  ;;  %v12654_v9 = vsel %vm21345_vm10, %v23671_v10, %v12070_v58  ;;  %v23711_v49 = vld [vmem:[#allocation194_spill] sm:$0xff] }
 0x61b   : > { %23702 = vst [vmem:[#allocation135_spill] sm:$0xff] %v23701_v46  ;;  %vm21364_vm15 = vcmp.gt.f32.partialorder %v21276_v6, %v12071_v60  ;;  %v23704_v43 = vmov 0  ;;  %v12921_v56 = vrot.slane %v12649_v44, %v15742_v42  ;;  %v12929_v13 = vrot.slane %v12651_v29, %v15742_v42  ;;  %v23760_v10 = vld [vmem:[#allocation58_spill] sm:$0xff] }
 0x61c   : > { %v23705_v43 = vsel %vm21364_vm15, 4294967295, %v23704_v43  ;;  %v12933_v1 = vrot.slane %v23707_v3, %v15742_v42  ;;  %vm21373_vm5 = vcmp.gt.f32.partialorder %v23696_v5, %v12072_v53  ;;  %v23708_v54 = vmov 0 }
 0x61d   : > { %23706 = vst [vmem:[#allocation56_spill] sm:$0xff] %v23705_v43  ;;  %v23709_v54 = vsel %vm21373_vm5, 4294967295, %v23708_v54  ;;  %v12655_v50 = vsel %vm21364_vm15, %v21276_v6, %v12071_v60  ;;  %v12937_v63 = vrot.slane %v12653_v55, %v15742_v42  ;;  %v12941_v31 = vrot.slane %v12654_v9, %v15742_v42  ;;  %v23716_v60 = vld [vmem:[#allocation152_spill] sm:$0xff]  ;;  %v23718_v55 = vld [vmem:[#allocation159_spill] sm:$0xff]  ;;  %v23719_v9 = vld [vmem:[#allocation158_spill] sm:$0xff] }
 0x61e   : > { %23710 = vst [vmem:[#allocation59_spill] sm:$0xff] %v23709_v54  ;;  %v12656_v22 = vsel %vm21373_vm5, %v23696_v5, %v12072_v53  ;;  %v12945_v27 = vrot.slane %v12655_v50, %v15742_v42  ;;  %v23712_v58 = vrot.slane %v23711_v49, %v15742_v42  ;;  %vm23713_vm7 = vcmask 1041409   ;;  %v23723_v49 = vld [vmem:[#allocation42_spill] sm:$0xff]  ;;  %v23750_v5 = vld [vmem:[#allocation11_spill] sm:$0xff] }
 0x61f   : > { %v10606_v47 = vrot.slane %v23714_v18, %v18458_v34  ;;  %v12949_v51 = vrot.slane %v12656_v22, %v15742_v42  ;;  %vm23715_vm2 = vcmask 1042434   ;;  %v10613_v21 = vrot.slane %v23714_v18, %v23290_v32  ;;  %v23729_v43 = vld [vmem:[#allocation178_spill] sm:$0xff] }
 0x620   : > { %v13027_v15 = vsel %vm23713_vm7, %v23712_v58, %v12921_v56  ;;  %v10862_v44 = vrot.slane %v23716_v60, %v18458_v34  ;;  %vm23717_vm9 = vcmask 1043459   ;;  %v10869_v29 = vrot.slane %v23716_v60, %v23290_v32  ;;  %v23720_v56 = vld [vmem:[#allocation165_spill] sm:$0xff] }
 0x621   : > { %v13028_v45 = vsel %vm23715_vm2, %v12929_v13, %v13027_v15  ;;  %v10716_v8 = vrot.slane %v10606_v47, 7  ;;  %vm23721_vm7 = vnez %v23720_v56  ;;  %vm23722_vm5 = vcmask 1044484   ;;  %v23732_v56 = vld [vmem:[#allocation81_spill] sm:$0xff] }
 0x622   : > { %v13029_v53 = vsel %vm23717_vm9, %v12933_v1, %v13028_v45  ;;  %v11021_v3 = vsel %vm23721_vm7, %v23719_v9, %v23718_v55  ;;  %v10717_v13 = vrot.slane %v10613_v21, 7  ;;  %v10972_v22 = vrot.slane %v10862_v44, 7  ;;  %v23726_v1 = vld [vmem:[#allocation179_spill] sm:$0xff] }
 0x623   : > { %v13030_v50 = vsel %vm23722_vm5, %v12937_v63, %v13029_v53  ;;  %vm23724_vm2 = vnez %v23723_v49  ;;  %vm23725_vm10 = vcmask 1045509   ;;  %v10973_v18 = vrot.slane %v10869_v29, 7  ;;  %v23735_v49 = vld [vmem:[#allocation167_spill] sm:$0xff] }
 0x624   : > { %v11023_v58 = vsel %vm23724_vm2, %v10606_v47, %v10862_v44  ;;  %v13031_v15 = vsel %vm23725_vm10, %v12941_v31, %v13030_v50  ;;  %vm23727_vm9 = vnez %v23726_v1  ;;  %v11438_v54 = vadd.s32 16, %v23716_v60 }
 0x625   : > { %v11025_v45 = vsel %vm23727_vm9, %v10613_v21, %v10869_v29  ;;  %vm23728_vm15 = vcmask 1046534   ;;  %vm23730_vm14 = vnez %v23729_v43  ;;  %v13766_v9 = vrot.slane %v11021_v3, 9 }
 0x626   : > { %v13032_v46 = vsel %vm23728_vm15, %v12945_v27, %v13031_v15  ;;  %v11022_v55 = vsel %vm23730_vm14, %v10716_v8, %v10972_v22  ;;  %v13768_v63 = vrot.slane %v11023_v58, 9  ;;  %vm23731_vm5 = vcmask 1047559   ;;  %v23737_v15 = vld [vmem:[#allocation184_spill] sm:$0xff] }
 0x627   : > { %v13033_v53 = vsel %vm23731_vm5, %v12949_v51, %v13032_v46  ;;  %vm23733_vm7 = vnez %v23732_v56  ;;  %v11560_v31 = vrot.slane %v11438_v54, %v22778_v7  ;;  %v11567_v44 = vrot.slane %v11438_v54, %v18512_v14  ;;  %v23741_v56 = vld [vmem:[#allocation243_spill] sm:$0xff] }
 0x628   : > { %v11024_v47 = vsel %vm23733_vm7, %v10717_v13, %v10973_v18  ;;  %vm23734_vm10 = vcmask 130048   ;;  %v11574_v29 = vrot.slane %v11438_v54, %v18458_v34  ;;  %v11581_v27 = vrot.slane %v11438_v54, %v23290_v32  ;;  %v23738_v18 = vld [vmem:[#allocation174_spill] sm:$0xff] }
 0x629   : > { %v21421_v21 = vsel %vm23734_vm10, %v13033_v53, 0.0  ;;  %v13767_v43 = vrot.slane %v11022_v55, 9  ;;  %v11682_v3 = vrot.slane %v11560_v31, 1  ;;  %v11683_v50 = vrot.slane %v11567_v44, 1  ;;  %v23740_v53 = vld [vmem:[#allocation236_spill] sm:$0xff] }
 0x62a   : > { %v22501_v8 = vrot.slane %v21421_v21, 1  ;;  %v13769_v46 = vrot.slane %v11024_v47, 9  ;;  %v11684_v51 = vrot.slane %v11574_v29, 1  ;;  %v11685_v22 = vrot.slane %v11581_v27, 1  ;;  %v23745_v47 = vld [vmem:[#allocation189_spill] sm:$0xff] }
 0x62b   : > { %v13770_v13 = vrot.slane %v11025_v45, 9  ;;  %v23736_v58 = vrot.slane %v23735_v49, 9  ;;  %vm23739_vm14 = vcmp.gt.f32.partialorder %v23737_v15, %v23738_v18  ;;  %v23742_v54 = vrot.slane %v21191_v30, 1  ;;  %v23754_v15 = vld [vmem:[#allocation181_spill] sm:$0xff]  ;;  %v23756_v30 = vld [vmem:[#allocation196_spill] sm:$0xff] }
 0x62c   : > { %vm23743_vm2 = vcmask 1046528   ;;  %vm23747_vm9 = vcmp.gt.f32.partialorder %v23745_v47, %v23746_v0  ;;  %v23749_v49 = vrot.slane %v23748_v25, 9  ;;  %vm23752_vm5 = vcmp.gt.f32.partialorder %v23750_v5, %v23751_v36  ;;  %v23763_v25 = vld [vmem:[#allocation5_spill] sm:$0xff]  ;;  %v23768_v47 = vld [vmem:[#allocation47_spill] sm:$0xff] }
 0x62d   : > { %v11858_v1 = vsel %vm23739_vm14, %v11560_v31, %v23736_v58  ;;  %v13080_v55 = vsel %vm23743_vm2, %v23742_v54, %v22501_v8  ;;  %v11859_v45 = vsel %vm23747_vm9, %v11682_v3, %v23744_v4  ;;  %v23753_v58 = vld [vmem:[#allocation197_spill] sm:$0xff]  ;;  %vm23758_vm10 = vcmp.gt.f32.partialorder %v23756_v30, %v23757_v16  ;;  %v23759_v8 = vld [vmem:[#allocation86_spill] sm:$0xff]  ;;  %v23776_v30 = vld [vmem:[#allocation51_spill] sm:$0xff] }
 0x62e   : > { %v11860_v31 = vsel %vm23752_vm5, %v11567_v44, %v23749_v49  ;;  %vm23755_vm7 = vcmp.gt.f32.partialorder %v23753_v58, %v23754_v15  ;;  %v13098_v6 = vadd.f32 %v13080_v55, %v21069_v12  ;;  %v11862_v54 = vsel %vm23758_vm10, %v11574_v29, %v13767_v43  ;;  %v23762_v4 = vld [vmem:[#allocation202_spill] sm:$0xff]  ;;  %v23770_v49 = vld [vmem:[#allocation41_spill] sm:$0xff]  ;;  %v23772_v58 = vld [vmem:[#allocation200_spill] sm:$0xff] }
 0x62f   : > { %v11861_v18 = vsel %vm23755_vm7, %v11683_v50, %v13766_v9  ;;  %vm23761_vm14 = vcmp.gt.f32.partialorder %v23759_v8, %v23760_v10  ;;  %vm23764_vm2 = vcmp.gt.f32.partialorder %v23762_v4, %v23763_v25  ;;  %vm23765_vm9 = vcmp.gt.f32.partialorder %v23589_v20, %v23588_v23  ;;  %v23774_v15 = vld [vmem:[#allocation204_spill] sm:$0xff] }
 0x630   : > { %v11863_v0 = vsel %vm23761_vm14, %v11684_v51, %v13768_v63  ;;  %v11864_v3 = vsel %vm23764_vm2, %v11581_v27, %v13769_v46  ;;  %v11865_v36 = vsel %vm23765_vm9, %v11685_v22, %v13770_v13  ;;  %v12214_v5 = vadd.s32 17, %v23716_v60 }
 0x631   : > { %v12506_v9 = vrot.slane %v11858_v1, 7  ;;  %v12507_v12 = vrot.slane %v11859_v45, 7  ;;  %vm13106_vm5 = vcmp.gt.f32.partialorder %v13098_v6, 0.0  ;;  %v13115_v16 = vmul.f32 %v23566_v24, %v13098_v6  ;;  %v23766_v1 = vld [vmem:[#allocation82_spill] sm:$0xff] }
 0x632   : > { %v12508_v44 = vrot.slane %v11860_v31, 7  ;;  %v12509_v29 = vrot.slane %v11861_v18, 7  ;;  %v12336_v10 = vrot.slane %v12214_v5, %v22778_v7  ;;  %v12343_v63 = vrot.slane %v12214_v5, %v18512_v14 }
 0x633   : > { %v12350_v43 = vrot.slane %v12214_v5, %v18458_v34  ;;  %v12357_v27 = vrot.slane %v12214_v5, %v23290_v32  ;;  %v13123_v8 = vsel %vm13106_vm5, %v13098_v6, %v13115_v16  ;;  %v12510_v23 = vrot.slane %v11862_v54, 7 }
 0x634   : > { %v12511_v20 = vrot.slane %v11863_v0, 7  ;;  %v12512_v50 = vrot.slane %v11864_v3, 7  ;;  %13131 = vxpose.xlu0.b32.cont [6/8] (short) (narrow) %v13123_v8, 32  ;;  %v12458_v60 = vrot.slane %v12336_v10, 7  ;;  %v12459_v46 = vrot.slane %v12343_v63, 7  ;;  %v23778_v0 = vld [vmem:[#allocation37_spill] sm:$0xff] }
 0x635   : > { %v12460_v51 = vrot.slane %v12350_v43, 7  ;;  %v12461_v22 = vrot.slane %v12357_v27, 7  ;;  %v12513_v13 = vrot.slane %v11865_v36, 7  ;;  %vm23767_vm7 = vnez %v23766_v1 }
 0x636   : > { %v12571_v55 = vsel %vm23767_vm7, %v12336_v10, %v12507_v12  ;;  %vm23769_vm10 = vnez %v23768_v47  ;;  %vm23771_vm14 = vnez %v23770_v49  ;;  %vm23773_vm2 = vnez %v23772_v58  ;;  %v23796_v58 = vld [vmem:[#allocation13_spill] sm:$0xff] }
 0x637   : > { %v12573_v45 = vsel %vm23769_vm10, %v12343_v63, %v12509_v29  ;;  %v12575_v31 = vsel %vm23771_vm14, %v12350_v43, %v12511_v20  ;;  %v12570_v6 = vsel %vm23773_vm2, %v12458_v60, %v12506_v9  ;;  %vm23775_vm9 = vnez %v23774_v15  ;;  %v23782_v63 = vld [vmem:[#allocation246_spill] sm:$0xff]  ;;  %v23785_v20 = vld [vmem:[#allocation240_spill] sm:$0xff]  ;;  %v23787_v60 = vld [vmem:[#allocation231_spill] sm:$0xff] }
 0x638   : > { %v12572_v18 = vsel %vm23775_vm9, %v12459_v46, %v12508_v44  ;;  %vm23777_vm5 = vnez %v23776_v30  ;;  %vm23779_vm15 = vnez %v23778_v0  ;;  %v12577_v25 = vsel %vm21099_vm3, %v12357_v27, %v12513_v13 }
 0x639   : > { %v12574_v54 = vsel %vm23777_vm5, %v12460_v51, %v12510_v23  ;;  %v12576_v4 = vsel %vm23779_vm15, %v12461_v22, %v12512_v50  ;;  %v13293_v3 = vrot.slane %v12570_v6, %v15742_v42  ;;  %v13297_v36 = vrot.slane %v12571_v55, %v15742_v42  ;;  %v23792_v55 = vld [vmem:[#allocation244_spill] sm:$0xff] }
 0x63a   : > { %v13301_v5 = vrot.slane %v12572_v18, %v15742_v42  ;;  %v13305_v9 = vrot.slane %v12573_v45, %v15742_v42  ;;  %v13309_v12 = vrot.slane %v12574_v54, %v15742_v42  ;;  %v13313_v16 = vrot.slane %v12575_v31, %v15742_v42  ;;  %v23800_v54 = vld [vmem:[#allocation245_spill] sm:$0xff] }
 0x63b   : > { %v13317_v44 = vrot.slane %v12576_v4, %v15742_v42  ;;  %v13321_v29 = vrot.slane %v12577_v25, %v15742_v42  ;;  %vm23780_vm15 = vcmask 1041409   ;;  %vm22503_vm3 = vcmp.gt.f32.partialorder %v23782_v63, %v23781_v52 }
 0x63c   : > { %v13446_v10 = vsel %vm23780_vm15, %v13297_v36, %v13293_v3  ;;  %vm23783_vm7 = vcmp.gt.f32.partialorder %v23741_v56, %v23740_v53  ;;  %vm23784_vm10 = vcmask 1042434   ;;  %v11951_v8 = vsel %vm22503_vm3, %v23782_v63, %v23781_v52  ;;  %v23802_v36 = vld [vmem:[#allocation239_spill] sm:$0xff] }
 0x63d   : > { %v11949_v43 = vsel %vm23783_vm7, %v23741_v56, %v23740_v53  ;;  %v13447_v27 = vsel %vm23784_vm10, %v13301_v5, %v13446_v10  ;;  %v23786_v50 = vrot.slane %v23785_v20, 7  ;;  %v23788_v46 = vmov 0  ;;  %v23808_v20 = vld [vmem:[#allocation199_spill] sm:$0xff] }
 0x63e   : > { %v12077_v23 = vrot.slane %v11949_v43, 7  ;;  %vm23790_vm2 = vcmask 1043459   ;;  %v12079_v22 = vrot.slane %v11951_v8, 7  ;;  %v12961_v47 = vrot.slane %v23792_v55, %v15742_v42 }
 0x63f   : > { %vm21510_vm14 = vcmp.gt.f32.partialorder %v23787_v60, %v23786_v50  ;;  %v13448_v51 = vsel %vm23790_vm2, %v13305_v9, %v13447_v27  ;;  %v23791_v13 = vmov %v23786_v50  ;;  %vm23793_vm9 = vcmask 1044484   ;;  %v23807_v27 = vld [vmem:[#allocation12_spill] sm:$0xff]  ;;  %v23809_v50 = vld [vmem:[#allocation201_spill] sm:$0xff] }
 0x640   : > { %v23789_v46 = vsel %vm21510_vm14, 4294967295, %v23788_v46  ;;  %v12664_v1 = vsel %vm21510_vm14, %v23787_v60, %v23791_v13  ;;  %v13449_v45 = vsel %vm23793_vm9, %v13309_v12, %v13448_v51  ;;  %vm21524_vm5 = vcmp.gt.f32.partialorder %v23741_v56, %v12077_v23  ;;  %v23810_v51 = vld [vmem:[#allocation203_spill] sm:$0xff] }
 0x641   : > { %v12981_v31 = vrot.slane %v12664_v1, %v15742_v42  ;;  %v10634_v6 = vrot.slane %v23796_v58, %v18458_v34  ;;  %vm23797_vm15 = vcmask 1045509   ;;  %vm21533_vm7 = vcmp.gt.f32.partialorder %v23782_v63, %v12079_v22 }
 0x642   : > { %v13450_v15 = vsel %vm23797_vm15, %v13313_v16, %v13449_v45  ;;  %v12661_v30 = vsel %vm21524_vm5, %v23741_v56, %v12077_v23  ;;  %v13035_v0 = vsel %vm23784_vm10, %v12961_v47, %v23800_v54  ;;  %vm23801_vm2 = vcmask 1046534   ;;  %v23815_v47 = vld [vmem:[#allocation17_spill] sm:$0xff] }
 0x643   : > { %v13451_v4 = vsel %vm23801_vm2, %v13317_v44, %v13450_v15  ;;  %v12663_v25 = vsel %vm21533_vm7, %v23782_v63, %v12079_v22  ;;  %v12969_v3 = vrot.slane %v12661_v30, %v15742_v42  ;;  %v23803_v5 = vrot.slane %v23802_v36, %v15742_v42  ;;  %v23812_v22 = vld [vmem:[#allocation241_spill] sm:$0xff] }
 0x644   : > { %vm23804_vm9 = vcmask 1043459   ;;  %vm23805_vm15 = vcmask 1047559   ;;  %v12977_v16 = vrot.slane %v12663_v25, %v15742_v42  ;;  %v10641_v10 = vrot.slane %v23796_v58, %v23290_v32 }
 0x645   : > { %v13036_v9 = vsel %vm23804_vm9, %v23803_v5, %v13035_v0  ;;  %v13452_v12 = vsel %vm23805_vm15, %v13321_v29, %v13451_v4  ;;  %v10720_v43 = vrot.slane %v10634_v6, 7  ;;  %vm23806_vm10 = vcmask 1044484   ;;  %v23817_v0 = vld [vmem:[#allocation141_spill] sm:$0xff] }
 0x646   : > { %13478 = vxpose.xlu1.b32.cont [5/8] (short) (narrow) %v13452_v12, 16  ;;  %v13037_v44 = vsel %vm23806_vm10, %v12969_v3, %v13036_v9  ;;  %v10890_v8 = vrot.slane %v23807_v27, %v18458_v34  ;;  %v10897_v23 = vrot.slane %v23807_v27, %v23290_v32  ;;  %vm23811_vm2 = vnez %v23810_v51  ;;  %v23820_v3 = vld [vmem:[#allocation131_spill] sm:$0xff] }
 0x647   : > { %v11029_v29 = vsel %vm23811_vm2, %v23809_v50, %v23808_v20  ;;  %v23813_v13 = vrot.slane %v23812_v22, %v15742_v42  ;;  %vm23814_vm9 = vcmask 1045509   ;;  %v10721_v55 = vrot.slane %v10641_v10, 7  ;;  %v23822_v9 = vld [vmem:[#allocation19_spill] sm:$0xff]  ;;  %v23824_v20 = vld [vmem:[#allocation130_spill] sm:$0xff] }
 0x648   : > { %v11595_v45 = vrot.slane %v23815_v47, %v18512_v14  ;;  %v11602_v58 = vrot.slane %v23815_v47, %v18458_v34  ;;  %vm23816_vm15 = vcmask 1046534   ;;  %v10976_v30 = vrot.slane %v10890_v8, 7  ;;  %v23826_v50 = vld [vmem:[#allocation143_spill] sm:$0xff] }
 0x649   : > { %v13038_v1 = vsel %vm23814_vm9, %v23813_v13, %v13037_v44  ;;  %v10977_v54 = vrot.slane %v10897_v23, 7  ;;  %vm23818_vm10 = vnez %v23817_v0  ;;  %vm23819_vm2 = vcmask 1047559  }
 0x64a   : > { %v13039_v15 = vsel %vm23816_vm15, %v12977_v16, %v13038_v1  ;;  %v11031_v4 = vsel %vm23818_vm10, %v10634_v6, %v10890_v8  ;;  %vm23821_vm3 = vnez %v23820_v3  ;;  %v11609_v5 = vrot.slane %v23815_v47, %v23290_v32 }
 0x64b   : > { %v13040_v25 = vsel %vm23819_vm2, %v12981_v31, %v13039_v15  ;;  %v11033_v36 = vsel %vm23821_vm3, %v10641_v10, %v10897_v23  ;;  %v11686_v12 = vrot.slane %v23822_v9, 1  ;;  %vm23823_vm9 = vcmask 130048   ;;  %v23828_v15 = vld [vmem:[#allocation29_spill] sm:$0xff] }
 0x64c   : > { %v21582_v44 = vsel %vm23823_vm9, %v13040_v25, 0.0  ;;  %vm23825_vm15 = vnez %v23824_v20  ;;  %vm23827_vm14 = vnez %v23826_v50  ;;  %v11687_v6 = vrot.slane %v11595_v45, 1 }
 0x64d   : > { %v11030_v16 = vsel %vm23825_vm15, %v10720_v43, %v10976_v30  ;;  %v11032_v51 = vsel %vm23827_vm14, %v10721_v55, %v10977_v54  ;;  %v13081_v31 = vrot.slane %v21582_v44, 1  ;;  %v11688_v8 = vrot.slane %v11602_v58, 1  ;;  %v23834_v30 = vld [vmem:[#allocation211_spill] sm:$0xff] }
 0x64e   : > { %v11689_v22 = vrot.slane %v11609_v5, 1  ;;  %v13774_v10 = vrot.slane %v11029_v29, 9  ;;  %v13775_v23 = vrot.slane %v11030_v16, 9  ;;  %v13776_v13 = vrot.slane %v11031_v4, 9  ;;  %v23835_v29 = vld [vmem:[#allocation14_spill] sm:$0xff] }
 0x64f   : > { %v13777_v1 = vrot.slane %v11032_v51, 9  ;;  %v13778_v47 = vrot.slane %v11033_v36, 9  ;;  %v23829_v0 = vrot.slane %v23828_v15, 7  ;;  %v23832_v43 = vrot.slane %v21421_v21, 1  ;;  %v23837_v4 = vld [vmem:[#allocation210_spill] sm:$0xff]  ;;  %v23839_v36 = vld [vmem:[#allocation15_spill] sm:$0xff] }
 0x650   : > { %vm23833_vm14 = vcmask 1046528   ;;  %vm23836_vm10 = vcmp.gt.f32.partialorder %v23570_v2, %v23835_v29  ;;  %v23838_v3 = vrot.slane %v23837_v4, 9  ;;  %vm23840_vm2 = vcmp.gt.f32.partialorder %v23576_v57, %v23839_v36  ;;  %v23845_v57 = vld [vmem:[#allocation149_spill] sm:$0xff] }
 0x651   : > { %vm21592_vm3 = vcmp.gt.f32.partialorder %v23828_v15, %v23829_v0  ;;  %v13082_v55 = vsel %vm23833_vm14, %v23832_v43, %v13081_v31  ;;  %v11867_v54 = vsel %vm23836_vm10, %v11686_v12, %v23834_v30  ;;  %vm23841_vm9 = vcmp.gt.f32.partialorder %v23565_v33, %v23564_v39  ;;  %v23847_v33 = vld [vmem:[#allocation20_spill] sm:$0xff] }
 0x652   : > { %v11868_v9 = vsel %vm23840_vm2, %v11595_v45, %v23838_v3  ;;  %v11869_v20 = vsel %vm23841_vm9, %v11687_v6, %v13774_v10  ;;  %v13099_v16 = vadd.f32 %v13082_v55, %v21054_v37  ;;  %vm23842_vm15 = vcmp.gt.f32.partialorder %v23544_v38, %v23567_v40  ;;  %v23851_v30 = vld [vmem:[#allocation224_spill] sm:$0xff] }
 0x653   : > { %v11870_v21 = vsel %vm23842_vm15, %v11602_v58, %v13775_v23  ;;  %vm23843_vm14 = vcmp.gt.f32.partialorder %v20947_v35, %v20951_v61  ;;  %vm23844_vm10 = vcmp.gt.f32.partialorder %v23590_v59, %v20955_v19  ;;  %vm23846_vm2 = vcmp.gt.f32.partialorder %v23686_v41, %v23845_v57  ;;  %v23854_v3 = vld [vmem:[#allocation108_spill] sm:$0xff] }
 0x654   : > { %v11871_v2 = vsel %vm23843_vm14, %v11688_v8, %v13776_v13  ;;  %v11872_v12 = vsel %vm23844_vm10, %v11609_v5, %v13777_v1  ;;  %v11873_v45 = vsel %vm23846_vm2, %v11689_v22, %v13778_v47  ;;  %v12215_v39 = vadd.s32 17, %v23807_v27 }
 0x655   : > { %v12514_v37 = vrot.slane %v23847_v33, 7  ;;  %v12515_v50 = vrot.slane %v11867_v54, 7  ;;  %vm13107_vm9 = vcmp.gt.f32.partialorder %v13099_v16, 0.0  ;;  %v13116_v38 = vmul.f32 %v23566_v24, %v13099_v16  ;;  %v23873_v54 = vld [vmem:[#allocation247_spill] sm:$0xff] }
 0x656   : > { %v12516_v40 = vrot.slane %v11868_v9, 7  ;;  %v12517_v58 = vrot.slane %v11869_v20, 7  ;;  %v12364_v35 = vrot.slane %v12215_v39, %v22778_v7  ;;  %v12371_v61 = vrot.slane %v12215_v39, %v18512_v14  ;;  %v23856_v9 = vld [vmem:[#allocation125_spill] sm:$0xff] }
 0x657   : > { %v12378_v19 = vrot.slane %v12215_v39, %v18458_v34  ;;  %v12385_v59 = vrot.slane %v12215_v39, %v23290_v32  ;;  %v13124_v41 = vsel %vm13107_vm9, %v13099_v16, %v13116_v38  ;;  %v12518_v5 = vrot.slane %v11870_v21, 7 }
 0x658   : > { %v12519_v51 = vrot.slane %v11871_v2, 7  ;;  %v12520_v27 = vrot.slane %v11872_v12, 7  ;;  %13132 = vxpose.xlu0.b32.cont [7/8] (short) (narrow) %v13124_v41, 32  ;;  %v12462_v6 = vrot.slane %v12364_v35, 7  ;;  %v12463_v8 = vrot.slane %v12371_v61, 7 }
 0x659   : > { %v12464_v22 = vrot.slane %v12378_v19, 7  ;;  %v12465_v10 = vrot.slane %v12385_v59, 7  ;;  %v12521_v23 = vrot.slane %v11873_v45, 7  ;;  %v12579_v1 = vsel %vm21029_vm0, %v12364_v35, %v12515_v50 }
 0x65a   : > { %v12581_v0 = vsel %vm21116_vm11, %v12371_v61, %v12517_v58  ;;  %v12583_v55 = vsel %vm21126_vm6, %v12378_v19, %v12519_v51  ;;  %vm23852_vm15 = vnez %v23851_v30  ;;  %v12580_v4 = vsel %vm21036_vm12, %v12463_v8, %v12516_v40  ;;  %v23860_v40 = vld [vmem:[#allocation142_spill] sm:$0xff]  ;;  %v23866_v8 = vld [vmem:[#allocation153_spill] sm:$0xff] }
 0x65b   : > { %v12578_v29 = vsel %vm23852_vm15, %v12462_v6, %v12514_v37  ;;  %vm23855_vm14 = vnez %v23854_v3  ;;  %vm23857_vm10 = vnez %v23856_v9  ;;  %v12585_v16 = vsel %vm21315_vm13, %v12385_v59, %v12521_v23  ;;  %v23862_v59 = vld [vmem:[#allocation132_spill] sm:$0xff]  ;;  %v23864_v6 = vld [vmem:[#allocation151_spill] sm:$0xff] }
 0x65c   : > { %v12582_v36 = vsel %vm23855_vm14, %v12464_v22, %v12518_v5  ;;  %v12584_v20 = vsel %vm23857_vm10, %v12465_v10, %v12520_v27  ;;  %v13325_v21 = vrot.slane %v12578_v29, %v15742_v42  ;;  %v13329_v2 = vrot.slane %v12579_v1, %v15742_v42 }
 0x65d   : > { %v13333_v12 = vrot.slane %v12580_v4, %v15742_v42  ;;  %v13337_v57 = vrot.slane %v12581_v0, %v15742_v42  ;;  %v13341_v45 = vrot.slane %v12582_v36, %v15742_v42  ;;  %v13345_v39 = vrot.slane %v12583_v55, %v15742_v42  ;;  %v23870_v55 = vld [vmem:[#allocation173_spill] sm:$0xff]  ;;  %v23874_v4 = vld [vmem:[#allocation172_spill] sm:$0xff] }
 0x65e   : > { %v13349_v33 = vrot.slane %v12584_v20, %v15742_v42  ;;  %v13353_v37 = vrot.slane %v12585_v16, %v15742_v42  ;;  %vm23858_vm0 = vcmask 1041409   ;;  %v23859_v26 = vrot.slane %v23828_v15, 7 }
 0x65f   : > { %v13453_v50 = vsel %vm23858_vm0, %v13329_v2, %v13325_v21  ;;  %v10662_v58 = vrot.slane %v23860_v40, %v18458_v34  ;;  %vm23861_vm12 = vcmask 1042434   ;;  %v10669_v19 = vrot.slane %v23860_v40, %v23290_v32 }
 0x660   : > { %v11113_v38 = vsel %vm21592_vm3, %v23828_v15, %v23859_v26  ;;  %v13454_v35 = vsel %vm23861_vm12, %v13333_v12, %v13453_v50  ;;  %v10918_v41 = vrot.slane %v23862_v59, %v18458_v34  ;;  %vm23863_vm11 = vcmask 1043459   ;;  %v23865_v15 = vld [vmem:[#allocation150_spill] sm:$0xff] }
 0x661   : > { %v11304_v61 = vrot.slane %v11113_v38, 7  ;;  %v13455_v5 = vsel %vm23863_vm11, %v13337_v57, %v13454_v35  ;;  %v10724_v51 = vrot.slane %v10662_v58, 7  ;;  %v10925_v27 = vrot.slane %v23862_v59, %v23290_v32 }
 0x662   : > { %vm23867_vm6 = vnez %v23866_v8  ;;  %vm23868_vm13 = vcmask 1044484   ;;  %v10725_v13 = vrot.slane %v10669_v19, 7  ;;  %v10980_v1 = vrot.slane %v10918_v41, 7 }
 0x663   : > { %v11037_v22 = vsel %vm23867_vm6, %v23865_v15, %v23864_v6  ;;  %v13456_v10 = vsel %vm23868_vm13, %v13341_v45, %v13455_v5  ;;  %v21678_v23 = vrot.slane %v11304_v61, 2  ;;  %vm23869_vm2 = vcmask 1045509   ;;  %v23879_v61 = vld [vmem:[#allocation156_spill] sm:$0xff]  ;;  %v23882_v5 = vld [vmem:[#allocation161_spill] sm:$0xff]  ;;  %v23884_v6 = vld [vmem:[#allocation171_spill] sm:$0xff] }
 0x664   : > { %v13457_v47 = vsel %vm23869_vm2, %v13345_v39, %v13456_v10  ;;  %v10981_v0 = vrot.slane %v10925_v27, 7  ;;  %v11039_v43 = vsel %vm21202_vm8, %v10662_v58, %v10918_v41  ;;  %vm23871_vm9 = vnez %v23870_v55  ;;  %v23881_v41 = vld [vmem:[#allocation168_spill] sm:$0xff]  ;;  %v23885_v15 = vld [vmem:[#allocation162_spill] sm:$0xff]  ;;  %v23894_v55 = vld [vmem:[#allocation185_spill] sm:$0xff] }
 0x665   : > { %v11041_v30 = vsel %vm23871_vm9, %v10669_v19, %v10925_v27  ;;  %vm23872_vm15 = vcmask 1046534   ;;  %vm11433_vm14 = vcmp.gt.f32.partialorder %v23873_v54, %v21678_v23  ;;  %vm23875_vm10 = vnez %v23874_v4  ;;  %v23897_v4 = vld [vmem:[#allocation139_spill] sm:$0xff] }
 0x666   : > { %v13458_v29 = vsel %vm23872_vm15, %v13349_v33, %v13457_v47  ;;  %v11038_v3 = vsel %vm23875_vm10, %v10724_v51, %v10980_v1  ;;  %v11440_v36 = vadd.s32 16, %v23862_v59  ;;  %vm23876_vm0 = vcmask 1047559   ;;  %v23890_v1 = vld [vmem:[#allocation163_spill] sm:$0xff] }
 0x667   : > { %v13459_v9 = vsel %vm23876_vm0, %v13353_v37, %v13458_v29  ;;  %v11953_v48 = vsel %vm11433_vm14, %v23873_v54, %v21678_v23  ;;  %v11040_v20 = vsel %vm21224_vm4, %v10725_v13, %v10981_v0  ;;  %v13782_v16 = vrot.slane %v11037_v22, 9  ;;  %v23887_v22 = vld [vmem:[#allocation160_spill] sm:$0xff]  ;;  %v23889_v13 = vld [vmem:[#allocation170_spill] sm:$0xff] }
 0x668   : > { %13479 = vxpose.xlu1.b32.cont [6/8] (short) (narrow) %v13459_v9, 16  ;;  %v12081_v21 = vrot.slane %v11953_v48, 7  ;;  %v11616_v2 = vrot.slane %v11440_v36, %v22778_v7  ;;  %v11623_v12 = vrot.slane %v11440_v36, %v18512_v14  ;;  %v11630_v57 = vrot.slane %v11440_v36, %v18458_v34  ;;  %v23896_v29 = vld [vmem:[#allocation126_spill] sm:$0xff] }
 0x669   : > { %v11637_v45 = vrot.slane %v11440_v36, %v23290_v32  ;;  %v13783_v39 = vrot.slane %v11038_v3, 9  ;;  %v13784_v33 = vrot.slane %v11039_v43, 9  ;;  %v13785_v37 = vrot.slane %v11040_v20, 9  ;;  %v23893_v43 = vld [vmem:[#allocation209_spill] sm:$0xff]  ;;  %v23900_v36 = vld [vmem:[#allocation127_spill] sm:$0xff]  ;;  %v23902_v48 = vld [vmem:[#allocation206_spill] sm:$0xff] }
 0x66a   : > { %vm21704_vm8 = vcmp.gt.f32.partialorder %v23873_v54, %v12081_v21  ;;  %v11690_v17 = vrot.slane %v11616_v2, 1  ;;  %v11691_v26 = vrot.slane %v11623_v12, 1  ;;  %v11692_v38 = vrot.slane %v11630_v57, 1  ;;  %v23903_v20 = vld [vmem:[#allocation186_spill] sm:$0xff] }
 0x66b   : > { %v12665_v40 = vsel %vm21704_vm8, %v23873_v54, %v12081_v21  ;;  %v11693_v58 = vrot.slane %v11637_v45, 1  ;;  %v13786_v35 = vrot.slane %v11041_v30, 9  ;;  %v23880_v19 = vrot.slane %v23879_v61, 9 }
 0x66c   : > { %vm23883_vm4 = vcmp.gt.f32.partialorder %v23881_v41, %v23882_v5  ;;  %v12985_v27 = vrot.slane %v12665_v40, %v15742_v42  ;;  %vm23886_vm12 = vcmp.gt.f32.partialorder %v23691_v11, %v23885_v15  ;;  %v23888_v10 = vrot.slane %v23887_v22, 9  ;;  %v23899_v11 = vld [vmem:[#allocation198_spill] sm:$0xff]  ;;  %v23909_v15 = vld [vmem:[#allocation140_spill] sm:$0xff] }
 0x66d   : > { %v11874_v51 = vsel %vm23883_vm4, %v11616_v2, %v23880_v19  ;;  %v11875_v8 = vsel %vm23886_vm12, %v11690_v17, %v23884_v6  ;;  %vm23891_vm11 = vcmp.gt.f32.partialorder %v23889_v13, %v23890_v1  ;;  %vm23892_vm6 = vcmp.gt.f32.partialorder %v23677_v28, %v23676_v62  ;;  %v23911_v22 = vld [vmem:[#allocation56_spill] sm:$0xff]  ;;  %v23915_v1 = vld [vmem:[#allocation191_spill] sm:$0xff] }
 0x66e   : > { %v11876_v47 = vsel %vm23891_vm11, %v11623_v12, %v23888_v10  ;;  %v11877_v0 = vsel %vm23892_vm6, %v11691_v26, %v13782_v16  ;;  %vm23895_vm13 = vcmp.gt.f32.partialorder %v23893_v43, %v23894_v55  ;;  %vm23898_vm2 = vcmp.gt.f32.partialorder %v23896_v29, %v23897_v4  ;;  %v23913_v10 = vld [vmem:[#allocation188_spill] sm:$0xff]  ;;  %v23919_v55 = vld [vmem:[#allocation59_spill] sm:$0xff]  ;;  %v23921_v29 = vld [vmem:[#allocation226_spill] sm:$0xff] }
 0x66f   : > { %v11878_v30 = vsel %vm23895_vm13, %v11630_v57, %v13783_v39  ;;  %v11879_v3 = vsel %vm23898_vm2, %v11692_v38, %v13784_v33  ;;  %vm23901_vm9 = vcmp.gt.f32.partialorder %v23899_v11, %v23900_v36  ;;  %vm23904_vm15 = vcmp.gt.f32.partialorder %v23902_v48, %v23903_v20 }
 0x670   : > { %v11880_v9 = vsel %vm23901_vm9, %v11637_v45, %v13785_v37  ;;  %v11881_v21 = vsel %vm23904_vm15, %v11693_v58, %v13786_v35  ;;  %vm23905_vm10 = vcmask 130048   ;;  %v12216_v62 = vadd.s32 17, %v23862_v59  ;;  %v23907_v35 = vld [vmem:[#allocation85_spill] sm:$0xff] }
 0x671   : > { %v13058_v2 = vsel %vm23905_vm10, %v12985_v27, 0.0  ;;  %v12522_v28 = vrot.slane %v11874_v51, 7  ;;  %v12523_v16 = vrot.slane %v11875_v8, 7  ;;  %v12524_v57 = vrot.slane %v11876_v47, 7 }
 0x672   : > { %v13083_v12 = vrot.slane %v13058_v2, 1  ;;  %v12525_v39 = vrot.slane %v11877_v0, 7  ;;  %v12526_v17 = vrot.slane %v11878_v30, 7  ;;  %v12392_v33 = vrot.slane %v12216_v62, %v22778_v7  ;;  %v23917_v0 = vld [vmem:[#allocation135_spill] sm:$0xff] }
 0x673   : > { %v12399_v26 = vrot.slane %v12216_v62, %v18512_v14  ;;  %v12406_v45 = vrot.slane %v12216_v62, %v18458_v34  ;;  %v12413_v37 = vrot.slane %v12216_v62, %v23290_v32  ;;  %vm23906_vm0 = vcmask 1046528  }
 0x674   : > { %v13084_v38 = vsel %vm23906_vm0, %v13081_v31, %v13083_v12  ;;  %v12527_v40 = vrot.slane %v11879_v3, 7  ;;  %v12528_v59 = vrot.slane %v11880_v9, 7  ;;  %v12529_v58 = vrot.slane %v11881_v21, 7  ;;  %v23925_v12 = vld [vmem:[#allocation27_spill] sm:$0xff] }
 0x675   : > { %v13100_v61 = vadd.f32 %v13084_v38, %v23907_v35  ;;  %v12466_v19 = vrot.slane %v12392_v33, 7  ;;  %v12467_v41 = vrot.slane %v12399_v26, 7  ;;  %v12468_v5 = vrot.slane %v12406_v45, 7  ;;  %v23932_v38 = vld [vmem:[#allocation222_spill] sm:$0xff] }
 0x676   : > { %v12469_v51 = vrot.slane %v12413_v37, 7  ;;  %v12587_v6 = vsel %vm21322_vm1, %v12392_v33, %v12523_v16  ;;  %vm23910_vm4 = vnez %v23909_v15  ;;  %vm23912_vm12 = vnez %v23911_v22  ;;  %v23928_v33 = vld [vmem:[#allocation220_spill] sm:$0xff] }
 0x677   : > { %v12589_v8 = vsel %vm23910_vm4, %v12399_v26, %v12525_v39  ;;  %v12591_v44 = vsel %vm23912_vm12, %v12406_v45, %v12527_v40  ;;  %vm13108_vm11 = vcmp.gt.f32.partialorder %v13100_v61, 0.0  ;;  %v13117_v31 = vmul.f32 %v23566_v24, %v13100_v61  ;;  %v23926_v39 = vld [vmem:[#allocation219_spill] sm:$0xff]  ;;  %v23933_v40 = vld [vmem:[#allocation225_spill] sm:$0xff] }
 0x678   : > { %vm23914_vm6 = vnez %v23913_v10  ;;  %vm23916_vm13 = vnez %v23915_v1  ;;  %vm23918_vm2 = vnez %v23917_v0  ;;  %vm23920_vm1 = vnez %v23919_v55  ;;  %v23943_v55 = vld [vmem:[#allocation237_spill] sm:$0xff] }
 0x679   : > { %v12586_v13 = vsel %vm23914_vm6, %v12466_v19, %v12522_v28  ;;  %v12588_v47 = vsel %vm23916_vm13, %v12467_v41, %v12524_v57  ;;  %v12590_v43 = vsel %vm23918_vm2, %v12468_v5, %v12526_v17  ;;  %v12592_v30 = vsel %vm23920_vm1, %v12469_v51, %v12528_v59  ;;  %v23924_v28 = vld [vmem:[#allocation28_spill] sm:$0xff]  ;;  %v23927_v17 = vld [vmem:[#allocation221_spill] sm:$0xff] }
 0x67a   : > { %vm23922_vm9 = vnez %v23921_v29  ;;  %v13357_v3 = vrot.slane %v12586_v13, %v15742_v42  ;;  %v13125_v11 = vsel %vm13108_vm11, %v13100_v61, %v13117_v31  ;;  %v13361_v24 = vrot.slane %v12587_v6, %v15742_v42 }
 0x67b   : > { %v12593_v4 = vsel %vm23922_vm9, %v12413_v37, %v12529_v58  ;;  %v13365_v36 = vrot.slane %v12588_v47, %v15742_v42  ;;  %v13369_v9 = vrot.slane %v12589_v8, %v15742_v42  ;;  %13133 = vxpose.xlu0.b32.end [8/8] (short) (narrow) %v13125_v11, 32  ;;  %v13373_v48 = vrot.slane %v12590_v43, %v15742_v42  ;;  %v23931_v37 = vld [vmem:[#allocation223_spill] sm:$0xff]  ;;  %v23935_v58 = vld [vmem:[#allocation32_spill] sm:$0xff] }
 0x67c   : > { %v13377_v20 = vrot.slane %v12591_v44, %v15742_v42  ;;  %v13381_v21 = vrot.slane %v12592_v30, %v15742_v42  ;;  %v13385_v2 = vrot.slane %v12593_v4, %v15742_v42  ;;  %vm23923_vm15 = vcmask 1041409   ;;  %v23939_v44 = vld [vmem:[#allocation214_spill] sm:$0xff]  ;;  %v23946_v4 = vld [vmem:[#allocation33_spill] sm:$0xff] }
 0x67d   : > { %v13460_v62 = vsel %vm23923_vm15, %v13361_v24, %v13357_v3  ;;  %v10697_v16 = vrot.slane %v23924_v28, %v23290_v32  ;;  %v10953_v57 = vrot.slane %v23925_v12, %v23290_v32  ;;  %vm23929_vm10 = vnez %v23928_v33  ;;  %v23944_v30 = vld [vmem:[#allocation34_spill] sm:$0xff]  ;;  %v23949_v24 = vld [vmem:[#allocation233_spill] sm:$0xff] }
 0x67e   : > { %v11045_v26 = vsel %vm23929_vm10, %v23927_v17, %v23926_v39  ;;  %vm23930_vm0 = vcmask 1042434   ;;  %vm23934_vm4 = vnez %v23933_v40  ;;  %v11651_v35 = vrot.slane %v23935_v58, %v18512_v14  ;;  %v23947_v3 = vld [vmem:[#allocation18_spill] sm:$0xff]  ;;  %v23959_v39 = vld [vmem:[#allocation215_spill] sm:$0xff] }
 0x67f   : > { %v13461_v45 = vsel %vm23930_vm0, %v13365_v36, %v13460_v62  ;;  %v11047_v59 = vsel %vm23934_vm4, %v23932_v38, %v23931_v37  ;;  %v11658_v61 = vrot.slane %v23935_v58, %v18458_v34  ;;  %vm23936_vm12 = vcmask 1043459   ;;  %v23955_v62 = vld [vmem:[#allocation35_spill] sm:$0xff] }
 0x680   : > { %v13462_v19 = vsel %vm23936_vm12, %v13369_v9, %v13461_v45  ;;  %v10729_v41 = vrot.slane %v10697_v16, 7  ;;  %v10985_v5 = vrot.slane %v10953_v57, 7  ;;  %v11049_v51 = vsel %vm21592_vm3, %v10697_v16, %v10953_v57  ;;  %v23951_v9 = vld [vmem:[#allocation213_spill] sm:$0xff]  ;;  %v23958_v57 = vld [vmem:[#allocation216_spill] sm:$0xff] }
 0x681   : > { %vm23937_vm11 = vcmask 1044484   ;;  %v11665_v6 = vrot.slane %v23935_v58, %v23290_v32  ;;  %v11695_v15 = vrot.slane %v11651_v35, 1  ;;  %v11696_v8 = vrot.slane %v11658_v61, 1 }
 0x682   : > { %v13463_v27 = vsel %vm23937_vm11, %v13373_v48, %v13462_v19  ;;  %vm23938_vm6 = vcmask 1045509   ;;  %vm23940_vm13 = vnez %v23939_v44  ;;  %v13790_v10 = vrot.slane %v11045_v26, 9  ;;  %v23952_v48 = vld [vmem:[#allocation212_spill] sm:$0xff]  ;;  %v23962_v26 = vld [vmem:[#allocation230_spill] sm:$0xff] }
 0x683   : > { %v13464_v22 = vsel %vm23938_vm6, %v13377_v20, %v13463_v27  ;;  %v11048_v31 = vsel %vm23940_vm13, %v10729_v41, %v10985_v5  ;;  %v13792_v13 = vrot.slane %v11047_v59, 9  ;;  %vm23941_vm2 = vcmask 1046534  }
 0x684   : > { %v13465_v1 = vsel %vm23941_vm2, %v13381_v21, %v13464_v22  ;;  %v11697_v47 = vrot.slane %v11665_v6, 1  ;;  %v13793_v0 = vrot.slane %v11048_v31, 9  ;;  %v13794_v25 = vrot.slane %v11049_v51, 9 }
 0x685   : > { %vm23942_vm3 = vcmask 1047559   ;;  %v23945_v29 = vrot.slane %v23944_v30, 1  ;;  %vm23948_vm1 = vcmp.gt.f32.partialorder %v23946_v4, %v23947_v3  ;;  %v23950_v36 = vrot.slane %v23949_v24, 9 }
 0x686   : > { %v13466_v43 = vsel %vm23942_vm3, %v13385_v2, %v13465_v1  ;;  %vm23953_vm9 = vcmp.gt.f32.partialorder %v23951_v9, %v23952_v48  ;;  %vm23954_vm15 = vcmp.gt.f32.partialorder %v23741_v56, %v23740_v53  ;;  %v12530_v28 = vrot.slane %v23955_v62, 7  ;;  %v23956_v2 = vld [vmem:[#allocation235_spill] sm:$0xff] }
 0x687   : > { %v11883_v11 = vsel %vm23948_vm1, %v23945_v29, %v23943_v55  ;;  %v11884_v20 = vsel %vm23953_vm9, %v11651_v35, %v23950_v36  ;;  %v11885_v21 = vsel %vm23954_vm15, %v11695_v15, %v13790_v10  ;;  %13480 = vxpose.xlu1.b32.cont [7/8] (short) (narrow) %v13466_v43, 16  ;;  %v23957_v16 = vrot.slane %v23956_v2, 9  ;;  %v23970_v15 = vld [vmem:[#allocation234_spill] sm:$0xff] }
 0x688   : > { %vm23960_vm10 = vcmp.gt.f32.partialorder %v23958_v57, %v23959_v39  ;;  %vm23961_vm0 = vcmp.gt.f32.partialorder %v23782_v63, %v23781_v52  ;;  %vm23963_vm4 = vcmp.gt.f32.partialorder %v23787_v60, %v23962_v26  ;;  %v11889_v53 = vsel %vm11433_vm14, %v11697_v47, %v13794_v25 }
 0x689   : > { %v11886_v17 = vsel %vm23960_vm10, %v11658_v61, %v23957_v16  ;;  %v11887_v33 = vsel %vm23961_vm0, %v11696_v8, %v13792_v13  ;;  %v11888_v45 = vsel %vm23963_vm4, %v11665_v6, %v13793_v0  ;;  %v12217_v56 = vadd.s32 17, %v23925_v12  ;;  %v23964_v12 = vld [vmem:[#allocation238_spill] sm:$0xff]  ;;  %v23966_v6 = vld [vmem:[#allocation227_spill] sm:$0xff] }
 0x68a   : > { %v12531_v37 = vrot.slane %v11883_v11, 7  ;;  %v12532_v38 = vrot.slane %v11884_v20, 7  ;;  %v12533_v40 = vrot.slane %v11885_v21, 7  ;;  %v12534_v59 = vrot.slane %v11886_v17, 7 }
 0x68b   : > { %v12535_v58 = vrot.slane %v11887_v33, 7  ;;  %v12536_v35 = vrot.slane %v11888_v45, 7  ;;  %v12420_v61 = vrot.slane %v12217_v56, %v22778_v7  ;;  %v12427_v52 = vrot.slane %v12217_v56, %v18512_v14 }
 0x68c   : > { %v12434_v63 = vrot.slane %v12217_v56, %v18458_v34  ;;  %v12441_v60 = vrot.slane %v12217_v56, %v23290_v32  ;;  %v12537_v19 = vrot.slane %v11889_v53, 7  ;;  %vm23965_vm14 = vnez %v23964_v12  ;;  %v23968_v34 = vld [vmem:[#allocation30_spill] sm:$0xff] }
 0x68d   : > { %v12470_v41 = vrot.slane %v12420_v61, 7  ;;  %v12471_v23 = vrot.slane %v12427_v52, 7  ;;  %v12595_v51 = vsel %vm23965_vm14, %v12420_v61, %v12531_v37  ;;  %v12597_v27 = vsel %vm21524_vm5, %v12427_v52, %v12533_v40 }
 0x68e   : > { %v12472_v54 = vrot.slane %v12434_v63, 7  ;;  %v12473_v5 = vrot.slane %v12441_v60, 7  ;;  %v12599_v7 = vsel %vm21533_vm7, %v12434_v63, %v12535_v58  ;;  %vm23967_vm12 = vnez %v23966_v6 }
 0x68f   : > { %v12594_v14 = vsel %vm23967_vm12, %v12470_v41, %v12530_v28  ;;  %vm23969_vm11 = vnez %v23968_v34  ;;  %vm23971_vm6 = vnez %v23970_v15  ;;  %vm23972_vm13 = vnez %v23789_v46 }
 0x690   : > { %v12596_v32 = vsel %vm23969_vm11, %v12471_v23, %v12532_v38  ;;  %v12598_v8 = vsel %vm23971_vm6, %v12472_v54, %v12534_v59  ;;  %v12600_v22 = vsel %vm23972_vm13, %v12473_v5, %v12536_v35  ;;  %v13389_v44 = vrot.slane %v12594_v14, %v15742_v42 }
 0x691   : > { %v13393_v49 = vrot.slane %v12595_v51, %v15742_v42  ;;  %v13397_v18 = vrot.slane %v12596_v32, %v15742_v42  ;;  %v13401_v31 = vrot.slane %v12597_v27, %v15742_v42  ;;  %v12601_v10 = vsel %vm21704_vm8, %v12441_v60, %v12537_v19 }
 0x692   : > { %v13405_v13 = vrot.slane %v12598_v8, %v15742_v42  ;;  %v13409_v1 = vrot.slane %v12599_v7, %v15742_v42  ;;  %vm23973_vm5 = vcmask 1041409   ;;  %v13413_v46 = vrot.slane %v12600_v22, %v15742_v42 }
 0x693   : > { %v13467_v47 = vsel %vm23973_vm5, %v13393_v49, %v13389_v44  ;;  %vm23974_vm7 = vcmask 1042434   ;;  %v13417_v25 = vrot.slane %v12601_v10, %v15742_v42  ;;  %vm23975_vm2 = vcmask 1043459  }
 0x694   : > { %v13468_v0 = vsel %vm23974_vm7, %v13397_v18, %v13467_v47  ;;  %vm23976_vm3 = vcmask 1044484   ;;  %vm23977_vm1 = vcmask 1045509   ;;  %vm23978_vm8 = vcmask 1046534  }
 0x695   : > { %v13469_v43 = vsel %vm23975_vm2, %v13401_v31, %v13468_v0  ;;  %vm23979_vm9 = vcmask 1047559   ;;  %vm23980_vm15 = vcmask 523264  }
 0x696   : > { %v13470_v55 = vsel %vm23976_vm3, %v13405_v13, %v13469_v43  ;;  %vm23981_vm10 = vmmov %vm23980_vm15 }
 0x697   : > { %v13471_v50 = vsel %vm23977_vm1, %v13409_v1, %v13470_v55  ;;  %vm23982_vm0 = vmmov %vm23981_vm10 }
 0x698   : > { %v13472_v30 = vsel %vm23978_vm8, %v13413_v46, %v13471_v50  ;;  %vm23983_vm4 = vmmov %vm23982_vm0 }
 0x699   : > { %v13473_v29 = vsel %vm23979_vm9, %v13417_v25, %v13472_v30  ;;  %vm23984_vm14 = vmmov %vm23982_vm0 }
 0x69a   : > { %13481 = vxpose.xlu1.b32.end [8/8] (short) (narrow) %v13473_v29, 16  ;;  %vm23985_vm12 = vmmov %vm23982_vm0 }
 0x6df   : > { %v13142_v4 = vpop.trf.xlu0 }
 0x6e0   : > { %13158 = vst.msk [vmem:[%s435_s20] sm:$0xff] %vm23980_vm15, %v13142_v4 }
 0x6e3   : > { %v13143_v42 = vpop.trf.xlu0 }
 0x6e4   : > { %13159 = vst.msk [vmem:[%s435_s20 + $0x8] sm:$0xff] %vm23981_vm10, %v13143_v42 }
 0x6e7   : > { %v13144_v3 = vpop.trf.xlu0 }
 0x6e8   : > { %13160 = vst.msk [vmem:[%s435_s20 + $0x10] sm:$0xff] %vm23982_vm0, %v13144_v3 }
 0x6eb   : > { %v13145_v11 = vpop.trf.xlu0 }
 0x6ec   : > { %13161 = vst.msk [vmem:[%s435_s20 + $0x18] sm:$0xff] %vm23983_vm4, %v13145_v11 }
 0x6fe   : > { %v13490_v24 = vpop.trf.xlu1 }
 0x6ff   : > { %13506 = vst.msk [vmem:[%s440_s28] sm:$0xff] %vm23984_vm14, %v13490_v24 }
 0x702   : > { %v13491_v36 = vpop.trf.xlu1 }
 0x703   : > { %13507 = vst.msk [vmem:[%s440_s28 + $0x8] sm:$0xff] %vm23985_vm12, %v13491_v36 }
 0x704 PF: > { %s24_s21 = sadd.s32 1, %s14248_s21  }
 0x705   : > { %p21_p1 = scmp.ge.s32.totalorder %s24_s21, 4  }
 0x707   :  { %23 = sbr.rel (!%p21_p1) target bundleno = 1 (0x1), region = 111 }
 0x70e   :  { %13545 = vsyncpa [#allocation3], 1 }
 0x70f   :  { %13547 = vsyncpa [#allocation3 + $0x1], 1 }

</bundles_post_ra>
